<compile_context>
chip_gen: v6e
topology: v6e:2x2x1
jax: 0.10.0
libtpu: 0.0.40
codegen_flags: <defaults>
</compile_context>

<pallas_src>
import functools
import math

import jax
import jax.numpy as jnp
from jax.experimental import pallas as pl
from jax.experimental.pallas import tpu as pltpu


# ----------------------------------------------------------------------------
# The single fused kernel
# ----------------------------------------------------------------------------
def _layer_norm(x, gamma, beta, eps=1e-5):
    mu = jnp.mean(x, axis=-1, keepdims=True)
    var = jnp.mean((x - mu) ** 2, axis=-1, keepdims=True)
    return (x - mu) * jax.lax.rsqrt(var + eps) * gamma + beta


def _hand_refiner_kernel(
        # --- data ---
        feat_l_ref, feat_r_ref,          # [B*L, D0]  (x, joints, m_contact, |pc|)
        j_l3_ref, j_r3_ref,              # [3, B*L, J] per-component joints
        pc3_ref,                         # [3, B*L, N] per-component point cloud
        pe_ref,                          # [T, H] frame-wise + agent-wise PE (token order)
        sm_ref,                          # [T, 1] mask_{l/r} * frame_padding (token order)
        bias_ref,                        # [T, T] additive attn bias (key-pad + cross-batch)
        # --- fc_lhand / fc_rhand, split: external-feature part + att-map part ---
        wl_head_ref, wl_att_ref, bl_ref,  # [D0,H], [3,J,H], [1,H]
        wr_head_ref, wr_att_ref, br_ref,
        # --- encoder stack, per-layer weights stacked on the leading axis ---
        wqkv_ref, bqkv_ref,              # [Ln,H,3H], [Ln,1,3H]
        wo_ref, bo_ref,                  # [Ln,H,H],  [Ln,1,H]
        ln1g_ref, ln1b_ref,              # [Ln,1,H]
        w1_ref, b1_ref,                  # [Ln,H,F],  [Ln,1,F]
        w2_ref, b2_ref,                  # [Ln,F,H],  [Ln,1,H]
        ln2g_ref, ln2b_ref,              # [Ln,1,H]
        # --- output heads ---
        wol_ref, bol_ref, wor_ref, bor_ref,
        # --- outputs ---
        out_l_ref, out_r_ref,            # [B*L, hand_dim]
        # --- scratch ---
        x_scr, head_scr,                 # VMEM [T, H] each
        *, nheads, L):
    BL = feat_l_ref.shape[0]
    B = BL // L
    T, H = x_scr.shape
    n_layers = wqkv_ref.shape[0]
    N = pc3_ref.shape[2]
    dh = H // nheads
    scale = 1.0 / math.sqrt(dh)
    f32 = jnp.float32

    # point-cloud components, loaded once  ([B*L, N] each)
    pc_c = [pc3_ref[c].astype(f32) for c in range(3)]

    # ---------------- attention map + fc projection, per hand (VPU) ----------
    def hand_projection(j3_ref, w_head_ref, w_att_ref, b_ref, feat_ref):
        hj_c = [j3_ref[c].astype(f32) for c in range(3)]            # [B*L, J]
        # squared distances joints <-> points, summed over xyz (no MXU)
        dist = None
        for c in range(3):
            d = hj_c[c][:, :, None] - pc_c[c][:, None, :]           # [B*L, J, N]
            d = d * d
            dist = d if dist is None else dist + d
        # first-occurrence argmin over N (matches torch.argmin) as a one-hot
        dmin = jnp.min(dist, axis=2, keepdims=True)
        iota = jax.lax.broadcasted_iota(jnp.int32, dist.shape, 2)
        cand = jnp.where(dist <= dmin, iota, N)
        idx = jnp.min(cand, axis=2, keepdims=True)
        onehot = (iota == idx).astype(f32)                          # [B*L, J, N]

        # fc(x) = feat @ W_head + sum_c att_c @ W_att[c] + b
        acc = jnp.dot(feat_ref[...].astype(f32), w_head_ref[...],
                      preferred_element_type=f32) + b_ref[...]
        for c in range(3):
            contact_c = jnp.sum(onehot * pc_c[c][:, None, :], axis=2)   # [B*L, J]
            att_c = jnp.exp(-50.0 * (hj_c[c] - contact_c) ** 2)         # [B*L, J]
            acc = acc + jnp.dot(att_c, w_att_ref[c], preferred_element_type=f32)
        return acc                                                   # [B*L, H]

    xl = hand_projection(j_l3_ref, wl_head_ref, wl_att_ref, bl_ref, feat_l_ref)
    xr = hand_projection(j_r3_ref, wr_head_ref, wr_att_ref, br_ref, feat_r_ref)

    # ---------------- assemble token sequence -------------------------------
    # token order: [batch0: left frames 0..L-1, right frames 0..L-1, batch1: ...]
    # (permutation of the interleaved torch layout; attention with a matching
    #  per-token PE / mask / bias is permutation-equivariant)
    for b in range(B):
        x_scr[2 * b * L:(2 * b + 1) * L, :] = xl[b * L:(b + 1) * L, :]
        x_scr[(2 * b + 1) * L:(2 * b + 2) * L, :] = xr[b * L:(b + 1) * L, :]

    sm = sm_ref[...]                                 # [T, 1]
    bias = bias_ref[...]                             # [T, T] (hoisted; no per-head bcast)
    x = (x_scr[...] + pe_ref[...]) * sm              # PE then slot masking (torch order)

    # ---------------- transformer encoder stack ------------------------------
    # TODO(synk): TransformerEncoder source not provided; post-norm layers with
    # `nheads` heads and a ReLU FFN (nn.TransformerEncoderLayer-style) assumed.
    for layer in range(n_layers):
        qkv = jnp.dot(x, wqkv_ref[layer],
                      preferred_element_type=f32) + bqkv_ref[layer]  # [T, 3H]
        for h in range(nheads):
            qh = qkv[:, h * dh:(h + 1) * dh]
            kh = qkv[:, H + h * dh:H + (h + 1) * dh]
            vh = qkv[:, 2 * H + h * dh:2 * H + (h + 1) * dh]
            s = jax.lax.dot_general(qh, kh, (((1,), (1,)), ((), ())),
                                    preferred_element_type=f32) * scale
            s = s + bias
            m = jnp.max(s, axis=-1, keepdims=True)
            p = jnp.exp(s - m)
            p = p * pl.reciprocal(jnp.sum(p, axis=-1, keepdims=True), approx=True)
            head_scr[:, h * dh:(h + 1) * dh] = jnp.dot(p, vh,
                                                       preferred_element_type=f32)
        # single output projection over all heads (hoisted out of the head loop)
        attn = jnp.dot(head_scr[...], wo_ref[layer],
                       preferred_element_type=f32) + bo_ref[layer]
        y = _layer_norm(x + attn, ln1g_ref[layer], ln1b_ref[layer])
        h1 = jnp.maximum(jnp.dot(y, w1_ref[layer],
                                 preferred_element_type=f32) + b1_ref[layer], 0.0)
        h2 = jnp.dot(h1, w2_ref[layer],
                     preferred_element_type=f32) + b2_ref[layer]
        x = _layer_norm(y + h2, ln2g_ref[layer], ln2b_ref[layer])

    # ---------------- output heads + masking ---------------------------------
    out_l = (jnp.dot(x, wol_ref[...], preferred_element_type=f32) + bol_ref[...]) * sm
    out_r = (jnp.dot(x, wor_ref[...], preferred_element_type=f32) + bor_ref[...]) * sm
    for b in range(B):
        out_l_ref[b * L:(b + 1) * L, :] = (
            out_l[2 * b * L:(2 * b + 1) * L, :].astype(out_l_ref.dtype))
        out_r_ref[b * L:(b + 1) * L, :] = (
            out_r[(2 * b + 1) * L:(2 * b + 2) * L, :].astype(out_r_ref.dtype))


# ----------------------------------------------------------------------------
# Plain-JAX wrapper (tiny layout plumbing, then ONE pallas_call)
# ----------------------------------------------------------------------------
def sinusoidal_pe(positions, d_model):
    # TODO(synk): PositionalEncoding(comp='hrn') source not provided; standard
    # sinusoidal table indexed frame-wise / agent-wise respectively.
    pos = positions[:, None].astype(jnp.float32)
    i = jnp.arange(0, d_model, 2, dtype=jnp.float32)
    div = jnp.exp(-jnp.log(10000.0) * i / d_model)
    ang = pos * div[None, :]
    pe = jnp.zeros((positions.shape[0], d_model), dtype=jnp.float32)
    pe = pe.at[:, 0::2].set(jnp.sin(ang))
    pe = pe.at[:, 1::2].set(jnp.cos(ang))
    return pe


def hand_refiner_forward(params, x_lhand, x_rhand, j_lhand, j_rhand,
                         m_contact, ref_point_cloud_pred,
                         hand_motion_mask, frame_padding_mask, *, nheads):
    f32 = jnp.float32
    B, L, hand_dim = x_lhand.shape
    J = j_lhand.shape[2]
    N = ref_point_cloud_pred.shape[2]
    H = params["fc_lhand_w"].shape[1]         # static python int from weight shape
    D0 = hand_dim + J * 3 + 2 * N             # external features (all but the att map)
    T = 2 * B * L

    # --- feature plumbing (cheap XLA fusions; everything heavy is in-kernel) ---
    mc = jnp.broadcast_to(m_contact[:, None, :, 0], (B, L, N)).astype(f32)
    pcn = jnp.sqrt(jnp.sum(ref_point_cloud_pred.astype(f32) ** 2, axis=-1))   # [B,L,N]
    feat_l = jnp.concatenate([x_lhand, j_lhand.reshape(B, L, J * 3), mc, pcn],
                             axis=-1).reshape(B * L, D0).astype(f32)
    feat_r = jnp.concatenate([x_rhand, j_rhand.reshape(B, L, J * 3), mc, pcn],
                             axis=-1).reshape(B * L, D0).astype(f32)
    j_l3 = j_lhand.reshape(B * L, J, 3).transpose(2, 0, 1).astype(f32)   # [3,B*L,J]
    j_r3 = j_rhand.reshape(B * L, J, 3).transpose(2, 0, 1).astype(f32)
    pc3 = ref_point_cloud_pred.reshape(B * L, N, 3).transpose(2, 0, 1).astype(f32)

    # positional encodings in token order [b: left frames, right frames]
    pe_frame = sinusoidal_pe(jnp.arange(L), H)
    pe_agent = sinusoidal_pe(jnp.arange(2), H)
    pe_pair = jnp.concatenate([pe_frame + pe_agent[0:1],
                               pe_frame + pe_agent[1:2]], axis=0)        # [2L, H]
    pe_tok = jnp.tile(pe_pair, (B, 1)).astype(f32)                       # [T, H]

    fpm = frame_padding_mask.astype(f32)                                 # [B, L, 1]
    ml = hand_motion_mask["mask_lhand"].astype(f32) * fpm
    mr = hand_motion_mask["mask_rhand"].astype(f32) * fpm
    sm_tok = jnp.concatenate([ml, mr], axis=1).reshape(T, 1)             # [T, 1]

    # additive attention bias: -1e9 for padded keys and for cross-batch pairs
    key_valid = jnp.concatenate([fpm[..., 0], fpm[..., 0]], axis=1).reshape(T)
    batch_id = jnp.repeat(jnp.arange(B), 2 * L)
    bias_tok = jnp.where((batch_id[:, None] == batch_id[None, :])
                         & (key_valid[None, :] != 0.0), 0.0, -1e9).astype(f32)

    # fc weights: head part (external features) + per-xyz-component att-map part
    def split_fc(w):
        w_head = w[:D0]
        w_att = w[D0:].reshape(J, 3, H).transpose(1, 0, 2)               # [3, J, H]
        return w_head, w_att

    wl_head, wl_att = split_fc(params["fc_lhand_w"])
    wr_head, wr_att = split_fc(params["fc_rhand_w"])

    kern = functools.partial(_hand_refiner_kernel, nheads=nheads, L=L)
    out_l, out_r = pl.pallas_call(
        kern,
        out_shape=(jax.ShapeDtypeStruct((B * L, hand_dim), f32),
                   jax.ShapeDtypeStruct((B * L, hand_dim), f32)),
        scratch_shapes=[pltpu.VMEM((T, H), f32),      # token-sequence assembly
                        pltpu.VMEM((T, H), f32)],     # per-head output assembly
    )(feat_l, feat_r, j_l3, j_r3, pc3, pe_tok, sm_tok, bias_tok,
      wl_head, wl_att, params["fc_lhand_b"],
      wr_head, wr_att, params["fc_rhand_b"],
      params["wqkv"], params["bqkv"], params["wo"], params["bo"],
      params["ln1_g"], params["ln1_b"], params["w1"], params["b1"],
      params["w2"], params["b2"], params["ln2_g"], params["ln2_b"],
      params["fc_out_lhand_w"], params["fc_out_lhand_b"],
      params["fc_out_rhand_w"], params["fc_out_rhand_b"])
    return out_l.reshape(B, L, hand_dim), out_r.reshape(B, L, hand_dim)


# ----------------------------------------------------------------------------
# Deterministic parameter construction (encoder weights pre-stacked per layer)
# ----------------------------------------------------------------------------
def init_params(key, hand_dim, hand_joint, npoint, hidden_dim, ffn_dim, n_layers):
    cat_dim = hand_dim + 2 * hand_joint * 3 + 2 * npoint
    keys = jax.random.split(key, 16)
    it = iter(keys)

    def w(shape, scale=0.05):
        return (scale * jax.random.normal(next(it), shape)).astype(jnp.float32)

    def zeros(*shape):
        return jnp.zeros(shape, jnp.float32)

    def ones(*shape):
        return jnp.ones(shape, jnp.float32)

    Ln, H, F = n_layers, hidden_dim, ffn_dim
    return dict(
        fc_lhand_w=w((cat_dim, H)), fc_lhand_b=zeros(1, H),
        fc_rhand_w=w((cat_dim, H)), fc_rhand_b=zeros(1, H),
        fc_out_lhand_w=w((H, hand_dim)), fc_out_lhand_b=zeros(1, hand_dim),
        fc_out_rhand_w=w((H, hand_dim)), fc_out_rhand_b=zeros(1, hand_dim),
        wqkv=w((Ln, H, 3 * H)), bqkv=zeros(Ln, 1, 3 * H),
        wo=w((Ln, H, H)), bo=zeros(Ln, 1, H),
        w1=w((Ln, H, F)), b1=zeros(Ln, 1, F),
        w2=w((Ln, F, H)), b2=zeros(Ln, 1, H),
        ln1_g=ones(Ln, 1, H), ln1_b=zeros(Ln, 1, H),
        ln2_g=ones(Ln, 1, H), ln2_b=zeros(Ln, 1, H),
    )


# ----------------------------------------------------------------------------
# Main
# ----------------------------------------------------------------------------
if __name__ == "__main__":
    B, L = 2, 8
    hand_dim, hand_joint, npoint = 12, 4, 8
    hidden_dim, nheads, ffn_dim, n_layers = 32, 4, 64, 2

    key = jax.random.PRNGKey(0)
    ks = jax.random.split(key, 12)

    params = init_params(ks[0], hand_dim, hand_joint, npoint,
                         hidden_dim, ffn_dim, n_layers)

    x_lhand = jax.random.normal(ks[1], (B, L, hand_dim), jnp.float32)
    x_rhand = jax.random.normal(ks[2], (B, L, hand_dim), jnp.float32)
    j_lhand = jax.random.normal(ks[3], (B, L, hand_joint, 3), jnp.float32)
    j_rhand = jax.random.normal(ks[4], (B, L, hand_joint, 3), jnp.float32)
    m_contact = jax.random.uniform(ks[5], (B, npoint, 1), jnp.float32)
    ref_pc = jax.random.normal(ks[6], (B, L, npoint, 3), jnp.float32)

    mask_lhand = (jax.random.uniform(ks[7], (B, L, 1)) > 0.2).astype(jnp.float32)
    mask_rhand = (jax.random.uniform(ks[8], (B, L, 1)) > 0.2).astype(jnp.float32)
    frame_padding_mask = jnp.concatenate(
        [jnp.ones((B, L - 2, 1), jnp.float32), jnp.zeros((B, 2, 1), jnp.float32)],
        axis=1)
    hand_motion_mask = {"mask_lhand": mask_lhand, "mask_rhand": mask_rhand}

    fwd = jax.jit(functools.partial(hand_refiner_forward, nheads=nheads))
    out_l, out_r = fwd(params, x_lhand, x_rhand, j_lhand, j_rhand,
                       m_contact, ref_pc, hand_motion_mask, frame_padding_mask)
    jax.block_until_ready((out_l, out_r))

    assert out_l.shape == (B, L, hand_dim) and out_r.shape == (B, L, hand_dim)
    assert jnp.all(jnp.isfinite(out_l)) and jnp.all(jnp.isfinite(out_r))
    print("KERNEL_OK")
</pallas_src>

<mosaic_0001>
module attributes {stable_mosaic.version = 11 : i64} {
  func.func @_hand_refiner_kernel(%arg0: memref<16x40xf32, #tpu.memory_space<vmem>>, %arg1: memref<16x40xf32, #tpu.memory_space<vmem>>, %arg2: memref<3x16x4xf32, #tpu.memory_space<vmem>>, %arg3: memref<3x16x4xf32, #tpu.memory_space<vmem>>, %arg4: memref<3x16x8xf32, #tpu.memory_space<vmem>>, %arg5: memref<32x32xf32, #tpu.memory_space<vmem>>, %arg6: memref<32x1xf32, #tpu.memory_space<vmem>>, %arg7: memref<32x32xf32, #tpu.memory_space<vmem>>, %arg8: memref<40x32xf32, #tpu.memory_space<vmem>>, %arg9: memref<3x4x32xf32, #tpu.memory_space<vmem>>, %arg10: memref<1x32xf32, #tpu.memory_space<vmem>>, %arg11: memref<40x32xf32, #tpu.memory_space<vmem>>, %arg12: memref<3x4x32xf32, #tpu.memory_space<vmem>>, %arg13: memref<1x32xf32, #tpu.memory_space<vmem>>, %arg14: memref<2x32x96xf32, #tpu.memory_space<vmem>>, %arg15: memref<2x1x96xf32, #tpu.memory_space<vmem>>, %arg16: memref<2x32x32xf32, #tpu.memory_space<vmem>>, %arg17: memref<2x1x32xf32, #tpu.memory_space<vmem>>, %arg18: memref<2x1x32xf32, #tpu.memory_space<vmem>>, %arg19: memref<2x1x32xf32, #tpu.memory_space<vmem>>, %arg20: memref<2x32x64xf32, #tpu.memory_space<vmem>>, %arg21: memref<2x1x64xf32, #tpu.memory_space<vmem>>, %arg22: memref<2x64x32xf32, #tpu.memory_space<vmem>>, %arg23: memref<2x1x32xf32, #tpu.memory_space<vmem>>, %arg24: memref<2x1x32xf32, #tpu.memory_space<vmem>>, %arg25: memref<2x1x32xf32, #tpu.memory_space<vmem>>, %arg26: memref<32x12xf32, #tpu.memory_space<vmem>>, %arg27: memref<1x12xf32, #tpu.memory_space<vmem>>, %arg28: memref<32x12xf32, #tpu.memory_space<vmem>>, %arg29: memref<1x12xf32, #tpu.memory_space<vmem>>, %arg30: memref<16x12xf32, #tpu.memory_space<vmem>>, %arg31: memref<16x12xf32, #tpu.memory_space<vmem>>, %arg32: memref<32x32xf32, #tpu.memory_space<vmem>>, %arg33: memref<32x32xf32, #tpu.memory_space<vmem>>) attributes {dimension_semantics = [], scalar_prefetch = 0 : i64, scratch_operands = 2 : i64, tpu.core_type = #tpu.core_type<tc>} {
    %c0 = arith.constant 0 : index
    %c0_0 = arith.constant 0 : index
    %c0_1 = arith.constant 0 : index
    %0 = vector.load %arg4[%c0, %c0_0, %c0_1] : memref<3x16x8xf32, #tpu.memory_space<vmem>>, vector<1x16x8xf32>
    %1 = vector.shape_cast %0 : vector<1x16x8xf32> to vector<16x8xf32>
    %c1 = arith.constant 1 : index
    %c0_2 = arith.constant 0 : index
    %c0_3 = arith.constant 0 : index
    %2 = vector.load %arg4[%c1, %c0_2, %c0_3] : memref<3x16x8xf32, #tpu.memory_space<vmem>>, vector<1x16x8xf32>
    %3 = vector.shape_cast %2 : vector<1x16x8xf32> to vector<16x8xf32>
    %c2 = arith.constant 2 : index
    %c0_4 = arith.constant 0 : index
    %c0_5 = arith.constant 0 : index
    %4 = vector.load %arg4[%c2, %c0_4, %c0_5] : memref<3x16x8xf32, #tpu.memory_space<vmem>>, vector<1x16x8xf32>
    %5 = vector.shape_cast %4 : vector<1x16x8xf32> to vector<16x8xf32>
    %c0_6 = arith.constant 0 : index
    %c0_7 = arith.constant 0 : index
    %c0_8 = arith.constant 0 : index
    %6 = vector.load %arg2[%c0_6, %c0_7, %c0_8] : memref<3x16x4xf32, #tpu.memory_space<vmem>>, vector<1x16x4xf32>
    %7 = vector.shape_cast %6 : vector<1x16x4xf32> to vector<16x4xf32>
    %c1_9 = arith.constant 1 : index
    %c0_10 = arith.constant 0 : index
    %c0_11 = arith.constant 0 : index
    %8 = vector.load %arg2[%c1_9, %c0_10, %c0_11] : memref<3x16x4xf32, #tpu.memory_space<vmem>>, vector<1x16x4xf32>
    %9 = vector.shape_cast %8 : vector<1x16x4xf32> to vector<16x4xf32>
    %c2_12 = arith.constant 2 : index
    %c0_13 = arith.constant 0 : index
    %c0_14 = arith.constant 0 : index
    %10 = vector.load %arg2[%c2_12, %c0_13, %c0_14] : memref<3x16x4xf32, #tpu.memory_space<vmem>>, vector<1x16x4xf32>
    %11 = vector.shape_cast %10 : vector<1x16x4xf32> to vector<16x4xf32>
    %12 = vector.shape_cast %7 : vector<16x4xf32> to vector<16x4x1xf32>
    %13 = vector.shape_cast %1 : vector<16x8xf32> to vector<16x1x8xf32>
    %14 = vector.broadcast %12 : vector<16x4x1xf32> to vector<16x4x8xf32>
    %15 = vector.broadcast %13 : vector<16x1x8xf32> to vector<16x4x8xf32>
    %16 = arith.subf %14, %15 : vector<16x4x8xf32>
    %17 = arith.mulf %16, %16 : vector<16x4x8xf32>
    %18 = vector.shape_cast %9 : vector<16x4xf32> to vector<16x4x1xf32>
    %19 = vector.shape_cast %3 : vector<16x8xf32> to vector<16x1x8xf32>
    %20 = vector.broadcast %18 : vector<16x4x1xf32> to vector<16x4x8xf32>
    %21 = vector.broadcast %19 : vector<16x1x8xf32> to vector<16x4x8xf32>
    %22 = arith.subf %20, %21 : vector<16x4x8xf32>
    %23 = arith.mulf %22, %22 : vector<16x4x8xf32>
    %24 = arith.addf %17, %23 : vector<16x4x8xf32>
    %25 = vector.shape_cast %11 : vector<16x4xf32> to vector<16x4x1xf32>
    %26 = vector.shape_cast %5 : vector<16x8xf32> to vector<16x1x8xf32>
    %27 = vector.broadcast %25 : vector<16x4x1xf32> to vector<16x4x8xf32>
    %28 = vector.broadcast %26 : vector<16x1x8xf32> to vector<16x4x8xf32>
    %29 = arith.subf %27, %28 : vector<16x4x8xf32>
    %30 = arith.mulf %29, %29 : vector<16x4x8xf32>
    %31 = arith.addf %24, %30 : vector<16x4x8xf32>
    %cst = arith.constant dense<0x7F800000> : vector<16x4xf32>
    %32 = vector.multi_reduction <minimumf>, %31, %cst [2] : vector<16x4x8xf32> to vector<16x4xf32>
    %33 = vector.shape_cast %32 : vector<16x4xf32> to vector<16x4x1xf32>
    %34 = tpu.iota {dimensions = array<i32: 2>} : vector<16x4x8xi32>
    %35 = vector.broadcast %33 : vector<16x4x1xf32> to vector<16x4x8xf32>
    %36 = arith.cmpf ole, %31, %35 : vector<16x4x8xf32>
    %c8_i32 = arith.constant 8 : i32
    %37 = vector.broadcast %c8_i32 : i32 to vector<16x4x8xi32>
    %38 = arith.select %36, %34, %37 : vector<16x4x8xi1>, vector<16x4x8xi32>
    %cst_15 = arith.constant dense<2147483647> : vector<16x4xi32>
    %39 = vector.multi_reduction <minsi>, %38, %cst_15 [2] : vector<16x4x8xi32> to vector<16x4xi32>
    %40 = vector.shape_cast %39 : vector<16x4xi32> to vector<16x4x1xi32>
    %41 = vector.broadcast %40 : vector<16x4x1xi32> to vector<16x4x8xi32>
    %42 = arith.cmpi eq, %34, %41 : vector<16x4x8xi32>
    %43 = arith.extui %42 : vector<16x4x8xi1> to vector<16x4x8xi32>
    %44 = arith.sitofp %43 : vector<16x4x8xi32> to vector<16x4x8xf32>
    %c0_16 = arith.constant 0 : index
    %c0_17 = arith.constant 0 : index
    %45 = vector.load %arg0[%c0_16, %c0_17] : memref<16x40xf32, #tpu.memory_space<vmem>>, vector<16x40xf32>
    %c0_18 = arith.constant 0 : index
    %c0_19 = arith.constant 0 : index
    %46 = vector.load %arg8[%c0_18, %c0_19] : memref<40x32xf32, #tpu.memory_space<vmem>>, vector<40x32xf32>
    %cst_20 = arith.constant dense<0.000000e+00> : vector<16x32xf32>
    %47 = tpu.matmul %45, %46, %cst_20 {dimension_numbers = #tpu.dot_dimension_numbers<[1], [0], [0], [1], [0, 0, 1, 1], [], []>} : vector<16x40xf32>, vector<40x32xf32>, vector<16x32xf32> -> vector<16x32xf32>
    %c0_21 = arith.constant 0 : index
    %c0_22 = arith.constant 0 : index
    %48 = vector.load %arg10[%c0_21, %c0_22] : memref<1x32xf32, #tpu.memory_space<vmem>>, vector<1x32xf32>
    %49 = vector.broadcast %48 : vector<1x32xf32> to vector<16x32xf32>
    %50 = arith.addf %47, %49 : vector<16x32xf32>
    %51 = vector.shape_cast %1 : vector<16x8xf32> to vector<16x1x8xf32>
    %52 = vector.broadcast %51 : vector<16x1x8xf32> to vector<16x4x8xf32>
    %53 = arith.mulf %44, %52 : vector<16x4x8xf32>
    %cst_23 = arith.constant dense<0.000000e+00> : vector<16x4xf32>
    %54 = vector.multi_reduction <add>, %53, %cst_23 [2] : vector<16x4x8xf32> to vector<16x4xf32>
    %55 = arith.subf %7, %54 : vector<16x4xf32>
    %56 = arith.mulf %55, %55 : vector<16x4xf32>
    %cst_24 = arith.constant -5.000000e+01 : f32
    %57 = vector.broadcast %cst_24 : f32 to vector<16x4xf32>
    %58 = arith.mulf %57, %56 : vector<16x4xf32>
    %59 = math.exp %58 : vector<16x4xf32>
    %c0_25 = arith.constant 0 : index
    %c0_26 = arith.constant 0 : index
    %c0_27 = arith.constant 0 : index
    %60 = vector.load %arg9[%c0_25, %c0_26, %c0_27] : memref<3x4x32xf32, #tpu.memory_space<vmem>>, vector<1x4x32xf32>
    %61 = vector.shape_cast %60 : vector<1x4x32xf32> to vector<4x32xf32>
    %cst_28 = arith.constant dense<0.000000e+00> : vector<16x32xf32>
    %62 = tpu.matmul %59, %61, %cst_28 {dimension_numbers = #tpu.dot_dimension_numbers<[1], [0], [0], [1], [0, 0, 1, 1], [], []>} : vector<16x4xf32>, vector<4x32xf32>, vector<16x32xf32> -> vector<16x32xf32>
    %63 = arith.addf %50, %62 : vector<16x32xf32>
    %64 = vector.shape_cast %3 : vector<16x8xf32> to vector<16x1x8xf32>
    %65 = vector.broadcast %64 : vector<16x1x8xf32> to vector<16x4x8xf32>
    %66 = arith.mulf %44, %65 : vector<16x4x8xf32>
    %cst_29 = arith.constant dense<0.000000e+00> : vector<16x4xf32>
    %67 = vector.multi_reduction <add>, %66, %cst_29 [2] : vector<16x4x8xf32> to vector<16x4xf32>
    %68 = arith.subf %9, %67 : vector<16x4xf32>
    %69 = arith.mulf %68, %68 : vector<16x4xf32>
    %cst_30 = arith.constant -5.000000e+01 : f32
    %70 = vector.broadcast %cst_30 : f32 to vector<16x4xf32>
    %71 = arith.mulf %70, %69 : vector<16x4xf32>
    %72 = math.exp %71 : vector<16x4xf32>
    %c1_31 = arith.constant 1 : index
    %c0_32 = arith.constant 0 : index
    %c0_33 = arith.constant 0 : index
    %73 = vector.load %arg9[%c1_31, %c0_32, %c0_33] : memref<3x4x32xf32, #tpu.memory_space<vmem>>, vector<1x4x32xf32>
    %74 = vector.shape_cast %73 : vector<1x4x32xf32> to vector<4x32xf32>
    %cst_34 = arith.constant dense<0.000000e+00> : vector<16x32xf32>
    %75 = tpu.matmul %72, %74, %cst_34 {dimension_numbers = #tpu.dot_dimension_numbers<[1], [0], [0], [1], [0, 0, 1, 1], [], []>} : vector<16x4xf32>, vector<4x32xf32>, vector<16x32xf32> -> vector<16x32xf32>
    %76 = arith.addf %63, %75 : vector<16x32xf32>
    %77 = vector.shape_cast %5 : vector<16x8xf32> to vector<16x1x8xf32>
    %78 = vector.broadcast %77 : vector<16x1x8xf32> to vector<16x4x8xf32>
    %79 = arith.mulf %44, %78 : vector<16x4x8xf32>
    %cst_35 = arith.constant dense<0.000000e+00> : vector<16x4xf32>
    %80 = vector.multi_reduction <add>, %79, %cst_35 [2] : vector<16x4x8xf32> to vector<16x4xf32>
    %81 = arith.subf %11, %80 : vector<16x4xf32>
    %82 = arith.mulf %81, %81 : vector<16x4xf32>
    %cst_36 = arith.constant -5.000000e+01 : f32
    %83 = vector.broadcast %cst_36 : f32 to vector<16x4xf32>
    %84 = arith.mulf %83, %82 : vector<16x4xf32>
    %85 = math.exp %84 : vector<16x4xf32>
    %c2_37 = arith.constant 2 : index
    %c0_38 = arith.constant 0 : index
    %c0_39 = arith.constant 0 : index
    %86 = vector.load %arg9[%c2_37, %c0_38, %c0_39] : memref<3x4x32xf32, #tpu.memory_space<vmem>>, vector<1x4x32xf32>
    %87 = vector.shape_cast %86 : vector<1x4x32xf32> to vector<4x32xf32>
    %cst_40 = arith.constant dense<0.000000e+00> : vector<16x32xf32>
    %88 = tpu.matmul %85, %87, %cst_40 {dimension_numbers = #tpu.dot_dimension_numbers<[1], [0], [0], [1], [0, 0, 1, 1], [], []>} : vector<16x4xf32>, vector<4x32xf32>, vector<16x32xf32> -> vector<16x32xf32>
    %89 = arith.addf %76, %88 : vector<16x32xf32>
    %c0_41 = arith.constant 0 : index
    %c0_42 = arith.constant 0 : index
    %c0_43 = arith.constant 0 : index
    %90 = vector.load %arg3[%c0_41, %c0_42, %c0_43] : memref<3x16x4xf32, #tpu.memory_space<vmem>>, vector<1x16x4xf32>
    %91 = vector.shape_cast %90 : vector<1x16x4xf32> to vector<16x4xf32>
    %c1_44 = arith.constant 1 : index
    %c0_45 = arith.constant 0 : index
    %c0_46 = arith.constant 0 : index
    %92 = vector.load %arg3[%c1_44, %c0_45, %c0_46] : memref<3x16x4xf32, #tpu.memory_space<vmem>>, vector<1x16x4xf32>
    %93 = vector.shape_cast %92 : vector<1x16x4xf32> to vector<16x4xf32>
    %c2_47 = arith.constant 2 : index
    %c0_48 = arith.constant 0 : index
    %c0_49 = arith.constant 0 : index
    %94 = vector.load %arg3[%c2_47, %c0_48, %c0_49] : memref<3x16x4xf32, #tpu.memory_space<vmem>>, vector<1x16x4xf32>
    %95 = vector.shape_cast %94 : vector<1x16x4xf32> to vector<16x4xf32>
    %96 = vector.shape_cast %91 : vector<16x4xf32> to vector<16x4x1xf32>
    %97 = vector.shape_cast %1 : vector<16x8xf32> to vector<16x1x8xf32>
    %98 = vector.broadcast %96 : vector<16x4x1xf32> to vector<16x4x8xf32>
    %99 = vector.broadcast %97 : vector<16x1x8xf32> to vector<16x4x8xf32>
    %100 = arith.subf %98, %99 : vector<16x4x8xf32>
    %101 = arith.mulf %100, %100 : vector<16x4x8xf32>
    %102 = vector.shape_cast %93 : vector<16x4xf32> to vector<16x4x1xf32>
    %103 = vector.shape_cast %3 : vector<16x8xf32> to vector<16x1x8xf32>
    %104 = vector.broadcast %102 : vector<16x4x1xf32> to vector<16x4x8xf32>
    %105 = vector.broadcast %103 : vector<16x1x8xf32> to vector<16x4x8xf32>
    %106 = arith.subf %104, %105 : vector<16x4x8xf32>
    %107 = arith.mulf %106, %106 : vector<16x4x8xf32>
    %108 = arith.addf %101, %107 : vector<16x4x8xf32>
    %109 = vector.shape_cast %95 : vector<16x4xf32> to vector<16x4x1xf32>
    %110 = vector.shape_cast %5 : vector<16x8xf32> to vector<16x1x8xf32>
    %111 = vector.broadcast %109 : vector<16x4x1xf32> to vector<16x4x8xf32>
    %112 = vector.broadcast %110 : vector<16x1x8xf32> to vector<16x4x8xf32>
    %113 = arith.subf %111, %112 : vector<16x4x8xf32>
    %114 = arith.mulf %113, %113 : vector<16x4x8xf32>
    %115 = arith.addf %108, %114 : vector<16x4x8xf32>
    %cst_50 = arith.constant dense<0x7F800000> : vector<16x4xf32>
    %116 = vector.multi_reduction <minimumf>, %115, %cst_50 [2] : vector<16x4x8xf32> to vector<16x4xf32>
    %117 = vector.shape_cast %116 : vector<16x4xf32> to vector<16x4x1xf32>
    %118 = tpu.iota {dimensions = array<i32: 2>} : vector<16x4x8xi32>
    %119 = vector.broadcast %117 : vector<16x4x1xf32> to vector<16x4x8xf32>
    %120 = arith.cmpf ole, %115, %119 : vector<16x4x8xf32>
    %c8_i32_51 = arith.constant 8 : i32
    %121 = vector.broadcast %c8_i32_51 : i32 to vector<16x4x8xi32>
    %122 = arith.select %120, %118, %121 : vector<16x4x8xi1>, vector<16x4x8xi32>
    %cst_52 = arith.constant dense<2147483647> : vector<16x4xi32>
    %123 = vector.multi_reduction <minsi>, %122, %cst_52 [2] : vector<16x4x8xi32> to vector<16x4xi32>
    %124 = vector.shape_cast %123 : vector<16x4xi32> to vector<16x4x1xi32>
    %125 = vector.broadcast %124 : vector<16x4x1xi32> to vector<16x4x8xi32>
    %126 = arith.cmpi eq, %118, %125 : vector<16x4x8xi32>
    %127 = arith.extui %126 : vector<16x4x8xi1> to vector<16x4x8xi32>
    %128 = arith.sitofp %127 : vector<16x4x8xi32> to vector<16x4x8xf32>
    %c0_53 = arith.constant 0 : index
    %c0_54 = arith.constant 0 : index
    %129 = vector.load %arg1[%c0_53, %c0_54] : memref<16x40xf32, #tpu.memory_space<vmem>>, vector<16x40xf32>
    %c0_55 = arith.constant 0 : index
    %c0_56 = arith.constant 0 : index
    %130 = vector.load %arg11[%c0_55, %c0_56] : memref<40x32xf32, #tpu.memory_space<vmem>>, vector<40x32xf32>
    %cst_57 = arith.constant dense<0.000000e+00> : vector<16x32xf32>
    %131 = tpu.matmul %129, %130, %cst_57 {dimension_numbers = #tpu.dot_dimension_numbers<[1], [0], [0], [1], [0, 0, 1, 1], [], []>} : vector<16x40xf32>, vector<40x32xf32>, vector<16x32xf32> -> vector<16x32xf32>
    %c0_58 = arith.constant 0 : index
    %c0_59 = arith.constant 0 : index
    %132 = vector.load %arg13[%c0_58, %c0_59] : memref<1x32xf32, #tpu.memory_space<vmem>>, vector<1x32xf32>
    %133 = vector.broadcast %132 : vector<1x32xf32> to vector<16x32xf32>
    %134 = arith.addf %131, %133 : vector<16x32xf32>
    %135 = vector.shape_cast %1 : vector<16x8xf32> to vector<16x1x8xf32>
    %136 = vector.broadcast %135 : vector<16x1x8xf32> to vector<16x4x8xf32>
    %137 = arith.mulf %128, %136 : vector<16x4x8xf32>
    %cst_60 = arith.constant dense<0.000000e+00> : vector<16x4xf32>
    %138 = vector.multi_reduction <add>, %137, %cst_60 [2] : vector<16x4x8xf32> to vector<16x4xf32>
    %139 = arith.subf %91, %138 : vector<16x4xf32>
    %140 = arith.mulf %139, %139 : vector<16x4xf32>
    %cst_61 = arith.constant -5.000000e+01 : f32
    %141 = vector.broadcast %cst_61 : f32 to vector<16x4xf32>
    %142 = arith.mulf %141, %140 : vector<16x4xf32>
    %143 = math.exp %142 : vector<16x4xf32>
    %c0_62 = arith.constant 0 : index
    %c0_63 = arith.constant 0 : index
    %c0_64 = arith.constant 0 : index
    %144 = vector.load %arg12[%c0_62, %c0_63, %c0_64] : memref<3x4x32xf32, #tpu.memory_space<vmem>>, vector<1x4x32xf32>
    %145 = vector.shape_cast %144 : vector<1x4x32xf32> to vector<4x32xf32>
    %cst_65 = arith.constant dense<0.000000e+00> : vector<16x32xf32>
    %146 = tpu.matmul %143, %145, %cst_65 {dimension_numbers = #tpu.dot_dimension_numbers<[1], [0], [0], [1], [0, 0, 1, 1], [], []>} : vector<16x4xf32>, vector<4x32xf32>, vector<16x32xf32> -> vector<16x32xf32>
    %147 = arith.addf %134, %146 : vector<16x32xf32>
    %148 = vector.shape_cast %3 : vector<16x8xf32> to vector<16x1x8xf32>
    %149 = vector.broadcast %148 : vector<16x1x8xf32> to vector<16x4x8xf32>
    %150 = arith.mulf %128, %149 : vector<16x4x8xf32>
    %cst_66 = arith.constant dense<0.000000e+00> : vector<16x4xf32>
    %151 = vector.multi_reduction <add>, %150, %cst_66 [2] : vector<16x4x8xf32> to vector<16x4xf32>
    %152 = arith.subf %93, %151 : vector<16x4xf32>
    %153 = arith.mulf %152, %152 : vector<16x4xf32>
    %cst_67 = arith.constant -5.000000e+01 : f32
    %154 = vector.broadcast %cst_67 : f32 to vector<16x4xf32>
    %155 = arith.mulf %154, %153 : vector<16x4xf32>
    %156 = math.exp %155 : vector<16x4xf32>
    %c1_68 = arith.constant 1 : index
    %c0_69 = arith.constant 0 : index
    %c0_70 = arith.constant 0 : index
    %157 = vector.load %arg12[%c1_68, %c0_69, %c0_70] : memref<3x4x32xf32, #tpu.memory_space<vmem>>, vector<1x4x32xf32>
    %158 = vector.shape_cast %157 : vector<1x4x32xf32> to vector<4x32xf32>
    %cst_71 = arith.constant dense<0.000000e+00> : vector<16x32xf32>
    %159 = tpu.matmul %156, %158, %cst_71 {dimension_numbers = #tpu.dot_dimension_numbers<[1], [0], [0], [1], [0, 0, 1, 1], [], []>} : vector<16x4xf32>, vector<4x32xf32>, vector<16x32xf32> -> vector<16x32xf32>
    %160 = arith.addf %147, %159 : vector<16x32xf32>
    %161 = vector.shape_cast %5 : vector<16x8xf32> to vector<16x1x8xf32>
    %162 = vector.broadcast %161 : vector<16x1x8xf32> to vector<16x4x8xf32>
    %163 = arith.mulf %128, %162 : vector<16x4x8xf32>
    %cst_72 = arith.constant dense<0.000000e+00> : vector<16x4xf32>
    %164 = vector.multi_reduction <add>, %163, %cst_72 [2] : vector<16x4x8xf32> to vector<16x4xf32>
    %165 = arith.subf %95, %164 : vector<16x4xf32>
    %166 = arith.mulf %165, %165 : vector<16x4xf32>
    %cst_73 = arith.constant -5.000000e+01 : f32
    %167 = vector.broadcast %cst_73 : f32 to vector<16x4xf32>
    %168 = arith.mulf %167, %166 : vector<16x4xf32>
    %169 = math.exp %168 : vector<16x4xf32>
    %c2_74 = arith.constant 2 : index
    %c0_75 = arith.constant 0 : index
    %c0_76 = arith.constant 0 : index
    %170 = vector.load %arg12[%c2_74, %c0_75, %c0_76] : memref<3x4x32xf32, #tpu.memory_space<vmem>>, vector<1x4x32xf32>
    %171 = vector.shape_cast %170 : vector<1x4x32xf32> to vector<4x32xf32>
    %cst_77 = arith.constant dense<0.000000e+00> : vector<16x32xf32>
    %172 = tpu.matmul %169, %171, %cst_77 {dimension_numbers = #tpu.dot_dimension_numbers<[1], [0], [0], [1], [0, 0, 1, 1], [], []>} : vector<16x4xf32>, vector<4x32xf32>, vector<16x32xf32> -> vector<16x32xf32>
    %173 = arith.addf %160, %172 : vector<16x32xf32>
    %174 = vector.extract_strided_slice %89 {offsets = [0, 0], sizes = [8, 32], strides = [1, 1]} : vector<16x32xf32> to vector<8x32xf32>
    %c0_78 = arith.constant 0 : index
    %c0_79 = arith.constant 0 : index
    %175 = vector.load %arg32[%c0_78, %c0_79] : memref<32x32xf32, #tpu.memory_space<vmem>>, vector<8x32xf32>
    tpu.vector_store %arg32[%c0_78, %c0_79], %174 {strides = array<i32>} : memref<32x32xf32, #tpu.memory_space<vmem>>, vector<8x32xf32>,
    %176 = vector.extract_strided_slice %173 {offsets = [0, 0], sizes = [8, 32], strides = [1, 1]} : vector<16x32xf32> to vector<8x32xf32>
    %c8 = arith.constant 8 : index
    %c0_80 = arith.constant 0 : index
    %177 = vector.load %arg32[%c8, %c0_80] : memref<32x32xf32, #tpu.memory_space<vmem>>, vector<8x32xf32>
    tpu.vector_store %arg32[%c8, %c0_80], %176 {strides = array<i32>} : memref<32x32xf32, #tpu.memory_space<vmem>>, vector<8x32xf32>,
    %178 = vector.extract_strided_slice %89 {offsets = [8, 0], sizes = [8, 32], strides = [1, 1]} : vector<16x32xf32> to vector<8x32xf32>
    %c16 = arith.constant 16 : index
    %c0_81 = arith.constant 0 : index
    %179 = vector.load %arg32[%c16, %c0_81] : memref<32x32xf32, #tpu.memory_space<vmem>>, vector<8x32xf32>
    tpu.vector_store %arg32[%c16, %c0_81], %178 {strides = array<i32>} : memref<32x32xf32, #tpu.memory_space<vmem>>, vector<8x32xf32>,
    %180 = vector.extract_strided_slice %173 {offsets = [8, 0], sizes = [8, 32], strides = [1, 1]} : vector<16x32xf32> to vector<8x32xf32>
    %c24 = arith.constant 24 : index
    %c0_82 = arith.constant 0 : index
    %181 = vector.load %arg32[%c24, %c0_82] : memref<32x32xf32, #tpu.memory_space<vmem>>, vector<8x32xf32>
    tpu.vector_store %arg32[%c24, %c0_82], %180 {strides = array<i32>} : memref<32x32xf32, #tpu.memory_space<vmem>>, vector<8x32xf32>,
    %c0_83 = arith.constant 0 : index
    %c0_84 = arith.constant 0 : index
    %182 = vector.load %arg6[%c0_83, %c0_84] : memref<32x1xf32, #tpu.memory_space<vmem>>, vector<32x1xf32>
    %c0_85 = arith.constant 0 : index
    %c0_86 = arith.constant 0 : index
    %183 = vector.load %arg7[%c0_85, %c0_86] : memref<32x32xf32, #tpu.memory_space<vmem>>, vector<32x32xf32>
    %c0_87 = arith.constant 0 : index
    %c0_88 = arith.constant 0 : index
    %184 = vector.load %arg32[%c0_87, %c0_88] : memref<32x32xf32, #tpu.memory_space<vmem>>, vector<32x32xf32>
    %c0_89 = arith.constant 0 : index
    %c0_90 = arith.constant 0 : index
    %185 = vector.load %arg5[%c0_89, %c0_90] : memref<32x32xf32, #tpu.memory_space<vmem>>, vector<32x32xf32>
    %186 = arith.addf %184, %185 : vector<32x32xf32>
    %187 = vector.broadcast %182 : vector<32x1xf32> to vector<32x32xf32>
    %188 = arith.mulf %186, %187 : vector<32x32xf32>
    %c0_91 = arith.constant 0 : index
    %c0_92 = arith.constant 0 : index
    %c0_93 = arith.constant 0 : index
    %189 = vector.load %arg14[%c0_91, %c0_92, %c0_93] : memref<2x32x96xf32, #tpu.memory_space<vmem>>, vector<1x32x96xf32>
    %190 = vector.shape_cast %189 : vector<1x32x96xf32> to vector<32x96xf32>
    %cst_94 = arith.constant dense<0.000000e+00> : vector<32x96xf32>
    %191 = tpu.matmul %188, %190, %cst_94 {dimension_numbers = #tpu.dot_dimension_numbers<[1], [0], [0], [1], [0, 0, 1, 1], [], []>} : vector<32x32xf32>, vector<32x96xf32>, vector<32x96xf32> -> vector<32x96xf32>
    %c0_95 = arith.constant 0 : index
    %c0_96 = arith.constant 0 : index
    %c0_97 = arith.constant 0 : index
    %192 = vector.load %arg15[%c0_95, %c0_96, %c0_97] : memref<2x1x96xf32, #tpu.memory_space<vmem>>, vector<1x1x96xf32>
    %193 = vector.shape_cast %192 : vector<1x1x96xf32> to vector<1x96xf32>
    %194 = vector.broadcast %193 : vector<1x96xf32> to vector<32x96xf32>
    %195 = arith.addf %191, %194 : vector<32x96xf32>
    %196 = vector.extract_strided_slice %195 {offsets = [0, 0], sizes = [32, 8], strides = [1, 1]} : vector<32x96xf32> to vector<32x8xf32>
    %197 = vector.extract_strided_slice %195 {offsets = [0, 32], sizes = [32, 8], strides = [1, 1]} : vector<32x96xf32> to vector<32x8xf32>
    %198 = vector.extract_strided_slice %195 {offsets = [0, 64], sizes = [32, 8], strides = [1, 1]} : vector<32x96xf32> to vector<32x8xf32>
    %cst_98 = arith.constant dense<0.000000e+00> : vector<32x32xf32>
    %199 = tpu.matmul %196, %197, %cst_98 {dimension_numbers = #tpu.dot_dimension_numbers<[1], [1], [0], [0], [0, 0, 1, 0], [], []>} : vector<32x8xf32>, vector<32x8xf32>, vector<32x32xf32> -> vector<32x32xf32>
    %cst_99 = arith.constant 0.353553385 : f32
    %200 = vector.broadcast %cst_99 : f32 to vector<32x32xf32>
    %201 = arith.mulf %199, %200 : vector<32x32xf32>
    %202 = arith.addf %201, %183 : vector<32x32xf32>
    %cst_100 = arith.constant dense<0xFF800000> : vector<32xf32>
    %203 = vector.multi_reduction <maximumf>, %202, %cst_100 [1] : vector<32x32xf32> to vector<32xf32>
    %204 = vector.shape_cast %203 : vector<32xf32> to vector<32x1xf32>
    %205 = vector.broadcast %204 : vector<32x1xf32> to vector<32x32xf32>
    %206 = arith.subf %202, %205 : vector<32x32xf32>
    %207 = math.exp %206 : vector<32x32xf32>
    %cst_101 = arith.constant dense<0.000000e+00> : vector<32xf32>
    %208 = vector.multi_reduction <add>, %207, %cst_101 [1] : vector<32x32xf32> to vector<32xf32>
    %209 = vector.shape_cast %208 : vector<32xf32> to vector<32x1xf32>
    %210 = tpu.reciprocal %209 {approx = true} : vector<32x1xf32> -> vector<32x1xf32>
    %211 = vector.broadcast %210 : vector<32x1xf32> to vector<32x32xf32>
    %212 = arith.mulf %207, %211 : vector<32x32xf32>
    %cst_102 = arith.constant dense<0.000000e+00> : vector<32x8xf32>
    %213 = tpu.matmul %212, %198, %cst_102 {dimension_numbers = #tpu.dot_dimension_numbers<[1], [0], [0], [1], [0, 0, 1, 1], [], []>} : vector<32x32xf32>, vector<32x8xf32>, vector<32x8xf32> -> vector<32x8xf32>
    %c0_103 = arith.constant 0 : index
    %c0_104 = arith.constant 0 : index
    %214 = vector.load %arg33[%c0_103, %c0_104] : memref<32x32xf32, #tpu.memory_space<vmem>>, vector<32x8xf32>
    tpu.vector_store %arg33[%c0_103, %c0_104], %213 {strides = array<i32>} : memref<32x32xf32, #tpu.memory_space<vmem>>, vector<32x8xf32>,
    %215 = vector.extract_strided_slice %195 {offsets = [0, 8], sizes = [32, 8], strides = [1, 1]} : vector<32x96xf32> to vector<32x8xf32>
    %216 = vector.extract_strided_slice %195 {offsets = [0, 40], sizes = [32, 8], strides = [1, 1]} : vector<32x96xf32> to vector<32x8xf32>
    %217 = vector.extract_strided_slice %195 {offsets = [0, 72], sizes = [32, 8], strides = [1, 1]} : vector<32x96xf32> to vector<32x8xf32>
    %cst_105 = arith.constant dense<0.000000e+00> : vector<32x32xf32>
    %218 = tpu.matmul %215, %216, %cst_105 {dimension_numbers = #tpu.dot_dimension_numbers<[1], [1], [0], [0], [0, 0, 1, 0], [], []>} : vector<32x8xf32>, vector<32x8xf32>, vector<32x32xf32> -> vector<32x32xf32>
    %cst_106 = arith.constant 0.353553385 : f32
    %219 = vector.broadcast %cst_106 : f32 to vector<32x32xf32>
    %220 = arith.mulf %218, %219 : vector<32x32xf32>
    %221 = arith.addf %220, %183 : vector<32x32xf32>
    %cst_107 = arith.constant dense<0xFF800000> : vector<32xf32>
    %222 = vector.multi_reduction <maximumf>, %221, %cst_107 [1] : vector<32x32xf32> to vector<32xf32>
    %223 = vector.shape_cast %222 : vector<32xf32> to vector<32x1xf32>
    %224 = vector.broadcast %223 : vector<32x1xf32> to vector<32x32xf32>
    %225 = arith.subf %221, %224 : vector<32x32xf32>
    %226 = math.exp %225 : vector<32x32xf32>
    %cst_108 = arith.constant dense<0.000000e+00> : vector<32xf32>
    %227 = vector.multi_reduction <add>, %226, %cst_108 [1] : vector<32x32xf32> to vector<32xf32>
    %228 = vector.shape_cast %227 : vector<32xf32> to vector<32x1xf32>
    %229 = tpu.reciprocal %228 {approx = true} : vector<32x1xf32> -> vector<32x1xf32>
    %230 = vector.broadcast %229 : vector<32x1xf32> to vector<32x32xf32>
    %231 = arith.mulf %226, %230 : vector<32x32xf32>
    %cst_109 = arith.constant dense<0.000000e+00> : vector<32x8xf32>
    %232 = tpu.matmul %231, %217, %cst_109 {dimension_numbers = #tpu.dot_dimension_numbers<[1], [0], [0], [1], [0, 0, 1, 1], [], []>} : vector<32x32xf32>, vector<32x8xf32>, vector<32x8xf32> -> vector<32x8xf32>
    %c0_110 = arith.constant 0 : index
    %c8_111 = arith.constant 8 : index
    %233 = vector.load %arg33[%c0_110, %c8_111] : memref<32x32xf32, #tpu.memory_space<vmem>>, vector<32x8xf32>
    tpu.vector_store %arg33[%c0_110, %c8_111], %232 {strides = array<i32>} : memref<32x32xf32, #tpu.memory_space<vmem>>, vector<32x8xf32>,
    %234 = vector.extract_strided_slice %195 {offsets = [0, 16], sizes = [32, 8], strides = [1, 1]} : vector<32x96xf32> to vector<32x8xf32>
    %235 = vector.extract_strided_slice %195 {offsets = [0, 48], sizes = [32, 8], strides = [1, 1]} : vector<32x96xf32> to vector<32x8xf32>
    %236 = vector.extract_strided_slice %195 {offsets = [0, 80], sizes = [32, 8], strides = [1, 1]} : vector<32x96xf32> to vector<32x8xf32>
    %cst_112 = arith.constant dense<0.000000e+00> : vector<32x32xf32>
    %237 = tpu.matmul %234, %235, %cst_112 {dimension_numbers = #tpu.dot_dimension_numbers<[1], [1], [0], [0], [0, 0, 1, 0], [], []>} : vector<32x8xf32>, vector<32x8xf32>, vector<32x32xf32> -> vector<32x32xf32>
    %cst_113 = arith.constant 0.353553385 : f32
    %238 = vector.broadcast %cst_113 : f32 to vector<32x32xf32>
    %239 = arith.mulf %237, %238 : vector<32x32xf32>
    %240 = arith.addf %239, %183 : vector<32x32xf32>
    %cst_114 = arith.constant dense<0xFF800000> : vector<32xf32>
    %241 = vector.multi_reduction <maximumf>, %240, %cst_114 [1] : vector<32x32xf32> to vector<32xf32>
    %242 = vector.shape_cast %241 : vector<32xf32> to vector<32x1xf32>
    %243 = vector.broadcast %242 : vector<32x1xf32> to vector<32x32xf32>
    %244 = arith.subf %240, %243 : vector<32x32xf32>
    %245 = math.exp %244 : vector<32x32xf32>
    %cst_115 = arith.constant dense<0.000000e+00> : vector<32xf32>
    %246 = vector.multi_reduction <add>, %245, %cst_115 [1] : vector<32x32xf32> to vector<32xf32>
    %247 = vector.shape_cast %246 : vector<32xf32> to vector<32x1xf32>
    %248 = tpu.reciprocal %247 {approx = true} : vector<32x1xf32> -> vector<32x1xf32>
    %249 = vector.broadcast %248 : vector<32x1xf32> to vector<32x32xf32>
    %250 = arith.mulf %245, %249 : vector<32x32xf32>
    %cst_116 = arith.constant dense<0.000000e+00> : vector<32x8xf32>
    %251 = tpu.matmul %250, %236, %cst_116 {dimension_numbers = #tpu.dot_dimension_numbers<[1], [0], [0], [1], [0, 0, 1, 1], [], []>} : vector<32x32xf32>, vector<32x8xf32>, vector<32x8xf32> -> vector<32x8xf32>
    %c0_117 = arith.constant 0 : index
    %c16_118 = arith.constant 16 : index
    %252 = vector.load %arg33[%c0_117, %c16_118] : memref<32x32xf32, #tpu.memory_space<vmem>>, vector<32x8xf32>
    tpu.vector_store %arg33[%c0_117, %c16_118], %251 {strides = array<i32>} : memref<32x32xf32, #tpu.memory_space<vmem>>, vector<32x8xf32>,
    %253 = vector.extract_strided_slice %195 {offsets = [0, 24], sizes = [32, 8], strides = [1, 1]} : vector<32x96xf32> to vector<32x8xf32>
    %254 = vector.extract_strided_slice %195 {offsets = [0, 56], sizes = [32, 8], strides = [1, 1]} : vector<32x96xf32> to vector<32x8xf32>
    %255 = vector.extract_strided_slice %195 {offsets = [0, 88], sizes = [32, 8], strides = [1, 1]} : vector<32x96xf32> to vector<32x8xf32>
    %cst_119 = arith.constant dense<0.000000e+00> : vector<32x32xf32>
    %256 = tpu.matmul %253, %254, %cst_119 {dimension_numbers = #tpu.dot_dimension_numbers<[1], [1], [0], [0], [0, 0, 1, 0], [], []>} : vector<32x8xf32>, vector<32x8xf32>, vector<32x32xf32> -> vector<32x32xf32>
    %cst_120 = arith.constant 0.353553385 : f32
    %257 = vector.broadcast %cst_120 : f32 to vector<32x32xf32>
    %258 = arith.mulf %256, %257 : vector<32x32xf32>
    %259 = arith.addf %258, %183 : vector<32x32xf32>
    %cst_121 = arith.constant dense<0xFF800000> : vector<32xf32>
    %260 = vector.multi_reduction <maximumf>, %259, %cst_121 [1] : vector<32x32xf32> to vector<32xf32>
    %261 = vector.shape_cast %260 : vector<32xf32> to vector<32x1xf32>
    %262 = vector.broadcast %261 : vector<32x1xf32> to vector<32x32xf32>
    %263 = arith.subf %259, %262 : vector<32x32xf32>
    %264 = math.exp %263 : vector<32x32xf32>
    %cst_122 = arith.constant dense<0.000000e+00> : vector<32xf32>
    %265 = vector.multi_reduction <add>, %264, %cst_122 [1] : vector<32x32xf32> to vector<32xf32>
    %266 = vector.shape_cast %265 : vector<32xf32> to vector<32x1xf32>
    %267 = tpu.reciprocal %266 {approx = true} : vector<32x1xf32> -> vector<32x1xf32>
    %268 = vector.broadcast %267 : vector<32x1xf32> to vector<32x32xf32>
    %269 = arith.mulf %264, %268 : vector<32x32xf32>
    %cst_123 = arith.constant dense<0.000000e+00> : vector<32x8xf32>
    %270 = tpu.matmul %269, %255, %cst_123 {dimension_numbers = #tpu.dot_dimension_numbers<[1], [0], [0], [1], [0, 0, 1, 1], [], []>} : vector<32x32xf32>, vector<32x8xf32>, vector<32x8xf32> -> vector<32x8xf32>
    %c0_124 = arith.constant 0 : index
    %c24_125 = arith.constant 24 : index
    %271 = vector.load %arg33[%c0_124, %c24_125] : memref<32x32xf32, #tpu.memory_space<vmem>>, vector<32x8xf32>
    tpu.vector_store %arg33[%c0_124, %c24_125], %270 {strides = array<i32>} : memref<32x32xf32, #tpu.memory_space<vmem>>, vector<32x8xf32>,
    %c0_126 = arith.constant 0 : index
    %c0_127 = arith.constant 0 : index
    %272 = vector.load %arg33[%c0_126, %c0_127] : memref<32x32xf32, #tpu.memory_space<vmem>>, vector<32x32xf32>
    %c0_128 = arith.constant 0 : index
    %c0_129 = arith.constant 0 : index
    %c0_130 = arith.constant 0 : index
    %273 = vector.load %arg16[%c0_128, %c0_129, %c0_130] : memref<2x32x32xf32, #tpu.memory_space<vmem>>, vector<1x32x32xf32>
    %274 = vector.shape_cast %273 : vector<1x32x32xf32> to vector<32x32xf32>
    %cst_131 = arith.constant dense<0.000000e+00> : vector<32x32xf32>
    %275 = tpu.matmul %272, %274, %cst_131 {dimension_numbers = #tpu.dot_dimension_numbers<[1], [0], [0], [1], [0, 0, 1, 1], [], []>} : vector<32x32xf32>, vector<32x32xf32>, vector<32x32xf32> -> vector<32x32xf32>
    %c0_132 = arith.constant 0 : index
    %c0_133 = arith.constant 0 : index
    %c0_134 = arith.constant 0 : index
    %276 = vector.load %arg17[%c0_132, %c0_133, %c0_134] : memref<2x1x32xf32, #tpu.memory_space<vmem>>, vector<1x1x32xf32>
    %277 = vector.shape_cast %276 : vector<1x1x32xf32> to vector<1x32xf32>
    %278 = vector.broadcast %277 : vector<1x32xf32> to vector<32x32xf32>
    %279 = arith.addf %275, %278 : vector<32x32xf32>
    %280 = arith.addf %188, %279 : vector<32x32xf32>
    %c0_135 = arith.constant 0 : index
    %c0_136 = arith.constant 0 : index
    %c0_137 = arith.constant 0 : index
    %281 = vector.load %arg18[%c0_135, %c0_136, %c0_137] : memref<2x1x32xf32, #tpu.memory_space<vmem>>, vector<1x1x32xf32>
    %282 = vector.shape_cast %281 : vector<1x1x32xf32> to vector<1x32xf32>
    %c0_138 = arith.constant 0 : index
    %c0_139 = arith.constant 0 : index
    %c0_140 = arith.constant 0 : index
    %283 = vector.load %arg19[%c0_138, %c0_139, %c0_140] : memref<2x1x32xf32, #tpu.memory_space<vmem>>, vector<1x1x32xf32>
    %284 = vector.shape_cast %283 : vector<1x1x32xf32> to vector<1x32xf32>
    %cst_141 = arith.constant dense<0.000000e+00> : vector<32xf32>
    %285 = vector.multi_reduction <add>, %280, %cst_141 [1] : vector<32x32xf32> to vector<32xf32>
    %286 = vector.shape_cast %285 : vector<32xf32> to vector<32x1xf32>
    %cst_142 = arith.constant 3.200000e+01 : f32
    %287 = vector.broadcast %cst_142 : f32 to vector<32x1xf32>
    %288 = arith.divf %286, %287 : vector<32x1xf32>
    %289 = vector.broadcast %288 : vector<32x1xf32> to vector<32x32xf32>
    %290 = arith.subf %280, %289 : vector<32x32xf32>
    %291 = arith.mulf %290, %290 : vector<32x32xf32>
    %cst_143 = arith.constant dense<0.000000e+00> : vector<32xf32>
    %292 = vector.multi_reduction <add>, %291, %cst_143 [1] : vector<32x32xf32> to vector<32xf32>
    %293 = vector.shape_cast %292 : vector<32xf32> to vector<32x1xf32>
    %cst_144 = arith.constant 3.200000e+01 : f32
    %294 = vector.broadcast %cst_144 : f32 to vector<32x1xf32>
    %295 = arith.divf %293, %294 : vector<32x1xf32>
    %296 = vector.broadcast %288 : vector<32x1xf32> to vector<32x32xf32>
    %297 = arith.subf %280, %296 : vector<32x32xf32>
    %cst_145 = arith.constant 9.99999974E-6 : f32
    %298 = vector.broadcast %cst_145 : f32 to vector<32x1xf32>
    %299 = arith.addf %295, %298 : vector<32x1xf32>
    %300 = math.rsqrt %299 : vector<32x1xf32>
    %301 = vector.broadcast %300 : vector<32x1xf32> to vector<32x32xf32>
    %302 = arith.mulf %297, %301 : vector<32x32xf32>
    %303 = vector.broadcast %282 : vector<1x32xf32> to vector<32x32xf32>
    %304 = arith.mulf %302, %303 : vector<32x32xf32>
    %305 = vector.broadcast %284 : vector<1x32xf32> to vector<32x32xf32>
    %306 = arith.addf %304, %305 : vector<32x32xf32>
    %c0_146 = arith.constant 0 : index
    %c0_147 = arith.constant 0 : index
    %c0_148 = arith.constant 0 : index
    %307 = vector.load %arg20[%c0_146, %c0_147, %c0_148] : memref<2x32x64xf32, #tpu.memory_space<vmem>>, vector<1x32x64xf32>
    %308 = vector.shape_cast %307 : vector<1x32x64xf32> to vector<32x64xf32>
    %cst_149 = arith.constant dense<0.000000e+00> : vector<32x64xf32>
    %309 = tpu.matmul %306, %308, %cst_149 {dimension_numbers = #tpu.dot_dimension_numbers<[1], [0], [0], [1], [0, 0, 1, 1], [], []>} : vector<32x32xf32>, vector<32x64xf32>, vector<32x64xf32> -> vector<32x64xf32>
    %c0_150 = arith.constant 0 : index
    %c0_151 = arith.constant 0 : index
    %c0_152 = arith.constant 0 : index
    %310 = vector.load %arg21[%c0_150, %c0_151, %c0_152] : memref<2x1x64xf32, #tpu.memory_space<vmem>>, vector<1x1x64xf32>
    %311 = vector.shape_cast %310 : vector<1x1x64xf32> to vector<1x64xf32>
    %312 = vector.broadcast %311 : vector<1x64xf32> to vector<32x64xf32>
    %313 = arith.addf %309, %312 : vector<32x64xf32>
    %cst_153 = arith.constant 0.000000e+00 : f32
    %314 = vector.broadcast %cst_153 : f32 to vector<32x64xf32>
    %315 = arith.maximumf %313, %314 : vector<32x64xf32>
    %c0_154 = arith.constant 0 : index
    %c0_155 = arith.constant 0 : index
    %c0_156 = arith.constant 0 : index
    %316 = vector.load %arg22[%c0_154, %c0_155, %c0_156] : memref<2x64x32xf32, #tpu.memory_space<vmem>>, vector<1x64x32xf32>
    %317 = vector.shape_cast %316 : vector<1x64x32xf32> to vector<64x32xf32>
    %cst_157 = arith.constant dense<0.000000e+00> : vector<32x32xf32>
    %318 = tpu.matmul %315, %317, %cst_157 {dimension_numbers = #tpu.dot_dimension_numbers<[1], [0], [0], [1], [0, 0, 1, 1], [], []>} : vector<32x64xf32>, vector<64x32xf32>, vector<32x32xf32> -> vector<32x32xf32>
    %c0_158 = arith.constant 0 : index
    %c0_159 = arith.constant 0 : index
    %c0_160 = arith.constant 0 : index
    %319 = vector.load %arg23[%c0_158, %c0_159, %c0_160] : memref<2x1x32xf32, #tpu.memory_space<vmem>>, vector<1x1x32xf32>
    %320 = vector.shape_cast %319 : vector<1x1x32xf32> to vector<1x32xf32>
    %321 = vector.broadcast %320 : vector<1x32xf32> to vector<32x32xf32>
    %322 = arith.addf %318, %321 : vector<32x32xf32>
    %323 = arith.addf %306, %322 : vector<32x32xf32>
    %c0_161 = arith.constant 0 : index
    %c0_162 = arith.constant 0 : index
    %c0_163 = arith.constant 0 : index
    %324 = vector.load %arg24[%c0_161, %c0_162, %c0_163] : memref<2x1x32xf32, #tpu.memory_space<vmem>>, vector<1x1x32xf32>
    %325 = vector.shape_cast %324 : vector<1x1x32xf32> to vector<1x32xf32>
    %c0_164 = arith.constant 0 : index
    %c0_165 = arith.constant 0 : index
    %c0_166 = arith.constant 0 : index
    %326 = vector.load %arg25[%c0_164, %c0_165, %c0_166] : memref<2x1x32xf32, #tpu.memory_space<vmem>>, vector<1x1x32xf32>
    %327 = vector.shape_cast %326 : vector<1x1x32xf32> to vector<1x32xf32>
    %cst_167 = arith.constant dense<0.000000e+00> : vector<32xf32>
    %328 = vector.multi_reduction <add>, %323, %cst_167 [1] : vector<32x32xf32> to vector<32xf32>
    %329 = vector.shape_cast %328 : vector<32xf32> to vector<32x1xf32>
    %cst_168 = arith.constant 3.200000e+01 : f32
    %330 = vector.broadcast %cst_168 : f32 to vector<32x1xf32>
    %331 = arith.divf %329, %330 : vector<32x1xf32>
    %332 = vector.broadcast %331 : vector<32x1xf32> to vector<32x32xf32>
    %333 = arith.subf %323, %332 : vector<32x32xf32>
    %334 = arith.mulf %333, %333 : vector<32x32xf32>
    %cst_169 = arith.constant dense<0.000000e+00> : vector<32xf32>
    %335 = vector.multi_reduction <add>, %334, %cst_169 [1] : vector<32x32xf32> to vector<32xf32>
    %336 = vector.shape_cast %335 : vector<32xf32> to vector<32x1xf32>
    %cst_170 = arith.constant 3.200000e+01 : f32
    %337 = vector.broadcast %cst_170 : f32 to vector<32x1xf32>
    %338 = arith.divf %336, %337 : vector<32x1xf32>
    %339 = vector.broadcast %331 : vector<32x1xf32> to vector<32x32xf32>
    %340 = arith.subf %323, %339 : vector<32x32xf32>
    %cst_171 = arith.constant 9.99999974E-6 : f32
    %341 = vector.broadcast %cst_171 : f32 to vector<32x1xf32>
    %342 = arith.addf %338, %341 : vector<32x1xf32>
    %343 = math.rsqrt %342 : vector<32x1xf32>
    %344 = vector.broadcast %343 : vector<32x1xf32> to vector<32x32xf32>
    %345 = arith.mulf %340, %344 : vector<32x32xf32>
    %346 = vector.broadcast %325 : vector<1x32xf32> to vector<32x32xf32>
    %347 = arith.mulf %345, %346 : vector<32x32xf32>
    %348 = vector.broadcast %327 : vector<1x32xf32> to vector<32x32xf32>
    %349 = arith.addf %347, %348 : vector<32x32xf32>
    %c1_172 = arith.constant 1 : index
    %c0_173 = arith.constant 0 : index
    %c0_174 = arith.constant 0 : index
    %350 = vector.load %arg14[%c1_172, %c0_173, %c0_174] : memref<2x32x96xf32, #tpu.memory_space<vmem>>, vector<1x32x96xf32>
    %351 = vector.shape_cast %350 : vector<1x32x96xf32> to vector<32x96xf32>
    %cst_175 = arith.constant dense<0.000000e+00> : vector<32x96xf32>
    %352 = tpu.matmul %349, %351, %cst_175 {dimension_numbers = #tpu.dot_dimension_numbers<[1], [0], [0], [1], [0, 0, 1, 1], [], []>} : vector<32x32xf32>, vector<32x96xf32>, vector<32x96xf32> -> vector<32x96xf32>
    %c1_176 = arith.constant 1 : index
    %c0_177 = arith.constant 0 : index
    %c0_178 = arith.constant 0 : index
    %353 = vector.load %arg15[%c1_176, %c0_177, %c0_178] : memref<2x1x96xf32, #tpu.memory_space<vmem>>, vector<1x1x96xf32>
    %354 = vector.shape_cast %353 : vector<1x1x96xf32> to vector<1x96xf32>
    %355 = vector.broadcast %354 : vector<1x96xf32> to vector<32x96xf32>
    %356 = arith.addf %352, %355 : vector<32x96xf32>
    %357 = vector.extract_strided_slice %356 {offsets = [0, 0], sizes = [32, 8], strides = [1, 1]} : vector<32x96xf32> to vector<32x8xf32>
    %358 = vector.extract_strided_slice %356 {offsets = [0, 32], sizes = [32, 8], strides = [1, 1]} : vector<32x96xf32> to vector<32x8xf32>
    %359 = vector.extract_strided_slice %356 {offsets = [0, 64], sizes = [32, 8], strides = [1, 1]} : vector<32x96xf32> to vector<32x8xf32>
    %cst_179 = arith.constant dense<0.000000e+00> : vector<32x32xf32>
    %360 = tpu.matmul %357, %358, %cst_179 {dimension_numbers = #tpu.dot_dimension_numbers<[1], [1], [0], [0], [0, 0, 1, 0], [], []>} : vector<32x8xf32>, vector<32x8xf32>, vector<32x32xf32> -> vector<32x32xf32>
    %cst_180 = arith.constant 0.353553385 : f32
    %361 = vector.broadcast %cst_180 : f32 to vector<32x32xf32>
    %362 = arith.mulf %360, %361 : vector<32x32xf32>
    %363 = arith.addf %362, %183 : vector<32x32xf32>
    %cst_181 = arith.constant dense<0xFF800000> : vector<32xf32>
    %364 = vector.multi_reduction <maximumf>, %363, %cst_181 [1] : vector<32x32xf32> to vector<32xf32>
    %365 = vector.shape_cast %364 : vector<32xf32> to vector<32x1xf32>
    %366 = vector.broadcast %365 : vector<32x1xf32> to vector<32x32xf32>
    %367 = arith.subf %363, %366 : vector<32x32xf32>
    %368 = math.exp %367 : vector<32x32xf32>
    %cst_182 = arith.constant dense<0.000000e+00> : vector<32xf32>
    %369 = vector.multi_reduction <add>, %368, %cst_182 [1] : vector<32x32xf32> to vector<32xf32>
    %370 = vector.shape_cast %369 : vector<32xf32> to vector<32x1xf32>
    %371 = tpu.reciprocal %370 {approx = true} : vector<32x1xf32> -> vector<32x1xf32>
    %372 = vector.broadcast %371 : vector<32x1xf32> to vector<32x32xf32>
    %373 = arith.mulf %368, %372 : vector<32x32xf32>
    %cst_183 = arith.constant dense<0.000000e+00> : vector<32x8xf32>
    %374 = tpu.matmul %373, %359, %cst_183 {dimension_numbers = #tpu.dot_dimension_numbers<[1], [0], [0], [1], [0, 0, 1, 1], [], []>} : vector<32x32xf32>, vector<32x8xf32>, vector<32x8xf32> -> vector<32x8xf32>
    %c0_184 = arith.constant 0 : index
    %c0_185 = arith.constant 0 : index
    %375 = vector.load %arg33[%c0_184, %c0_185] : memref<32x32xf32, #tpu.memory_space<vmem>>, vector<32x8xf32>
    tpu.vector_store %arg33[%c0_184, %c0_185], %374 {strides = array<i32>} : memref<32x32xf32, #tpu.memory_space<vmem>>, vector<32x8xf32>,
    %376 = vector.extract_strided_slice %356 {offsets = [0, 8], sizes = [32, 8], strides = [1, 1]} : vector<32x96xf32> to vector<32x8xf32>
    %377 = vector.extract_strided_slice %356 {offsets = [0, 40], sizes = [32, 8], strides = [1, 1]} : vector<32x96xf32> to vector<32x8xf32>
    %378 = vector.extract_strided_slice %356 {offsets = [0, 72], sizes = [32, 8], strides = [1, 1]} : vector<32x96xf32> to vector<32x8xf32>
    %cst_186 = arith.constant dense<0.000000e+00> : vector<32x32xf32>
    %379 = tpu.matmul %376, %377, %cst_186 {dimension_numbers = #tpu.dot_dimension_numbers<[1], [1], [0], [0], [0, 0, 1, 0], [], []>} : vector<32x8xf32>, vector<32x8xf32>, vector<32x32xf32> -> vector<32x32xf32>
    %cst_187 = arith.constant 0.353553385 : f32
    %380 = vector.broadcast %cst_187 : f32 to vector<32x32xf32>
    %381 = arith.mulf %379, %380 : vector<32x32xf32>
    %382 = arith.addf %381, %183 : vector<32x32xf32>
    %cst_188 = arith.constant dense<0xFF800000> : vector<32xf32>
    %383 = vector.multi_reduction <maximumf>, %382, %cst_188 [1] : vector<32x32xf32> to vector<32xf32>
    %384 = vector.shape_cast %383 : vector<32xf32> to vector<32x1xf32>
    %385 = vector.broadcast %384 : vector<32x1xf32> to vector<32x32xf32>
    %386 = arith.subf %382, %385 : vector<32x32xf32>
    %387 = math.exp %386 : vector<32x32xf32>
    %cst_189 = arith.constant dense<0.000000e+00> : vector<32xf32>
    %388 = vector.multi_reduction <add>, %387, %cst_189 [1] : vector<32x32xf32> to vector<32xf32>
    %389 = vector.shape_cast %388 : vector<32xf32> to vector<32x1xf32>
    %390 = tpu.reciprocal %389 {approx = true} : vector<32x1xf32> -> vector<32x1xf32>
    %391 = vector.broadcast %390 : vector<32x1xf32> to vector<32x32xf32>
    %392 = arith.mulf %387, %391 : vector<32x32xf32>
    %cst_190 = arith.constant dense<0.000000e+00> : vector<32x8xf32>
    %393 = tpu.matmul %392, %378, %cst_190 {dimension_numbers = #tpu.dot_dimension_numbers<[1], [0], [0], [1], [0, 0, 1, 1], [], []>} : vector<32x32xf32>, vector<32x8xf32>, vector<32x8xf32> -> vector<32x8xf32>
    %c0_191 = arith.constant 0 : index
    %c8_192 = arith.constant 8 : index
    %394 = vector.load %arg33[%c0_191, %c8_192] : memref<32x32xf32, #tpu.memory_space<vmem>>, vector<32x8xf32>
    tpu.vector_store %arg33[%c0_191, %c8_192], %393 {strides = array<i32>} : memref<32x32xf32, #tpu.memory_space<vmem>>, vector<32x8xf32>,
    %395 = vector.extract_strided_slice %356 {offsets = [0, 16], sizes = [32, 8], strides = [1, 1]} : vector<32x96xf32> to vector<32x8xf32>
    %396 = vector.extract_strided_slice %356 {offsets = [0, 48], sizes = [32, 8], strides = [1, 1]} : vector<32x96xf32> to vector<32x8xf32>
    %397 = vector.extract_strided_slice %356 {offsets = [0, 80], sizes = [32, 8], strides = [1, 1]} : vector<32x96xf32> to vector<32x8xf32>
    %cst_193 = arith.constant dense<0.000000e+00> : vector<32x32xf32>
    %398 = tpu.matmul %395, %396, %cst_193 {dimension_numbers = #tpu.dot_dimension_numbers<[1], [1], [0], [0], [0, 0, 1, 0], [], []>} : vector<32x8xf32>, vector<32x8xf32>, vector<32x32xf32> -> vector<32x32xf32>
    %cst_194 = arith.constant 0.353553385 : f32
    %399 = vector.broadcast %cst_194 : f32 to vector<32x32xf32>
    %400 = arith.mulf %398, %399 : vector<32x32xf32>
    %401 = arith.addf %400, %183 : vector<32x32xf32>
    %cst_195 = arith.constant dense<0xFF800000> : vector<32xf32>
    %402 = vector.multi_reduction <maximumf>, %401, %cst_195 [1] : vector<32x32xf32> to vector<32xf32>
    %403 = vector.shape_cast %402 : vector<32xf32> to vector<32x1xf32>
    %404 = vector.broadcast %403 : vector<32x1xf32> to vector<32x32xf32>
    %405 = arith.subf %401, %404 : vector<32x32xf32>
    %406 = math.exp %405 : vector<32x32xf32>
    %cst_196 = arith.constant dense<0.000000e+00> : vector<32xf32>
    %407 = vector.multi_reduction <add>, %406, %cst_196 [1] : vector<32x32xf32> to vector<32xf32>
    %408 = vector.shape_cast %407 : vector<32xf32> to vector<32x1xf32>
    %409 = tpu.reciprocal %408 {approx = true} : vector<32x1xf32> -> vector<32x1xf32>
    %410 = vector.broadcast %409 : vector<32x1xf32> to vector<32x32xf32>
    %411 = arith.mulf %406, %410 : vector<32x32xf32>
    %cst_197 = arith.constant dense<0.000000e+00> : vector<32x8xf32>
    %412 = tpu.matmul %411, %397, %cst_197 {dimension_numbers = #tpu.dot_dimension_numbers<[1], [0], [0], [1], [0, 0, 1, 1], [], []>} : vector<32x32xf32>, vector<32x8xf32>, vector<32x8xf32> -> vector<32x8xf32>
    %c0_198 = arith.constant 0 : index
    %c16_199 = arith.constant 16 : index
    %413 = vector.load %arg33[%c0_198, %c16_199] : memref<32x32xf32, #tpu.memory_space<vmem>>, vector<32x8xf32>
    tpu.vector_store %arg33[%c0_198, %c16_199], %412 {strides = array<i32>} : memref<32x32xf32, #tpu.memory_space<vmem>>, vector<32x8xf32>,
    %414 = vector.extract_strided_slice %356 {offsets = [0, 24], sizes = [32, 8], strides = [1, 1]} : vector<32x96xf32> to vector<32x8xf32>
    %415 = vector.extract_strided_slice %356 {offsets = [0, 56], sizes = [32, 8], strides = [1, 1]} : vector<32x96xf32> to vector<32x8xf32>
    %416 = vector.extract_strided_slice %356 {offsets = [0, 88], sizes = [32, 8], strides = [1, 1]} : vector<32x96xf32> to vector<32x8xf32>
    %cst_200 = arith.constant dense<0.000000e+00> : vector<32x32xf32>
    %417 = tpu.matmul %414, %415, %cst_200 {dimension_numbers = #tpu.dot_dimension_numbers<[1], [1], [0], [0], [0, 0, 1, 0], [], []>} : vector<32x8xf32>, vector<32x8xf32>, vector<32x32xf32> -> vector<32x32xf32>
    %cst_201 = arith.constant 0.353553385 : f32
    %418 = vector.broadcast %cst_201 : f32 to vector<32x32xf32>
    %419 = arith.mulf %417, %418 : vector<32x32xf32>
    %420 = arith.addf %419, %183 : vector<32x32xf32>
    %cst_202 = arith.constant dense<0xFF800000> : vector<32xf32>
    %421 = vector.multi_reduction <maximumf>, %420, %cst_202 [1] : vector<32x32xf32> to vector<32xf32>
    %422 = vector.shape_cast %421 : vector<32xf32> to vector<32x1xf32>
    %423 = vector.broadcast %422 : vector<32x1xf32> to vector<32x32xf32>
    %424 = arith.subf %420, %423 : vector<32x32xf32>
    %425 = math.exp %424 : vector<32x32xf32>
    %cst_203 = arith.constant dense<0.000000e+00> : vector<32xf32>
    %426 = vector.multi_reduction <add>, %425, %cst_203 [1] : vector<32x32xf32> to vector<32xf32>
    %427 = vector.shape_cast %426 : vector<32xf32> to vector<32x1xf32>
    %428 = tpu.reciprocal %427 {approx = true} : vector<32x1xf32> -> vector<32x1xf32>
    %429 = vector.broadcast %428 : vector<32x1xf32> to vector<32x32xf32>
    %430 = arith.mulf %425, %429 : vector<32x32xf32>
    %cst_204 = arith.constant dense<0.000000e+00> : vector<32x8xf32>
    %431 = tpu.matmul %430, %416, %cst_204 {dimension_numbers = #tpu.dot_dimension_numbers<[1], [0], [0], [1], [0, 0, 1, 1], [], []>} : vector<32x32xf32>, vector<32x8xf32>, vector<32x8xf32> -> vector<32x8xf32>
    %c0_205 = arith.constant 0 : index
    %c24_206 = arith.constant 24 : index
    %432 = vector.load %arg33[%c0_205, %c24_206] : memref<32x32xf32, #tpu.memory_space<vmem>>, vector<32x8xf32>
    tpu.vector_store %arg33[%c0_205, %c24_206], %431 {strides = array<i32>} : memref<32x32xf32, #tpu.memory_space<vmem>>, vector<32x8xf32>,
    %c0_207 = arith.constant 0 : index
    %c0_208 = arith.constant 0 : index
    %433 = vector.load %arg33[%c0_207, %c0_208] : memref<32x32xf32, #tpu.memory_space<vmem>>, vector<32x32xf32>
    %c1_209 = arith.constant 1 : index
    %c0_210 = arith.constant 0 : index
    %c0_211 = arith.constant 0 : index
    %434 = vector.load %arg16[%c1_209, %c0_210, %c0_211] : memref<2x32x32xf32, #tpu.memory_space<vmem>>, vector<1x32x32xf32>
    %435 = vector.shape_cast %434 : vector<1x32x32xf32> to vector<32x32xf32>
    %cst_212 = arith.constant dense<0.000000e+00> : vector<32x32xf32>
    %436 = tpu.matmul %433, %435, %cst_212 {dimension_numbers = #tpu.dot_dimension_numbers<[1], [0], [0], [1], [0, 0, 1, 1], [], []>} : vector<32x32xf32>, vector<32x32xf32>, vector<32x32xf32> -> vector<32x32xf32>
    %c1_213 = arith.constant 1 : index
    %c0_214 = arith.constant 0 : index
    %c0_215 = arith.constant 0 : index
    %437 = vector.load %arg17[%c1_213, %c0_214, %c0_215] : memref<2x1x32xf32, #tpu.memory_space<vmem>>, vector<1x1x32xf32>
    %438 = vector.shape_cast %437 : vector<1x1x32xf32> to vector<1x32xf32>
    %439 = vector.broadcast %438 : vector<1x32xf32> to vector<32x32xf32>
    %440 = arith.addf %436, %439 : vector<32x32xf32>
    %441 = arith.addf %349, %440 : vector<32x32xf32>
    %c1_216 = arith.constant 1 : index
    %c0_217 = arith.constant 0 : index
    %c0_218 = arith.constant 0 : index
    %442 = vector.load %arg18[%c1_216, %c0_217, %c0_218] : memref<2x1x32xf32, #tpu.memory_space<vmem>>, vector<1x1x32xf32>
    %443 = vector.shape_cast %442 : vector<1x1x32xf32> to vector<1x32xf32>
    %c1_219 = arith.constant 1 : index
    %c0_220 = arith.constant 0 : index
    %c0_221 = arith.constant 0 : index
    %444 = vector.load %arg19[%c1_219, %c0_220, %c0_221] : memref<2x1x32xf32, #tpu.memory_space<vmem>>, vector<1x1x32xf32>
    %445 = vector.shape_cast %444 : vector<1x1x32xf32> to vector<1x32xf32>
    %cst_222 = arith.constant dense<0.000000e+00> : vector<32xf32>
    %446 = vector.multi_reduction <add>, %441, %cst_222 [1] : vector<32x32xf32> to vector<32xf32>
    %447 = vector.shape_cast %446 : vector<32xf32> to vector<32x1xf32>
    %cst_223 = arith.constant 3.200000e+01 : f32
    %448 = vector.broadcast %cst_223 : f32 to vector<32x1xf32>
    %449 = arith.divf %447, %448 : vector<32x1xf32>
    %450 = vector.broadcast %449 : vector<32x1xf32> to vector<32x32xf32>
    %451 = arith.subf %441, %450 : vector<32x32xf32>
    %452 = arith.mulf %451, %451 : vector<32x32xf32>
    %cst_224 = arith.constant dense<0.000000e+00> : vector<32xf32>
    %453 = vector.multi_reduction <add>, %452, %cst_224 [1] : vector<32x32xf32> to vector<32xf32>
    %454 = vector.shape_cast %453 : vector<32xf32> to vector<32x1xf32>
    %cst_225 = arith.constant 3.200000e+01 : f32
    %455 = vector.broadcast %cst_225 : f32 to vector<32x1xf32>
    %456 = arith.divf %454, %455 : vector<32x1xf32>
    %457 = vector.broadcast %449 : vector<32x1xf32> to vector<32x32xf32>
    %458 = arith.subf %441, %457 : vector<32x32xf32>
    %cst_226 = arith.constant 9.99999974E-6 : f32
    %459 = vector.broadcast %cst_226 : f32 to vector<32x1xf32>
    %460 = arith.addf %456, %459 : vector<32x1xf32>
    %461 = math.rsqrt %460 : vector<32x1xf32>
    %462 = vector.broadcast %461 : vector<32x1xf32> to vector<32x32xf32>
    %463 = arith.mulf %458, %462 : vector<32x32xf32>
    %464 = vector.broadcast %443 : vector<1x32xf32> to vector<32x32xf32>
    %465 = arith.mulf %463, %464 : vector<32x32xf32>
    %466 = vector.broadcast %445 : vector<1x32xf32> to vector<32x32xf32>
    %467 = arith.addf %465, %466 : vector<32x32xf32>
    %c1_227 = arith.constant 1 : index
    %c0_228 = arith.constant 0 : index
    %c0_229 = arith.constant 0 : index
    %468 = vector.load %arg20[%c1_227, %c0_228, %c0_229] : memref<2x32x64xf32, #tpu.memory_space<vmem>>, vector<1x32x64xf32>
    %469 = vector.shape_cast %468 : vector<1x32x64xf32> to vector<32x64xf32>
    %cst_230 = arith.constant dense<0.000000e+00> : vector<32x64xf32>
    %470 = tpu.matmul %467, %469, %cst_230 {dimension_numbers = #tpu.dot_dimension_numbers<[1], [0], [0], [1], [0, 0, 1, 1], [], []>} : vector<32x32xf32>, vector<32x64xf32>, vector<32x64xf32> -> vector<32x64xf32>
    %c1_231 = arith.constant 1 : index
    %c0_232 = arith.constant 0 : index
    %c0_233 = arith.constant 0 : index
    %471 = vector.load %arg21[%c1_231, %c0_232, %c0_233] : memref<2x1x64xf32, #tpu.memory_space<vmem>>, vector<1x1x64xf32>
    %472 = vector.shape_cast %471 : vector<1x1x64xf32> to vector<1x64xf32>
    %473 = vector.broadcast %472 : vector<1x64xf32> to vector<32x64xf32>
    %474 = arith.addf %470, %473 : vector<32x64xf32>
    %cst_234 = arith.constant 0.000000e+00 : f32
    %475 = vector.broadcast %cst_234 : f32 to vector<32x64xf32>
    %476 = arith.maximumf %474, %475 : vector<32x64xf32>
    %c1_235 = arith.constant 1 : index
    %c0_236 = arith.constant 0 : index
    %c0_237 = arith.constant 0 : index
    %477 = vector.load %arg22[%c1_235, %c0_236, %c0_237] : memref<2x64x32xf32, #tpu.memory_space<vmem>>, vector<1x64x32xf32>
    %478 = vector.shape_cast %477 : vector<1x64x32xf32> to vector<64x32xf32>
    %cst_238 = arith.constant dense<0.000000e+00> : vector<32x32xf32>
    %479 = tpu.matmul %476, %478, %cst_238 {dimension_numbers = #tpu.dot_dimension_numbers<[1], [0], [0], [1], [0, 0, 1, 1], [], []>} : vector<32x64xf32>, vector<64x32xf32>, vector<32x32xf32> -> vector<32x32xf32>
    %c1_239 = arith.constant 1 : index
    %c0_240 = arith.constant 0 : index
    %c0_241 = arith.constant 0 : index
    %480 = vector.load %arg23[%c1_239, %c0_240, %c0_241] : memref<2x1x32xf32, #tpu.memory_space<vmem>>, vector<1x1x32xf32>
    %481 = vector.shape_cast %480 : vector<1x1x32xf32> to vector<1x32xf32>
    %482 = vector.broadcast %481 : vector<1x32xf32> to vector<32x32xf32>
    %483 = arith.addf %479, %482 : vector<32x32xf32>
    %484 = arith.addf %467, %483 : vector<32x32xf32>
    %c1_242 = arith.constant 1 : index
    %c0_243 = arith.constant 0 : index
    %c0_244 = arith.constant 0 : index
    %485 = vector.load %arg24[%c1_242, %c0_243, %c0_244] : memref<2x1x32xf32, #tpu.memory_space<vmem>>, vector<1x1x32xf32>
    %486 = vector.shape_cast %485 : vector<1x1x32xf32> to vector<1x32xf32>
    %c1_245 = arith.constant 1 : index
    %c0_246 = arith.constant 0 : index
    %c0_247 = arith.constant 0 : index
    %487 = vector.load %arg25[%c1_245, %c0_246, %c0_247] : memref<2x1x32xf32, #tpu.memory_space<vmem>>, vector<1x1x32xf32>
    %488 = vector.shape_cast %487 : vector<1x1x32xf32> to vector<1x32xf32>
    %cst_248 = arith.constant dense<0.000000e+00> : vector<32xf32>
    %489 = vector.multi_reduction <add>, %484, %cst_248 [1] : vector<32x32xf32> to vector<32xf32>
    %490 = vector.shape_cast %489 : vector<32xf32> to vector<32x1xf32>
    %cst_249 = arith.constant 3.200000e+01 : f32
    %491 = vector.broadcast %cst_249 : f32 to vector<32x1xf32>
    %492 = arith.divf %490, %491 : vector<32x1xf32>
    %493 = vector.broadcast %492 : vector<32x1xf32> to vector<32x32xf32>
    %494 = arith.subf %484, %493 : vector<32x32xf32>
    %495 = arith.mulf %494, %494 : vector<32x32xf32>
    %cst_250 = arith.constant dense<0.000000e+00> : vector<32xf32>
    %496 = vector.multi_reduction <add>, %495, %cst_250 [1] : vector<32x32xf32> to vector<32xf32>
    %497 = vector.shape_cast %496 : vector<32xf32> to vector<32x1xf32>
    %cst_251 = arith.constant 3.200000e+01 : f32
    %498 = vector.broadcast %cst_251 : f32 to vector<32x1xf32>
    %499 = arith.divf %497, %498 : vector<32x1xf32>
    %500 = vector.broadcast %492 : vector<32x1xf32> to vector<32x32xf32>
    %501 = arith.subf %484, %500 : vector<32x32xf32>
    %cst_252 = arith.constant 9.99999974E-6 : f32
    %502 = vector.broadcast %cst_252 : f32 to vector<32x1xf32>
    %503 = arith.addf %499, %502 : vector<32x1xf32>
    %504 = math.rsqrt %503 : vector<32x1xf32>
    %505 = vector.broadcast %504 : vector<32x1xf32> to vector<32x32xf32>
    %506 = arith.mulf %501, %505 : vector<32x32xf32>
    %507 = vector.broadcast %486 : vector<1x32xf32> to vector<32x32xf32>
    %508 = arith.mulf %506, %507 : vector<32x32xf32>
    %509 = vector.broadcast %488 : vector<1x32xf32> to vector<32x32xf32>
    %510 = arith.addf %508, %509 : vector<32x32xf32>
    %c0_253 = arith.constant 0 : index
    %c0_254 = arith.constant 0 : index
    %511 = vector.load %arg26[%c0_253, %c0_254] : memref<32x12xf32, #tpu.memory_space<vmem>>, vector<32x12xf32>
    %cst_255 = arith.constant dense<0.000000e+00> : vector<32x12xf32>
    %512 = tpu.matmul %510, %511, %cst_255 {dimension_numbers = #tpu.dot_dimension_numbers<[1], [0], [0], [1], [0, 0, 1, 1], [], []>} : vector<32x32xf32>, vector<32x12xf32>, vector<32x12xf32> -> vector<32x12xf32>
    %c0_256 = arith.constant 0 : index
    %c0_257 = arith.constant 0 : index
    %513 = vector.load %arg27[%c0_256, %c0_257] : memref<1x12xf32, #tpu.memory_space<vmem>>, vector<1x12xf32>
    %514 = vector.broadcast %513 : vector<1x12xf32> to vector<32x12xf32>
    %515 = arith.addf %512, %514 : vector<32x12xf32>
    %516 = vector.broadcast %182 : vector<32x1xf32> to vector<32x12xf32>
    %517 = arith.mulf %515, %516 : vector<32x12xf32>
    %c0_258 = arith.constant 0 : index
    %c0_259 = arith.constant 0 : index
    %518 = vector.load %arg28[%c0_258, %c0_259] : memref<32x12xf32, #tpu.memory_space<vmem>>, vector<32x12xf32>
    %cst_260 = arith.constant dense<0.000000e+00> : vector<32x12xf32>
    %519 = tpu.matmul %510, %518, %cst_260 {dimension_numbers = #tpu.dot_dimension_numbers<[1], [0], [0], [1], [0, 0, 1, 1], [], []>} : vector<32x32xf32>, vector<32x12xf32>, vector<32x12xf32> -> vector<32x12xf32>
    %c0_261 = arith.constant 0 : index
    %c0_262 = arith.constant 0 : index
    %520 = vector.load %arg29[%c0_261, %c0_262] : memref<1x12xf32, #tpu.memory_space<vmem>>, vector<1x12xf32>
    %521 = vector.broadcast %520 : vector<1x12xf32> to vector<32x12xf32>
    %522 = arith.addf %519, %521 : vector<32x12xf32>
    %523 = vector.broadcast %182 : vector<32x1xf32> to vector<32x12xf32>
    %524 = arith.mulf %522, %523 : vector<32x12xf32>
    %525 = vector.extract_strided_slice %517 {offsets = [0, 0], sizes = [8, 12], strides = [1, 1]} : vector<32x12xf32> to vector<8x12xf32>
    %c0_263 = arith.constant 0 : index
    %c0_264 = arith.constant 0 : index
    %526 = vector.load %arg30[%c0_263, %c0_264] : memref<16x12xf32, #tpu.memory_space<vmem>>, vector<8x12xf32>
    tpu.vector_store %arg30[%c0_263, %c0_264], %525 {strides = array<i32>} : memref<16x12xf32, #tpu.memory_space<vmem>>, vector<8x12xf32>,
    %527 = vector.extract_strided_slice %524 {offsets = [8, 0], sizes = [8, 12], strides = [1, 1]} : vector<32x12xf32> to vector<8x12xf32>
    %c0_265 = arith.constant 0 : index
    %c0_266 = arith.constant 0 : index
    %528 = vector.load %arg31[%c0_265, %c0_266] : memref<16x12xf32, #tpu.memory_space<vmem>>, vector<8x12xf32>
    tpu.vector_store %arg31[%c0_265, %c0_266], %527 {strides = array<i32>} : memref<16x12xf32, #tpu.memory_space<vmem>>, vector<8x12xf32>,
    %529 = vector.extract_strided_slice %517 {offsets = [16, 0], sizes = [8, 12], strides = [1, 1]} : vector<32x12xf32> to vector<8x12xf32>
    %c8_267 = arith.constant 8 : index
    %c0_268 = arith.constant 0 : index
    %530 = vector.load %arg30[%c8_267, %c0_268] : memref<16x12xf32, #tpu.memory_space<vmem>>, vector<8x12xf32>
    tpu.vector_store %arg30[%c8_267, %c0_268], %529 {strides = array<i32>} : memref<16x12xf32, #tpu.memory_space<vmem>>, vector<8x12xf32>,
    %531 = vector.extract_strided_slice %524 {offsets = [24, 0], sizes = [8, 12], strides = [1, 1]} : vector<32x12xf32> to vector<8x12xf32>
    %c8_269 = arith.constant 8 : index
    %c0_270 = arith.constant 0 : index
    %532 = vector.load %arg31[%c8_269, %c0_270] : memref<16x12xf32, #tpu.memory_space<vmem>>, vector<8x12xf32>
    tpu.vector_store %arg31[%c8_269, %c0_270], %531 {strides = array<i32>} : memref<16x12xf32, #tpu.memory_space<vmem>>, vector<8x12xf32>,
    return
  }
}

</mosaic_0001>

<bundles_post_ra>
// kernel: eq.8
= control target key start
LH: loop header
LB: loop body
LE: loop exit
PB: predicated region body
PF: predicated region fallthrough
CT: control target
= control target key end

     0   :  { %vm8_vm0 = vcmask 130048   ;;  %vm14_vm1 = vcmask 261248   ;;  %s42_s0 = inlined_call_operand.vmem [shape: s32[2,16], index: 0, kind: input, shape index: {}]   ;;  %s43_s1 = inlined_call_operand.vmem [shape: s32[32], index: 1, kind: output, shape index: {}]  }
   0x1   :  { %v5_v0 = vld [vmem:[%s42_s0] sm:$0x3]  ;;  %s25_s0 = smov 16  }
   0x2   :  { %6 = vst [vmem:[#allocation1] sm:$0x3] %v5_v0 }
   0x9   :  { %v11_v1 = vld [vmem:[#allocation1 + $0x1] sm:$0x1]   ;;  %v7_v2 = vld [vmem:[#allocation1] sm:$0x1]  }
   0xa   :  { %12 = vrot.lane.b32.xlu0 %v11_v1, %s25_s0  ;;  %9 = vst.msk [vmem:[#allocation0] sm:$0x1] %vm8_vm0, %v7_v2  }
  0x7c   :  { %v13_v3 = vpop.permute.xlu0 %12  }
  0x7d   :  { %15 = vst.msk [vmem:[#allocation0] sm:$0x1] %vm14_vm1, %v13_v3  }
  0x84   :  { %v20_v4 = vld [vmem:[#allocation0] sm:$0x1] }
  0x85   :  { %23 = vst [vmem:[%s43_s1] sm:$0x1] %v20_v4 }

// kernel: hand_refiner_forward.1
= control target key start
LH: loop header
LB: loop body
LE: loop exit
PB: predicated region body
PF: predicated region fallthrough
CT: control target
= control target key end

     0   :  { %s9232_s6 = smov 1   ;;  %s9233_s10 = smov 2   ;;  %s12405_s0 = inlined_call_operand.smem [shape: u32[32], index: -1, kind: input, shape index: {}] }
   0x1   :  { %s9291_s5 = sld [smem:[%s12405_s0]]   ;;  %s9234_s14 = smov 3  }
   0x2   :  { %s9296_s9 = sld [smem:[%s12405_s0 + %s9232_s6]]   ;;  %s9235_s18 = smov 4  }
   0x3   :  { %s9301_s13 = sld [smem:[%s12405_s0 + %s9233_s10]]   ;;  %s9236_s22 = smov 5  }
   0x4   :  { %s9306_s17 = sld [smem:[%s12405_s0 + %s9234_s14]]   ;;  %s9237_s26 = smov 6  }
   0x5   :  { %s9311_s21 = sld [smem:[%s12405_s0 + %s9235_s18]]   ;;  %s9238_s30 = smov 7  }
   0x6   :  { %s9316_s25 = sld [smem:[%s12405_s0 + %s9236_s22]]   ;;  %s9239_s4 = smov 8  }
   0x7   :  { %s9321_s29 = sld [smem:[%s12405_s0 + %s9237_s26]]   ;;  %s9240_s10 = smov 9  }
   0x8   :  { %s9326_s3 = sld [smem:[%s12405_s0 + %s9238_s30]]   ;;  %s9241_s15 = smov 10  }
   0x9   :  { %s9331_s8 = sld [smem:[%s12405_s0 + %s9239_s4]]   ;;  %s9242_s20 = smov 11  }
   0xa   :  { %s9336_s14 = sld [smem:[%s12405_s0 + %s9240_s10]]   ;;  %s9243_s26 = smov 12  }
   0xb   :  { %s9341_s19 = sld [smem:[%s12405_s0 + %s9241_s15]]   ;;  %s9244_s1 = smov 13  }
   0xc   :  { %s9346_s24 = sld [smem:[%s12405_s0 + %s9242_s20]]   ;;  %s9245_s7 = smov 14  }
   0xd   :  { %s9351_s30 = sld [smem:[%s12405_s0 + %s9243_s26]]   ;;  %s9246_s15 = smov 15  }
   0xe   :  { %12534 = sst [smem:[#allocation10_spill]] %s9326_s3  ;;  %s9247_s22 = smov 16  }
   0xf   :  { %s9356_s6 = sld [smem:[%s12405_s0 + %s9244_s1]]   ;;  %s9248_s28 = smov 17  }
  0x10   :  { %s9361_s12 = sld [smem:[%s12405_s0 + %s9245_s7]]   ;;  %s9249_s7 = smov 18  }
  0x11   :  { %s9366_s20 = sld [smem:[%s12405_s0 + %s9246_s15]]   ;;  %s9250_s15 = smov 19  }
  0x12   :  { %s9371_s27 = sld [smem:[%s12405_s0 + %s9247_s22]]   ;;  %s9251_s22 = smov 20  }
  0x13   :  { %s9376_s4 = sld [smem:[%s12405_s0 + %s9248_s28]]   ;;  %s9252_s28 = smov 21  }
  0x14   :  { %s9381_s3 = sld [smem:[%s12405_s0 + %s9249_s7]]   ;;  %s9253_s7 = smov 22  }
  0x17   :  { %12535 = sst [smem:[#allocation11_spill]] %s9366_s20 }
  0x18   :  { %12536 = sst [smem:[#allocation12_spill]] %s9371_s27 }
  0x19   :  { %12537 = sst [smem:[#allocation13_spill]] %s9376_s4 }
  0x1a   :  { %12538 = sst [smem:[#allocation14_spill]] %s9381_s3 }
  0x1b   :  { %s9386_s20 = sld [smem:[%s12405_s0 + %s9250_s15]]   ;;  %s9254_s15 = smov 23  }
  0x1c   :  { %s9391_s27 = sld [smem:[%s12405_s0 + %s9251_s22]]   ;;  %s9255_s22 = smov 24  }
  0x1d   :  { %s9396_s4 = sld [smem:[%s12405_s0 + %s9252_s28]]   ;;  %s9256_s28 = smov 25  }
  0x1e   :  { %s9401_s3 = sld [smem:[%s12405_s0 + %s9253_s7]]   ;;  %s9257_s7 = smov 26  }
  0x21   :  { %12539 = sst [smem:[#allocation15_spill]] %s9386_s20 }
  0x22   :  { %12540 = sst [smem:[#allocation16_spill]] %s9391_s27 }
  0x23   :  { %12541 = sst [smem:[#allocation17_spill]] %s9396_s4 }
  0x24   :  { %12542 = sst [smem:[#allocation18_spill]] %s9401_s3 }
  0x25   :  { %s9406_s20 = sld [smem:[%s12405_s0 + %s9254_s15]]   ;;  %s9258_s15 = smov 27  }
  0x26   :  { %s9411_s27 = sld [smem:[%s12405_s0 + %s9255_s22]]   ;;  %s9259_s22 = smov 28  }
  0x27   :  { %s9416_s4 = sld [smem:[%s12405_s0 + %s9256_s28]]   ;;  %s9260_s28 = smov 29  }
  0x28   :  { %s9421_s3 = sld [smem:[%s12405_s0 + %s9257_s7]]   ;;  %s9261_s7 = smov 30  }
  0x2b   :  { %12543 = sst [smem:[#allocation19_spill]] %s9406_s20 }
  0x2c   :  { %12544 = sst [smem:[#allocation20_spill]] %s9411_s27 }
  0x2d   :  { %12545 = sst [smem:[#allocation21_spill]] %s9416_s4 }
  0x2e   :  { %12546 = sst [smem:[#allocation22_spill]] %s9421_s3 }
  0x2f   :  { %s9426_s20 = sld [smem:[%s12405_s0 + %s9258_s15]]   ;;  %s9262_s15 = smov 31  }
  0x30   :  { %s9431_s27 = sld [smem:[%s12405_s0 + %s9259_s22]]  }
  0x31   :  { %s9436_s4 = sld [smem:[%s12405_s0 + %s9260_s28]]  }
  0x32   :  { %s9441_s3 = sld [smem:[%s12405_s0 + %s9261_s7]]  }
  0x35   :  { %12547 = sst [smem:[#allocation23_spill]] %s9426_s20 }
  0x36   :  { %s9446_s20 = sld [smem:[%s12405_s0 + %s9262_s15]]  }
  0x37   :  { %69 = vsyncpa [#allocation5], 0  ;;  %v12419_v0 = vlaneseq  ;;  %v9452_v2 = vld [vmem:[%s9301_s13 + $0x10] sm:$0xff]  ;;  %v9455_v3 = vld [vmem:[%s9301_s13] sm:$0xff] }
  0x39   :  { %v9449_v1 = vshrl.u32 %v12419_v0, 7 }
  0x3b   :  { %12548 = vst [vmem:[#allocation24_spill] sm:$0xff] %v9449_v1  ;;  %v9458_v4 = vsub.s32 0, %v9449_v1  ;;  %v9461_v5 = vsub.s32 1, %v9449_v1 }
  0x3c   :  { %70 = vsyncpa [#allocation7], 0  ;;  %v9472_v10 = vsub.s32 2, %v9449_v1  ;;  %v9475_v11 = vld [vmem:[%s9301_s13 + $0x8] sm:$0xff]  ;;  %v9486_v16 = vld [vmem:[%s9301_s13 + $0x18] sm:$0xff]  ;;  %v9493_v19 = vsub.s32 3, %v9449_v1 }
  0x3d   :  { %v474_v6 = vrot.slane %v9452_v2, %v9458_v4  ;;  %v150_v7 = vrot.slane %v9455_v3, %v9458_v4  ;;  %v481_v8 = vrot.slane %v9452_v2, %v9461_v5  ;;  %v157_v9 = vrot.slane %v9455_v3, %v9461_v5  ;;  %v9504_v24 = vld [vmem:[%s9301_s13 + $0x20] sm:$0xff]  ;;  %v7998_v32 = vld [vmem:[%s9301_s13 + $0x28] sm:$0xff]  ;;  %s12803_s0 = sld [smem:[#allocation11_spill]]  ;;  %s9278_s22 = smov 16  }
  0x3e   :  { %v206_v12 = vrot.slane %v9475_v11, %v9458_v4  ;;  %v164_v13 = vrot.slane %v9455_v3, %v9472_v10  ;;  %v488_v14 = vrot.slane %v9452_v2, %v9472_v10  ;;  %v213_v15 = vrot.slane %v9475_v11, %v9461_v5  ;;  %s12805_s23 = sld [smem:[#allocation12_spill]]  ;;  %s9279_s26 = smov 24  }
  0x3f   :  { %476 = vbcast.lane.b32.xlu1 %v474_v6, 256  ;;  %152 = vbcast.lane.b32.xlu0 %v150_v7, 256  ;;  %v537_v17 = vrot.slane %v9486_v16, %v9461_v5  ;;  %v530_v18 = vrot.slane %v9486_v16, %v9458_v4  ;;  %v220_v20 = vrot.slane %v9475_v11, %v9472_v10  ;;  %v9511_v27 = vsub.s32 4, %v9449_v1  ;;  %v9587_v7 = vld [vmem:[%s9306_s17 + $0x10] sm:$0xff]  ;;  %s12806_s28 = sld [smem:[#allocation13_spill]] }
  0x40   :  { %v171_v21 = vrot.slane %v9455_v3, %v9493_v19  ;;  %v544_v22 = vrot.slane %v9486_v16, %v9472_v10  ;;  %v495_v23 = vrot.slane %v9452_v2, %v9493_v19  ;;  %v821_v25 = vrot.slane %v9504_v24, %v9461_v5  ;;  %s12807_s1 = sld [smem:[#allocation16_spill]] }
  0x41   :  { %v814_v26 = vrot.slane %v9504_v24, %v9458_v4  ;;  %v227_v28 = vrot.slane %v9475_v11, %v9493_v19  ;;  %v178_v29 = vrot.slane %v9455_v3, %v9511_v27  ;;  %v551_v30 = vrot.slane %v9486_v16, %v9493_v19  ;;  %s12808_s2 = sld [smem:[#allocation18_spill]] }
  0x42   :  { %v502_v31 = vrot.slane %v9452_v2, %v9511_v27  ;;  %v870_v33 = vrot.slane %v7998_v32, %v9458_v4  ;;  %v828_v34 = vrot.slane %v9504_v24, %v9472_v10  ;;  %v9526_v35 = vsub.s32 5, %v9449_v1  ;;  %s12809_s7 = sld [smem:[#allocation14_spill]] }
  0x43   :  { %483 = vbcast.lane.b32.xlu1 %v481_v8, 256  ;;  %159 = vbcast.lane.b32.xlu0 %v157_v9, 256  ;;  %v877_v37 = vrot.slane %v7998_v32, %v9461_v5  ;;  %v234_v39 = vrot.slane %v9475_v11, %v9511_v27  ;;  %v835_v40 = vrot.slane %v9504_v24, %v9493_v19  ;;  %v9540_v42 = vsub.s32 6, %v9449_v1  ;;  %s12810_s10 = sld [smem:[#allocation15_spill]] }
  0x44   :  { %v185_v36 = vrot.slane %v9455_v3, %v9526_v35  ;;  %v509_v38 = vrot.slane %v9452_v2, %v9526_v35  ;;  %v558_v41 = vrot.slane %v9486_v16, %v9511_v27  ;;  %v884_v44 = vrot.slane %v7998_v32, %v9472_v10  ;;  %s12811_s11 = sld [smem:[#allocation17_spill]] }
  0x45   :  { %v192_v43 = vrot.slane %v9455_v3, %v9540_v42  ;;  %v516_v45 = vrot.slane %v9452_v2, %v9540_v42  ;;  %v241_v46 = vrot.slane %v9475_v11, %v9526_v35  ;;  %v842_v47 = vrot.slane %v9504_v24, %v9511_v27  ;;  %s12812_s15 = sld [smem:[#allocation19_spill]] }
  0x46   :  { %v565_v48 = vrot.slane %v9486_v16, %v9526_v35  ;;  %v9554_v49 = vsub.s32 7, %v9449_v1  ;;  %v891_v51 = vrot.slane %v7998_v32, %v9493_v19  ;;  %v248_v53 = vrot.slane %v9475_v11, %v9540_v42  ;;  %s12813_s16 = sld [smem:[#allocation20_spill]] }
  0x47   :  { %208 = vbcast.lane.b32.xlu1 %v206_v12, 256  ;;  %166 = vbcast.lane.b32.xlu0 %v164_v13, 256  ;;  %v849_v54 = vrot.slane %v9504_v24, %v9526_v35  ;;  %v572_v55 = vrot.slane %v9486_v16, %v9540_v42  ;;  %v898_v57 = vrot.slane %v7998_v32, %v9511_v27  ;;  %vm1151_vm0 = vcmask 60416   ;;  %s12814_s18 = sld [smem:[#allocation21_spill]] }
  0x48   :  { %v199_v50 = vrot.slane %v9455_v3, %v9554_v49  ;;  %v523_v52 = vrot.slane %v9452_v2, %v9554_v49  ;;  %v255_v56 = vrot.slane %v9475_v11, %v9554_v49  ;;  %v856_v58 = vrot.slane %v9504_v24, %v9540_v42  ;;  %v9580_v2 = vld [vmem:[%s9306_s17] sm:$0xff]  ;;  %v9594_v11 = vld [vmem:[%s9306_s17 + $0x8] sm:$0xff] }
  0x49   :  { %v579_v59 = vrot.slane %v9486_v16, %v9554_v49  ;;  %v863_v60 = vrot.slane %v9504_v24, %v9554_v49  ;;  %v905_v61 = vrot.slane %v7998_v32, %v9526_v35  ;;  %v919_v62 = vrot.slane %v7998_v32, %v9554_v49  ;;  %v9605_v16 = vld [vmem:[%s9306_s17 + $0x18] sm:$0xff] }
  0x4a   :  { %v912_v63 = vrot.slane %v7998_v32, %v9540_v42  ;;  %v2418_v3 = vrot.slane %v9580_v2, %v9461_v5  ;;  %v2411_v6 = vrot.slane %v9580_v2, %v9458_v4  ;;  %v2562_v8 = vrot.slane %v9587_v7, %v9461_v5 }
  0x4b   :  { %490 = vbcast.lane.b32.xlu1 %v488_v14, 256  ;;  %215 = vbcast.lane.b32.xlu0 %v213_v15, 256  ;;  %v2555_v9 = vrot.slane %v9587_v7, %v9458_v4  ;;  %v2467_v12 = vrot.slane %v9594_v11, %v9458_v4  ;;  %v2425_v13 = vrot.slane %v9580_v2, %v9472_v10 }
  0x4c   :  { %v2569_v14 = vrot.slane %v9587_v7, %v9472_v10  ;;  %v2474_v15 = vrot.slane %v9594_v11, %v9461_v5  ;;  %v2625_v24 = vrot.slane %v9605_v16, %v9472_v10 }
  0x4f   :  { %539 = vbcast.lane.b32.xlu1 %v537_v17, 256  ;;  %532 = vbcast.lane.b32.xlu0 %v530_v18, 256  ;;  %v2618_v17 = vrot.slane %v9605_v16, %v9461_v5  ;;  %v2611_v18 = vrot.slane %v9605_v16, %v9458_v4 }
  0x53   :  { %222 = vbcast.lane.b32.xlu1 %v220_v20, 256  ;;  %173 = vbcast.lane.b32.xlu0 %v171_v21, 256  ;;  %v2481_v20 = vrot.slane %v9594_v11, %v9472_v10  ;;  %v2432_v21 = vrot.slane %v9580_v2, %v9493_v19 }
  0x57   :  { %546 = vbcast.lane.b32.xlu1 %v544_v22, 256  ;;  %497 = vbcast.lane.b32.xlu0 %v495_v23, 256 }
  0x5b   :  { %823 = vbcast.lane.b32.xlu1 %v821_v25, 256  ;;  %816 = vbcast.lane.b32.xlu0 %v814_v26, 256  ;;  %v2576_v25 = vrot.slane %v9587_v7, %v9493_v19  ;;  %v9624_v26 = vld [vmem:[%s9306_s17 + $0x20] sm:$0xff] }
  0x5f   :  { %229 = vbcast.lane.b32.xlu1 %v227_v28, 256  ;;  %180 = vbcast.lane.b32.xlu0 %v178_v29, 256 }
  0x63   :  { %553 = vbcast.lane.b32.xlu1 %v551_v30, 256  ;;  %504 = vbcast.lane.b32.xlu0 %v502_v31, 256  ;;  %v2722_v30 = vrot.slane %v9624_v26, %v9461_v5  ;;  %v2715_v31 = vrot.slane %v9624_v26, %v9458_v4 }
  0x67   :  { %872 = vbcast.lane.b32.xlu1 %v870_v33, 256  ;;  %830 = vbcast.lane.b32.xlu0 %v828_v34, 256  ;;  %v2488_v34 = vrot.slane %v9594_v11, %v9493_v19 }
  0x6b   :  { %187 = vbcast.lane.b32.xlu1 %v185_v36, 256  ;;  %879 = vbcast.lane.b32.xlu0 %v877_v37, 256  ;;  %v2439_v36 = vrot.slane %v9580_v2, %v9511_v27 }
  0x6f   :  { %511 = vbcast.lane.b32.xlu1 %v509_v38, 256  ;;  %236 = vbcast.lane.b32.xlu0 %v234_v39, 256  ;;  %v2632_v39 = vrot.slane %v9605_v16, %v9493_v19 }
  0x73   :  { %837 = vbcast.lane.b32.xlu1 %v835_v40, 256  ;;  %560 = vbcast.lane.b32.xlu0 %v558_v41, 256  ;;  %v2583_v40 = vrot.slane %v9587_v7, %v9511_v27  ;;  %v9651_v41 = vld [vmem:[%s9306_s17 + $0x28] sm:$0xff] }
  0x77   :  { %194 = vbcast.lane.b32.xlu1 %v192_v43, 256  ;;  %886 = vbcast.lane.b32.xlu0 %v884_v44, 256 }
  0x7b   :  { %518 = vbcast.lane.b32.xlu1 %v516_v45, 256  ;;  %243 = vbcast.lane.b32.xlu0 %v241_v46, 256  ;;  %v2771_v45 = vrot.slane %v9651_v41, %v9458_v4  ;;  %v2729_v46 = vrot.slane %v9624_v26, %v9472_v10 }
  0x7f   :  { %844 = vbcast.lane.b32.xlu1 %v842_v47, 256  ;;  %567 = vbcast.lane.b32.xlu0 %v565_v48, 256 }
  0x83   :  { %201 = vbcast.lane.b32.xlu1 %v199_v50, 256  ;;  %893 = vbcast.lane.b32.xlu0 %v891_v51, 256  ;;  %v2446_v50 = vrot.slane %v9580_v2, %v9526_v35  ;;  %v2778_v51 = vrot.slane %v9651_v41, %v9461_v5  ;;  %v2736_v5 = vrot.slane %v9624_v26, %v9493_v19 }
  0x87   :  { %525 = vbcast.lane.b32.xlu1 %v523_v52, 256  ;;  %250 = vbcast.lane.b32.xlu0 %v248_v53, 256 }
  0x8b   :  { %851 = vbcast.lane.b32.xlu1 %v849_v54, 256  ;;  %574 = vbcast.lane.b32.xlu0 %v572_v55, 256  ;;  %v2590_v54 = vrot.slane %v9587_v7, %v9526_v35  ;;  %v2495_v55 = vrot.slane %v9594_v11, %v9511_v27 }
  0x8f   :  { %257 = vbcast.lane.b32.xlu1 %v255_v56, 256  ;;  %900 = vbcast.lane.b32.xlu0 %v898_v57, 256 }
  0x93   :  { %858 = vbcast.lane.b32.xlu1 %v856_v58, 256  ;;  %581 = vbcast.lane.b32.xlu0 %v579_v59, 256  ;;  %v2639_v58 = vrot.slane %v9605_v16, %v9511_v27 }
  0x97   :  { %865 = vbcast.lane.b32.xlu1 %v863_v60, 256  ;;  %907 = vbcast.lane.b32.xlu0 %v905_v61, 256  ;;  %v2453_v61 = vrot.slane %v9580_v2, %v9540_v42 }
  0x9b   :  { %921 = vbcast.lane.b32.xlu1 %v919_v62, 256  ;;  %914 = vbcast.lane.b32.xlu0 %v912_v63, 256  ;;  %v2785_v62 = vrot.slane %v9651_v41, %v9472_v10  ;;  %v2743_v10 = vrot.slane %v9624_v26, %v9511_v27 }
  0x9f   :  { %2420 = vbcast.lane.b32.xlu1 %v2418_v3, 256  ;;  %2413 = vbcast.lane.b32.xlu0 %v2411_v6, 256  ;;  %v2597_v6 = vrot.slane %v9587_v7, %v9540_v42 }
  0xa3   :  { %2564 = vbcast.lane.b32.xlu1 %v2562_v8, 256  ;;  %2557 = vbcast.lane.b32.xlu0 %v2555_v9, 256  ;;  %v2502_v8 = vrot.slane %v9594_v11, %v9526_v35 }
  0xa7   :  { %2469 = vbcast.lane.b32.xlu1 %v2467_v12, 256  ;;  %2427 = vbcast.lane.b32.xlu0 %v2425_v13, 256  ;;  %v9263_v13 = vmov 1966171168  }
  0xab   :  { %2571 = vbcast.lane.b32.xlu1 %v2569_v14, 256  ;;  %2476 = vbcast.lane.b32.xlu0 %v2474_v15, 256  ;;  %v263_v14 = vunpack.c.l.s4 %v9263_v13  ;;  %v2646_v15 = vrot.slane %v9605_v16, %v9526_v35  ;;  %v2799_v13 = vrot.slane %v9651_v41, %v9511_v27  ;;  %v9776_v27 = vld [vmem:[%s9311_s21 + $0x20] sm:$0xff] }
  0xaf   :  { %2620 = vbcast.lane.b32.xlu1 %v2618_v17, 256  ;;  %2613 = vbcast.lane.b32.xlu0 %v2611_v18, 256 }
  0xb1   :  { %v9615_v22 = vpop.permute.xlu1 %476  ;;  %v9617_v23 = vpop.permute.xlu0 %152 }
  0xb3   :  { %2483 = vbcast.lane.b32.xlu1 %v2481_v20, 256  ;;  %2434 = vbcast.lane.b32.xlu0 %v2432_v21, 256  ;;  %v264_v20 = vunpack.c.0.s8 %v263_v14  ;;  %v2460_v21 = vrot.slane %v9580_v2, %v9554_v49  ;;  %v9732_v2 = vld [vmem:[%s9311_s21] sm:$0xff] }
  0xb5   :  { %v9626_v28 = vpop.permute.xlu1 %483  ;;  %v9628_v29 = vpop.permute.xlu0 %159 }
  0xb7   :  { %2627 = vbcast.lane.b32.xlu1 %v2625_v24, 256  ;;  %2578 = vbcast.lane.b32.xlu0 %v2576_v25, 256  ;;  %v2792_v24 = vrot.slane %v9651_v41, %v9493_v19 }
  0xb9   :  { %v9634_v32 = vpop.permute.xlu1 %208  ;;  %v9636_v33 = vpop.permute.xlu0 %166 }
  0xbb   :  { %2724 = vbcast.lane.b32.xlu1 %v2722_v30, 256  ;;  %2717 = vbcast.lane.b32.xlu0 %v2715_v31, 256  ;;  %v9722_v31 = vsub.s32 %v264_v20, %v9449_v1 }
  0xbd   :  { %v9642_v37 = vpop.permute.xlu1 %490  ;;  %v9644_v38 = vpop.permute.xlu0 %215 }
  0xbf   :  { %2490 = vbcast.lane.b32.xlu1 %v2488_v34, 256  ;;  %2441 = vbcast.lane.b32.xlu0 %v2439_v36, 256  ;;  %v2604_v34 = vrot.slane %v9587_v7, %v9554_v49  ;;  %v2509_v36 = vrot.slane %v9594_v11, %v9540_v42  ;;  %v2750_v7 = vrot.slane %v9624_v26, %v9526_v35 }
  0xc1   :  { %v9653_v43 = vpop.permute.xlu1 %539  ;;  %v9655_v44 = vpop.permute.xlu0 %532 }
  0xc3   :  { %2634 = vbcast.lane.b32.xlu1 %v2632_v39, 256  ;;  %2585 = vbcast.lane.b32.xlu0 %v2583_v40, 256  ;;  %v9729_v39 = vld [vmem:[%s9311_s21 + $0x10] sm:$0xff] }
  0xc5   :  { %v9661_v47 = vpop.permute.xlu1 %222  ;;  %v9663_v48 = vpop.permute.xlu0 %173 }
  0xc7   :  { %2773 = vbcast.lane.b32.xlu1 %v2771_v45, 256  ;;  %2731 = vbcast.lane.b32.xlu0 %v2729_v46, 256  ;;  %v9739_v45 = vld [vmem:[%s9311_s21 + $0x8] sm:$0xff]  ;;  %v9742_v46 = vld [vmem:[%s9311_s21 + $0x18] sm:$0xff] }
  0xc9   :  { %v9669_v52 = vpop.permute.xlu1 %546  ;;  %v9671_v53 = vpop.permute.xlu0 %497 }
  0xcb   :  { %2448 = vbcast.lane.b32.xlu1 %v2446_v50, 256  ;;  %2780 = vbcast.lane.b32.xlu0 %v2778_v51, 256  ;;  %v592_v50 = vrot.slane %v9729_v39, %v9722_v31  ;;  %v2653_v51 = vrot.slane %v9605_v16, %v9540_v42 }
  0xcd   :  { %v9677_v56 = vpop.permute.xlu1 %823  ;;  %v9679_v57 = vpop.permute.xlu0 %816  ;;  %v608_v14 = vrot.slane %v592_v50, %v9722_v31 }
  0xcf   :  { %2592 = vbcast.lane.b32.xlu1 %v2590_v54, 256  ;;  %2497 = vbcast.lane.b32.xlu0 %v2495_v55, 256  ;;  %v268_v54 = vrot.slane %v9732_v2, %v9722_v31  ;;  %v600_v55 = vcombine.high %v592_v50, %v592_v50  ;;  %v2757_v50 = vrot.slane %v9624_v26, %v9540_v42 }
  0xd1   :  { %v9685_v59 = vpop.permute.xlu1 %229  ;;  %v9687_v60 = vpop.permute.xlu0 %180  ;;  %v9767_v20 = vrot.slane %v600_v55, %v9722_v31  ;;  %v9783_v55 = vrot.slane %v608_v14, %v9458_v4 }
  0xd2   :  { %12549 = vst [vmem:[#allocation25_spill] sm:$0xff] %v9685_v59  ;;  %12550 = vst [vmem:[#allocation26_spill] sm:$0xff] %v9687_v60 }
  0xd3   :  { %2738 = vbcast.lane.b32.xlu1 %v2736_v5, 256  ;;  %2641 = vbcast.lane.b32.xlu0 %v2639_v58, 256  ;;  %v317_v5 = vrot.slane %v9739_v45, %v9722_v31  ;;  %v641_v58 = vrot.slane %v9742_v46, %v9722_v31  ;;  %12562 = vst [vmem:[#allocation38_spill] sm:$0xff] %v9783_v55 }
  0xd5   :  { %v9693_v63 = vpop.permute.xlu1 %553  ;;  %v9695_v3 = vpop.permute.xlu0 %504  ;;  %v657_v0 = vrot.slane %v641_v58, %v9722_v31 }
  0xd6   :  { %12551 = vst [vmem:[#allocation27_spill] sm:$0xff] %v9693_v63  ;;  %12552 = vst [vmem:[#allocation28_spill] sm:$0xff] %v9695_v3 }
  0xd7   :  { %2455 = vbcast.lane.b32.xlu1 %v2453_v61, 256  ;;  %2787 = vbcast.lane.b32.xlu0 %v2785_v62, 256 }
  0xd9   :  { %v9701_v9 = vpop.permute.xlu1 %872  ;;  %v9703_v12 = vpop.permute.xlu0 %830 }
  0xdb   :  { %2599 = vbcast.lane.b32.xlu1 %v2597_v6, 256  ;;  %2504 = vbcast.lane.b32.xlu0 %v2502_v8, 256  ;;  %v276_v6 = vcombine.high %v268_v54, %v268_v54  ;;  %v2516_v8 = vrot.slane %v9594_v11, %v9554_v49 }
  0xdd   :  { %v9709_v17 = vpop.permute.xlu1 %187  ;;  %v9711_v18 = vpop.permute.xlu0 %879  ;;  %v298_v11 = vrot.slane %v276_v6, %v9722_v31 }
  0xde   :  { %12553 = vst [vmem:[#allocation29_spill] sm:$0xff] %v9709_v17 }
  0xdf   :  { %2745 = vbcast.lane.b32.xlu1 %v2743_v10, 256  ;;  %2648 = vbcast.lane.b32.xlu0 %v2646_v15, 256  ;;  %v284_v10 = vrot.slane %v268_v54, %v9722_v31  ;;  %v325_v15 = vcombine.high %v317_v5, %v317_v5  ;;  %v2660_v54 = vrot.slane %v9605_v16, %v9554_v49 }
  0xe1   :  { %v9717_v25 = vpop.permute.xlu1 %511  ;;  %v9719_v30 = vpop.permute.xlu0 %236  ;;  %v347_v6 = vrot.slane %v325_v15, %v9722_v31  ;;  %v932_v15 = vrot.slane %v9776_v27, %v9722_v31 }
  0xe2   :  { %12554 = vst [vmem:[#allocation30_spill] sm:$0xff] %v9717_v25  ;;  %12555 = vst [vmem:[#allocation31_spill] sm:$0xff] %v9719_v30  ;;  %v679_v30 = vcombine.high %v657_v0, %v657_v0 }
  0xe3   :  { %2462 = vbcast.lane.b32.xlu1 %v2460_v21, 256  ;;  %2794 = vbcast.lane.b32.xlu0 %v2792_v24, 256  ;;  %v333_v21 = vrot.slane %v317_v5, %v9722_v31  ;;  %v649_v24 = vcombine.high %v641_v58, %v641_v58  ;;  %v9786_v5 = vrot.slane %v284_v10, %v9458_v4 }
  0xe4   :  { %v357_v17 = vcombine.high %v347_v6, %v347_v6 }
  0xe5   :  { %v9734_v19 = vpop.permute.xlu1 %837  ;;  %v9736_v40 = vpop.permute.xlu0 %560  ;;  %12563 = vst [vmem:[#allocation39_spill] sm:$0xff] %v9786_v5  ;;  %v671_v1 = vrot.slane %v649_v24, %v9722_v31  ;;  %v355_v16 = vcombine.high %v333_v21, %v333_v21 }
  0xe6   :  { %12556 = vst [vmem:[#allocation32_spill] sm:$0xff] %v9734_v19  ;;  %12557 = vst [vmem:[#allocation33_spill] sm:$0xff] %v9736_v40 }
  0xe7   :  { %2606 = vbcast.lane.b32.xlu1 %v2604_v34, 256  ;;  %2511 = vbcast.lane.b32.xlu0 %v2509_v36, 256 }
  0xe9   :  { %v9756_v61 = vpop.permute.xlu1 %194  ;;  %v9758_v62 = vpop.permute.xlu0 %886 }
  0xea   :  { %12558 = vst [vmem:[#allocation34_spill] sm:$0xff] %v9756_v61  ;;  %12559 = vst [vmem:[#allocation35_spill] sm:$0xff] %v9758_v62  ;;  %v261_v61 = vcombine.high %v9732_v2, %v9732_v2  ;;  %v9826_v2 = vld [vmem:[%s9311_s21 + $0x28] sm:$0xff]  ;;  %s9269_s21 = smov 120  }
  0xeb   :  { %2752 = vbcast.lane.b32.xlu1 %v2750_v7, 256  ;;  %2655 = vbcast.lane.b32.xlu0 %v2653_v51, 256  ;;  %v306_v7 = vcombine.high %v284_v10, %v284_v10  ;;  %v630_v51 = vcombine.high %v608_v14, %v608_v14  ;;  %v9803_v10 = vrot.slane %v298_v11, %v9458_v4 }
  0xec   :  { %v275_v25 = vrot.slane %v261_v61, %v9722_v31  ;;  %v310_v61 = vcombine.high %v9739_v45, %v9739_v45  ;;  %v974_v3 = vcombine.high %v9826_v2, %v9826_v2 }
  0xed   :  { %v9770_v34 = vpop.permute.xlu1 %518  ;;  %v9772_v36 = vpop.permute.xlu0 %243  ;;  %12568 = vst [vmem:[#allocation44_spill] sm:$0xff] %v9803_v10  ;;  %v9806_v58 = vrot.slane %v306_v7, %v9458_v4  ;;  %v9813_v24 = vrot.slane %v630_v51, %v9458_v4  ;;  %v9820_v7 = vrot.slane %v347_v6, %v9458_v4  ;;  %v9829_v51 = vrot.slane %v671_v1, %v9458_v4 }
  0xee   :  { %12560 = vst [vmem:[#allocation36_spill] sm:$0xff] %v9770_v34  ;;  %12561 = vst [vmem:[#allocation37_spill] sm:$0xff] %v9772_v36  ;;  %v9823_v34 = vrot.slane %v657_v0, %v9458_v4  ;;  %v948_v0 = vrot.slane %v932_v15, %v9722_v31  ;;  %v681_v6 = vcombine.high %v671_v1, %v671_v1 }
  0xef   :  { %2518 = vbcast.lane.b32.xlu1 %v2516_v8, 256  ;;  %2801 = vbcast.lane.b32.xlu0 %v2799_v13, 256  ;;  %v9792_v8 = vrot.slane %v9767_v20, %v9458_v4  ;;  %v9795_v13 = vrot.slane %v333_v21, %v9458_v4  ;;  %12569 = vst [vmem:[#allocation45_spill] sm:$0xff] %v9806_v58  ;;  %12570 = vst [vmem:[#allocation46_spill] sm:$0xff] %v9813_v24 }
  0xf0   :  { %v2764_v21 = vrot.slane %v9624_v26, %v9554_v49  ;;  %12571 = vst [vmem:[#allocation47_spill] sm:$0xff] %v9820_v7  ;;  %12572 = vst [vmem:[#allocation48_spill] sm:$0xff] %v9823_v34  ;;  %v632_v26 = vcombine.high %v9767_v20, %v9767_v20  ;;  %v2820_v20 = vrot.slane %v9651_v41, %v9554_v49 }
  0xf1   :  { %12564 = vst [vmem:[#allocation40_spill] sm:$0xff] %v9792_v8  ;;  %12565 = vst [vmem:[#allocation41_spill] sm:$0xff] %v9795_v13  ;;  %v9798_v14 = vpop.permute.xlu1 %844  ;;  %v9800_v36 = vpop.permute.xlu0 %567  ;;  %v634_v49 = vcombine.high %v9742_v46, %v9742_v46  ;;  %v9870_v1 = vrot.slane %v357_v17, %v9458_v4  ;;  %v291_v45 = vrot.slane %v275_v25, %v9722_v31 }
  0xf2   :  { %12566 = vst [vmem:[#allocation42_spill] sm:$0xff] %v9798_v14  ;;  %12567 = vst [vmem:[#allocation43_spill] sm:$0xff] %v9800_v36  ;;  %v2806_v36 = vrot.slane %v9651_v41, %v9526_v35  ;;  %v308_v14 = vcombine.high %v298_v11, %v298_v11  ;;  %v585_v35 = vcombine.high %v9729_v39, %v9729_v39 }
  0xf3   :  { %2759 = vbcast.lane.b32.xlu1 %v2757_v50, 256  ;;  %2662 = vbcast.lane.b32.xlu0 %v2660_v54, 256  ;;  %12573 = vst [vmem:[#allocation49_spill] sm:$0xff] %v9829_v51  ;;  %v9832_v50 = vrot.slane %v355_v16, %v9458_v4  ;;  %v940_v11 = vcombine.high %v932_v15, %v932_v15  ;;  %12582 = vst [vmem:[#allocation58_spill] sm:$0xff] %v9870_v1 }
  0xf4   :  { %v981_v16 = vrot.slane %v9826_v2, %v9722_v31  ;;  %v2813_v39 = vrot.slane %v9651_v41, %v9540_v42  ;;  %v599_v15 = vrot.slane %v585_v35, %v9722_v31  ;;  %v9866_v41 = vrot.slane %v632_v26, %v9458_v4 }
  0xf5   :  { %12574 = vst [vmem:[#allocation50_spill] sm:$0xff] %v9832_v50  ;;  %v9838_v54 = vpop.permute.xlu1 %201  ;;  %v9840_v40 = vpop.permute.xlu0 %893  ;;  %v970_v26 = vcombine.high %v948_v0, %v948_v0  ;;  %v925_v17 = vcombine.high %v9776_v27, %v9776_v27 }
  0xf6   :  { %12575 = vst [vmem:[#allocation51_spill] sm:$0xff] %v9838_v54  ;;  %12576 = vst [vmem:[#allocation52_spill] sm:$0xff] %v9840_v40  ;;  %v9851_v54 = vrot.slane %v308_v14, %v9458_v4  ;;  %v9854_v40 = vrot.slane %v679_v30, %v9458_v4  ;;  %v962_v30 = vrot.slane %v940_v11, %v9722_v31 }
  0xf7   :  { %2766 = vbcast.lane.b32.xlu1 %v2764_v21, 256  ;;  %2808 = vbcast.lane.b32.xlu0 %v2806_v36, 256  ;;  %v277_v21 = vcombine.high %v275_v25, %v275_v25  ;;  %v989_v36 = vcombine.high %v981_v16, %v981_v16  ;;  %12581 = vst [vmem:[#allocation57_spill] sm:$0xff] %v9866_v41 }
  0xf8   :  { %12577 = vst [vmem:[#allocation53_spill] sm:$0xff] %v9851_v54  ;;  %12578 = vst [vmem:[#allocation54_spill] sm:$0xff] %v9854_v40  ;;  %v9874_v14 = vrot.slane %v948_v0, %v9458_v4  ;;  %v997_v35 = vrot.slane %v981_v16, %v9722_v31  ;;  %v601_v46 = vcombine.high %v599_v15, %v599_v15 }
  0xf9   :  { %v9861_v62 = vpop.permute.xlu1 %525  ;;  %v9863_v42 = vpop.permute.xlu0 %250  ;;  %v615_v11 = vrot.slane %v599_v15, %v9722_v31  ;;  %v305_v25 = vrot.slane %v277_v21, %v9722_v31  ;;  %v1011_v60 = vrot.slane %v989_v36, %v9722_v31  ;;  %v648_v16 = vrot.slane %v634_v49, %v9722_v31 }
  0xfa   :  { %12579 = vst [vmem:[#allocation55_spill] sm:$0xff] %v9861_v62  ;;  %12580 = vst [vmem:[#allocation56_spill] sm:$0xff] %v9863_v42  ;;  %v9878_v42 = vrot.slane %v681_v6, %v9458_v4  ;;  %v324_v62 = vrot.slane %v310_v61, %v9722_v31  ;;  %v9895_v0 = vrot.slane %v291_v45, %v9458_v4 }
  0xfb   :  { %12583 = vst [vmem:[#allocation59_spill] sm:$0xff] %v9874_v14  ;;  %2822 = vbcast.lane.b32.xlu1 %v2820_v20, 256  ;;  %2815 = vbcast.lane.b32.xlu0 %v2813_v39, 256  ;;  %v9892_v39 = vrot.slane %v962_v30, %v9458_v4  ;;  %v972_v6 = vcombine.high %v962_v30, %v962_v30 }
  0xfc   :  { %12584 = vst [vmem:[#allocation60_spill] sm:$0xff] %v9878_v42  ;;  %12588 = vst [vmem:[#allocation64_spill] sm:$0xff] %v9895_v0  ;;  %v326_v27 = vcombine.high %v324_v62, %v324_v62  ;;  %v9898_v61 = vrot.slane %v997_v35, %v9458_v4  ;;  %v629_v15 = vrot.slane %v601_v46, %v9722_v31 }
  0xfd   :  { %v9887_v19 = vpop.permute.xlu1 %851  ;;  %v9889_v20 = vpop.permute.xlu0 %574  ;;  %12587 = vst [vmem:[#allocation63_spill] sm:$0xff] %v9892_v39  ;;  %v307_v21 = vcombine.high %v291_v45, %v291_v45  ;;  %v650_v36 = vcombine.high %v648_v16, %v648_v16  ;;  %v9902_v49 = vrot.slane %v970_v26, %v9458_v4  ;;  %v9909_v30 = vrot.slane %v615_v11, %v9458_v4 }
  0xfe   :  { %12585 = vst [vmem:[#allocation61_spill] sm:$0xff] %v9887_v19  ;;  %12586 = vst [vmem:[#allocation62_spill] sm:$0xff] %v9889_v20  ;;  %v340_v20 = vrot.slane %v324_v62, %v9722_v31  ;;  %v939_v19 = vrot.slane %v925_v17, %v9722_v31  ;;  %v9912_v0 = vrot.slane %v305_v25, %v9458_v4 }
  0xff   :  { %12589 = vst [vmem:[#allocation65_spill] sm:$0xff] %v9898_v61  ;;  %12590 = vst [vmem:[#allocation66_spill] sm:$0xff] %v9902_v49  ;;  %v9915_v46 = vrot.slane %v1011_v60, %v9458_v4  ;;  %v1019_v45 = vcombine.high %v997_v35, %v997_v35  ;;  %v9922_v62 = vrot.slane %v972_v6, %v9458_v4 }
 0x100   :  { %12591 = vst [vmem:[#allocation67_spill] sm:$0xff] %v9909_v30  ;;  %12592 = vst [vmem:[#allocation68_spill] sm:$0xff] %v9912_v0  ;;  %v664_v17 = vrot.slane %v648_v16, %v9722_v31  ;;  %v631_v2 = vcombine.high %v615_v11, %v615_v11  ;;  %v354_v42 = vrot.slane %v326_v27, %v9722_v31 }
 0x101   :  { %12593 = vst [vmem:[#allocation69_spill] sm:$0xff] %v9915_v46  ;;  %v9917_v63 = vpop.permute.xlu1 %257  ;;  %v9919_v26 = vpop.permute.xlu0 %900  ;;  %12596 = vst [vmem:[#allocation72_spill] sm:$0xff] %v9922_v62  ;;  %v9927_v30 = vrot.slane %v629_v15, %v9458_v4  ;;  %v9930_v0 = vrot.slane %v307_v21, %v9458_v4  ;;  %v678_v35 = vrot.slane %v650_v36, %v9722_v31 }
 0x102   :  { %12594 = vst [vmem:[#allocation70_spill] sm:$0xff] %v9917_v63  ;;  %12595 = vst [vmem:[#allocation71_spill] sm:$0xff] %v9919_v26  ;;  %v941_v59 = vcombine.high %v939_v19, %v939_v19  ;;  %v9934_v63 = vrot.slane %v340_v20, %v9458_v4  ;;  %v955_v6 = vrot.slane %v939_v19, %v9722_v31 }
 0x103   :  { %12597 = vst [vmem:[#allocation73_spill] sm:$0xff] %v9927_v30  ;;  %12598 = vst [vmem:[#allocation74_spill] sm:$0xff] %v9930_v0  ;;  %v309_v26 = vcombine.high %v305_v25, %v305_v25  ;;  %v988_v16 = vrot.slane %v974_v3, %v9722_v31  ;;  %v9939_v11 = vrot.slane %v1019_v45, %v9458_v4 }
 0x104   :  { %12599 = vst [vmem:[#allocation75_spill] sm:$0xff] %v9934_v63  ;;  %v1021_v27 = vcombine.high %v1011_v60, %v1011_v60  ;;  %v633_v62 = vcombine.high %v629_v15, %v629_v15  ;;  %v356_v30 = vcombine.high %v340_v20, %v340_v20  ;;  %v9946_v36 = vrot.slane %v664_v17, %v9458_v4 }
 0x105   :  { %12600 = vst [vmem:[#allocation76_spill] sm:$0xff] %v9939_v11  ;;  %v9941_v1 = vpop.permute.xlu1 %858  ;;  %v9943_v21 = vpop.permute.xlu0 %581  ;;  %v9949_v0 = vrot.slane %v631_v2, %v9458_v4  ;;  %v9952_v19 = vrot.slane %v354_v42, %v9458_v4  ;;  %v990_v3 = vcombine.high %v988_v16, %v988_v16  ;;  %v9955_v25 = vrot.slane %v678_v35, %v9458_v4 }
 0x106   :  { %12601 = vst [vmem:[#allocation77_spill] sm:$0xff] %v9941_v1  ;;  %12602 = vst [vmem:[#allocation78_spill] sm:$0xff] %v9943_v21  ;;  %v969_v60 = vrot.slane %v941_v59, %v9722_v31  ;;  %v680_v20 = vcombine.high %v664_v17, %v664_v17  ;;  %v358_v15 = vcombine.high %v354_v42, %v354_v42 }
 0x107   :  { %12603 = vst [vmem:[#allocation79_spill] sm:$0xff] %v9946_v36  ;;  %12604 = vst [vmem:[#allocation80_spill] sm:$0xff] %v9949_v0  ;;  %v9959_v45 = vrot.slane %v955_v6, %v9458_v4  ;;  %v9962_v21 = vrot.slane %v309_v26, %v9458_v4  ;;  %v1004_v2 = vrot.slane %v988_v16, %v9722_v31 }
 0x108   :  { %12605 = vst [vmem:[#allocation81_spill] sm:$0xff] %v9952_v19  ;;  %12606 = vst [vmem:[#allocation82_spill] sm:$0xff] %v9955_v25  ;;  %v971_v1 = vcombine.high %v955_v6, %v955_v6  ;;  %v9966_v0 = vrot.slane %v1021_v27, %v9458_v4  ;;  %v9969_v19 = vrot.slane %v633_v62, %v9458_v4 }
 0x109   :  { %12607 = vst [vmem:[#allocation83_spill] sm:$0xff] %v9959_v45  ;;  %12608 = vst [vmem:[#allocation84_spill] sm:$0xff] %v9962_v21  ;;  %v9972_v25 = vrot.slane %v356_v30, %v9458_v4  ;;  %v682_v59 = vcombine.high %v678_v35, %v678_v35  ;;  %v9974_v42 = vpop.permute.xlu1 %865  ;;  %v9976_v17 = vpop.permute.xlu0 %907  ;;  %v763_v26 = vsub.f32 %v9615_v22, %v9783_v55 }
 0x10a   :  { %12609 = vst [vmem:[#allocation85_spill] sm:$0xff] %v9966_v0  ;;  %12610 = vst [vmem:[#allocation86_spill] sm:$0xff] %v9969_v19  ;;  %v439_v6 = vsub.f32 %v9617_v23, %v9786_v5  ;;  %v764_v16 = vsub.f32 %v9626_v28, %v9792_v8  ;;  %v1018_v62 = vrot.slane %v990_v3, %v9722_v31 }
 0x10b   :  { %12611 = vst [vmem:[#allocation87_spill] sm:$0xff] %v9972_v25  ;;  %12612 = vst [vmem:[#allocation88_spill] sm:$0xff] %v9974_v42  ;;  %v440_v30 = vsub.f32 %v9628_v29, %v9803_v10  ;;  %v9988_v35 = vrot.slane %v969_v60, %v9458_v4  ;;  %v9991_v27 = vrot.slane %v680_v20, %v9458_v4 }
 0x10c   :  { %v9994_v42 = vrot.slane %v358_v15, %v9458_v4  ;;  %v9997_v22 = vrot.slane %v1004_v2, %v9458_v4  ;;  %v10000_v23 = vrot.slane %v971_v1, %v9458_v4  ;;  %v973_v28 = vcombine.high %v969_v60, %v969_v60 }
 0x10d   :  { %12613 = vst [vmem:[#allocation89_spill] sm:$0xff] %v9988_v35  ;;  %12614 = vst [vmem:[#allocation90_spill] sm:$0xff] %v9991_v27  ;;  %v1022_v31 = vcombine.high %v1018_v62, %v1018_v62  ;;  %v765_v29 = vsub.f32 %v9642_v37, %v9813_v24  ;;  %v1103_v3 = vsub.f32 %v9679_v57, %v9874_v14  ;;  %v10009_v10 = vpop.permute.xlu1 %921  ;;  %v10011_v15 = vpop.permute.xlu0 %914 }
 0x10e   :  { %12615 = vst [vmem:[#allocation91_spill] sm:$0xff] %v9994_v42  ;;  %12616 = vst [vmem:[#allocation92_spill] sm:$0xff] %v9997_v22  ;;  %v10007_v20 = vrot.slane %v682_v59, %v9458_v4  ;;  %v1020_v8 = vcombine.high %v1004_v2, %v1004_v2  ;;  %v779_v5 = vmul.f32 %v763_v26, %v763_v26 }
 0x10f   :  { %12617 = vst [vmem:[#allocation93_spill] sm:$0xff] %v10000_v23  ;;  %v455_v55 = vmul.f32 %v439_v6, %v439_v6  ;;  %v780_v1 = vmul.f32 %v764_v16, %v764_v16  ;;  %v772_v60 = vsub.f32 %v9653_v43, %v9829_v51  ;;  %v456_v42 = vmul.f32 %v440_v30, %v440_v30 }
 0x110   :  { %12618 = vst [vmem:[#allocation94_spill] sm:$0xff] %v10007_v20  ;;  %v447_v37 = vsub.f32 %v9634_v32, %v9795_v13  ;;  %v441_v57 = vsub.f32 %v9636_v33, %v9806_v58  ;;  %v771_v59 = vsub.f32 %v9655_v44, %v9823_v34  ;;  %v448_v2 = vsub.f32 %v9644_v38, %v9820_v7 }
 0x111   :  { %v10024_v26 = vrot.slane %v973_v28, %v9458_v4  ;;  %v10027_v6 = vrot.slane %v1018_v62, %v9458_v4  ;;  %v10030_v43 = vrot.slane %v1022_v31, %v9458_v4  ;;  %v781_v16 = vmul.f32 %v765_v29, %v765_v29  ;;  %v10037_v44 = vpop.permute.xlu1 %2420  ;;  %v10039_v38 = vpop.permute.xlu0 %2413 }
 0x112   :  { %v1119_v32 = vmul.f32 %v1103_v3, %v1103_v3  ;;  %v1105_v33 = vsub.f32 %v9703_v12, %v9902_v49  ;;  %v10035_v30 = vrot.slane %v1020_v8, %v9458_v4  ;;  %v795_v28 = vadd.f32 %v779_v5, %v455_v55 }
 0x113   :  { %12619 = vst [vmem:[#allocation95_spill] sm:$0xff] %v10024_v26  ;;  %12620 = vst [vmem:[#allocation96_spill] sm:$0xff] %v10027_v6  ;;  %v788_v7 = vmul.f32 %v772_v60, %v772_v60  ;;  %v766_v62 = vsub.f32 %v9671_v53, %v9866_v41  ;;  %v1104_v31 = vsub.f32 %v9677_v56, %v9892_v39 }
 0x114   :  { %12621 = vst [vmem:[#allocation97_spill] sm:$0xff] %v10030_v43  ;;  %12622 = vst [vmem:[#allocation98_spill] sm:$0xff] %v10035_v30  ;;  %v796_v29 = vadd.f32 %v780_v1, %v456_v42  ;;  %v463_v3 = vmul.f32 %v447_v37, %v447_v37  ;;  %v457_v51 = vmul.f32 %v441_v57, %v441_v57 }
 0x115   :  { %v787_v58 = vmul.f32 %v771_v59, %v771_v59  ;;  %v464_v12 = vmul.f32 %v448_v2, %v448_v2  ;;  %v449_v4 = vsub.f32 %v9661_v47, %v9832_v50  ;;  %v442_v8 = vsub.f32 %v9663_v48, %v9851_v54  ;;  %v10053_v56 = vpop.permute.xlu1 %2564  ;;  %v10055_v42 = vpop.permute.xlu0 %2557  ;;  %v12624_v2 = vld [vmem:[#allocation58_spill] sm:$0xff]  ;;  %v12627_v50 = vld [vmem:[#allocation27_spill] sm:$0xff] }
 0x116   :  { %v1111_v55 = vsub.f32 %v9701_v9, %v9898_v61  ;;  %v797_v5 = vadd.f32 %v781_v16, %v457_v51  ;;  %v773_v53 = vsub.f32 %v9669_v52, %v9854_v40  ;;  %v1121_v60 = vmul.f32 %v1105_v33, %v1105_v33  ;;  %v12625_v9 = vld [vmem:[#allocation25_spill] sm:$0xff]  ;;  %v12626_v16 = vld [vmem:[#allocation60_spill] sm:$0xff]  ;;  %v12628_v33 = vld [vmem:[#allocation67_spill] sm:$0xff] }
 0x117   :  { %v10057_v1 = vadd.f32 %v1119_v32, %v795_v28  ;;  %v804_v37 = vadd.f32 %v788_v7, %v464_v12  ;;  %v782_v57 = vmul.f32 %v766_v62, %v766_v62  ;;  %v1120_v47 = vmul.f32 %v1104_v31, %v1104_v31  ;;  %v12629_v40 = vld [vmem:[#allocation28_spill] sm:$0xff]  ;;  %v12633_v61 = vld [vmem:[#allocation26_spill] sm:$0xff] }
 0x118   :  { %v1112_v48 = vsub.f32 %v9711_v18, %v9915_v46  ;;  %v803_v59 = vadd.f32 %v787_v58, %v463_v3  ;;  %v450_v51 = vsub.f32 %v12625_v9, %v12624_v2  ;;  %v774_v52 = vsub.f32 %v12627_v50, %v12626_v16  ;;  %v12630_v28 = vld [vmem:[#allocation72_spill] sm:$0xff]  ;;  %v12638_v16 = vld [vmem:[#allocation73_spill] sm:$0xff] }
 0x119   :  { %12623 = vst [vmem:[#allocation99_spill] sm:$0xff] %v10057_v1  ;;  %v767_v54 = vsub.f32 %v12629_v40, %v12628_v33  ;;  %v465_v41 = vmul.f32 %v449_v4, %v449_v4  ;;  %v458_v49 = vmul.f32 %v442_v8, %v442_v8  ;;  %v1127_v32 = vmul.f32 %v1111_v55, %v1111_v55  ;;  %v12631_v7 = vld [vmem:[#allocation32_spill] sm:$0xff]  ;;  %v10071_v58 = vpop.permute.xlu1 %2469  ;;  %v10073_v3 = vpop.permute.xlu0 %2427  ;;  %v12636_v8 = vld [vmem:[#allocation35_spill] sm:$0xff]  ;;  %v12641_v46 = vld [vmem:[#allocation29_spill] sm:$0xff] }
 0x11a   :  { %v1106_v62 = vsub.f32 %v12631_v7, %v12630_v28  ;;  %v789_v31 = vmul.f32 %v773_v53, %v773_v53  ;;  %v12632_v12 = vld [vmem:[#allocation64_spill] sm:$0xff]  ;;  %12634 = vst [vmem:[#allocation25_spill] sm:$0xff] %v10073_v3  ;;  %v1152_v50 = vsel %vm1151_vm0, %v10057_v1, inf  ;;  %v10077_v9 = vadd.f32 %v1121_v60, %v797_v5  ;;  %v12642_v5 = vld [vmem:[#allocation33_spill] sm:$0xff] }
 0x11b   :  { %v443_v18 = vsub.f32 %v12633_v61, %v12632_v12  ;;  %v798_v40 = vadd.f32 %v782_v57, %v458_v49  ;;  %v1128_v4 = vmul.f32 %v1112_v48, %v1112_v48  ;;  %v1113_v55 = vsub.f32 %v12636_v8, %v9939_v11  ;;  %1153 = vmin.xlane.f32.xlu0 %v1152_v50  ;;  %v12639_v12 = vld [vmem:[#allocation30_spill] sm:$0xff]  ;;  %v12640_v28 = vld [vmem:[#allocation68_spill] sm:$0xff]  ;;  %v12644_v48 = vld [vmem:[#allocation31_spill] sm:$0xff] }
 0x11c   :  { %12635 = vst [vmem:[#allocation27_spill] sm:$0xff] %v10077_v9  ;;  %v10081_v7 = vadd.f32 %v1120_v47, %v796_v29  ;;  %v466_v53 = vmul.f32 %v450_v51, %v450_v51  ;;  %v790_v2 = vmul.f32 %v774_v52, %v774_v52  ;;  %v783_v61 = vmul.f32 %v767_v54, %v767_v54  ;;  %v12645_v47 = vld [vmem:[#allocation42_spill] sm:$0xff] }
 0x11d   :  { %v768_v33 = vsub.f32 %v12639_v12, %v12638_v16  ;;  %v444_v3 = vsub.f32 %v12641_v46, %v12640_v28  ;;  %v1122_v1 = vmul.f32 %v1106_v62, %v1106_v62  ;;  %v775_v49 = vsub.f32 %v12642_v5, %v9946_v36  ;;  %v10095_v54 = vpop.permute.xlu1 %2571  ;;  %v10097_v52 = vpop.permute.xlu0 %2476  ;;  %v12646_v12 = vld [vmem:[#allocation52_spill] sm:$0xff] }
 0x11e   :  { %12637 = vst [vmem:[#allocation28_spill] sm:$0xff] %v10081_v7  ;;  %v10089_v60 = vadd.f32 %v1127_v32, %v803_v59  ;;  %v459_v57 = vmul.f32 %v443_v18, %v443_v18  ;;  %v451_v29 = vsub.f32 %v12644_v48, %v9934_v63  ;;  %v1107_v51 = vsub.f32 %v12645_v47, %v9959_v45 }
 0x11f   :  { %v1158_v46 = vsel %vm1151_vm0, %v10077_v9, inf  ;;  %v1129_v62 = vmul.f32 %v1113_v55, %v1113_v55  ;;  %v1114_v50 = vsub.f32 %v12646_v12, %v9966_v0  ;;  %v1155_v59 = vsel %vm1151_vm0, %v10081_v7, inf }
 0x120   :  { %12643 = vst [vmem:[#allocation32_spill] sm:$0xff] %v10089_v60  ;;  %1159 = vmin.xlane.f32.xlu0 %v1158_v46  ;;  %v10105_v32 = vadd.f32 %v1128_v4, %v804_v37  ;;  %v805_v18 = vadd.f32 %v789_v31, %v465_v41  ;;  %v806_v8 = vadd.f32 %v790_v2, %v466_v53  ;;  %v1176_v9 = vsel %vm1151_vm0, %v10089_v60, inf  ;;  %v12649_v46 = vld [vmem:[#allocation61_spill] sm:$0xff]  ;;  %v12650_v37 = vld [vmem:[#allocation71_spill] sm:$0xff]  ;;  %v12652_v31 = vld [vmem:[#allocation36_spill] sm:$0xff] }
 0x121   :  { %v799_v5 = vadd.f32 %v783_v61, %v459_v57  ;;  %v784_v48 = vmul.f32 %v768_v33, %v768_v33  ;;  %1156 = vmin.xlane.f32.xlu1 %v1155_v59  ;;  %v460_v47 = vmul.f32 %v444_v3, %v444_v3  ;;  %v791_v63 = vmul.f32 %v775_v49, %v775_v49  ;;  %v10115_v41 = vpop.permute.xlu1 %2620  ;;  %v10117_v2 = vpop.permute.xlu0 %2613  ;;  %v12651_v33 = vld [vmem:[#allocation80_spill] sm:$0xff]  ;;  %v12654_v49 = vld [vmem:[#allocation74_spill] sm:$0xff]  ;;  %v12657_v59 = vld [vmem:[#allocation43_spill] sm:$0xff] }
 0x122   :  { %12647 = vst [vmem:[#allocation26_spill] sm:$0xff] %v10105_v32  ;;  %v10109_v55 = vadd.f32 %v1122_v1, %v798_v40  ;;  %v467_v36 = vmul.f32 %v451_v29, %v451_v29  ;;  %v1123_v12 = vmul.f32 %v1107_v51, %v1107_v51  ;;  %v1108_v28 = vsub.f32 %v12649_v46, %v9988_v35  ;;  %v12655_v57 = vld [vmem:[#allocation34_spill] sm:$0xff] }
 0x123   :  { %v1115_v4 = vsub.f32 %v12650_v37, %v9997_v22  ;;  %v769_v3 = vsub.f32 %v12652_v31, %v12651_v33  ;;  %v1130_v53 = vmul.f32 %v1114_v50, %v1114_v50  ;;  %v1179_v1 = vsel %vm1151_vm0, %v10105_v32, inf  ;;  %v12656_v51 = vld [vmem:[#allocation82_spill] sm:$0xff]  ;;  %v12658_v37 = vld [vmem:[#allocation55_spill] sm:$0xff]  ;;  %v12659_v31 = vld [vmem:[#allocation81_spill] sm:$0xff] }
 0x124   :  { %12648 = vst [vmem:[#allocation35_spill] sm:$0xff] %v10109_v55  ;;  %1177 = vmin.xlane.f32.xlu0 %v1176_v9  ;;  %v10123_v40 = vadd.f32 %v1129_v62, %v805_v18  ;;  %v800_v61 = vadd.f32 %v784_v48, %v460_v47  ;;  %v445_v29 = vsub.f32 %v12655_v57, %v12654_v49  ;;  %v12660_v50 = vld [vmem:[#allocation37_spill] sm:$0xff]  ;;  %v12661_v22 = vld [vmem:[#allocation51_spill] sm:$0xff]  ;;  %v1161_v62 = vsel %vm1151_vm0, %v10109_v55, inf }
 0x125   :  { %v776_v46 = vsub.f32 %v12657_v59, %v12656_v51  ;;  %v770_v60 = vsub.f32 %v12658_v37, %v9969_v19  ;;  %1180 = vmin.xlane.f32.xlu1 %v1179_v1  ;;  %v807_v7 = vadd.f32 %v791_v63, %v467_v36  ;;  %v452_v9 = vsub.f32 %v12660_v50, %v12659_v31  ;;  %v12662_v47 = vld [vmem:[#allocation77_spill] sm:$0xff]  ;;  %v10139_v59 = vpop.permute.xlu1 %2483  ;;  %v10141_v51 = vpop.permute.xlu0 %2434 }
 0x126   :  { %12653 = vst [vmem:[#allocation30_spill] sm:$0xff] %v10123_v40  ;;  %v446_v32 = vsub.f32 %v12661_v22, %v9962_v21  ;;  %v1124_v18 = vmul.f32 %v1108_v28, %v1108_v28  ;;  %v1131_v48 = vmul.f32 %v1115_v4, %v1115_v4  ;;  %v1109_v57 = vsub.f32 %v12662_v47, %v10000_v23  ;;  %v12664_v47 = vld [vmem:[#allocation56_spill] sm:$0xff] }
 0x127   :  { %v10143_v1 = vadd.f32 %v1123_v12, %v799_v5  ;;  %v785_v63 = vmul.f32 %v769_v3, %v769_v3  ;;  %v1116_v36 = vsub.f32 %v9976_v17, %v10027_v6  ;;  %v1182_v22 = vsel %vm1151_vm0, %v10123_v40, inf  ;;  %v12665_v12 = vld [vmem:[#allocation62_spill] sm:$0xff]  ;;  %v12666_v17 = vld [vmem:[#allocation88_spill] sm:$0xff] }
 0x128   :  { %1162 = vmin.xlane.f32.xlu0 %v1161_v62  ;;  %v10149_v37 = vadd.f32 %v1130_v53, %v806_v8  ;;  %v461_v28 = vmul.f32 %v445_v29, %v445_v29  ;;  %v792_v4 = vmul.f32 %v776_v46, %v776_v46  ;;  %v786_v50 = vmul.f32 %v770_v60, %v770_v60 }
 0x129   :  { %v453_v55 = vsub.f32 %v12664_v47, %v9972_v25  ;;  %1183 = vmin.xlane.f32.xlu1 %v1182_v22  ;;  %v468_v23 = vmul.f32 %v452_v9, %v452_v9  ;;  %v462_v5 = vmul.f32 %v446_v32, %v446_v32  ;;  %v777_v3 = vsub.f32 %v12665_v12, %v9991_v27  ;;  %v10157_v21 = vpop.permute.xlu1 %2627  ;;  %v10159_v8 = vpop.permute.xlu0 %2578 }
 0x12a   :  { %12663 = vst [vmem:[#allocation29_spill] sm:$0xff] %v10149_v37  ;;  %v1110_v62 = vsub.f32 %v12666_v17, %v10024_v26  ;;  %v1125_v6 = vmul.f32 %v1109_v57, %v1109_v57  ;;  %v1164_v60 = vsel %vm1151_vm0, %v10143_v1, inf  ;;  %v10163_v53 = vadd.f32 %v1124_v18, %v800_v61  ;;  %v12669_v17 = vld [vmem:[#allocation78_spill] sm:$0xff]  ;;  %v12670_v18 = vld [vmem:[#allocation91_spill] sm:$0xff] }
 0x12b   :  { %v10165_v29 = vadd.f32 %v1131_v48, %v807_v7  ;;  %v801_v46 = vadd.f32 %v785_v63, %v461_v28  ;;  %v1132_v32 = vmul.f32 %v1116_v36, %v1116_v36  ;;  %v1117_v9 = vsub.f32 %v10011_v15, %v10035_v30  ;;  %v12671_v7 = vld [vmem:[#allocation70_spill] sm:$0xff] }
 0x12c   :  { %12667 = vst [vmem:[#allocation33_spill] sm:$0xff] %v10163_v53  ;;  %1165 = vmin.xlane.f32.xlu0 %v1164_v60  ;;  %v1185_v57 = vsel %vm1151_vm0, %v10149_v37, inf  ;;  %v808_v22 = vadd.f32 %v792_v4, %v468_v23  ;;  %v802_v47 = vadd.f32 %v786_v50, %v462_v5  ;;  %v469_v12 = vmul.f32 %v453_v55, %v453_v55  ;;  %v12672_v36 = vld [vmem:[#allocation38_spill] sm:$0xff]  ;;  %v12673_v5 = vld [vmem:[#allocation39_spill] sm:$0xff] }
 0x12d   :  { %12668 = vst [vmem:[#allocation31_spill] sm:$0xff] %v10165_v29  ;;  %v778_v40 = vsub.f32 %v12669_v17, %v10007_v20  ;;  %1186 = vmin.xlane.f32.xlu1 %v1185_v57  ;;  %v793_v61 = vmul.f32 %v777_v3, %v777_v3  ;;  %v454_v48 = vsub.f32 %v12671_v7, %v12670_v18  ;;  %v2725_v60 = vpop.permute.xlu1 %2724  ;;  %v2718_v37 = vpop.permute.xlu0 %2717  ;;  %v1167_v23 = vsel %vm1151_vm0, %v10163_v53, inf  ;;  %v12674_v57 = vld [vmem:[#allocation40_spill] sm:$0xff] }
 0x12e   :  { %v1126_v63 = vmul.f32 %v1110_v62, %v1110_v62  ;;  %v2664_v28 = vsub.f32 %v10055_v42, %v12672_v36  ;;  %v1118_v15 = vsub.f32 %v10009_v10, %v10030_v43  ;;  %v1188_v55 = vsel %vm1151_vm0, %v10165_v29, inf }
 0x12f   :  { %v10183_v4 = vadd.f32 %v1125_v6, %v801_v46  ;;  %v1133_v50 = vmul.f32 %v1117_v9, %v1117_v9  ;;  %v2520_v3 = vsub.f32 %v10039_v38, %v12673_v5  ;;  %v2824_v62 = vsub.f32 %v2718_v37, %v9874_v14  ;;  %v12675_v46 = vld [vmem:[#allocation44_spill] sm:$0xff] }
 0x130   :  { %1168 = vmin.xlane.f32.xlu0 %v1167_v23  ;;  %v10188_v42 = vadd.f32 %v1132_v32, %v808_v22  ;;  %v794_v10 = vmul.f32 %v778_v40, %v778_v40  ;;  %v2665_v17 = vsub.f32 %v10053_v56, %v12674_v57  ;;  %v809_v7 = vadd.f32 %v793_v61, %v469_v12 }
 0x131   :  { %1189 = vmin.xlane.f32.xlu1 %v1188_v55  ;;  %v470_v36 = vmul.f32 %v454_v48, %v454_v48  ;;  %v2680_v53 = vmul.f32 %v2664_v28, %v2664_v28  ;;  %v10192_v29 = vadd.f32 %v1126_v63, %v802_v47  ;;  %v1134_v6 = vmul.f32 %v1118_v15, %v1118_v15  ;;  %v10197_v37 = vpop.permute.xlu1 %2490  ;;  %v10199_v32 = vpop.permute.xlu0 %2441 }
 0x132   :  { %v2521_v9 = vsub.f32 %v10037_v44, %v12675_v46  ;;  %v2825_v38 = vsub.f32 %v2725_v60, %v9892_v39  ;;  %v1170_v40 = vsel %vm1151_vm0, %v10183_v4, inf  ;;  %v2536_v56 = vmul.f32 %v2520_v3, %v2520_v3 }
 0x133   :  { %v2840_v22 = vmul.f32 %v2824_v62, %v2824_v62  ;;  %v1191_v47 = vsel %vm1151_vm0, %v10188_v42, inf  ;;  %v10205_v12 = vadd.f32 %v1133_v50, %v809_v7  ;;  %v810_v61 = vadd.f32 %v794_v10, %v470_v36  ;;  %v12677_v62 = vld [vmem:[#allocation25_spill] sm:$0xff] }
 0x134   :  { %1171 = vmin.xlane.f32.xlu0 %v1170_v40  ;;  %v2681_v48 = vmul.f32 %v2665_v17, %v2665_v17  ;;  %v2696_v44 = vadd.f32 %v2680_v53, %v2536_v56  ;;  %v2666_v63 = vsub.f32 %v10095_v54, %v9813_v24  ;;  %v2672_v28 = vsub.f32 %v10117_v2, %v9823_v34  ;;  %v12676_v53 = vld [vmem:[#allocation45_spill] sm:$0xff]  ;;  %v12679_v56 = vld [vmem:[#allocation47_spill] sm:$0xff] }
 0x135   :  { %1192 = vmin.xlane.f32.xlu1 %v1191_v47  ;;  %v1173_v15 = vsel %vm1151_vm0, %v10192_v29, inf  ;;  %v2537_v60 = vmul.f32 %v2521_v9, %v2521_v9  ;;  %v2528_v23 = vsub.f32 %v10071_v58, %v9795_v13  ;;  %v2841_v55 = vmul.f32 %v2825_v38, %v2825_v38  ;;  %v10215_v50 = vpop.permute.xlu1 %2634  ;;  %v10217_v36 = vpop.permute.xlu0 %2585  ;;  %v12678_v7 = vld [vmem:[#allocation49_spill] sm:$0xff]  ;;  %v12688_v24 = vld [vmem:[#allocation67_spill] sm:$0xff] }
 0x136   :  { %v10219_v3 = vadd.f32 %v1134_v6, %v810_v61  ;;  %v2522_v54 = vsub.f32 %v12677_v62, %v12676_v53  ;;  %v1194_v2 = vsel %vm1151_vm0, %v10205_v12, inf  ;;  %v10225_v10 = vadd.f32 %v2840_v22, %v2696_v44  ;;  %v12680_v44 = vld [vmem:[#allocation65_spill] sm:$0xff] }
 0x137   :  { %v2697_v17 = vadd.f32 %v2681_v48, %v2537_v60  ;;  %v2673_v58 = vsub.f32 %v10115_v41, %v12678_v7  ;;  %v2682_v9 = vmul.f32 %v2666_v63, %v2666_v63  ;;  %v2688_v38 = vmul.f32 %v2672_v28, %v2672_v28  ;;  %v12681_v60 = vld [vmem:[#allocation66_spill] sm:$0xff] }
 0x138   :  { %1174 = vmin.xlane.f32.xlu0 %v1173_v15  ;;  %v2544_v40 = vmul.f32 %v2528_v23, %v2528_v23  ;;  %v2529_v6 = vsub.f32 %v10097_v52, %v12679_v56  ;;  %v1197_v15 = vsel %vm1151_vm0, %v10219_v3, inf  ;;  %v2538_v22 = vmul.f32 %v2522_v54, %v2522_v54 }
 0x139   :  { %1195 = vmin.xlane.f32.xlu1 %v1194_v2  ;;  %v2774_v47 = vpop.permute.xlu1 %2773  ;;  %v2732_v61 = vpop.permute.xlu0 %2731  ;;  %v10233_v62 = vadd.f32 %v2841_v55, %v2697_v17  ;;  %v2872_v41 = vsel %vm1151_vm0, %v10225_v10, inf  ;;  %v2689_v63 = vmul.f32 %v2673_v58, %v2673_v58  ;;  %v12682_v17 = vld [vmem:[#allocation69_spill] sm:$0xff] }
 0x13a   :  { %v2832_v48 = vsub.f32 %v2774_v47, %v12680_v44  ;;  %v2826_v39 = vsub.f32 %v2732_v61, %v12681_v60  ;;  %v2698_v28 = vadd.f32 %v2682_v9, %v2538_v22  ;;  %v2704_v52 = vadd.f32 %v2688_v38, %v2544_v40 }
 0x13b   :  { %v2545_v14 = vmul.f32 %v2529_v6, %v2529_v6  ;;  %v2875_v54 = vsel %vm1151_vm0, %v10233_v62, inf }
 0x13c   :  { %1198 = vmin.xlane.f32.xlu0 %v1197_v15  ;;  %v2848_v23 = vmul.f32 %v2832_v48, %v2832_v48  ;;  %v2842_v2 = vmul.f32 %v2826_v39, %v2826_v39  ;;  %v12684_v48 = vld [vmem:[#allocation53_spill] sm:$0xff] }
 0x13d   :  { %2873 = vmin.xlane.f32.xlu1 %v2872_v41  ;;  %v10239_v7 = vpop.permute.xlu1 %2448  ;;  %v2781_v55 = vpop.permute.xlu0 %2780  ;;  %v2705_v58 = vadd.f32 %v2689_v63, %v2545_v14  ;;  %v12683_v41 = vld [vmem:[#allocation57_spill] sm:$0xff]  ;;  %v12685_v14 = vld [vmem:[#allocation54_spill] sm:$0xff] }
 0x13e   :  { %v2833_v47 = vsub.f32 %v2781_v55, %v12682_v17  ;;  %v10244_v61 = vadd.f32 %v2842_v2, %v2698_v28  ;;  %v10246_v15 = vadd.f32 %v2848_v23, %v2704_v52  ;;  %v2667_v9 = vsub.f32 %v10159_v8, %v12683_v41  ;;  %v12687_v17 = vld [vmem:[#allocation72_spill] sm:$0xff] }
 0x13f   :  { %v2523_v28 = vsub.f32 %v10141_v51, %v12684_v48  ;;  %v2674_v63 = vsub.f32 %v10157_v21, %v12685_v14 }
 0x140   :  { %2876 = vmin.xlane.f32.xlu0 %v2875_v54  ;;  %v2849_v38 = vmul.f32 %v2833_v47, %v2833_v47  ;;  %v2878_v39 = vsel %vm1151_vm0, %v10244_v61, inf  ;;  %v2896_v40 = vsel %vm1151_vm0, %v10246_v15, inf  ;;  %v2683_v8 = vmul.f32 %v2667_v9, %v2667_v9  ;;  %v12686_v54 = vld [vmem:[#allocation50_spill] sm:$0xff] }
 0x141   :  { %v2593_v6 = vpop.permute.xlu1 %2592  ;;  %v2498_v22 = vpop.permute.xlu0 %2497  ;;  %2879 = vmin.xlane.f32.xlu1 %v2878_v39  ;;  %v2530_v47 = vsub.f32 %v10139_v59, %v12686_v54  ;;  %v2539_v39 = vmul.f32 %v2523_v28, %v2523_v28  ;;  %v2690_v51 = vmul.f32 %v2674_v63, %v2674_v63  ;;  %v12689_v63 = vld [vmem:[#allocation64_spill] sm:$0xff] }
 0x142   :  { %v10256_v52 = vadd.f32 %v2849_v38, %v2705_v58  ;;  %v2669_v57 = vsub.f32 %v2593_v6, %v12638_v16 }
 0x143   :  { %v2546_v41 = vmul.f32 %v2530_v47, %v2530_v47  ;;  %v12690_v47 = vld [vmem:[#allocation60_spill] sm:$0xff] }
 0x144   :  { %2897 = vmin.xlane.f32.xlu0 %v2896_v40  ;;  %v2899_v23 = vsel %vm1151_vm0, %v10256_v52, inf  ;;  %v2699_v40 = vadd.f32 %v2683_v8, %v2539_v39 }
 0x145   :  { %v2739_v2 = vpop.permute.xlu1 %2738  ;;  %v2642_v55 = vpop.permute.xlu0 %2641  ;;  %2900 = vmin.xlane.f32.xlu1 %v2899_v23  ;;  %v2706_v14 = vadd.f32 %v2690_v51, %v2546_v41  ;;  %v2668_v23 = vsub.f32 %v10217_v36, %v12688_v24 }
 0x146   :  { %v2827_v44 = vsub.f32 %v2739_v2, %v12687_v17 }
 0x147   :  { %v2684_v39 = vmul.f32 %v2668_v23, %v2668_v23 }
 0x148   :  { %v2843_v58 = vmul.f32 %v2827_v44, %v2827_v44  ;;  %v2524_v44 = vsub.f32 %v10199_v32, %v12689_v63 }
 0x149   :  { %v2456_v38 = vpop.permute.xlu1 %2455  ;;  %v2788_v60 = vpop.permute.xlu0 %2787 }
 0x14a   :  { %v2834_v21 = vsub.f32 %v2788_v60, %v9939_v11  ;;  %v10266_v9 = vadd.f32 %v2843_v58, %v2699_v40  ;;  %v2675_v60 = vsub.f32 %v10215_v50, %v12690_v47  ;;  %v12691_v40 = vld [vmem:[#allocation58_spill] sm:$0xff] }
 0x14b   :  { %v2531_v58 = vsub.f32 %v10197_v37, %v12691_v40 }
 0x14c   :  { %v2850_v34 = vmul.f32 %v2834_v21, %v2834_v21  ;;  %v2881_v59 = vsel %vm1151_vm0, %v10266_v9, inf  ;;  %v2540_v21 = vmul.f32 %v2524_v44, %v2524_v44  ;;  %v2691_v11 = vmul.f32 %v2675_v60, %v2675_v60  ;;  %v12692_v60 = vld [vmem:[#allocation68_spill] sm:$0xff] }
 0x14d   :  { %v2600_v28 = vpop.permute.xlu1 %2599  ;;  %v2505_v2 = vpop.permute.xlu0 %2504  ;;  %2882 = vmin.xlane.f32.xlu0 %v2881_v59  ;;  %v2547_v24 = vmul.f32 %v2531_v58, %v2531_v58  ;;  %v12693_v58 = vld [vmem:[#allocation79_spill] sm:$0xff] }
 0x14e   :  { %v10274_v8 = vadd.f32 %v2850_v34, %v2706_v14  ;;  %v2700_v32 = vadd.f32 %v2684_v39, %v2540_v21  ;;  %v2525_v39 = vsub.f32 %v10239_v7, %v12692_v60  ;;  %v2676_v21 = vsub.f32 %v2642_v55, %v12693_v58  ;;  %v12695_v58 = vld [vmem:[#allocation92_spill] sm:$0xff] }
 0x14f   :  { %v2707_v47 = vadd.f32 %v2691_v11, %v2547_v24  ;;  %v12694_v11 = vld [vmem:[#allocation75_spill] sm:$0xff]  ;;  %v2670_v7 = vsub.f32 %v2600_v28, %v12651_v33 }
 0x150   :  { %v2902_v41 = vsel %vm1151_vm0, %v10274_v8, inf  ;;  %v2532_v6 = vsub.f32 %v2498_v22, %v12694_v11  ;;  %v12696_v11 = vld [vmem:[#allocation82_spill] sm:$0xff] }
 0x151   :  { %v2746_v36 = vpop.permute.xlu1 %2745  ;;  %v2649_v51 = vpop.permute.xlu0 %2648  ;;  %2903 = vmin.xlane.f32.xlu1 %v2902_v41 }
 0x152   :  { %v2828_v59 = vsub.f32 %v2746_v36, %v9959_v45 }
 0x154   :  { %v2844_v34 = vmul.f32 %v2828_v59, %v2828_v59 }
 0x155   :  { %v2463_v14 = vpop.permute.xlu1 %2462  ;;  %v2795_v17 = vpop.permute.xlu0 %2794 }
 0x156   :  { %v2835_v50 = vsub.f32 %v2795_v17, %v9966_v0  ;;  %v10284_v23 = vadd.f32 %v2844_v34, %v2700_v32  ;;  %v2685_v17 = vmul.f32 %v2669_v57, %v2669_v57  ;;  %v2541_v34 = vmul.f32 %v2525_v39, %v2525_v39 }
 0x157   :  { %v2526_v57 = vsub.f32 %v2456_v38, %v12654_v49  ;;  %v2686_v39 = vmul.f32 %v2670_v7, %v2670_v7 }
 0x158   :  { %v2851_v41 = vmul.f32 %v2835_v50, %v2835_v50  ;;  %v2884_v37 = vsel %vm1151_vm0, %v10284_v23, inf  ;;  %v2701_v0 = vadd.f32 %v2685_v17, %v2541_v34  ;;  %v2533_v17 = vsub.f32 %v2505_v2, %v12659_v31 }
 0x159   :  { %v2607_v44 = vpop.permute.xlu1 %2606  ;;  %v2512_v63 = vpop.permute.xlu0 %2511  ;;  %2885 = vmin.xlane.f32.xlu0 %v2884_v37  ;;  %v2692_v37 = vmul.f32 %v2676_v21, %v2676_v21  ;;  %v2542_v38 = vmul.f32 %v2526_v57, %v2526_v57 }
 0x15a   :  { %v10291_v36 = vadd.f32 %v2851_v41, %v2707_v47  ;;  %v2548_v41 = vmul.f32 %v2532_v6, %v2532_v6  ;;  %v2534_v57 = vsub.f32 %v2512_v63, %v9972_v25 }
 0x15c   :  { %v2905_v24 = vsel %vm1151_vm0, %v10291_v36, inf  ;;  %v2708_v22 = vadd.f32 %v2692_v37, %v2548_v41 }
 0x15d   :  { %v2753_v59 = vpop.permute.xlu1 %2752  ;;  %v2656_v32 = vpop.permute.xlu0 %2655  ;;  %2906 = vmin.xlane.f32.xlu1 %v2905_v24  ;;  %v2677_v24 = vsub.f32 %v2649_v51, %v12696_v11 }
 0x15e   :  { %v2829_v50 = vsub.f32 %v2753_v59, %v9988_v35  ;;  %v2671_v59 = vsub.f32 %v2607_v44, %v9969_v19  ;;  %v2678_v7 = vsub.f32 %v2656_v32, %v9991_v27  ;;  %v2702_v44 = vadd.f32 %v2686_v39, %v2542_v38  ;;  %v12699_v32 = vld [vmem:[#allocation96_spill] sm:$0xff] }
 0x15f   :  { %v2693_v51 = vmul.f32 %v2677_v24, %v2677_v24  ;;  %v2549_v35 = vmul.f32 %v2533_v17, %v2533_v17 }
 0x160   :  { %v2845_v47 = vmul.f32 %v2829_v50, %v2829_v50  ;;  %v12697_v50 = vld [vmem:[#allocation84_spill] sm:$0xff]  ;;  %v2687_v41 = vmul.f32 %v2671_v59, %v2671_v59  ;;  %v2694_v59 = vmul.f32 %v2678_v7, %v2678_v7 }
 0x161   :  { %v2519_v45 = vpop.permute.xlu1 %2518  ;;  %v2802_v55 = vpop.permute.xlu0 %2801  ;;  %v2709_v39 = vadd.f32 %v2693_v51, %v2549_v35 }
 0x162   :  { %v2836_v16 = vsub.f32 %v2802_v55, %v12695_v58  ;;  %v10301_v60 = vadd.f32 %v2845_v47, %v2701_v0  ;;  %v2527_v55 = vsub.f32 %v2463_v14, %v12697_v50  ;;  %v12698_v0 = vld [vmem:[#allocation93_spill] sm:$0xff]  ;;  %v2535_v14 = vsub.f32 %v2519_v45, %v12670_v18 }
 0x163   :  { %v2550_v45 = vmul.f32 %v2534_v57, %v2534_v57 }
 0x164   :  { %v2852_v21 = vmul.f32 %v2836_v16, %v2836_v16  ;;  %v2887_v28 = vsel %vm1151_vm0, %v10301_v60, inf }
 0x165   :  { %v2760_v6 = vpop.permute.xlu1 %2759  ;;  %v2663_v34 = vpop.permute.xlu0 %2662  ;;  %2888 = vmin.xlane.f32.xlu0 %v2887_v28  ;;  %v2710_v51 = vadd.f32 %v2694_v59, %v2550_v45 }
 0x166   :  { %v2830_v47 = vsub.f32 %v2760_v6, %v12698_v0  ;;  %v10310_v37 = vadd.f32 %v2852_v21, %v2708_v22  ;;  %v2679_v16 = vsub.f32 %v2663_v34, %v10007_v20  ;;  %v2543_v22 = vmul.f32 %v2527_v55, %v2527_v55 }
 0x167   :  { %v2551_v20 = vmul.f32 %v2535_v14, %v2535_v14 }
 0x168   :  { %v2846_v58 = vmul.f32 %v2830_v47, %v2830_v47  ;;  %v2908_v2 = vsel %vm1151_vm0, %v10310_v37, inf  ;;  %v2695_v38 = vmul.f32 %v2679_v16, %v2679_v16  ;;  %v2703_v47 = vadd.f32 %v2687_v41, %v2543_v22 }
 0x169   :  { %v2767_v28 = vpop.permute.xlu1 %2766  ;;  %v2809_v6 = vpop.permute.xlu0 %2808  ;;  %2909 = vmin.xlane.f32.xlu1 %v2908_v2 }
 0x16a   :  { %v2831_v24 = vsub.f32 %v2767_v28, %v10024_v26  ;;  %v2837_v21 = vsub.f32 %v2809_v6, %v12699_v32  ;;  %v10320_v34 = vadd.f32 %v2846_v58, %v2702_v44  ;;  %v2711_v7 = vadd.f32 %v2695_v38, %v2551_v20  ;;  %v12710_v26 = vld [vmem:[#allocation33_spill] sm:$0xff] }
 0x16b   :  { %v12700_v6 = vlaneseq }
 0x16c   :  { %v2847_v0 = vmul.f32 %v2831_v24, %v2831_v24  ;;  %v2853_v17 = vmul.f32 %v2837_v21, %v2837_v21  ;;  %v2890_v63 = vsel %vm1151_vm0, %v10320_v34, inf  ;;  %v12702_v21 = vld [vmem:[#allocation99_spill] sm:$0xff] }
 0x16d   :  { %v2823_v27 = vpop.permute.xlu1 %2822  ;;  %v2816_v2 = vpop.permute.xlu0 %2815  ;;  %2891 = vmin.xlane.f32.xlu0 %v2890_v63  ;;  %v10343_v22 = vand.u32 127, %v12700_v6  ;;  %v12706_v6 = vld [vmem:[#allocation26_spill] sm:$0xff] }
 0x16e   :  { %v2839_v55 = vsub.f32 %v2823_v27, %v10030_v43  ;;  %v2838_v28 = vsub.f32 %v2816_v2, %v10035_v30  ;;  %v10326_v58 = vadd.f32 %v2853_v17, %v2709_v39  ;;  %v10328_v35 = vadd.f32 %v2847_v0, %v2703_v47  ;;  %v12703_v17 = vld [vmem:[#allocation27_spill] sm:$0xff]  ;;  %v12704_v2 = vld [vmem:[#allocation28_spill] sm:$0xff] }
 0x16f   :  { %12701 = vst [vmem:[#allocation42_spill] sm:$0xff] %v10343_v22 }
 0x170   :  { %v2855_v16 = vmul.f32 %v2839_v55, %v2839_v55  ;;  %v2854_v44 = vmul.f32 %v2838_v28, %v2838_v28  ;;  %v2911_v41 = vsel %vm1151_vm0, %v10326_v58, inf  ;;  %v2893_v57 = vsel %vm1151_vm0, %v10328_v35, inf }
 0x171   :  { %2912 = vmin.xlane.f32.xlu1 %v2911_v41  ;;  %2894 = vmin.xlane.f32.xlu0 %v2893_v57  ;;  %v12705_v41 = vld [vmem:[#allocation32_spill] sm:$0xff] }
 0x172   :  { %v10334_v14 = vadd.f32 %v2854_v44, %v2710_v51  ;;  %v10336_v27 = vadd.f32 %v2855_v16, %v2711_v7 }
 0x174   :  { %v2914_v0 = vsel %vm1151_vm0, %v10334_v14, inf  ;;  %v2917_v20 = vsel %vm1151_vm0, %v10336_v27, inf }
 0x175   :  { %2915 = vmin.xlane.f32.xlu1 %v2914_v0  ;;  %2918 = vmin.xlane.f32.xlu0 %v2917_v20 }
 0x1a4   :  { %v1154_v24 = vpop.xlane.xlu0 %1153 }
 0x1a5   :  { %vm1202_vm1 = vcmp.le.f32.partialorder %v12702_v21, %v1154_v24 }
 0x1a6   :  { %v1218_v39 = vsel %vm1202_vm1, %v10343_v22, 8 }
 0x1a7   :  { %v10348_v59 = vsel %vm1151_vm0, %v1218_v39, 2147483647 }
 0x1a8   :  { %v1236_v47 = vshra.s32 %v10348_v59, 16 }
 0x1a9   :  { %v1160_v38 = vpop.xlane.xlu0 %1159 }
 0x1aa   :  { %vm1204_vm2 = vcmp.le.f32.partialorder %v12703_v17, %v1160_v38  ;;  %v1157_v63 = vpop.xlane.xlu1 %1156  ;;  %v10354_v55 = vcvt.s32.f32 %v1236_v47 }
 0x1ab   :  { %v1220_v45 = vsel %vm1204_vm2, %v10343_v22, 8  ;;  %vm1203_vm3 = vcmp.le.f32.partialorder %v12704_v2, %v1157_v63 }
 0x1ac   :  { %v10357_v28 = vsel %vm1151_vm0, %v1220_v45, 2147483647  ;;  %v1219_v51 = vsel %vm1203_vm3, %v10343_v22, 8  ;;  %1239 = vmin.xlane.f32.xlu1 %v10354_v55  ;;  %v12707_v45 = vld [vmem:[#allocation35_spill] sm:$0xff] }
 0x1ad   :  { %v10361_v7 = vsel %vm1151_vm0, %v1219_v51, 2147483647  ;;  %v1178_v16 = vpop.xlane.xlu0 %1177  ;;  %v1266_v44 = vshra.s32 %v10357_v28, 16 }
 0x1ae   :  { %vm1210_vm4 = vcmp.le.f32.partialorder %v12705_v41, %v1178_v16  ;;  %v1181_v57 = vpop.xlane.xlu1 %1180  ;;  %v1251_v0 = vshra.s32 %v10361_v7, 16 }
 0x1af   :  { %v1226_v20 = vsel %vm1210_vm4, %v10343_v22, 8  ;;  %vm1211_vm5 = vcmp.le.f32.partialorder %v12706_v6, %v1181_v57  ;;  %v10369_v24 = vcvt.s32.f32 %v1266_v44  ;;  %v12708_v44 = vld [vmem:[#allocation30_spill] sm:$0xff] }
 0x1b0   :  { %v10372_v21 = vsel %vm1151_vm0, %v1226_v20, 2147483647  ;;  %v1227_v39 = vsel %vm1211_vm5, %v10343_v22, 8  ;;  %v10375_v38 = vcvt.s32.f32 %v1251_v0 }
 0x1b1   :  { %v10378_v47 = vsel %vm1151_vm0, %v1227_v39, 2147483647  ;;  %1269 = vmin.xlane.f32.xlu1 %v10369_v24  ;;  %v1163_v17 = vpop.xlane.xlu0 %1162  ;;  %v1356_v63 = vshra.s32 %v10372_v21, 16 }
 0x1b2   :  { %vm1205_vm6 = vcmp.le.f32.partialorder %v12707_v45, %v1163_v17  ;;  %v1184_v2 = vpop.xlane.xlu1 %1183  ;;  %1254 = vmin.xlane.f32.xlu0 %v10375_v38  ;;  %v1371_v51 = vshra.s32 %v10378_v47, 16 }
 0x1b3   :  { %v1221_v16 = vsel %vm1205_vm6, %v10343_v22, 8  ;;  %vm1212_vm7 = vcmp.le.f32.partialorder %v12708_v44, %v1184_v2  ;;  %v10387_v41 = vcvt.s32.f32 %v1356_v63 }
 0x1b4   :  { %v10390_v57 = vsel %vm1151_vm0, %v1221_v16, 2147483647  ;;  %v1228_v0 = vsel %vm1212_vm7, %v10343_v22, 8  ;;  %v10393_v20 = vcvt.s32.f32 %v1371_v51  ;;  %v12709_v16 = vld [vmem:[#allocation29_spill] sm:$0xff] }
 0x1b5   :  { %v10396_v6 = vsel %vm1151_vm0, %v1228_v0, 2147483647  ;;  %v1166_v39 = vpop.xlane.xlu0 %1165  ;;  %v1281_v17 = vshra.s32 %v10390_v57, 16 }
 0x1b6   :  { %vm1206_vm8 = vcmp.le.f32.partialorder %v10143_v1, %v1166_v39  ;;  %1374 = vmin.xlane.f32.xlu1 %v10393_v20  ;;  %v1187_v45 = vpop.xlane.xlu1 %1186  ;;  %1359 = vmin.xlane.f32.xlu0 %v10387_v41  ;;  %v1386_v63 = vshra.s32 %v10396_v6, 16 }
 0x1b7   :  { %v1222_v2 = vsel %vm1206_vm8, %v10343_v22, 8  ;;  %vm1213_vm9 = vcmp.le.f32.partialorder %v12709_v16, %v1187_v45  ;;  %v10405_v51 = vcvt.s32.f32 %v1281_v17  ;;  %v12711_v16 = vld [vmem:[#allocation31_spill] sm:$0xff] }
 0x1b8   :  { %v10408_v44 = vsel %vm1151_vm0, %v1222_v2, 2147483647  ;;  %v1229_v0 = vsel %vm1213_vm9, %v10343_v22, 8  ;;  %v10411_v43 = vcvt.s32.f32 %v1386_v63 }
 0x1b9   :  { %v10414_v1 = vsel %vm1151_vm0, %v1229_v0, 2147483647  ;;  %v1169_v39 = vpop.xlane.xlu0 %1168  ;;  %v1296_v30 = vshra.s32 %v10408_v44, 16 }
 0x1ba   :  { %vm1207_vm10 = vcmp.le.f32.partialorder %v12710_v26, %v1169_v39  ;;  %1389 = vmin.xlane.f32.xlu1 %v10411_v43  ;;  %v1190_v45 = vpop.xlane.xlu1 %1189  ;;  %1284 = vmin.xlane.f32.xlu0 %v10405_v51  ;;  %v1401_v17 = vshra.s32 %v10414_v1, 16 }
 0x1bb   :  { %v1223_v2 = vsel %vm1207_vm10, %v10343_v22, 8  ;;  %vm1214_vm11 = vcmp.le.f32.partialorder %v12711_v16, %v1190_v45  ;;  %v10423_v63 = vcvt.s32.f32 %v1296_v30 }
 0x1bc   :  { %v10426_v0 = vsel %vm1151_vm0, %v1223_v2, 2147483647  ;;  %v1230_v32 = vsel %vm1214_vm11, %v10343_v22, 8  ;;  %v10429_v19 = vcvt.s32.f32 %v1401_v17 }
 0x1bd   :  { %v10432_v26 = vsel %vm1151_vm0, %v1230_v32, 2147483647  ;;  %v1172_v39 = vpop.xlane.xlu0 %1171  ;;  %v1311_v11 = vshra.s32 %v10426_v0, 16 }
 0x1be   :  { %vm1208_vm12 = vcmp.le.f32.partialorder %v10183_v4, %v1172_v39  ;;  %1404 = vmin.xlane.f32.xlu1 %v10429_v19  ;;  %v1193_v45 = vpop.xlane.xlu1 %1192  ;;  %1299 = vmin.xlane.f32.xlu0 %v10423_v63  ;;  %v1416_v30 = vshra.s32 %v10432_v26, 16 }
 0x1bf   :  { %v1224_v2 = vsel %vm1208_vm12, %v10343_v22, 8  ;;  %vm1215_vm13 = vcmp.le.f32.partialorder %v10188_v42, %v1193_v45  ;;  %v10441_v17 = vcvt.s32.f32 %v1311_v11 }
 0x1c0   :  { %v10444_v32 = vsel %vm1151_vm0, %v1224_v2, 2147483647  ;;  %v1231_v16 = vsel %vm1215_vm13, %v10343_v22, 8  ;;  %v10447_v33 = vcvt.s32.f32 %v1416_v30 }
 0x1c1   :  { %v10450_v4 = vsel %vm1151_vm0, %v1231_v16, 2147483647  ;;  %v1175_v39 = vpop.xlane.xlu0 %1174  ;;  %v1326_v18 = vshra.s32 %v10444_v32, 16 }
 0x1c2   :  { %vm1209_vm14 = vcmp.le.f32.partialorder %v10192_v29, %v1175_v39  ;;  %1419 = vmin.xlane.f32.xlu1 %v10447_v33  ;;  %v1196_v42 = vpop.xlane.xlu1 %1195  ;;  %1314 = vmin.xlane.f32.xlu0 %v10441_v17  ;;  %v1431_v11 = vshra.s32 %v10450_v4, 16 }
 0x1c3   :  { %v1225_v45 = vsel %vm1209_vm14, %v10343_v22, 8  ;;  %vm1216_vm15 = vcmp.le.f32.partialorder %v10205_v12, %v1196_v42  ;;  %v10459_v30 = vcvt.s32.f32 %v1326_v18 }
 0x1c4   :  { %v10462_v2 = vsel %vm1151_vm0, %v1225_v45, 2147483647  ;;  %v1232_v16 = vsel %vm1216_vm15, %v10343_v22, 8  ;;  %v10465_v25 = vcvt.s32.f32 %v1431_v11 }
 0x1c5   :  { %v10468_v29 = vsel %vm1151_vm0, %v1232_v16, 2147483647  ;;  %v1199_v39 = vpop.xlane.xlu0 %1198  ;;  %v1341_v50 = vshra.s32 %v10462_v2, 16 }
 0x1c6   :  { %vm1217_vm1 = vcmp.le.f32.partialorder %v10219_v3, %v1199_v39  ;;  %1434 = vmin.xlane.f32.xlu1 %v10465_v25  ;;  %v2874_v12 = vpop.xlane.xlu1 %2873  ;;  %1329 = vmin.xlane.f32.xlu0 %v10459_v30  ;;  %v1446_v18 = vshra.s32 %v10468_v29, 16 }
 0x1c7   :  { %v1233_v42 = vsel %vm1217_vm1, %v10343_v22, 8  ;;  %vm2920_vm2 = vcmp.le.f32.partialorder %v10225_v10, %v2874_v12  ;;  %v10477_v11 = vcvt.s32.f32 %v1341_v50 }
 0x1c8   :  { %v10480_v45 = vsel %vm1151_vm0, %v1233_v42, 2147483647  ;;  %v2936_v16 = vsel %vm2920_vm2, %v10343_v22, 8  ;;  %v10483_v49 = vcvt.s32.f32 %v1446_v18 }
 0x1c9   :  { %v10486_v3 = vsel %vm1151_vm0, %v2936_v16, 2147483647  ;;  %v2877_v39 = vpop.xlane.xlu0 %2876  ;;  %v1461_v31 = vshra.s32 %v10480_v45, 16 }
 0x1ca   :  { %vm2921_vm3 = vcmp.le.f32.partialorder %v10233_v62, %v2877_v39  ;;  %1449 = vmin.xlane.f32.xlu1 %v10483_v49  ;;  %1344 = vmin.xlane.f32.xlu0 %v10477_v11  ;;  %v2954_v10 = vshra.s32 %v10486_v3, 16  ;;  %v2880_v42 = vpop.xlane.xlu1 %2879 }
 0x1cb   :  { %v2937_v50 = vsel %vm2921_vm3, %v10343_v22, 8  ;;  %v10494_v12 = vcvt.s32.f32 %v1461_v31  ;;  %vm2922_vm4 = vcmp.le.f32.partialorder %v10244_v61, %v2880_v42 }
 0x1cc   :  { %v10497_v18 = vsel %vm1151_vm0, %v2937_v50, 2147483647  ;;  %v10499_v16 = vcvt.s32.f32 %v2954_v10  ;;  %v2938_v39 = vsel %vm2922_vm4, %v10343_v22, 8 }
 0x1cd   :  { %v2898_v40 = vpop.xlane.xlu0 %2897  ;;  %v2969_v62 = vshra.s32 %v10497_v18, 16  ;;  %v10508_v31 = vsel %vm1151_vm0, %v2938_v39, 2147483647 }
 0x1ce   :  { %vm2928_vm5 = vcmp.le.f32.partialorder %v10246_v15, %v2898_v40  ;;  %2957 = vmin.xlane.f32.xlu1 %v10499_v16  ;;  %1464 = vmin.xlane.f32.xlu0 %v10494_v12  ;;  %v2901_v42 = vpop.xlane.xlu1 %2900  ;;  %v2984_v48 = vshra.s32 %v10508_v31, 16 }
 0x1cf   :  { %v2944_v50 = vsel %vm2928_vm5, %v10343_v22, 8  ;;  %v10511_v10 = vcvt.s32.f32 %v2969_v62  ;;  %vm2929_vm6 = vcmp.le.f32.partialorder %v10256_v52, %v2901_v42 }
 0x1d0   :  { %v10514_v61 = vsel %vm1151_vm0, %v2944_v50, 2147483647  ;;  %v2945_v40 = vsel %vm2929_vm6, %v10343_v22, 8  ;;  %v10521_v39 = vcvt.s32.f32 %v2984_v48 }
 0x1d1   :  { %v3074_v15 = vshra.s32 %v10514_v61, 16  ;;  %v10524_v54 = vsel %vm1151_vm0, %v2945_v40, 2147483647 }
 0x1d2   :  { %2972 = vmin.xlane.f32.xlu0 %v10511_v10  ;;  %2987 = vmin.xlane.f32.xlu1 %v10521_v39  ;;  %v3089_v50 = vshra.s32 %v10524_v54, 16 }
 0x1d3   :  { %v10526_v62 = vcvt.s32.f32 %v3074_v15 }
 0x1d4   :  { %v10531_v52 = vcvt.s32.f32 %v3089_v50 }
 0x1d6   :  { %3077 = vmin.xlane.f32.xlu0 %v10526_v62  ;;  %3092 = vmin.xlane.f32.xlu1 %v10531_v52  ;;  %v2883_v42 = vpop.xlane.xlu0 %2882 }
 0x1d7   :  { %vm2923_vm7 = vcmp.le.f32.partialorder %v10266_v9, %v2883_v42 }
 0x1d8   :  { %v2939_v48 = vsel %vm2923_vm7, %v10343_v22, 8 }
 0x1d9   :  { %v10537_v40 = vsel %vm1151_vm0, %v2939_v48, 2147483647 }
 0x1da   :  { %v2904_v15 = vpop.xlane.xlu1 %2903  ;;  %v2999_v13 = vshra.s32 %v10537_v40, 16 }
 0x1db   :  { %vm2930_vm8 = vcmp.le.f32.partialorder %v10274_v8, %v2904_v15 }
 0x1dc   :  { %v2946_v56 = vsel %vm2930_vm8, %v10343_v22, 8  ;;  %v10542_v46 = vcvt.s32.f32 %v2999_v13 }
 0x1dd   :  { %v10545_v50 = vsel %vm1151_vm0, %v2946_v56, 2147483647 }
 0x1de   :  { %3002 = vmin.xlane.f32.xlu0 %v10542_v46  ;;  %v3104_v9 = vshra.s32 %v10545_v50, 16 }
 0x1e0   :  { %v10549_v42 = vcvt.s32.f32 %v3104_v9 }
 0x1e2   :  { %3107 = vmin.xlane.f32.xlu1 %v10549_v42  ;;  %v2886_v48 = vpop.xlane.xlu0 %2885 }
 0x1e3   :  { %vm2924_vm9 = vcmp.le.f32.partialorder %v10284_v23, %v2886_v48 }
 0x1e4   :  { %v2940_v8 = vsel %vm2924_vm9, %v10343_v22, 8 }
 0x1e5   :  { %v10555_v15 = vsel %vm1151_vm0, %v2940_v8, 2147483647 }
 0x1e6   :  { %v2907_v13 = vpop.xlane.xlu1 %2906  ;;  %v3014_v56 = vshra.s32 %v10555_v15, 16 }
 0x1e7   :  { %vm2931_vm10 = vcmp.le.f32.partialorder %v10291_v36, %v2907_v13 }
 0x1e8   :  { %v2947_v53 = vsel %vm2931_vm10, %v10343_v22, 8  ;;  %v10560_v5 = vcvt.s32.f32 %v3014_v56 }
 0x1e9   :  { %v10563_v9 = vsel %vm1151_vm0, %v2947_v53, 2147483647 }
 0x1ea   :  { %12712 = vst [vmem:[#allocation52_spill] sm:$0xff] %v10560_v5  ;;  %12713 = vst [vmem:[#allocation61_spill] sm:$0xff] %v10563_v9  ;;  %3017 = vmin.xlane.f32.xlu0 %v10560_v5  ;;  %v3119_v23 = vshra.s32 %v10563_v9, 16 }
 0x1ec   :  { %v10567_v48 = vcvt.s32.f32 %v3119_v23 }
 0x1ee   :  { %12714 = vst [vmem:[#allocation71_spill] sm:$0xff] %v10567_v48  ;;  %3122 = vmin.xlane.f32.xlu1 %v10567_v48  ;;  %v2889_v8 = vpop.xlane.xlu0 %2888 }
 0x1ef   :  { %vm2925_vm11 = vcmp.le.f32.partialorder %v10301_v60, %v2889_v8 }
 0x1f0   :  { %v2941_v36 = vsel %vm2925_vm11, %v10343_v22, 8 }
 0x1f1   :  { %v10573_v13 = vsel %vm1151_vm0, %v2941_v36, 2147483647 }
 0x1f2   :  { %v2910_v56 = vpop.xlane.xlu1 %2909  ;;  %v3029_v53 = vshra.s32 %v10573_v13, 16 }
 0x1f3   :  { %vm2932_vm12 = vcmp.le.f32.partialorder %v10310_v37, %v2910_v56 }
 0x1f4   :  { %v2948_v5 = vsel %vm2932_vm12, %v10343_v22, 8  ;;  %v10578_v9 = vcvt.s32.f32 %v3029_v53 }
 0x1f5   :  { %v10581_v23 = vsel %vm1151_vm0, %v2948_v5, 2147483647 }
 0x1f6   :  { %12715 = vst [vmem:[#allocation36_spill] sm:$0xff] %v10578_v9  ;;  %3032 = vmin.xlane.f32.xlu0 %v10578_v9  ;;  %v2892_v60 = vpop.xlane.xlu0 %2891  ;;  %v3134_v8 = vshra.s32 %v10581_v23, 16 }
 0x1f7   :  { %vm2926_vm13 = vcmp.le.f32.partialorder %v10320_v34, %v2892_v60 }
 0x1f8   :  { %v2942_v36 = vsel %vm2926_vm13, %v10343_v22, 8  ;;  %v10587_v48 = vcvt.s32.f32 %v3134_v8 }
 0x1f9   :  { %v10590_v37 = vsel %vm1151_vm0, %v2942_v36, 2147483647 }
 0x1fa   :  { %12716 = vst [vmem:[#allocation34_spill] sm:$0xff] %v10587_v48  ;;  %12717 = vst [vmem:[#allocation43_spill] sm:$0xff] %v10590_v37  ;;  %3137 = vmin.xlane.f32.xlu1 %v10587_v48  ;;  %v2913_v56 = vpop.xlane.xlu1 %2912  ;;  %v2895_v53 = vpop.xlane.xlu0 %2894  ;;  %v3044_v5 = vshra.s32 %v10590_v37, 16 }
 0x1fb   :  { %vm2933_vm14 = vcmp.le.f32.partialorder %v10326_v58, %v2913_v56  ;;  %vm2927_vm15 = vcmp.le.f32.partialorder %v10328_v35, %v2895_v53 }
 0x1fc   :  { %v2949_v9 = vsel %vm2933_vm14, %v10343_v22, 8  ;;  %v2943_v34 = vsel %vm2927_vm15, %v10343_v22, 8  ;;  %v10598_v60 = vcvt.s32.f32 %v3044_v5 }
 0x1fd   :  { %v10601_v8 = vsel %vm1151_vm0, %v2949_v9, 2147483647  ;;  %v10604_v36 = vsel %vm1151_vm0, %v2943_v34, 2147483647 }
 0x1fe   :  { %12718 = vst [vmem:[#allocation55_spill] sm:$0xff] %v10598_v60  ;;  %v2916_v48 = vpop.xlane.xlu1 %2915  ;;  %3047 = vmin.xlane.f32.xlu0 %v10598_v60  ;;  %v2919_v37 = vpop.xlane.xlu0 %2918  ;;  %v3149_v58 = vshra.s32 %v10601_v8, 16  ;;  %v3059_v35 = vshra.s32 %v10604_v36, 16 }
 0x1ff   :  { %vm2934_vm1 = vcmp.le.f32.partialorder %v10334_v14, %v2916_v48  ;;  %vm2935_vm2 = vcmp.le.f32.partialorder %v10336_v27, %v2919_v37 }
 0x200   :  { %v2950_v56 = vsel %vm2934_vm1, %v10343_v22, 8  ;;  %v2951_v9 = vsel %vm2935_vm2, %v10343_v22, 8  ;;  %v10613_v53 = vcvt.s32.f32 %v3149_v58  ;;  %v10615_v5 = vcvt.s32.f32 %v3059_v35 }
 0x201   :  { %v10618_v34 = vsel %vm1151_vm0, %v2950_v56, 2147483647  ;;  %v10621_v60 = vsel %vm1151_vm0, %v2951_v9, 2147483647  ;;  %v1235_v58 = vand.u32 65535, %v10348_v59  ;;  %v1265_v9 = vand.u32 65535, %v10357_v28 }
 0x202   :  { %12719 = vst [vmem:[#allocation37_spill] sm:$0xff] %v10615_v5  ;;  %3152 = vmin.xlane.f32.xlu1 %v10613_v53  ;;  %3062 = vmin.xlane.f32.xlu0 %v10615_v5  ;;  %v3164_v14 = vshra.s32 %v10618_v34, 16  ;;  %v3179_v27 = vshra.s32 %v10621_v60, 16  ;;  %v1250_v22 = vand.u32 65535, %v10361_v7  ;;  %v1355_v28 = vand.u32 65535, %v10372_v21 }
 0x203   :  { %v1237_v56 = vcvt.s32.f32 %v1235_v58  ;;  %v1267_v5 = vcvt.s32.f32 %v1265_v9  ;;  %v1370_v58 = vand.u32 65535, %v10378_v47 }
 0x204   :  { %v10627_v48 = vcvt.s32.f32 %v3164_v14  ;;  %v10629_v37 = vcvt.s32.f32 %v3179_v27  ;;  %v1252_v59 = vcvt.s32.f32 %v1250_v22  ;;  %v1280_v22 = vand.u32 65535, %v10390_v57 }
 0x205   :  { %v1372_v9 = vcvt.s32.f32 %v1370_v58  ;;  %v1295_v57 = vand.u32 65535, %v10408_v44  ;;  %v1310_v44 = vand.u32 65535, %v10426_v0  ;;  %v1325_v0 = vand.u32 65535, %v10444_v32 }
 0x206   :  { %12720 = vst [vmem:[#allocation51_spill] sm:$0xff] %v10627_v48  ;;  %12721 = vst [vmem:[#allocation77_spill] sm:$0xff] %v10629_v37  ;;  %3167 = vmin.xlane.f32.xlu1 %v10627_v48  ;;  %3182 = vmin.xlane.f32.xlu0 %v10629_v37  ;;  %v1340_v32 = vand.u32 65535, %v10462_v2  ;;  %v1460_v2 = vand.u32 65535, %v10480_v45  ;;  %v2983_v45 = vand.u32 65535, %v10508_v31 }
 0x235   :  { %v10634_v35 = vpop.xlane.xlu1 %1239 }
 0x236   :  { %vm1241_vm3 = vcmp.eq.f32.partialorder %v10354_v55, %v10634_v35 }
 0x237   :  { %v1242_v14 = vsel %vm1241_vm3, %v1237_v56, inf }
 0x238   :  { %1243 = vmin.xlane.f32.xlu1 %v1242_v14  ;;  %v1357_v14 = vcvt.s32.f32 %v1355_v28 }
 0x23a   :  { %v10640_v27 = vpop.xlane.xlu1 %1269 }
 0x23b   :  { %v10642_v48 = vpop.xlane.xlu0 %1254  ;;  %vm1271_vm4 = vcmp.eq.f32.partialorder %v10369_v24, %v10640_v27  ;;  %v1385_v24 = vand.u32 65535, %v10396_v6  ;;  %v1400_v6 = vand.u32 65535, %v10414_v1  ;;  %v1415_v1 = vand.u32 65535, %v10432_v26 }
 0x23c   :  { %v1272_v37 = vsel %vm1271_vm4, %v1267_v5, inf  ;;  %vm1256_vm5 = vcmp.eq.f32.partialorder %v10375_v38, %v10642_v48  ;;  %v1430_v26 = vand.u32 65535, %v10450_v4  ;;  %v1445_v4 = vand.u32 65535, %v10468_v29 }
 0x23d   :  { %1273 = vmin.xlane.f32.xlu1 %v1272_v37  ;;  %v1257_v55 = vsel %vm1256_vm5, %v1252_v59, inf  ;;  %v1387_v37 = vcvt.s32.f32 %v1385_v24  ;;  %v1282_v59 = vcvt.s32.f32 %v1280_v22  ;;  %v1417_v22 = vcvt.s32.f32 %v1415_v1 }
 0x23e   :  { %1258 = vmin.xlane.f32.xlu0 %v1257_v55  ;;  %v1402_v55 = vcvt.s32.f32 %v1400_v6  ;;  %v1327_v6 = vcvt.s32.f32 %v1325_v0  ;;  %v2953_v29 = vand.u32 65535, %v10486_v3  ;;  %v2968_v3 = vand.u32 65535, %v10497_v18 }
 0x23f   :  { %v10650_v7 = vpop.xlane.xlu1 %1374  ;;  %v10652_v56 = vpop.xlane.xlu0 %1359 }
 0x240   :  { %vm1376_vm6 = vcmp.eq.f32.partialorder %v10393_v20, %v10650_v7  ;;  %vm1361_vm7 = vcmp.eq.f32.partialorder %v10387_v41, %v10652_v56 }
 0x241   :  { %v1377_v21 = vsel %vm1376_vm6, %v1372_v9, inf  ;;  %v1362_v38 = vsel %vm1361_vm7, %v1357_v14, inf  ;;  %v1297_v9 = vcvt.s32.f32 %v1295_v57 }
 0x242   :  { %1378 = vmin.xlane.f32.xlu1 %v1377_v21  ;;  %1363 = vmin.xlane.f32.xlu0 %v1362_v38  ;;  %v1312_v21 = vcvt.s32.f32 %v1310_v44  ;;  %v2955_v44 = vcvt.s32.f32 %v2953_v29  ;;  %v12723_v29 = vld [vmem:[#allocation52_spill] sm:$0xff] }
 0x243   :  { %v10660_v47 = vpop.xlane.xlu1 %1389  ;;  %v10662_v5 = vpop.xlane.xlu0 %1284 }
 0x244   :  { %vm1391_vm8 = vcmp.eq.f32.partialorder %v10411_v43, %v10660_v47  ;;  %vm1286_vm9 = vcmp.eq.f32.partialorder %v10405_v51, %v10662_v5 }
 0x245   :  { %v1392_v41 = vsel %vm1391_vm8, %v1387_v37, inf  ;;  %v1287_v20 = vsel %vm1286_vm9, %v1282_v59, inf  ;;  %v1432_v59 = vcvt.s32.f32 %v1430_v26  ;;  %v2985_v26 = vcvt.s32.f32 %v2983_v45 }
 0x246   :  { %1393 = vmin.xlane.f32.xlu1 %v1392_v41  ;;  %1288 = vmin.xlane.f32.xlu0 %v1287_v20  ;;  %v1447_v20 = vcvt.s32.f32 %v1445_v4  ;;  %v3103_v4 = vand.u32 65535, %v10545_v50 }
 0x247   :  { %v10670_v58 = vpop.xlane.xlu1 %1404  ;;  %v10672_v28 = vpop.xlane.xlu0 %1299 }
 0x248   :  { %vm1406_vm10 = vcmp.eq.f32.partialorder %v10429_v19, %v10670_v58  ;;  %vm1301_vm11 = vcmp.eq.f32.partialorder %v10423_v63, %v10672_v28 }
 0x249   :  { %v1407_v43 = vsel %vm1406_vm10, %v1402_v55, inf  ;;  %v1302_v51 = vsel %vm1301_vm11, %v1297_v9, inf  ;;  %v1342_v55 = vcvt.s32.f32 %v1340_v32 }
 0x24a   :  { %1408 = vmin.xlane.f32.xlu1 %v1407_v43  ;;  %1303 = vmin.xlane.f32.xlu0 %v1302_v51  ;;  %v1462_v43 = vcvt.s32.f32 %v1460_v2 }
 0x24b   :  { %v10680_v14 = vpop.xlane.xlu1 %1419  ;;  %v10682_v24 = vpop.xlane.xlu0 %1314 }
 0x24c   :  { %vm1421_vm12 = vcmp.eq.f32.partialorder %v10447_v33, %v10680_v14  ;;  %vm1316_vm13 = vcmp.eq.f32.partialorder %v10441_v17, %v10682_v24 }
 0x24d   :  { %v1422_v19 = vsel %vm1421_vm12, %v1417_v22, inf  ;;  %v1317_v63 = vsel %vm1316_vm13, %v1312_v21, inf  ;;  %v2970_v22 = vcvt.s32.f32 %v2968_v3  ;;  %v3073_v21 = vand.u32 65535, %v10514_v61 }
 0x24e   :  { %1423 = vmin.xlane.f32.xlu1 %v1422_v19  ;;  %1318 = vmin.xlane.f32.xlu0 %v1317_v63  ;;  %v3133_v3 = vand.u32 65535, %v10581_v23  ;;  %v3148_v23 = vand.u32 65535, %v10601_v8  ;;  %v12729_v8 = vld [vmem:[#allocation37_spill] sm:$0xff] }
 0x24f   :  { %v10690_v38 = vpop.xlane.xlu1 %1434  ;;  %v10692_v37 = vpop.xlane.xlu0 %1329  ;;  %v3075_v19 = vcvt.s32.f32 %v3073_v21  ;;  %v12726_v21 = vld [vmem:[#allocation43_spill] sm:$0xff] }
 0x250   :  { %vm1436_vm14 = vcmp.eq.f32.partialorder %v10465_v25, %v10690_v38  ;;  %vm1331_vm15 = vcmp.eq.f32.partialorder %v10459_v30, %v10692_v37 }
 0x251   :  { %v1437_v33 = vsel %vm1436_vm14, %v1432_v59, inf  ;;  %v1332_v17 = vsel %vm1331_vm15, %v1327_v6, inf }
 0x252   :  { %1438 = vmin.xlane.f32.xlu1 %v1437_v33  ;;  %1333 = vmin.xlane.f32.xlu0 %v1332_v17  ;;  %v3105_v33 = vcvt.s32.f32 %v3103_v4 }
 0x253   :  { %v10700_v57 = vpop.xlane.xlu1 %1449  ;;  %v10702_v41 = vpop.xlane.xlu0 %1344 }
 0x254   :  { %vm1451_vm1 = vcmp.eq.f32.partialorder %v10483_v49, %v10700_v57  ;;  %vm1346_vm2 = vcmp.eq.f32.partialorder %v10477_v11, %v10702_v41 }
 0x255   :  { %v1452_v25 = vsel %vm1451_vm1, %v1447_v20, inf  ;;  %v1347_v30 = vsel %vm1346_vm2, %v1342_v55, inf  ;;  %v12722_v55 = vld [vmem:[#allocation61_spill] sm:$0xff] }
 0x256   :  { %1453 = vmin.xlane.f32.xlu1 %v1452_v25  ;;  %1348 = vmin.xlane.f32.xlu0 %v1347_v30  ;;  %v3118_v50 = vand.u32 65535, %v12722_v55  ;;  %v12724_v30 = vld [vmem:[#allocation71_spill] sm:$0xff] }
 0x257   :  { %v10710_v9 = vpop.xlane.xlu1 %2957  ;;  %v10712_v1 = vpop.xlane.xlu0 %1464 }
 0x258   :  { %vm2959_vm3 = vcmp.eq.f32.partialorder %v10499_v16, %v10710_v9  ;;  %vm1466_vm4 = vcmp.eq.f32.partialorder %v10494_v12, %v10712_v1  ;;  %v3088_v12 = vand.u32 65535, %v10524_v54  ;;  %v3120_v25 = vcvt.s32.f32 %v3118_v50 }
 0x259   :  { %v2960_v49 = vsel %vm2959_vm3, %v2955_v44, inf  ;;  %v1467_v11 = vsel %vm1466_vm4, %v1462_v43, inf }
 0x25a   :  { %2961 = vmin.xlane.f32.xlu1 %v2960_v49  ;;  %1468 = vmin.xlane.f32.xlu0 %v1467_v11  ;;  %v3090_v63 = vcvt.s32.f32 %v3088_v12  ;;  %v12725_v49 = vld [vmem:[#allocation36_spill] sm:$0xff] }
 0x25b   :  { %v10720_v51 = vpop.xlane.xlu0 %2972  ;;  %v10725_v18 = vpop.xlane.xlu1 %2987 }
 0x25c   :  { %vm2974_vm5 = vcmp.eq.f32.partialorder %v10511_v10, %v10720_v51  ;;  %vm2989_vm6 = vcmp.eq.f32.partialorder %v10521_v39, %v10725_v18  ;;  %v2998_v39 = vand.u32 65535, %v10537_v40  ;;  %v3013_v40 = vand.u32 65535, %v10555_v15 }
 0x25d   :  { %v2975_v16 = vsel %vm2974_vm5, %v2970_v22, inf  ;;  %v2990_v0 = vsel %vm2989_vm6, %v2985_v26, inf  ;;  %v3028_v15 = vand.u32 65535, %v10573_v13  ;;  %v3135_v22 = vcvt.s32.f32 %v3133_v3  ;;  %v12727_v26 = vld [vmem:[#allocation34_spill] sm:$0xff] }
 0x25e   :  { %2976 = vmin.xlane.f32.xlu0 %v2975_v16  ;;  %2991 = vmin.xlane.f32.xlu1 %v2990_v0  ;;  %v3000_v6 = vcvt.s32.f32 %v2998_v39  ;;  %v3015_v20 = vcvt.s32.f32 %v3013_v40  ;;  %v3043_v16 = vand.u32 65535, %v12726_v21  ;;  %v1366_v21 = vcvt.f32.s32 %v10652_v56 }
 0x25f   :  { %v10730_v31 = vpop.xlane.xlu0 %3077  ;;  %v10734_v61 = vpop.xlane.xlu1 %3092  ;;  %v3030_v43 = vcvt.s32.f32 %v3028_v15  ;;  %v1291_v56 = vcvt.f32.s32 %v10662_v5 }
 0x260   :  { %vm3079_vm7 = vcmp.eq.f32.partialorder %v10526_v62, %v10730_v31  ;;  %vm3094_vm8 = vcmp.eq.f32.partialorder %v10531_v52, %v10734_v61  ;;  %v3045_v0 = vcvt.s32.f32 %v3043_v16  ;;  %v12732_v16 = vld [vmem:[#allocation42_spill] sm:$0xff] }
 0x261   :  { %v3080_v10 = vsel %vm3079_vm7, %v3075_v19, inf  ;;  %v3095_v54 = vsel %vm3094_vm8, %v3090_v63, inf  ;;  %v3058_v19 = vand.u32 65535, %v10604_v36 }
 0x262   :  { %3081 = vmin.xlane.f32.xlu0 %v3080_v10  ;;  %3096 = vmin.xlane.f32.xlu1 %v3095_v54  ;;  %v12728_v10 = vld [vmem:[#allocation55_spill] sm:$0xff] }
 0x263   :  { %v3060_v4 = vcvt.s32.f32 %v3058_v19 }
 0x267   :  { %v10739_v59 = vpop.xlane.xlu0 %3002 }
 0x268   :  { %vm3004_vm9 = vcmp.eq.f32.partialorder %v10542_v46, %v10739_v59 }
 0x269   :  { %v3005_v62 = vsel %vm3004_vm9, %v3000_v6, inf  ;;  %v3150_v6 = vcvt.s32.f32 %v3148_v23  ;;  %v12532_v23 = vmov 0.0  }
 0x26a   :  { %3006 = vmin.xlane.f32.xlu0 %v3005_v62  ;;  %v3163_v62 = vand.u32 65535, %v10618_v34  ;;  %v12730_v34 = vld [vmem:[#allocation51_spill] sm:$0xff] }
 0x26b   :  { %v10744_v32 = vpop.xlane.xlu1 %3107 }
 0x26c   :  { %vm3109_vm10 = vcmp.eq.f32.partialorder %v10549_v42, %v10744_v32  ;;  %v3165_v55 = vcvt.s32.f32 %v3163_v62 }
 0x26d   :  { %v3110_v52 = vsel %vm3109_vm10, %v3105_v33, inf  ;;  %v3178_v33 = vand.u32 65535, %v10621_v60  ;;  %v12731_v60 = vld [vmem:[#allocation77_spill] sm:$0xff] }
 0x26e   :  { %3111 = vmin.xlane.f32.xlu1 %v3110_v52 }
 0x26f   :  { %v3180_v50 = vcvt.s32.f32 %v3178_v33 }
 0x273   :  { %v10749_v17 = vpop.xlane.xlu0 %3017 }
 0x274   :  { %vm3019_vm11 = vcmp.eq.f32.partialorder %v12723_v29, %v10749_v17 }
 0x275   :  { %v3020_v46 = vsel %vm3019_vm11, %v3015_v20, inf }
 0x276   :  { %3021 = vmin.xlane.f32.xlu0 %v3020_v46  ;;  %v1246_v46 = vcvt.f32.s32 %v10634_v35 }
 0x277   :  { %v10754_v2 = vpop.xlane.xlu1 %3122 }
 0x278   :  { %vm3124_vm12 = vcmp.eq.f32.partialorder %v12724_v30, %v10754_v2  ;;  %v1247_v30 = vshll.u32 %v1246_v46, 16 }
 0x279   :  { %v3125_v42 = vsel %vm3124_vm12, %v3120_v25, inf }
 0x27a   :  { %3126 = vmin.xlane.f32.xlu1 %v3125_v42  ;;  %v1276_v42 = vcvt.f32.s32 %v10640_v27 }
 0x27f   :  { %v10759_v44 = vpop.xlane.xlu0 %3032 }
 0x280   :  { %vm3034_vm13 = vcmp.eq.f32.partialorder %v12725_v49, %v10759_v44  ;;  %v1381_v49 = vcvt.f32.s32 %v10650_v7  ;;  %v1396_v7 = vcvt.f32.s32 %v10660_v47 }
 0x281   :  { %v3035_v11 = vsel %vm3034_vm13, %v3030_v43, inf  ;;  %v1261_v43 = vcvt.f32.s32 %v10642_v48 }
 0x282   :  { %3036 = vmin.xlane.f32.xlu0 %v3035_v11  ;;  %v1397_v5 = vshll.u32 %v1396_v7, 16 }
 0x283   :  { %v10764_v45 = vpop.xlane.xlu1 %3137 }
 0x284   :  { %vm3139_vm14 = vcmp.eq.f32.partialorder %v12727_v26, %v10764_v45 }
 0x285   :  { %v3140_v12 = vsel %vm3139_vm14, %v3135_v22, inf  ;;  %v1277_v22 = vshll.u32 %v1276_v42, 16  ;;  %v1306_v42 = vcvt.f32.s32 %v10672_v28 }
 0x286   :  { %3141 = vmin.xlane.f32.xlu1 %v3140_v12 }
 0x287   :  { %v10769_v13 = vpop.xlane.xlu0 %3047  ;;  %v1307_v7 = vshll.u32 %v1306_v42, 16 }
 0x288   :  { %vm3049_vm15 = vcmp.eq.f32.partialorder %v12728_v10, %v10769_v13  ;;  %v12733_v10 = vld [vmem:[#allocation39_spill] sm:$0xff] }
 0x289   :  { %v3050_v63 = vsel %vm3049_vm15, %v3045_v0, inf  ;;  %v1262_v0 = vshll.u32 %v1261_v43, 16 }
 0x28a   :  { %3051 = vmin.xlane.f32.xlu0 %v3050_v63  ;;  %v1382_v63 = vshll.u32 %v1381_v49, 16 }
 0x28b   :  { %v10775_v54 = vpop.xlane.xlu1 %3152  ;;  %v10777_v39 = vpop.xlane.xlu0 %3062 }
 0x28c   :  { %vm3154_vm1 = vcmp.eq.f32.partialorder %v10613_v53, %v10775_v54  ;;  %vm3064_vm2 = vcmp.eq.f32.partialorder %v12729_v8, %v10777_v39 }
 0x28d   :  { %v3155_v36 = vsel %vm3154_vm1, %v3150_v6, inf  ;;  %v3065_v52 = vsel %vm3064_vm2, %v3060_v4, inf  ;;  %v1367_v4 = vshll.u32 %v1366_v21, 16 }
 0x28e   :  { %3156 = vmin.xlane.f32.xlu1 %v3155_v36  ;;  %3066 = vmin.xlane.f32.xlu0 %v3065_v52 }
 0x28f   :  { %v10785_v40 = vpop.xlane.xlu1 %3167  ;;  %v10787_v20 = vpop.xlane.xlu0 %3182 }
 0x290   :  { %vm3169_vm3 = vcmp.eq.f32.partialorder %v12730_v34, %v10785_v40  ;;  %vm3184_vm4 = vcmp.eq.f32.partialorder %v12731_v60, %v10787_v20 }
 0x291   :  { %v3170_v53 = vsel %vm3169_vm3, %v3165_v55, inf  ;;  %v3185_v29 = vsel %vm3184_vm4, %v3180_v50, inf  ;;  %v12734_v50 = vld [vmem:[#allocation45_spill] sm:$0xff] }
 0x292   :  { %3171 = vmin.xlane.f32.xlu1 %v3170_v53  ;;  %3186 = vmin.xlane.f32.xlu0 %v3185_v29  ;;  %v12735_v29 = vld [vmem:[#allocation44_spill] sm:$0xff] }
 0x2c1   :  { %v1244_v25 = vpop.xlane.xlu1 %1243 }
 0x2c2   :  { %v1245_v15 = vcvt.f32.s32 %v1244_v25  ;;  %v1292_v25 = vshll.u32 %v1291_v56, 16 }
 0x2c4   :  { %v1248_v3 = vadd.s32 %v1247_v30, %v1245_v15  ;;  %v1411_v30 = vcvt.f32.s32 %v10670_v58 }
 0x2c6   :  { %v1274_v11 = vpop.xlane.xlu1 %1273  ;;  %vm1474_vm5 = vcmp.eq.s32.totalorder %v12732_v16, %v1248_v3 }
 0x2c7   :  { %v1275_v26 = vcvt.f32.s32 %v1274_v11  ;;  %v1259_v12 = vpop.xlane.xlu0 %1258  ;;  %v10800_v19 = vsel %vm1474_vm5, 1.0, %v12532_v23 }
 0x2c8   :  { %v1260_v35 = vcvt.f32.s32 %v1259_v12  ;;  %v1618_v48 = vmul.f32 %v10800_v19, %v12733_v10 }
 0x2c9   :  { %v1278_v27 = vadd.s32 %v1277_v22, %v1275_v26  ;;  %v1426_v22 = vcvt.f32.s32 %v10680_v14  ;;  %v1321_v14 = vcvt.f32.s32 %v10682_v24 }
 0x2ca   :  { %v1263_v6 = vadd.s32 %v1262_v0, %v1260_v35  ;;  %v1634_v8 = vsel %vm1151_vm0, %v1618_v48, 0.0  ;;  %v12736_v0 = vld [vmem:[#allocation47_spill] sm:$0xff] }
 0x2cb   :  { %vm1476_vm6 = vcmp.eq.s32.totalorder %v12732_v16, %v1278_v27  ;;  %v1379_v62 = vpop.xlane.xlu1 %1378  ;;  %v1364_v33 = vpop.xlane.xlu0 %1363  ;;  %1635 = vadd.xlane.f32.xlu1 %v1634_v8  ;;  %v12737_v27 = vld [vmem:[#allocation41_spill] sm:$0xff] }
 0x2cc   :  { %vm1475_vm7 = vcmp.eq.s32.totalorder %v12732_v16, %v1263_v6  ;;  %v1380_v36 = vcvt.f32.s32 %v1379_v62  ;;  %v1365_v52 = vcvt.f32.s32 %v1364_v33  ;;  %v10810_v55 = vsel %vm1476_vm6, 1.0, %v12532_v23 }
 0x2cd   :  { %v1620_v47 = vmul.f32 %v10810_v55, %v12734_v50  ;;  %v10815_v34 = vsel %vm1475_vm7, 1.0, %v12532_v23 }
 0x2ce   :  { %v1383_v60 = vadd.s32 %v1382_v63, %v1380_v36  ;;  %v1368_v53 = vadd.s32 %v1367_v4, %v1365_v52  ;;  %v1619_v46 = vmul.f32 %v10815_v34, %v12735_v29  ;;  %v1412_v63 = vshll.u32 %v1411_v30, 16 }
 0x2cf   :  { %v1394_v15 = vpop.xlane.xlu1 %1393  ;;  %v1289_v43 = vpop.xlane.xlu0 %1288  ;;  %v1640_v3 = vsel %vm1151_vm0, %v1620_v47, 0.0  ;;  %v1427_v47 = vshll.u32 %v1426_v22, 16  ;;  %v1336_v30 = vcvt.f32.s32 %v10692_v37 }
 0x2d0   :  { %vm1483_vm8 = vcmp.eq.s32.totalorder %v12732_v16, %v1383_v60  ;;  %vm1482_vm9 = vcmp.eq.s32.totalorder %v12732_v16, %v1368_v53  ;;  %v1395_v49 = vcvt.f32.s32 %v1394_v15  ;;  %v1290_v11 = vcvt.f32.s32 %v1289_v43  ;;  %1641 = vadd.xlane.f32.xlu1 %v1640_v3  ;;  %v12738_v60 = vld [vmem:[#allocation50_spill] sm:$0xff]  ;;  %v12739_v43 = vld [vmem:[#allocation53_spill] sm:$0xff] }
 0x2d1   :  { %v1637_v21 = vsel %vm1151_vm0, %v1619_v46, 0.0  ;;  %v10827_v26 = vsel %vm1483_vm8, 1.0, %v12532_v23  ;;  %v10830_v58 = vsel %vm1482_vm9, 1.0, %v12532_v23  ;;  %v1322_v46 = vshll.u32 %v1321_v14, 16 }
 0x2d2   :  { %v1398_v28 = vadd.s32 %v1397_v5, %v1395_v49  ;;  %v1293_v12 = vadd.s32 %v1292_v25, %v1290_v11  ;;  %1638 = vadd.xlane.f32.xlu0 %v1637_v21  ;;  %v1627_v35 = vmul.f32 %v10827_v26, %v12736_v0  ;;  %v1626_v48 = vmul.f32 %v10830_v58, %v12737_v27 }
 0x2d3   :  { %v1409_v6 = vpop.xlane.xlu1 %1408  ;;  %v1304_v4 = vpop.xlane.xlu0 %1303  ;;  %v1441_v25 = vcvt.f32.s32 %v10690_v38  ;;  %v1351_v14 = vcvt.f32.s32 %v10702_v41  ;;  %vm1536_vm8 = vcmask 326656   ;;  %vm1803_vm9 = vcmask 1043456  }
 0x2d4   :  { %vm1484_vm10 = vcmp.eq.s32.totalorder %v12732_v16, %v1398_v28  ;;  %vm1477_vm11 = vcmp.eq.s32.totalorder %v12732_v16, %v1293_v12  ;;  %v1410_v56 = vcvt.f32.s32 %v1409_v6  ;;  %v1305_v62 = vcvt.f32.s32 %v1304_v4 }
 0x2d5   :  { %v1661_v33 = vsel %vm1151_vm0, %v1627_v35, 0.0  ;;  %v1658_v8 = vsel %vm1151_vm0, %v1626_v48, 0.0  ;;  %v10842_v36 = vsel %vm1484_vm10, 1.0, %v12532_v23  ;;  %v10845_v52 = vsel %vm1477_vm11, 1.0, %v12532_v23  ;;  %v12740_v35 = vld [vmem:[#allocation58_spill] sm:$0xff] }
 0x2d6   :  { %v1413_v24 = vadd.s32 %v1412_v63, %v1410_v56  ;;  %v1308_v5 = vadd.s32 %v1307_v7, %v1305_v62  ;;  %1662 = vadd.xlane.f32.xlu1 %v1661_v33  ;;  %1659 = vadd.xlane.f32.xlu0 %v1658_v8  ;;  %v1628_v53 = vmul.f32 %v10842_v36, %v12738_v60  ;;  %v1442_v63 = vshll.u32 %v1441_v25, 16  ;;  %v12741_v56 = vld [vmem:[#allocation64_spill] sm:$0xff]  ;;  %v12742_v25 = vld [vmem:[#allocation75_spill] sm:$0xff] }
 0x2d7   :  { %v1424_v42 = vpop.xlane.xlu1 %1423  ;;  %v1319_v15 = vpop.xlane.xlu0 %1318  ;;  %v1621_v3 = vmul.f32 %v10845_v52, %v12739_v43  ;;  %v1337_v7 = vshll.u32 %v1336_v30, 16 }
 0x2d8   :  { %vm1485_vm12 = vcmp.eq.s32.totalorder %v12732_v16, %v1413_v24  ;;  %vm1478_vm13 = vcmp.eq.s32.totalorder %v12732_v16, %v1308_v5  ;;  %v1425_v49 = vcvt.f32.s32 %v1424_v42  ;;  %v1320_v11 = vcvt.f32.s32 %v1319_v15 }
 0x2d9   :  { %v1664_v22 = vsel %vm1151_vm0, %v1628_v53, 0.0  ;;  %v1643_v21 = vsel %vm1151_vm0, %v1621_v3, 0.0  ;;  %v10858_v28 = vsel %vm1485_vm12, 1.0, %v12532_v23  ;;  %v10861_v38 = vsel %vm1478_vm13, 1.0, %v12532_v23  ;;  %v12743_v3 = vld [vmem:[#allocation68_spill] sm:$0xff] }
 0x2da   :  { %v1428_v37 = vadd.s32 %v1427_v47, %v1425_v49  ;;  %v1323_v12 = vadd.s32 %v1322_v46, %v1320_v11  ;;  %1665 = vadd.xlane.f32.xlu1 %v1664_v22  ;;  %1644 = vadd.xlane.f32.xlu0 %v1643_v21  ;;  %v1629_v48 = vmul.f32 %v10858_v28, %v12740_v35  ;;  %v1456_v42 = vcvt.f32.s32 %v10700_v57 }
 0x2db   :  { %v1439_v6 = vpop.xlane.xlu1 %1438  ;;  %v1334_v4 = vpop.xlane.xlu0 %1333  ;;  %v1622_v62 = vmul.f32 %v10861_v38, %v12741_v56  ;;  %v1352_v11 = vshll.u32 %v1351_v14, 16 }
 0x2dc   :  { %vm1486_vm14 = vcmp.eq.s32.totalorder %v12732_v16, %v1428_v37  ;;  %vm1479_vm15 = vcmp.eq.s32.totalorder %v12732_v16, %v1323_v12  ;;  %v1440_v33 = vcvt.f32.s32 %v1439_v6  ;;  %v1335_v8 = vcvt.f32.s32 %v1334_v4 }
 0x2dd   :  { %v1667_v47 = vsel %vm1151_vm0, %v1629_v48, 0.0  ;;  %v1646_v24 = vsel %vm1151_vm0, %v1622_v62, 0.0  ;;  %v10873_v5 = vsel %vm1486_vm14, 1.0, %v12532_v23  ;;  %v10876_v41 = vsel %vm1479_vm15, 1.0, %v12532_v23  ;;  %v12744_v48 = vld [vmem:[#allocation40_spill] sm:$0xff] }
 0x2de   :  { %v1443_v53 = vadd.s32 %v1442_v63, %v1440_v33  ;;  %v1338_v46 = vadd.s32 %v1337_v7, %v1335_v8  ;;  %1668 = vadd.xlane.f32.xlu1 %v1667_v47  ;;  %1647 = vadd.xlane.f32.xlu0 %v1646_v24  ;;  %v1630_v30 = vmul.f32 %v10873_v5, %v12742_v25  ;;  %v12745_v7 = vld [vmem:[#allocation38_spill] sm:$0xff]  ;;  %v1457_v33 = vshll.u32 %v1456_v42, 16 }
 0x2df   :  { %v1349_v15 = vpop.xlane.xlu0 %1348  ;;  %v1623_v49 = vmul.f32 %v10876_v41, %v12743_v3  ;;  %v1454_v22 = vpop.xlane.xlu1 %1453  ;;  %v1885_v63 = vmul.f32 %v10815_v34, %v12744_v48  ;;  %v1884_v57 = vmul.f32 %v10800_v19, %v12745_v7  ;;  %v1471_v8 = vcvt.f32.s32 %v10712_v1 }
 0x2e0   :  { %vm1487_vm1 = vcmp.eq.s32.totalorder %v12732_v16, %v1443_v53  ;;  %vm1480_vm2 = vcmp.eq.s32.totalorder %v12732_v16, %v1338_v46  ;;  %v1350_v21 = vcvt.f32.s32 %v1349_v15  ;;  %v1670_v37 = vsel %vm1151_vm0, %v1630_v30, 0.0  ;;  %v12746_v46 = vld [vmem:[#allocation81_spill] sm:$0xff]  ;;  %v12747_v15 = vld [vmem:[#allocation74_spill] sm:$0xff] }
 0x2e1   :  { %v1649_v12 = vsel %vm1151_vm0, %v1623_v49, 0.0  ;;  %v10892_v14 = vsel %vm1487_vm1, 1.0, %v12532_v23  ;;  %v10895_v6 = vsel %vm1480_vm2, 1.0, %v12532_v23  ;;  %v1455_v4 = vcvt.f32.s32 %v1454_v22 }
 0x2e2   :  { %1671 = vadd.xlane.f32.xlu1 %v1670_v37  ;;  %1650 = vadd.xlane.f32.xlu0 %v1649_v12  ;;  %v1353_v62 = vadd.s32 %v1352_v11, %v1350_v21  ;;  %v1903_v24 = vsel %vm1151_vm0, %v1885_v63, 0.0  ;;  %v1900_v53 = vsel %vm1151_vm0, %v1884_v57, 0.0  ;;  %v1631_v30 = vmul.f32 %v10892_v14, %v12746_v46  ;;  %v12748_v21 = vld [vmem:[#allocation48_spill] sm:$0xff]  ;;  %v12749_v63 = vld [vmem:[#allocation46_spill] sm:$0xff] }
 0x2e3   :  { %v1469_v47 = vpop.xlane.xlu0 %1468  ;;  %v1624_v49 = vmul.f32 %v10895_v6, %v12747_v15  ;;  %v1458_v37 = vadd.s32 %v1457_v33, %v1455_v4  ;;  %v1472_v42 = vshll.u32 %v1471_v8, 16  ;;  %v1892_v12 = vmul.f32 %v10830_v58, %v12748_v21  ;;  %v12750_v8 = vld [vmem:[#allocation49_spill] sm:$0xff] }
 0x2e4   :  { %vm1481_vm3 = vcmp.eq.s32.totalorder %v12732_v16, %v1353_v62  ;;  %v1470_v11 = vcvt.f32.s32 %v1469_v47  ;;  %v1673_v1 = vsel %vm1151_vm0, %v1631_v30, 0.0  ;;  %v1886_v57 = vmul.f32 %v10810_v55, %v12749_v63 }
 0x2e5   :  { %v1652_v22 = vsel %vm1151_vm0, %v1624_v49, 0.0  ;;  %vm1488_vm4 = vcmp.eq.s32.totalorder %v12732_v16, %v1458_v37  ;;  %v1924_v62 = vsel %vm1151_vm0, %v1892_v12, 0.0  ;;  %v1893_v47 = vmul.f32 %v10827_v26, %v12750_v8  ;;  %v12758_v8 = vld [vmem:[#allocation73_spill] sm:$0xff] }
 0x2e6   :  { %1904 = vadd.xlane.f32.xlu1 %v1903_v24  ;;  %1901 = vadd.xlane.f32.xlu0 %v1900_v53  ;;  %v10912_v24 = vsel %vm1481_vm3, 1.0, %v12532_v23  ;;  %v1473_v4 = vadd.s32 %v1472_v42, %v1470_v11  ;;  %v1906_v33 = vsel %vm1151_vm0, %v1886_v57, 0.0  ;;  %v12751_v53 = vld [vmem:[#allocation84_spill] sm:$0xff]  ;;  %v10922_v49 = vsel %vm1488_vm4, 1.0, %v12532_v23  ;;  %v12752_v42 = vld [vmem:[#allocation87_spill] sm:$0xff] }
 0x2e7   :  { %v1625_v30 = vmul.f32 %v10912_v24, %v12751_v53  ;;  %v1927_v37 = vsel %vm1151_vm0, %v1893_v47, 0.0  ;;  %v12755_v53 = vld [vmem:[#allocation91_spill] sm:$0xff] }
 0x2e8   :  { %vm1489_vm5 = vcmp.eq.s32.totalorder %v12732_v16, %v1473_v4  ;;  %v12754_v4 = vld [vmem:[#allocation54_spill] sm:$0xff] }
 0x2e9   :  { %v1655_v11 = vsel %vm1151_vm0, %v1625_v30, 0.0  ;;  %v10932_v57 = vsel %vm1489_vm5, 1.0, %v12532_v23  ;;  %v1894_v47 = vmul.f32 %v10842_v36, %v12754_v4 }
 0x2ea   :  { %1674 = vadd.xlane.f32.xlu1 %v1673_v1  ;;  %1653 = vadd.xlane.f32.xlu0 %v1652_v22  ;;  %v1632_v1 = vmul.f32 %v10922_v49, %v12752_v42  ;;  %v12753_v22 = vld [vmem:[#allocation57_spill] sm:$0xff]  ;;  %v1633_v30 = vmul.f32 %v10932_v57, %v12755_v53  ;;  %v12760_v53 = vld [vmem:[#allocation59_spill] sm:$0xff] }
 0x2eb   :  { %v1887_v12 = vmul.f32 %v10845_v52, %v12753_v22  ;;  %v1930_v42 = vsel %vm1151_vm0, %v1894_v47, 0.0  ;;  %v12757_v22 = vld [vmem:[#allocation60_spill] sm:$0xff] }
 0x2ee   :  { %1925 = vadd.xlane.f32.xlu1 %v1924_v62  ;;  %1907 = vadd.xlane.f32.xlu0 %v1906_v33  ;;  %v1676_v62 = vsel %vm1151_vm0, %v1632_v1, 0.0  ;;  %v1909_v33 = vsel %vm1151_vm0, %v1887_v12, 0.0  ;;  %v1895_v1 = vmul.f32 %v10858_v28, %v12757_v22  ;;  %v12762_v22 = vld [vmem:[#allocation80_spill] sm:$0xff] }
 0x2f0   :  { %v1933_v4 = vsel %vm1151_vm0, %v1895_v1, 0.0 }
 0x2f2   :  { %1928 = vadd.xlane.f32.xlu0 %v1927_v37  ;;  %1656 = vadd.xlane.f32.xlu1 %v1655_v11  ;;  %v1679_v37 = vsel %vm1151_vm0, %v1633_v30, 0.0  ;;  %v12756_v11 = vld [vmem:[#allocation67_spill] sm:$0xff] }
 0x2f3   :  { %v1888_v23 = vmul.f32 %v10861_v38, %v12756_v11 }
 0x2f5   :  { %v1912_v12 = vsel %vm1151_vm0, %v1888_v23, 0.0 }
 0x2f6   :  { %1677 = vadd.xlane.f32.xlu0 %v1676_v62  ;;  %1910 = vadd.xlane.f32.xlu1 %v1909_v33  ;;  %v1889_v62 = vmul.f32 %v10876_v41, %v12758_v8  ;;  %v12759_v33 = vld [vmem:[#allocation79_spill] sm:$0xff] }
 0x2f7   :  { %v1896_v47 = vmul.f32 %v10873_v5, %v12759_v33 }
 0x2f8   :  { %v1915_v30 = vsel %vm1151_vm0, %v1889_v62, 0.0 }
 0x2f9   :  { %v1936_v11 = vsel %vm1151_vm0, %v1896_v47, 0.0 }
 0x2fa   :  { %1931 = vadd.xlane.f32.xlu0 %v1930_v42  ;;  %1680 = vadd.xlane.f32.xlu1 %v1679_v37  ;;  %v2142_v42 = vmul.f32 %v10800_v19, %v12760_v53  ;;  %v12761_v37 = vld [vmem:[#allocation63_spill] sm:$0xff]  ;;  %v12764_v53 = vld [vmem:[#allocation66_spill] sm:$0xff] }
 0x2fb   :  { %v2143_v23 = vmul.f32 %v10815_v34, %v12761_v37  ;;  %v2144_v34 = vmul.f32 %v10810_v55, %v12764_v53  ;;  %v2962_v55 = vpop.xlane.xlu1 %2961 }
 0x2fc   :  { %v2158_v1 = vsel %vm1151_vm0, %v2142_v42, 0.0  ;;  %v2963_v53 = vcvt.f32.s32 %v2962_v55 }
 0x2fd   :  { %v2161_v8 = vsel %vm1151_vm0, %v2143_v23, 0.0  ;;  %v2164_v42 = vsel %vm1151_vm0, %v2144_v34, 0.0 }
 0x2fe   :  { %1913 = vadd.xlane.f32.xlu0 %v1912_v12  ;;  %1934 = vadd.xlane.f32.xlu1 %v1933_v4  ;;  %v1890_v12 = vmul.f32 %v10895_v6, %v12762_v22  ;;  %v12763_v4 = vld [vmem:[#allocation82_spill] sm:$0xff]  ;;  %v12766_v22 = vld [vmem:[#allocation69_spill] sm:$0xff] }
 0x2ff   :  { %v1897_v62 = vmul.f32 %v10892_v14, %v12763_v4 }
 0x300   :  { %v1918_v47 = vsel %vm1151_vm0, %v1890_v12, 0.0 }
 0x301   :  { %v1939_v19 = vsel %vm1151_vm0, %v1897_v62, 0.0  ;;  %v2964_v62 = vcvt.f32.s32 %v10710_v9 }
 0x302   :  { %1916 = vadd.xlane.f32.xlu0 %v1915_v30  ;;  %1937 = vadd.xlane.f32.xlu1 %v1936_v11  ;;  %v12765_v11 = vld [vmem:[#allocation65_spill] sm:$0xff] }
 0x303   :  { %v2150_v30 = vmul.f32 %v10830_v58, %v12765_v11  ;;  %v2979_v58 = vcvt.f32.s32 %v10720_v51  ;;  %v2965_v51 = vshll.u32 %v2964_v62, 16 }
 0x305   :  { %v2182_v23 = vsel %vm1151_vm0, %v2150_v30, 0.0  ;;  %v12768_v30 = vld [vmem:[#allocation90_spill] sm:$0xff] }
 0x306   :  { %2159 = vadd.xlane.f32.xlu0 %v2158_v1  ;;  %2162 = vadd.xlane.f32.xlu1 %v2161_v8  ;;  %v2151_v8 = vmul.f32 %v10827_v26, %v12766_v22  ;;  %v12767_v1 = vld [vmem:[#allocation86_spill] sm:$0xff]  ;;  %v1898_v11 = vmul.f32 %v10922_v49, %v12768_v30  ;;  %v12769_v26 = vld [vmem:[#allocation72_spill] sm:$0xff] }
 0x307   :  { %v1891_v12 = vmul.f32 %v10912_v24, %v12767_v1  ;;  %v2145_v22 = vmul.f32 %v10845_v52, %v12769_v26  ;;  %v2980_v1 = vshll.u32 %v2979_v58, 16  ;;  %v12770_v30 = vld [vmem:[#allocation76_spill] sm:$0xff]  ;;  %v12771_v52 = vld [vmem:[#allocation94_spill] sm:$0xff] }
 0x308   :  { %v2152_v4 = vmul.f32 %v10842_v36, %v12770_v30  ;;  %v1899_v55 = vmul.f32 %v10932_v57, %v12771_v52  ;;  %v1525_v36 = vld [vmem:[%s9331_s8 + $0x8] sm:$0xff] }
 0x309   :  { %v1921_v34 = vsel %vm1151_vm0, %v1891_v12, 0.0  ;;  %v2167_v12 = vsel %vm1151_vm0, %v2145_v22, 0.0  ;;  %v3084_v22 = vcvt.f32.s32 %v10730_v31  ;;  %v1522_v31 = vld [vmem:[%s9291_s5] sm:$0xff] }
 0x30a   :  { %1919 = vadd.xlane.f32.xlu0 %v1918_v47  ;;  %1940 = vadd.xlane.f32.xlu1 %v1939_v19  ;;  %v2977_v47 = vpop.xlane.xlu0 %2976  ;;  %v2185_v19 = vsel %vm1151_vm0, %v2151_v8, 0.0  ;;  %v1942_v8 = vsel %vm1151_vm0, %v1898_v11, 0.0  ;;  %v2994_v11 = vcvt.f32.s32 %v10725_v18  ;;  %v1945_v52 = vsel %vm1151_vm0, %v1899_v55, 0.0  ;;  %v1524_v18 = vld [vmem:[%s9331_s8] sm:$0xff]  ;;  %v12774_v55 = vld [vmem:[#allocation89_spill] sm:$0xff] }
 0x30b   :  { %v2978_v9 = vcvt.f32.s32 %v2977_v47  ;;  %v1526_v47 = vld [vmem:[%s9331_s8 + $0x10] sm:$0xff]  ;;  %8503 = vmatprep.mubr.msk.f32.mxu0 %vm1536_vm8, %v1522_v31 }
 0x30d   :  { %v2981_v62 = vadd.s32 %v2980_v1, %v2978_v9  ;;  %v3099_v9 = vcvt.f32.s32 %v10734_v61  ;;  %v12776_v61 = vmov 0.0  }
 0x30e   :  { %2165 = vadd.xlane.f32.xlu0 %v2164_v42  ;;  %2183 = vadd.xlane.f32.xlu1 %v2182_v23  ;;  %v1528_v42 = vld [vmem:[%s9331_s8 + $0x20] sm:$0xff]  ;;  %v1527_v23 = vld [vmem:[%s9331_s8 + $0x18] sm:$0xff]  ;;  %v3082_v58 = vpop.xlane.xlu0 %3081  ;;  %s9272_s8 = smov 112  }
 0x30f   :  { %8493 = vmatprep.subr.mxu0 %v1528_v42  ;;  %vm3193_vm7 = vcmp.eq.s32.totalorder %v12732_v16, %v2981_v62 }
 0x310   :  { %8494 = vmatpush3.msra.mxu0 %v1528_v42  ;;  %v2188_v42 = vsel %vm1151_vm0, %v2152_v4, 0.0  ;;  %v3083_v4 = vcvt.f32.s32 %v3082_v58 }
 0x311   :  { %8495 = vmatprep.subr.mxu0 %v1527_v23 }
 0x312   :  { %2186 = vadd.xlane.f32.xlu0 %v2185_v19  ;;  %1922 = vadd.xlane.f32.xlu1 %v1921_v34  ;;  %v2966_v19 = vadd.s32 %v2965_v51, %v2963_v53  ;;  %v2992_v34 = vpop.xlane.xlu1 %2991  ;;  %v12772_v53 = vld [vmem:[#allocation83_spill] sm:$0xff] }
 0x313   :  { %8496 = vmatpush3.msra.mxu0 %v1527_v23  ;;  %v2146_v51 = vmul.f32 %v10861_v38, %v12772_v53  ;;  %v2993_v1 = vcvt.f32.s32 %v2992_v34  ;;  %v2995_v23 = vshll.u32 %v2994_v11, 16  ;;  %v3085_v38 = vshll.u32 %v3084_v22, 16  ;;  %v12775_v53 = vld [vmem:[#allocation92_spill] sm:$0xff]  ;;  %v1523_v11 = vld [vmem:[%s9291_s5 + $0x8] sm:$0xff]  ;;  %s9266_s5 = smov 96  }
 0x314   :  { %8497 = vmatprep.subr.mxu0 %v1526_v47  ;;  %vm3192_vm6 = vcmp.eq.s32.totalorder %v12732_v16, %v2966_v19  ;;  %v2154_v34 = vmul.f32 %v10873_v5, %v12775_v53  ;;  %v11024_v22 = vsel %vm3193_vm7, 1.0, %v12776_v61 }
 0x315   :  { %8498 = vmatpush3.msra.mxu0 %v1526_v47  ;;  %v2147_v47 = vmul.f32 %v10876_v41, %v12774_v55  ;;  %v11019_v41 = vsel %vm3192_vm6, 1.0, %v12776_v61  ;;  %v2996_v58 = vadd.s32 %v2995_v23, %v2993_v1  ;;  %v3336_v1 = vmul.f32 %v11024_v22, %v12735_v29 }
 0x316   :  { %1943 = vadd.xlane.f32.xlu0 %v1942_v8  ;;  %2168 = vadd.xlane.f32.xlu1 %v2167_v12  ;;  %v12773_v8 = vld [vmem:[#allocation85_spill] sm:$0xff]  ;;  %v2194_v31 = vsel %vm1151_vm0, %v2154_v34, 0.0  ;;  %v3335_v62 = vmul.f32 %v11019_v41, %v12733_v10 }
 0x317   :  { %v2153_v12 = vmul.f32 %v10858_v28, %v12773_v8  ;;  %8499 = vmatprep.subr.mxu0 %v1525_v36  ;;  %v3097_v28 = vpop.xlane.xlu1 %3096  ;;  %v2173_v19 = vsel %vm1151_vm0, %v2147_v47, 0.0  ;;  %vm3194_vm10 = vcmp.eq.s32.totalorder %v12732_v16, %v2996_v58  ;;  %v3354_v10 = vsel %vm1151_vm0, %v3336_v1, 0.0  ;;  %v12778_v47 = vld [vmem:[#allocation96_spill] sm:$0xff] }
 0x318   :  { %8500 = vmatpush3.msra.mxu0 %v1525_v36  ;;  %v3086_v36 = vadd.s32 %v3085_v38, %v3083_v4  ;;  %v3098_v5 = vcvt.f32.s32 %v3097_v28  ;;  %v3114_v38 = vcvt.f32.s32 %v10744_v32  ;;  %v12777_v28 = vld [vmem:[#allocation93_spill] sm:$0xff]  ;;  %v11046_v34 = vsel %vm3194_vm10, 1.0, %v12776_v61 }
 0x319   :  { %v2191_v8 = vsel %vm1151_vm0, %v2153_v12, 0.0  ;;  %8501 = vmatprep.subr.mxu0 %v1524_v18  ;;  %v3009_v12 = vcvt.f32.s32 %v10739_v59  ;;  %v2148_v29 = vmul.f32 %v10895_v6, %v12777_v28  ;;  %v3129_v6 = vcvt.f32.s32 %v10754_v2 }
 0x31a   :  { %2189 = vadd.xlane.f32.xlu0 %v2188_v42  ;;  %1946 = vadd.xlane.f32.xlu1 %v1945_v52  ;;  %v1795_v42 = vld [vmem:[%s9336_s14] sm:$0xf]  ;;  %v2170_v52 = vsel %vm1151_vm0, %v2146_v51, 0.0  ;;  %v3100_v51 = vshll.u32 %v3099_v9, 16  ;;  %vm3200_vm11 = vcmp.eq.s32.totalorder %v12732_v16, %v3086_v36  ;;  %v3351_v9 = vsel %vm1151_vm0, %v3335_v62, 0.0 }
 0x31b   :  { %8502 = vmatpush3.msra.mxu0 %v1524_v18  ;;  %8506 = vmatprep.subr.msk.mxu1 %vm1803_vm9, %v1795_v42  ;;  %v3112_v4 = vpop.xlane.xlu1 %3111  ;;  %v3010_v23 = vshll.u32 %v3009_v12, 16  ;;  %v3115_v58 = vshll.u32 %v3114_v38, 16  ;;  %v3024_v36 = vcvt.f32.s32 %v10749_v17 }
 0x31c   :  { %8504 = vmatmul.mubr.msk.f32.vlgmr.msra.gmra.mxu0 %vm1536_vm8, %v1523_v11  ;;  %8507 = vmatpush3.msk.msra.mxu1 %vm1803_vm9, %v1795_v42  ;;  %v3101_v59 = vadd.s32 %v3100_v51, %v3098_v5  ;;  %v2155_v42 = vmul.f32 %v10892_v14, %v12778_v47  ;;  %v11049_v11 = vsel %vm3200_vm11, 1.0, %v12776_v61  ;;  %v2176_v14 = vsel %vm1151_vm0, %v2148_v29, 0.0 }
 0x31d   :  { %v3025_v1 = vshll.u32 %v3024_v36, 16  ;;  %vm1762_vm11 = vcmask 1041409  }
 0x31e   :  { %2171 = vadd.xlane.f32.xlu0 %v2170_v52  ;;  %2192 = vadd.xlane.f32.xlu1 %v2191_v8  ;;  %v3007_v8 = vpop.xlane.xlu0 %3006  ;;  %v3113_v52 = vcvt.f32.s32 %v3112_v4  ;;  %vm3201_vm12 = vcmp.eq.s32.totalorder %v12732_v16, %v3101_v59  ;;  %v2197_v12 = vsel %vm1151_vm0, %v2155_v42, 0.0  ;;  %v3130_v59 = vshll.u32 %v3129_v6, 16 }
 0x31f   :  { %v3008_v18 = vcvt.f32.s32 %v3007_v8  ;;  %v3127_v51 = vpop.xlane.xlu1 %3126  ;;  %v3337_v8 = vmul.f32 %v11046_v34, %v12734_v50  ;;  %v11061_v62 = vsel %vm3201_vm12, 1.0, %v12776_v61  ;;  %v3144_v4 = vcvt.f32.s32 %v10764_v45 }
 0x320   :  { %v3128_v2 = vcvt.f32.s32 %v3127_v51  ;;  %vm1764_vm12 = vcmask 1042434  }
 0x321   :  { %v3011_v32 = vadd.s32 %v3010_v23, %v3008_v18  ;;  %v3039_v18 = vcvt.f32.s32 %v10759_v44  ;;  %v3145_v6 = vshll.u32 %v3144_v4, 16 }
 0x322   :  { %2174 = vadd.xlane.f32.xlu0 %v2173_v19  ;;  %2195 = vadd.xlane.f32.xlu1 %v2194_v31  ;;  %v3022_v5 = vpop.xlane.xlu0 %3021  ;;  %v3343_v19 = vmul.f32 %v11049_v11, %v12737_v27  ;;  %v3116_v31 = vadd.s32 %v3115_v58, %v3113_v52  ;;  %v3357_v27 = vsel %vm1151_vm0, %v3337_v8, 0.0  ;;  %v3131_v42 = vadd.s32 %v3130_v59, %v3128_v2  ;;  %v12781_v59 = vld [vmem:[#allocation97_spill] sm:$0xff] }
 0x323   :  { %vm3195_vm13 = vcmp.eq.s32.totalorder %v12732_v16, %v3011_v32  ;;  %v3023_v17 = vcvt.f32.s32 %v3022_v5  ;;  %v3142_v23 = vpop.xlane.xlu1 %3141  ;;  %v3040_v36 = vshll.u32 %v3039_v18, 16  ;;  %v2157_v18 = vmul.f32 %v10932_v57, %v12781_v59 }
 0x324   :  { %v3375_v38 = vsel %vm1151_vm0, %v3343_v19, 0.0  ;;  %vm3202_vm14 = vcmp.eq.s32.totalorder %v12732_v16, %v3116_v31  ;;  %v11076_v44 = vsel %vm3195_vm13, 1.0, %v12776_v61  ;;  %v3143_v58 = vcvt.f32.s32 %v3142_v23 }
 0x325   :  { %v3026_v45 = vadd.s32 %v3025_v1, %v3023_v17  ;;  %v11087_v32 = vsel %vm3202_vm14, 1.0, %v12776_v61  ;;  %vm3203_vm1 = vcmp.eq.s32.totalorder %v12732_v16, %v3131_v42  ;;  %v3054_v19 = vcvt.f32.s32 %v10769_v13  ;;  %v11120_v42 = vld [vmem:[%s9336_s14 + $0x4] sm:$0xf] }
 0x326   :  { %3352 = vadd.xlane.f32.xlu0 %v3351_v9  ;;  %3355 = vadd.xlane.f32.xlu1 %v3354_v10  ;;  %v3037_v50 = vpop.xlane.xlu0 %3036  ;;  %v3344_v9 = vmul.f32 %v11061_v62, %v12736_v0  ;;  %v12779_v10 = vld [vmem:[#allocation95_spill] sm:$0xff]  ;;  %v3146_v8 = vadd.s32 %v3145_v6, %v3143_v58  ;;  %v3345_v31 = vmul.f32 %v11087_v32, %v12738_v60  ;;  %v11100_v4 = vsel %vm3203_vm1, 1.0, %v12776_v61 }
 0x327   :  { %v2149_v29 = vmul.f32 %v10912_v24, %v12779_v10  ;;  %v3038_v52 = vcvt.f32.s32 %v3037_v50  ;;  %v12780_v24 = vld [vmem:[#allocation98_spill] sm:$0xff]  ;;  %vm3196_vm15 = vcmp.eq.s32.totalorder %v12732_v16, %v3026_v45  ;;  %v3157_v2 = vpop.xlane.xlu1 %3156  ;;  %v3055_v23 = vshll.u32 %v3054_v19, 16  ;;  %8511 = vmatprep.subr.msk.mxu1 %vm1803_vm9, %v11120_v42 }
 0x328   :  { %v3378_v0 = vsel %vm1151_vm0, %v3344_v9, 0.0  ;;  %v2156_v51 = vmul.f32 %v10922_v49, %v12780_v24  ;;  %v3159_v49 = vcvt.f32.s32 %v10775_v54  ;;  %v11103_v13 = vsel %vm3196_vm15, 1.0, %v12776_v61 }
 0x329   :  { %v2179_v5 = vsel %vm1151_vm0, %v2149_v29, 0.0  ;;  %vm3204_vm3 = vcmp.eq.s32.totalorder %v12732_v16, %v3146_v8  ;;  %v3158_v50 = vcvt.f32.s32 %v3157_v2  ;;  %v2203_v57 = vsel %vm1151_vm0, %v2157_v18, 0.0 }
 0x32a   :  { %2177 = vadd.xlane.f32.xlu0 %v2176_v14  ;;  %2198 = vadd.xlane.f32.xlu1 %v2197_v12  ;;  %v3338_v14 = vmul.f32 %v11076_v44, %v12739_v43  ;;  %v3041_v12 = vadd.s32 %v3040_v36, %v3038_v52  ;;  %v3052_v17 = vpop.xlane.xlu0 %3051  ;;  %v2200_v43 = vsel %vm1151_vm0, %v2156_v51, 0.0  ;;  %v3160_v60 = vshll.u32 %v3159_v49, 16 }
 0x32b   :  { %v3053_v54 = vcvt.f32.s32 %v3052_v17  ;;  %v3339_v9 = vmul.f32 %v11103_v13, %v12741_v56  ;;  %v11114_v29 = vsel %vm3204_vm3, 1.0, %v12776_v61  ;;  %vm1766_vm13 = vcmask 1043459  }
 0x32c   :  { %v3360_v1 = vsel %vm1151_vm0, %v3338_v14, 0.0  ;;  %vm3197_vm2 = vcmp.eq.s32.totalorder %v12732_v16, %v3041_v12  ;;  %v3161_v58 = vadd.s32 %v3160_v60, %v3158_v50  ;;  %v3172_v12 = vpop.xlane.xlu1 %3171  ;;  %vm1768_vm14 = vcmask 1044484  }
 0x32d   :  { %v11117_v45 = vsel %vm3197_vm2, 1.0, %v12776_v61  ;;  %v3056_v52 = vadd.s32 %v3055_v23, %v3053_v54  ;;  %v3363_v6 = vsel %vm1151_vm0, %v3339_v9, 0.0  ;;  %v3173_v2 = vcvt.f32.s32 %v3172_v12 }
 0x32e   :  { %3358 = vadd.xlane.f32.xlu0 %v3357_v27  ;;  %3376 = vadd.xlane.f32.xlu1 %v3375_v38  ;;  %v3381_v27 = vsel %vm1151_vm0, %v3345_v31, 0.0  ;;  %v3346_v38 = vmul.f32 %v11100_v4, %v12740_v35  ;;  %v3069_v35 = vcvt.f32.s32 %v10777_v39  ;;  %v3067_v36 = vpop.xlane.xlu0 %3066  ;;  %vm3205_vm5 = vcmp.eq.s32.totalorder %v12732_v16, %v3161_v58  ;;  %v12782_v58 = vld [vmem:[#allocation49_spill] sm:$0xff] }
 0x32f   :  { %vm3198_vm4 = vcmp.eq.s32.totalorder %v12732_v16, %v3056_v52  ;;  %v3068_v51 = vcvt.f32.s32 %v3067_v36  ;;  %v3174_v39 = vcvt.f32.s32 %v10785_v40  ;;  %v11141_v49 = vsel %vm3205_vm5, 1.0, %v12776_v61  ;;  %v12783_v36 = vld [vmem:[#allocation84_spill] sm:$0xff] }
 0x330   :  { %v3384_v56 = vsel %vm1151_vm0, %v3346_v38, 0.0  ;;  %v3070_v14 = vshll.u32 %v3069_v35, 16  ;;  %v11144_v17 = vsel %vm3198_vm4, 1.0, %v12776_v61  ;;  %v3601_v35 = vmul.f32 %v11061_v62, %v12782_v58 }
 0x331   :  { %v3341_v54 = vmul.f32 %v11144_v17, %v12747_v15  ;;  %vm1770_vm15 = vcmask 1045509   ;;  %vm1772_vm1 = vcmask 1046534   ;;  %vm1774_vm2 = vcmask 1047559  }
 0x332   :  { %3379 = vadd.xlane.f32.xlu0 %v3378_v0  ;;  %2180 = vadd.xlane.f32.xlu1 %v2179_v5  ;;  %v3347_v0 = vmul.f32 %v11114_v29, %v12742_v25  ;;  %v3340_v5 = vmul.f32 %v11117_v45, %v12743_v3  ;;  %v3593_v25 = vmul.f32 %v11024_v22, %v12744_v48  ;;  %v3187_v31 = vpop.xlane.xlu0 %3186  ;;  %vm4838_vm3 = vcmask 130112  }
 0x333   :  { %v3592_v3 = vmul.f32 %v11019_v41, %v12745_v7  ;;  %v3071_v40 = vadd.s32 %v3070_v14, %v3068_v51  ;;  %v3348_v7 = vmul.f32 %v11141_v49, %v12746_v46  ;;  %v3188_v23 = vcvt.f32.s32 %v3187_v31  ;;  %v12785_v51 = vld [vmem:[#allocation57_spill] sm:$0xff]  ;;  %v12788_v31 = vld [vmem:[#allocation67_spill] sm:$0xff] }
 0x334   :  { %v3387_v8 = vsel %vm1151_vm0, %v3347_v0, 0.0  ;;  %v3366_v19 = vsel %vm1151_vm0, %v3340_v5, 0.0  ;;  %v3611_v18 = vsel %vm1151_vm0, %v3593_v25, 0.0  ;;  %v3594_v46 = vmul.f32 %v11046_v34, %v12749_v63  ;;  %v12784_v0 = vld [vmem:[#allocation87_spill] sm:$0xff]  ;;  %v12786_v25 = vld [vmem:[#allocation54_spill] sm:$0xff] }
 0x335   :  { %v3608_v48 = vsel %vm1151_vm0, %v3592_v3, 0.0  ;;  %vm3199_vm6 = vcmp.eq.s32.totalorder %v12732_v16, %v3071_v40  ;;  %v3595_v14 = vmul.f32 %v11076_v44, %v12785_v51  ;;  %v3602_v3 = vmul.f32 %v11087_v32, %v12786_v25  ;;  %v12787_v40 = vld [vmem:[#allocation91_spill] sm:$0xff]  ;;  %v12795_v25 = vld [vmem:[#allocation65_spill] sm:$0xff] }
 0x336   :  { %2201 = vadd.xlane.f32.xlu0 %v2200_v43  ;;  %3361 = vadd.xlane.f32.xlu1 %v3360_v1  ;;  %v3175_v43 = vshll.u32 %v3174_v39, 16  ;;  %v3189_v1 = vcvt.f32.s32 %v10787_v20  ;;  %v3390_v20 = vsel %vm1151_vm0, %v3348_v7, 0.0  ;;  %v11161_v15 = vsel %vm3199_vm6, 1.0, %v12776_v61 }
 0x337   :  { %v3614_v52 = vsel %vm1151_vm0, %v3594_v46, 0.0  ;;  %vm5137_vm4 = vcmask 195712   ;;  %vm5436_vm5 = vcmask 261312   ;;  %vm5759_vm6 = vcmask 523264  }
 0x338   :  { %v3176_v50 = vadd.s32 %v3175_v43, %v3173_v2  ;;  %v3190_v60 = vshll.u32 %v3189_v1, 16  ;;  %v3638_v1 = vsel %vm1151_vm0, %v3602_v3, 0.0  ;;  %v3858_v3 = vmul.f32 %v11049_v11, %v12795_v25 }
 0x33a   :  { %3382 = vadd.xlane.f32.xlu0 %v3381_v27  ;;  %2204 = vadd.xlane.f32.xlu1 %v2203_v57  ;;  %v3369_v27 = vsel %vm1151_vm0, %v3341_v54, 0.0  ;;  %v3600_v57 = vmul.f32 %v11049_v11, %v12748_v21  ;;  %vm3206_vm7 = vcmp.eq.s32.totalorder %v12732_v16, %v3176_v50  ;;  %v3191_v38 = vadd.s32 %v3190_v60, %v3188_v23  ;;  %v12790_v60 = vld [vmem:[#allocation73_spill] sm:$0xff] }
 0x33b   :  { %v3342_v21 = vmul.f32 %v11161_v15, %v12783_v36  ;;  %v11171_v63 = vsel %vm3206_vm7, 1.0, %v12776_v61  ;;  %vm7923_vm7 = vcmask 97280  }
 0x33c   :  { %v3632_v9 = vsel %vm1151_vm0, %v3600_v57, 0.0  ;;  %vm3207_vm10 = vcmp.eq.s32.totalorder %v12732_v16, %v3191_v38  ;;  %v3349_v5 = vmul.f32 %v11171_v63, %v12784_v0 }
 0x33d   :  { %v11181_v39 = vsel %vm3207_vm10, 1.0, %v12776_v61 }
 0x33e   :  { %3385 = vadd.xlane.f32.xlu1 %v3384_v56  ;;  %3364 = vadd.xlane.f32.xlu0 %v3363_v6  ;;  %v3635_v56 = vsel %vm1151_vm0, %v3601_v35, 0.0  ;;  %v3372_v6 = vsel %vm1151_vm0, %v3342_v21, 0.0  ;;  %v3350_v2 = vmul.f32 %v11181_v39, %v12787_v40  ;;  %v3851_v35 = vmul.f32 %v11024_v22, %v12761_v37 }
 0x340   :  { %v3396_v61 = vsel %vm1151_vm0, %v3350_v2, 0.0 }
 0x342   :  { %3388 = vadd.xlane.f32.xlu1 %v3387_v8  ;;  %3367 = vadd.xlane.f32.xlu0 %v3366_v19  ;;  %v3393_v8 = vsel %vm1151_vm0, %v3349_v5, 0.0  ;;  %v3617_v19 = vsel %vm1151_vm0, %v3595_v14, 0.0  ;;  %v12793_v5 = vld [vmem:[#allocation82_spill] sm:$0xff] }
 0x343   :  { %v3605_v51 = vmul.f32 %v11141_v49, %v12793_v5 }
 0x345   :  { %v3647_v14 = vsel %vm1151_vm0, %v3605_v51, 0.0 }
 0x346   :  { %3612 = vadd.xlane.f32.xlu1 %v3611_v18  ;;  %3609 = vadd.xlane.f32.xlu0 %v3608_v48  ;;  %v3596_v18 = vmul.f32 %v11103_v13, %v12788_v31  ;;  %v12789_v48 = vld [vmem:[#allocation60_spill] sm:$0xff]  ;;  %v12796_v31 = vld [vmem:[#allocation69_spill] sm:$0xff] }
 0x347   :  { %v3603_v7 = vmul.f32 %v11100_v4, %v12789_v48  ;;  %v12797_v48 = vld [vmem:[#allocation86_spill] sm:$0xff] }
 0x348   :  { %v3620_v50 = vsel %vm1151_vm0, %v3596_v18, 0.0  ;;  %v3859_v18 = vmul.f32 %v11061_v62, %v12796_v31  ;;  %v3240_v31 = vld [vmem:[%s9296_s9] sm:$0xff] }
 0x349   :  { %v3641_v23 = vsel %vm1151_vm0, %v3603_v7, 0.0  ;;  %8531 = vmatprep.mubr.msk.f32.mxu0 %vm1536_vm8, %v3240_v31 }
 0x34a   :  { %3391 = vadd.xlane.f32.xlu1 %v3390_v20  ;;  %3370 = vadd.xlane.f32.xlu0 %v3369_v27  ;;  %v3597_v20 = vmul.f32 %v11117_v45, %v12790_v60  ;;  %v3604_v27 = vmul.f32 %v11114_v29, %v12759_v33  ;;  %v3893_v60 = vsel %vm1151_vm0, %v3859_v18, 0.0 }
 0x34c   :  { %v3623_v38 = vsel %vm1151_vm0, %v3597_v20, 0.0 }
 0x34e   :  { %3633 = vadd.xlane.f32.xlu1 %v3632_v9  ;;  %3615 = vadd.xlane.f32.xlu0 %v3614_v52  ;;  %v3644_v9 = vsel %vm1151_vm0, %v3604_v27, 0.0  ;;  %v12791_v52 = vld [vmem:[#allocation59_spill] sm:$0xff]  ;;  %v12799_v27 = vld [vmem:[#allocation90_spill] sm:$0xff] }
 0x34f   :  { %v3850_v58 = vmul.f32 %v11019_v41, %v12791_v52  ;;  %v3606_v62 = vmul.f32 %v11171_v63, %v12799_v27  ;;  %v3246_v52 = vld [vmem:[%s9346_s24 + $0x20] sm:$0xff] }
 0x350   :  { %8521 = vmatprep.subr.mxu0 %v3246_v52 }
 0x351   :  { %v3866_v21 = vsel %vm1151_vm0, %v3850_v58, 0.0  ;;  %v3245_v58 = vld [vmem:[%s9346_s24 + $0x18] sm:$0xff]  ;;  %8522 = vmatpush3.msra.mxu0 %v3246_v52 }
 0x352   :  { %3636 = vadd.xlane.f32.xlu0 %v3635_v56  ;;  %3373 = vadd.xlane.f32.xlu1 %v3372_v6  ;;  %v3869_v56 = vsel %vm1151_vm0, %v3851_v35, 0.0  ;;  %v12792_v6 = vld [vmem:[#allocation80_spill] sm:$0xff] }
 0x353   :  { %v3598_v0 = vmul.f32 %v11144_v17, %v12792_v6  ;;  %8523 = vmatprep.subr.mxu0 %v3245_v58 }
 0x354   :  { %v11183_v12 = vpop.xlane.xlu1 %1635  ;;  %8524 = vmatpush3.msra.mxu0 %v3245_v58 }
 0x355   :  { %v3626_v22 = vsel %vm1151_vm0, %v3598_v0, 0.0 }
 0x356   :  { %3394 = vadd.xlane.f32.xlu0 %v3393_v8  ;;  %3618 = vadd.xlane.f32.xlu1 %v3617_v19  ;;  %v12794_v8 = vld [vmem:[#allocation66_spill] sm:$0xff] }
 0x357   :  { %v3852_v19 = vmul.f32 %v11046_v34, %v12794_v8  ;;  %v3599_v34 = vmul.f32 %v11161_v15, %v12797_v48 }
 0x359   :  { %v11191_v43 = vpop.xlane.xlu1 %1641  ;;  %v3629_v20 = vsel %vm1151_vm0, %v3599_v34, 0.0 }
 0x35a   :  { %3639 = vadd.xlane.f32.xlu0 %v3638_v1  ;;  %3397 = vadd.xlane.f32.xlu1 %v3396_v61  ;;  %v3872_v1 = vsel %vm1151_vm0, %v3852_v19, 0.0  ;;  %v3890_v61 = vsel %vm1151_vm0, %v3858_v3, 0.0  ;;  %v3243_v19 = vld [vmem:[%s9346_s24 + $0x8] sm:$0xff] }
 0x35b   :  { %v11199_v54 = vpop.xlane.xlu0 %1638 }
 0x35e   :  { %3621 = vadd.xlane.f32.xlu0 %v3620_v50  ;;  %3642 = vadd.xlane.f32.xlu1 %v3641_v23  ;;  %v12798_v50 = vld [vmem:[#allocation24_spill] sm:$0xff] }
 0x35f   :  { %v11207_v57 = vpop.xlane.xlu1 %1662  ;;  %v11209_v46 = vpop.xlane.xlu0 %1659  ;;  %v11253_v23 = vsub.s32 %v12732_v16, %v12798_v50 }
 0x362   :  { %3624 = vadd.xlane.f32.xlu0 %v3623_v38  ;;  %3645 = vadd.xlane.f32.xlu1 %v3644_v9  ;;  %v3853_v38 = vmul.f32 %v11076_v44, %v12769_v26  ;;  %v1705_v9 = vrot.slane %v11199_v54, %v11253_v23  ;;  %v3650_v26 = vsel %vm1151_vm0, %v3606_v62, 0.0  ;;  %v12800_v54 = vld [vmem:[#allocation94_spill] sm:$0xff] }
 0x363   :  { %v11217_v36 = vpop.xlane.xlu1 %1665  ;;  %v11219_v33 = vpop.xlane.xlu0 %1644  ;;  %v3607_v6 = vmul.f32 %v11181_v39, %v12800_v54 }
 0x364   :  { %v3875_v44 = vsel %vm1151_vm0, %v3853_v38, 0.0  ;;  %v1713_v5 = vrot.slane %v11219_v33, %v11253_v23  ;;  %v1741_v38 = vrot.slane %v11217_v36, %v11253_v23  ;;  %v9172_v36 = vld [vmem:[%s9301_s13] sm:$0xff] }
 0x365   :  { %v3653_v3 = vsel %vm1151_vm0, %v3607_v6, 0.0 }
 0x366   :  { %3867 = vadd.xlane.f32.xlu0 %v3866_v21  ;;  %3870 = vadd.xlane.f32.xlu1 %v3869_v56  ;;  %v1701_v21 = vrot.slane %v11183_v12, %v11253_v23  ;;  %v3860_v56 = vmul.f32 %v11087_v32, %v12770_v30  ;;  %v3244_v12 = vld [vmem:[%s9346_s24 + $0x10] sm:$0xff]  ;;  %v1709_v30 = vrot.slane %v11191_v43, %v11253_v23 }
 0x367   :  { %v11227_v41 = vpop.xlane.xlu1 %1668  ;;  %v11229_v37 = vpop.xlane.xlu0 %1647  ;;  %8525 = vmatprep.subr.mxu0 %v3244_v12 }
 0x368   :  { %v1763_v0 = vsel %vm1762_vm11, %v1705_v9, %v1701_v21  ;;  %v1717_v32 = vrot.slane %v11229_v37, %v11253_v23  ;;  %v3896_v43 = vsel %vm1151_vm0, %v3860_v56, 0.0  ;;  %8526 = vmatpush3.msra.mxu0 %v3244_v12  ;;  %v3862_v9 = vmul.f32 %v11114_v29, %v12775_v53 }
 0x369   :  { %v1765_v37 = vsel %vm1764_vm12, %v1709_v30, %v1763_v0  ;;  %8527 = vmatprep.subr.mxu0 %v3243_v19 }
 0x36a   :  { %3627 = vadd.xlane.f32.xlu0 %v3626_v22  ;;  %3648 = vadd.xlane.f32.xlu1 %v3647_v14  ;;  %v12801_v14 = vld [vmem:[#allocation83_spill] sm:$0xff]  ;;  %v3902_v0 = vsel %vm1151_vm0, %v3862_v9, 0.0 }
 0x36b   :  { %v11237_v40 = vpop.xlane.xlu1 %1671  ;;  %v11239_v2 = vpop.xlane.xlu0 %1650  ;;  %v3854_v8 = vmul.f32 %v11103_v13, %v12801_v14  ;;  %8528 = vmatpush3.msra.mxu0 %v3243_v19 }
 0x36c   :  { %v1721_v33 = vrot.slane %v11239_v2, %v11253_v23  ;;  %v3242_v2 = vld [vmem:[%s9346_s24] sm:$0xff]  ;;  %v1749_v58 = vrot.slane %v11237_v40, %v11253_v23  ;;  %s9275_s24 = smov 104  }
 0x36d   :  { %v3878_v50 = vsel %vm1151_vm0, %v3854_v8, 0.0  ;;  %8529 = vmatprep.subr.mxu0 %v3242_v2 }
 0x36e   :  { %3873 = vadd.xlane.f32.xlu0 %v3872_v1  ;;  %3891 = vadd.xlane.f32.xlu1 %v3890_v61  ;;  %v12802_v1 = vld [vmem:[#allocation85_spill] sm:$0xff]  ;;  %v1767_v61 = vsel %vm1766_vm13, %v1713_v5, %v1765_v37 }
 0x36f   :  { %v11247_v11 = vpop.xlane.xlu1 %1904  ;;  %v11249_v7 = vpop.xlane.xlu0 %1901  ;;  %v3861_v13 = vmul.f32 %v11100_v4, %v12802_v1  ;;  %v1769_v18 = vsel %vm1768_vm14, %v1717_v32, %v1767_v61  ;;  %v3855_v4 = vmul.f32 %v11117_v45, %v12774_v55  ;;  %8530 = vmatpush3.msra.mxu0 %v3242_v2  ;;  %v9173_v37 = vld [vmem:[%s9301_s13 + $0x8] sm:$0xff] }
 0x370   :  { %v1771_v27 = vsel %vm1770_vm15, %v1721_v33, %v1769_v18  ;;  %v3857_v33 = vmul.f32 %v11161_v15, %v12779_v10  ;;  %v3865_v10 = vmul.f32 %v11181_v39, %v12781_v59  ;;  %v1971_v59 = vrot.slane %v11247_v11, %v11253_v23 }
 0x371   :  { %v3899_v45 = vsel %vm1151_vm0, %v3861_v13, 0.0  ;;  %v1967_v39 = vrot.slane %v11249_v7, %v11253_v23 }
 0x372   :  { %3894 = vadd.xlane.f32.xlu0 %v3893_v60  ;;  %3630 = vadd.xlane.f32.xlu1 %v3629_v20  ;;  %v1737_v60 = vrot.slane %v11207_v57, %v11253_v23  ;;  %v1733_v20 = vrot.slane %v11209_v46, %v11253_v23  ;;  %v3241_v57 = vld [vmem:[%s9296_s9 + $0x8] sm:$0xff]  ;;  %v1745_v46 = vrot.slane %v11227_v41, %v11253_v23  ;;  %v3887_v61 = vsel %vm1151_vm0, %v3857_v33, 0.0  ;;  %s9267_s9 = smov 64  }
 0x373   :  { %v11265_v16 = vpop.xlane.xlu1 %1674  ;;  %v1654_v35 = vpop.xlane.xlu0 %1653  ;;  %v3856_v41 = vmul.f32 %v11144_v17, %v12777_v28  ;;  %8532 = vmatmul.mubr.msk.f32.vlgmr.msra.gmra.mxu0 %vm1536_vm8, %v3241_v57  ;;  %v3911_v18 = vsel %vm1151_vm0, %v3865_v10, 0.0  ;;  %vm1796_vm8 = vcmask 31744   ;;  %v2028_v11 = vsel %vm1762_vm11, %v1971_v59, %v1967_v39 }
 0x374   :  { %v1725_v25 = vrot.slane %v1654_v35, %v11253_v23  ;;  %v1776_v53 = vsel %vm1762_vm11, %v1737_v60, %v1733_v20  ;;  %v1753_v29 = vrot.slane %v11265_v16, %v11253_v23 }
 0x375   :  { %v1777_v40 = vsel %vm1764_vm12, %v1741_v38, %v1776_v53  ;;  %v3884_v30 = vsel %vm1151_vm0, %v3856_v41, 0.0 }
 0x376   :  { %3651 = vadd.xlane.f32.xlu0 %v3650_v26  ;;  %3876 = vadd.xlane.f32.xlu1 %v3875_v44  ;;  %v1773_v55 = vsel %vm1772_vm1, %v1725_v25, %v1771_v27  ;;  %v3881_v26 = vsel %vm1151_vm0, %v3855_v4, 0.0  ;;  %v3863_v44 = vmul.f32 %v11141_v49, %v12778_v47  ;;  %v1778_v5 = vsel %vm1766_vm13, %v1745_v46, %v1777_v40 }
 0x377   :  { %v11283_v51 = vpop.xlane.xlu1 %1925  ;;  %v11285_v22 = vpop.xlane.xlu0 %1907  ;;  %v1779_v16 = vsel %vm1768_vm14, %v1749_v58, %v1778_v5 }
 0x378   :  { %v1780_v47 = vsel %vm1770_vm15, %v1753_v29, %v1779_v16  ;;  %v3905_v32 = vsel %vm1151_vm0, %v3863_v44, 0.0  ;;  %v1975_v27 = vrot.slane %v11285_v22, %v11253_v23  ;;  %v1999_v41 = vrot.slane %v11283_v51, %v11253_v23 }
 0x37a   :  { %3897 = vadd.xlane.f32.xlu0 %v3896_v43  ;;  %3654 = vadd.xlane.f32.xlu1 %v3653_v3  ;;  %v3864_v43 = vmul.f32 %v11171_v63, %v12780_v24  ;;  %v2029_v7 = vsel %vm1764_vm12, %v1975_v27, %v2028_v11 }
 0x37b   :  { %v1657_v48 = vpop.xlane.xlu1 %1656  ;;  %v11302_v34 = vpop.xlane.xlu0 %1928 }
 0x37c   :  { %v1729_v62 = vrot.slane %v1657_v48, %v11253_v23  ;;  %v3908_v2 = vsel %vm1151_vm0, %v3864_v43, 0.0  ;;  %v9265_v43 = vmov 0   ;;  %vm4108_vm0 = vcmask 261120  }
 0x37d   :  { %8980 = vset.pattern.permute.xlu1 %v9265_v43  ;;  %8981 = vset.pattern.permute.xlu0 %v9265_v43 }
 0x37e   :  { %v1775_v52 = vsel %vm1774_vm2, %v1729_v62, %v1773_v55  ;;  %3879 = vadd.xlane.f32.xlu0 %v3878_v50  ;;  %3900 = vadd.xlane.f32.xlu1 %v3899_v45 }
 0x37f   :  { %v1785_v35 = vsub.f32 %v9172_v36, %v1775_v52  ;;  %v11327_v21 = vpop.xlane.xlu1 %1910  ;;  %v1678_v56 = vpop.xlane.xlu0 %1677 }
 0x380   :  { %v1757_v6 = vrot.slane %v1678_v56, %v11253_v23  ;;  %v1979_v62 = vrot.slane %v11327_v21, %v11253_v23 }
 0x381   :  { %v1787_v54 = vmul.f32 %v1785_v35, %v1785_v35  ;;  %v2003_v35 = vrot.slane %v11302_v34, %v11253_v23 }
 0x382   :  { %3882 = vadd.xlane.f32.xlu0 %v3881_v26  ;;  %3903 = vadd.xlane.f32.xlu1 %v3902_v0  ;;  %v1781_v8 = vsel %vm1772_vm1, %v1757_v6, %v1780_v47  ;;  %v2030_v57 = vsel %vm1766_vm13, %v1979_v62, %v2029_v7  ;;  %v11392_v26 = vld [vmem:[%s9336_s14 + $0x8] sm:$0xf]  ;;  %s9273_s14 = smov 48  }
 0x383   :  { %v1789_v28 = vmul.f32 -50.0, %v1787_v54  ;;  %v1681_v17 = vpop.xlane.xlu1 %1680  ;;  %v11343_v12 = vpop.xlane.xlu0 %1931  ;;  %v9174_v54 = vld [vmem:[%s9301_s13 + $0x10] sm:$0xff]  ;;  %v2035_v16 = vsel %vm1762_vm11, %v2003_v35, %v1999_v41 }
 0x384   :  { %v1761_v49 = vrot.slane %v1681_v17, %v11253_v23  ;;  %v2007_v53 = vrot.slane %v11343_v12, %v11253_v23 }
 0x385   :  { %v1791_v14 = vmul.f32 1.442695, %v1789_v28 }
 0x386   :  { %v1782_v19 = vsel %vm1774_vm2, %v1761_v49, %v1781_v8  ;;  %3885 = vadd.xlane.f32.xlu0 %v3884_v30  ;;  %3906 = vadd.xlane.f32.xlu1 %v3905_v32  ;;  %v2036_v28 = vsel %vm1764_vm12, %v2007_v53, %v2035_v16 }
 0x387   :  { %8988 = vpow2.f32 %v1791_v14  ;;  %v1786_v25 = vsub.f32 %v9173_v37, %v1782_v19  ;;  %v1935_v3 = vpop.xlane.xlu1 %1934  ;;  %v1914_v1 = vpop.xlane.xlu0 %1913  ;;  %v4113_v14 = vld [vmem:[%s9321_s29] sm:$0xff] }
 0x388   :  { %v1983_v38 = vrot.slane %v1914_v1, %v11253_v23  ;;  %v2011_v44 = vrot.slane %v1935_v3, %v11253_v23  ;;  %v9175_v3 = vld [vmem:[%s9301_s13 + $0x18] sm:$0xff] }
 0x389   :  { %v1788_v13 = vmul.f32 %v1786_v25, %v1786_v25 }
 0x38a   :  { %3888 = vadd.xlane.f32.xlu0 %v3887_v61  ;;  %3909 = vadd.xlane.f32.xlu1 %v3908_v2  ;;  %v2031_v46 = vsel %vm1768_vm14, %v1983_v38, %v2030_v57 }
 0x38b   :  { %v1790_v24 = vmul.f32 -50.0, %v1788_v13  ;;  %v1938_v15 = vpop.xlane.xlu1 %1937  ;;  %v1917_v63 = vpop.xlane.xlu0 %1916 }
 0x38c   :  { %v1987_v9 = vrot.slane %v1917_v63, %v11253_v23  ;;  %v2015_v40 = vrot.slane %v1938_v15, %v11253_v23 }
 0x38d   :  { %v1793_v31 = vmul.f32 1.442695, %v1790_v24 }
 0x38e   :  { %3912 = vadd.xlane.f32.xlu0 %v3911_v18  ;;  %v2032_v21 = vsel %vm1770_vm15, %v1987_v9, %v2031_v46 }
 0x38f   :  { %8990 = vpow2.f32 %v1793_v31  ;;  %v11361_v48 = vpop.xlane.xlu1 %2162  ;;  %v11363_v50 = vpop.xlane.xlu0 %2159  ;;  %v4115_v31 = vld [vmem:[%s9321_s29 + $0x10] sm:$0xff] }
 0x390   :  { %v2229_v39 = vrot.slane %v11361_v48, %v11253_v23  ;;  %v2225_v27 = vrot.slane %v11363_v50, %v11253_v23 }
 0x393   :  { %v1941_v4 = vpop.xlane.xlu1 %1940  ;;  %v1920_v60 = vpop.xlane.xlu0 %1919 }
 0x394   :  { %v8989_v20 = vpop.eup %8988  ;;  %v1991_v22 = vrot.slane %v1920_v60, %v11253_v23  ;;  %v2019_v51 = vrot.slane %v1941_v4, %v11253_v23 }
 0x395   :  { %8508 = vmatprep.mubr.msk.f32.mxu1 %vm1796_vm8, %v8989_v20 }
 0x396   :  { %v2033_v29 = vsel %vm1772_vm1, %v1991_v22, %v2032_v21  ;;  %v2286_v22 = vsel %vm1762_vm11, %v2229_v39, %v2225_v27 }
 0x397   :  { %v11375_v55 = vpop.xlane.xlu1 %2183  ;;  %v11377_v45 = vpop.xlane.xlu0 %2165 }
 0x398   :  { %v2233_v62 = vrot.slane %v11377_v45, %v11253_v23 }
 0x39a   :  { %v2287_v50 = vsel %vm1764_vm12, %v2233_v62, %v2286_v22 }
 0x39b   :  { %v1923_v52 = vpop.xlane.xlu1 %1922  ;;  %v11385_v58 = vpop.xlane.xlu0 %2186  ;;  %4135 = vperm.xlu1 %8980, %v4113_v14  }
 0x39c   :  { %v8991_v36 = vpop.eup %8990  ;;  %v1995_v56 = vrot.slane %v1923_v52, %v11253_v23  ;;  %v2261_v21 = vrot.slane %v11385_v58, %v11253_v23 }
 0x39d   :  { %8509 = vmatmul.mubr.msk.f32.vlgmr.msra.gmra.mxu1 %vm1796_vm8, %v8991_v36 }
 0x39e   :  { %v2034_v34 = vsel %vm1774_vm2, %v1995_v56, %v2033_v29  ;;  %8512 = vmatpush3.msk.msra.mxu1 %vm1803_vm9, %v11120_v42  ;;  %v2037_v42 = vsel %vm1766_vm13, %v2011_v44, %v2036_v28  ;;  %v11453_v29 = vld [vmem:[%s9351_s30] sm:$0xf] }
 0x39f   :  { %v2044_v6 = vsub.f32 %v9174_v54, %v2034_v34  ;;  %v2169_v0 = vpop.xlane.xlu1 %2168  ;;  %v1944_v5 = vpop.xlane.xlu0 %1943  ;;  %8516 = vmatprep.subr.msk.mxu1 %vm1803_vm9, %v11392_v26  ;;  %v2038_v47 = vsel %vm1768_vm14, %v2015_v40, %v2037_v42  ;;  %4145 = vperm.xlu1 %8980, %v4115_v31   ;;  %v2257_v34 = vrot.slane %v11375_v55, %v11253_v23 }
 0x3a0   :  { %v2023_v12 = vrot.slane %v1944_v5, %v11253_v23  ;;  %v2039_v8 = vsel %vm1770_vm15, %v2019_v51, %v2038_v47  ;;  %v2237_v38 = vrot.slane %v2169_v0, %v11253_v23 }
 0x3a1   :  { %v2046_v17 = vmul.f32 %v2044_v6, %v2044_v6  ;;  %v9176_v6 = vld [vmem:[%s9301_s13 + $0x20] sm:$0xff]  ;;  %v2293_v51 = vsel %vm1762_vm11, %v2261_v21, %v2257_v34 }
 0x3a2   :  { %v2040_v37 = vsel %vm1772_vm1, %v2023_v12, %v2039_v8  ;;  %v2288_v45 = vsel %vm1766_vm13, %v2237_v38, %v2287_v50 }
 0x3a3   :  { %v2048_v49 = vmul.f32 -50.0, %v2046_v17  ;;  %v1947_v30 = vpop.xlane.xlu1 %1946  ;;  %v11414_v32 = vpop.xlane.xlu0 %2189 }
 0x3a4   :  { %v2027_v33 = vrot.slane %v1947_v30, %v11253_v23  ;;  %v2265_v41 = vrot.slane %v11414_v32, %v11253_v23 }
 0x3a5   :  { %v2050_v19 = vmul.f32 1.442695, %v2048_v49 }
 0x3a6   :  { %v2041_v25 = vsel %vm1774_vm2, %v2027_v33, %v2040_v37  ;;  %v2294_v28 = vsel %vm1764_vm12, %v2265_v41, %v2293_v51 }
 0x3a7   :  { %8992 = vpow2.f32 %v2050_v19  ;;  %v2045_v1 = vsub.f32 %v9175_v3, %v2041_v25  ;;  %v2193_v13 = vpop.xlane.xlu1 %2192  ;;  %v2172_v61 = vpop.xlane.xlu0 %2171  ;;  %v9177_v19 = vld [vmem:[%s9301_s13 + $0x28] sm:$0xff]  ;;  %s12804_s13 = sld [smem:[#allocation10_spill]] }
 0x3a8   :  { %v2241_v11 = vrot.slane %v2172_v61, %v11253_v23  ;;  %v2269_v40 = vrot.slane %v2193_v13, %v11253_v23 }
 0x3a9   :  { %v2047_v2 = vmul.f32 %v2045_v1, %v2045_v1 }
 0x3aa   :  { %v2289_v46 = vsel %vm1768_vm14, %v2241_v11, %v2288_v45 }
 0x3ab   :  { %v2049_v10 = vmul.f32 -50.0, %v2047_v2  ;;  %v2196_v24 = vpop.xlane.xlu1 %2195  ;;  %v2175_v15 = vpop.xlane.xlu0 %2174 }
 0x3ac   :  { %v2245_v48 = vrot.slane %v2175_v15, %v11253_v23  ;;  %v2273_v54 = vrot.slane %v2196_v24, %v11253_v23 }
 0x3ad   :  { %v2052_v63 = vmul.f32 1.442695, %v2049_v10 }
 0x3ae   :  { %v2290_v56 = vsel %vm1770_vm15, %v2245_v48, %v2289_v46 }
 0x3af   :  { %8994 = vpow2.f32 %v2052_v63  ;;  %v11423_v18 = vpop.xlane.xlu1 %3355  ;;  %v11425_v4 = vpop.xlane.xlu0 %3352 }
 0x3b3   :  { %v2199_v60 = vpop.xlane.xlu1 %2198  ;;  %v2178_v20 = vpop.xlane.xlu0 %2177 }
 0x3b4   :  { %v8993_v59 = vpop.eup %8992  ;;  %v2249_v57 = vrot.slane %v2178_v20, %v11253_v23  ;;  %v2277_v55 = vrot.slane %v2199_v60, %v11253_v23  ;;  %v3422_v20 = vrot.slane %v11423_v18, %v11253_v23 }
 0x3b5   :  { %8513 = vmatprep.mubr.msk.f32.mxu1 %vm1796_vm8, %v8993_v59  ;;  %v3418_v59 = vrot.slane %v11425_v4, %v11253_v23 }
 0x3b6   :  { %v2291_v44 = vsel %vm1772_vm1, %v2249_v57, %v2290_v56  ;;  %v11510_v56 = vld [vmem:[%s9351_s30 + $0x4] sm:$0xf] }
 0x3b7   :  { %v11436_v9 = vpop.xlane.xlu1 %3376  ;;  %v11438_v7 = vpop.xlane.xlu0 %3358  ;;  %v3479_v22 = vsel %vm1762_vm11, %v3422_v20, %v3418_v59 }
 0x3b8   :  { %v3426_v39 = vrot.slane %v11438_v7, %v11253_v23 }
 0x3ba   :  { %v3480_v4 = vsel %vm1764_vm12, %v3426_v39, %v3479_v22 }
 0x3bb   :  { %v2181_v52 = vpop.xlane.xlu1 %2180  ;;  %v11446_v36 = vpop.xlane.xlu0 %3379 }
 0x3bc   :  { %v8995_v35 = vpop.eup %8994  ;;  %v2253_v53 = vrot.slane %v2181_v52, %v11253_v23  ;;  %v3454_v52 = vrot.slane %v11446_v36, %v11253_v23 }
 0x3bd   :  { %8514 = vmatmul.mubr.msk.f32.vlgmr.msra.gmra.mxu1 %vm1796_vm8, %v8995_v35 }
 0x3be   :  { %v2292_v58 = vsel %vm1774_vm2, %v2253_v53, %v2291_v44  ;;  %8517 = vmatpush3.msk.msra.mxu1 %vm1803_vm9, %v11392_v26  ;;  %v2295_v26 = vsel %vm1766_vm13, %v2269_v40, %v2294_v28  ;;  %v3450_v44 = vrot.slane %v11436_v9, %v11253_v23 }
 0x3bf   :  { %v2302_v0 = vsub.f32 %v9176_v6, %v2292_v58  ;;  %v3362_v5 = vpop.xlane.xlu1 %3361  ;;  %v2202_v16 = vpop.xlane.xlu0 %2201  ;;  %8534 = vmatprep.subr.msk.mxu1 %vm1803_vm9, %v11453_v29  ;;  %v2296_v42 = vsel %vm1768_vm14, %v2273_v54, %v2295_v26  ;;  %v9178_v58 = vld [vmem:[%s9306_s17] sm:$0xff] }
 0x3c0   :  { %v2281_v12 = vrot.slane %v2202_v16, %v11253_v23  ;;  %v2297_v32 = vsel %vm1770_vm15, %v2277_v55, %v2296_v42  ;;  %v3430_v27 = vrot.slane %v3362_v5, %v11253_v23  ;;  %v3486_v5 = vsel %vm1762_vm11, %v3454_v52, %v3450_v44 }
 0x3c1   :  { %v2304_v17 = vmul.f32 %v2302_v0, %v2302_v0 }
 0x3c2   :  { %v2298_v33 = vsel %vm1772_vm1, %v2281_v12, %v2297_v32  ;;  %v3481_v7 = vsel %vm1766_vm13, %v3430_v27, %v3480_v4 }
 0x3c3   :  { %v2306_v47 = vmul.f32 -50.0, %v2304_v17  ;;  %v2205_v49 = vpop.xlane.xlu1 %2204  ;;  %v3383_v30 = vpop.xlane.xlu0 %3382 }
 0x3c4   :  { %v2285_v14 = vrot.slane %v2205_v49, %v11253_v23  ;;  %v3458_v53 = vrot.slane %v3383_v30, %v11253_v23 }
 0x3c5   :  { %v2308_v8 = vmul.f32 1.442695, %v2306_v47 }
 0x3c6   :  { %v2299_v43 = vsel %vm1774_vm2, %v2285_v14, %v2298_v33  ;;  %v3487_v16 = vsel %vm1764_vm12, %v3458_v53, %v3486_v5  ;;  %v9179_v14 = vld [vmem:[%s9306_s17 + $0x8] sm:$0xff] }
 0x3c7   :  { %8996 = vpow2.f32 %v2308_v8  ;;  %v2303_v37 = vsub.f32 %v9177_v19, %v2299_v43  ;;  %v3386_v25 = vpop.xlane.xlu1 %3385  ;;  %v3365_v3 = vpop.xlane.xlu0 %3364  ;;  %v4114_v5 = vld [vmem:[%s9321_s29 + $0x8] sm:$0xff] }
 0x3c8   :  { %v3434_v62 = vrot.slane %v3365_v3, %v11253_v23  ;;  %v3462_v34 = vrot.slane %v3386_v25, %v11253_v23  ;;  %4140 = vperm.xlu0 %8981, %v4114_v5  }
 0x3c9   :  { %v2305_v1 = vmul.f32 %v2303_v37, %v2303_v37 }
 0x3ca   :  { %v3482_v50 = vsel %vm1768_vm14, %v3434_v62, %v3481_v7 }
 0x3cb   :  { %v2307_v13 = vmul.f32 -50.0, %v2305_v1  ;;  %v3389_v61 = vpop.xlane.xlu1 %3388  ;;  %v3368_v2 = vpop.xlane.xlu0 %3367 }
 0x3cc   :  { %v3438_v18 = vrot.slane %v3368_v2, %v11253_v23  ;;  %v3466_v36 = vrot.slane %v3389_v61, %v11253_v23 }
 0x3cd   :  { %v2310_v10 = vmul.f32 1.442695, %v2307_v13 }
 0x3ce   :  { %v3483_v35 = vsel %vm1770_vm15, %v3438_v18, %v3482_v50 }
 0x3cf   :  { %8998 = vpow2.f32 %v2310_v10  ;;  %v11480_v24 = vpop.xlane.xlu1 %3612  ;;  %v11482_v15 = vpop.xlane.xlu0 %3609 }
 0x3d3   :  { %v3392_v63 = vpop.xlane.xlu1 %3391  ;;  %v3371_v31 = vpop.xlane.xlu0 %3370 }
 0x3d4   :  { %v8997_v60 = vpop.eup %8996  ;;  %v3442_v48 = vrot.slane %v3371_v31, %v11253_v23  ;;  %v3470_v9 = vrot.slane %v3392_v63, %v11253_v23  ;;  %v3679_v31 = vrot.slane %v11480_v24, %v11253_v23 }
 0x3d5   :  { %8518 = vmatprep.mubr.msk.f32.mxu1 %vm1796_vm8, %v8997_v60  ;;  %v3675_v60 = vrot.slane %v11482_v15, %v11253_v23 }
 0x3d6   :  { %v3484_v41 = vsel %vm1772_vm1, %v3442_v48, %v3483_v35  ;;  %v11566_v35 = vld [vmem:[%s9351_s30 + $0x8] sm:$0xf]  ;;  %s9276_s30 = smov 40  }
 0x3d7   :  { %v11493_v38 = vpop.xlane.xlu1 %3633  ;;  %v11495_v11 = vpop.xlane.xlu0 %3615  ;;  %v3736_v22 = vsel %vm1762_vm11, %v3679_v31, %v3675_v60 }
 0x3d8   :  { %v3683_v20 = vrot.slane %v11495_v11, %v11253_v23 }
 0x3da   :  { %v3737_v15 = vsel %vm1764_vm12, %v3683_v20, %v3736_v22 }
 0x3db   :  { %v3374_v57 = vpop.xlane.xlu1 %3373  ;;  %v11503_v45 = vpop.xlane.xlu0 %3636 }
 0x3dc   :  { %v8999_v46 = vpop.eup %8998  ;;  %v3446_v21 = vrot.slane %v3374_v57, %v11253_v23  ;;  %v3711_v57 = vrot.slane %v11503_v45, %v11253_v23 }
 0x3dd   :  { %8519 = vmatmul.mubr.msk.f32.vlgmr.msra.gmra.mxu1 %vm1796_vm8, %v8999_v46 }
 0x3de   :  { %v3485_v40 = vsel %vm1774_vm2, %v3446_v21, %v3484_v41  ;;  %8535 = vmatpush3.msk.msra.mxu1 %vm1803_vm9, %v11453_v29  ;;  %v3488_v29 = vsel %vm1766_vm13, %v3462_v34, %v3487_v16  ;;  %v3707_v41 = vrot.slane %v11493_v38, %v11253_v23 }
 0x3df   :  { %v3495_v54 = vsub.f32 %v9178_v58, %v3485_v40  ;;  %v3619_v6 = vpop.xlane.xlu1 %3618  ;;  %v3395_v0 = vpop.xlane.xlu0 %3394  ;;  %8539 = vmatprep.subr.msk.mxu1 %vm1803_vm9, %v11510_v56  ;;  %v3489_v28 = vsel %vm1768_vm14, %v3466_v36, %v3488_v29  ;;  %v9180_v40 = vld [vmem:[%s9306_s17 + $0x10] sm:$0xff] }
 0x3e0   :  { %v3474_v55 = vrot.slane %v3395_v0, %v11253_v23  ;;  %v3490_v42 = vsel %vm1770_vm15, %v3470_v9, %v3489_v28  ;;  %v3687_v59 = vrot.slane %v3619_v6, %v11253_v23  ;;  %v3743_v6 = vsel %vm1762_vm11, %v3711_v57, %v3707_v41  ;;  %v4116_v0 = vld [vmem:[%s9321_s29 + $0x18] sm:$0xff]  ;;  %s9271_s29 = smov 80  }
 0x3e1   :  { %v3497_v51 = vmul.f32 %v3495_v54, %v3495_v54  ;;  %4150 = vperm.xlu1 %8980, %v4116_v0  }
 0x3e2   :  { %v3491_v30 = vsel %vm1772_vm1, %v3474_v55, %v3490_v42  ;;  %v3738_v11 = vsel %vm1766_vm13, %v3687_v59, %v3737_v15 }
 0x3e3   :  { %v3499_v17 = vmul.f32 -50.0, %v3497_v51  ;;  %v3398_v12 = vpop.xlane.xlu1 %3397  ;;  %v3640_v26 = vpop.xlane.xlu0 %3639 }
 0x3e4   :  { %v3478_v47 = vrot.slane %v3398_v12, %v11253_v23  ;;  %v3715_v21 = vrot.slane %v3640_v26, %v11253_v23 }
 0x3e5   :  { %v3501_v49 = vmul.f32 1.442695, %v3499_v17 }
 0x3e6   :  { %v3492_v32 = vsel %vm1774_vm2, %v3478_v47, %v3491_v30  ;;  %v3744_v9 = vsel %vm1764_vm12, %v3715_v21, %v3743_v6  ;;  %v9181_v30 = vld [vmem:[%s9306_s17 + $0x18] sm:$0xff] }
 0x3e7   :  { %9000 = vpow2.f32 %v3501_v49  ;;  %v3496_v8 = vsub.f32 %v9179_v14, %v3492_v32  ;;  %v3643_v33 = vpop.xlane.xlu1 %3642  ;;  %v3622_v43 = vpop.xlane.xlu0 %3621 }
 0x3e8   :  { %v3691_v39 = vrot.slane %v3622_v43, %v11253_v23  ;;  %v3719_v44 = vrot.slane %v3643_v33, %v11253_v23 }
 0x3e9   :  { %v3498_v19 = vmul.f32 %v3496_v8, %v3496_v8 }
 0x3ea   :  { %v3739_v4 = vsel %vm1768_vm14, %v3691_v39, %v3738_v11  ;;  %v3745_v51 = vsel %vm1766_vm13, %v3719_v44, %v3744_v9  ;;  %v9183_v9 = vld [vmem:[%s9306_s17 + $0x28] sm:$0xff] }
 0x3eb   :  { %v3500_v37 = vmul.f32 -50.0, %v3498_v19  ;;  %v3646_v25 = vpop.xlane.xlu1 %3645  ;;  %v3625_v3 = vpop.xlane.xlu0 %3624 }
 0x3ec   :  { %v3695_v24 = vrot.slane %v3625_v3, %v11253_v23  ;;  %v3723_v34 = vrot.slane %v3646_v25, %v11253_v23 }
 0x3ed   :  { %v3503_v1 = vmul.f32 1.442695, %v3500_v37 }
 0x3ee   :  { %v3740_v46 = vsel %vm1770_vm15, %v3695_v24, %v3739_v4  ;;  %v3746_v55 = vsel %vm1768_vm14, %v3723_v34, %v3745_v51  ;;  %v9182_v34 = vld [vmem:[%s9306_s17 + $0x20] sm:$0xff]  ;;  %s9268_s17 = smov 88  }
 0x3ef   :  { %9002 = vpow2.f32 %v3503_v1  ;;  %v11536_v13 = vpop.xlane.xlu1 %3870  ;;  %v11538_v61 = vpop.xlane.xlu0 %3867 }
 0x3f0   :  { %v3937_v25 = vrot.slane %v11536_v13, %v11253_v23  ;;  %v3933_v3 = vrot.slane %v11538_v61, %v11253_v23 }
 0x3f2   :  { %v3994_v20 = vsel %vm1762_vm11, %v3937_v25, %v3933_v3 }
 0x3f3   :  { %v3649_v2 = vpop.xlane.xlu1 %3648  ;;  %v3628_v10 = vpop.xlane.xlu0 %3627 }
 0x3f4   :  { %v9001_v63 = vpop.eup %9000  ;;  %v3699_v18 = vrot.slane %v3628_v10, %v11253_v23  ;;  %v3727_v38 = vrot.slane %v3649_v2, %v11253_v23 }
 0x3f5   :  { %8536 = vmatprep.mubr.msk.f32.mxu1 %vm1796_vm8, %v9001_v63 }
 0x3f6   :  { %v3741_v53 = vsel %vm1772_vm1, %v3699_v18, %v3740_v46  ;;  %v3747_v12 = vsel %vm1770_vm15, %v3727_v38, %v3746_v55 }
 0x3f7   :  { %v11549_v27 = vpop.xlane.xlu1 %3891  ;;  %v11551_v62 = vpop.xlane.xlu0 %3873 }
 0x3f8   :  { %v3941_v1 = vrot.slane %v11551_v62, %v11253_v23  ;;  %v3965_v22 = vrot.slane %v11549_v27, %v11253_v23 }
 0x3fa   :  { %v3995_v61 = vsel %vm1764_vm12, %v3941_v1, %v3994_v20 }
 0x3fb   :  { %v3631_v48 = vpop.xlane.xlu1 %3630  ;;  %v11559_v7 = vpop.xlane.xlu0 %3894 }
 0x3fc   :  { %v9003_v50 = vpop.eup %9002  ;;  %v3703_v52 = vrot.slane %v3631_v48, %v11253_v23  ;;  %v3969_v59 = vrot.slane %v11559_v7, %v11253_v23 }
 0x3fd   :  { %8537 = vmatmul.mubr.msk.f32.vlgmr.msra.gmra.mxu1 %vm1796_vm8, %v9003_v50 }
 0x3fe   :  { %v3742_v45 = vsel %vm1774_vm2, %v3703_v52, %v3741_v53  ;;  %8540 = vmatpush3.msk.msra.mxu1 %vm1803_vm9, %v11510_v56  ;;  %v4001_v50 = vsel %vm1762_vm11, %v3969_v59, %v3965_v22  ;;  %v8049_v22 = vld [vmem:[%s9356_s6] ss:$0 sm:$0xff]  ;;  %s9277_s6 = smov 8  }
 0x3ff   :  { %v3752_v36 = vsub.f32 %v9180_v40, %v3742_v45  ;;  %v3877_v58 = vpop.xlane.xlu1 %3876  ;;  %v3652_v54 = vpop.xlane.xlu0 %3651  ;;  %8544 = vmatprep.subr.msk.mxu1 %vm1803_vm9, %v11566_v35 }
 0x400   :  { %v3731_v56 = vrot.slane %v3652_v54, %v11253_v23  ;;  %v3945_v10 = vrot.slane %v3877_v58, %v11253_v23 }
 0x401   :  { %v3754_v16 = vmul.f32 %v3752_v36, %v3752_v36 }
 0x402   :  { %v3748_v47 = vsel %vm1772_vm1, %v3731_v56, %v3747_v12  ;;  %v3996_v24 = vsel %vm1766_vm13, %v3945_v10, %v3995_v61  ;;  %v4160_v12 = vld [vmem:[%s9361_s12 + $0x18] sm:$0xff] }
 0x403   :  { %v3756_v29 = vmul.f32 -50.0, %v3754_v16  ;;  %v3655_v28 = vpop.xlane.xlu1 %3654  ;;  %v3898_v17 = vpop.xlane.xlu0 %3897  ;;  %8549 = vmatprep.subr.mxu0 %v4160_v12 }
 0x404   :  { %v3735_v26 = vrot.slane %v3655_v28, %v11253_v23  ;;  %v3973_v39 = vrot.slane %v3898_v17, %v11253_v23  ;;  %8550 = vmatpush3.msra.mxu0 %v4160_v12 }
 0x405   :  { %v3758_v42 = vmul.f32 1.442695, %v3756_v29 }
 0x406   :  { %v3749_v49 = vsel %vm1774_vm2, %v3735_v26, %v3748_v47  ;;  %v4002_v52 = vsel %vm1764_vm12, %v3973_v39, %v4001_v50  ;;  %v4159_v26 = vld [vmem:[%s9361_s12 + $0x10] sm:$0xff]  ;;  %v8505_v47 = vpop.f32.mrf.mxu0 }
 0x407   :  { %9004 = vpow2.f32 %v3758_v42  ;;  %v3753_v32 = vsub.f32 %v9181_v30, %v3749_v49  ;;  %v3901_v14 = vpop.xlane.xlu1 %3900  ;;  %v3880_v8 = vpop.xlane.xlu0 %3879  ;;  %v4158_v42 = vld [vmem:[%s9361_s12 + $0x8] sm:$0xff]  ;;  %8551 = vmatprep.subr.mxu0 %v4159_v26  ;;  %v8015_v30 = vld [vmem:[%s9341_s19] ss:$0 sm:$0xff]  ;;  %s9274_s19 = smov 72  }
 0x408   :  { %v3949_v63 = vrot.slane %v3880_v8, %v11253_v23  ;;  %v3977_v15 = vrot.slane %v3901_v14, %v11253_v23  ;;  %8552 = vmatpush3.msra.mxu0 %v4159_v26  ;;  %v1615_v8 = vadd.f32 %v8505_v47, %v8015_v30 }
 0x409   :  { %v3755_v33 = vmul.f32 %v3753_v32, %v3753_v32  ;;  %8553 = vmatprep.subr.mxu0 %v4158_v42  ;;  %v1609_v32 = vpop.f32.mrf.mxu0 }
 0x40a   :  { %v3997_v18 = vsel %vm1768_vm14, %v3949_v63, %v3996_v24  ;;  %v4003_v41 = vsel %vm1766_vm13, %v3977_v15, %v4002_v52  ;;  %8554 = vmatpush3.msra.mxu0 %v4158_v42 }
 0x40b   :  { %v3757_v43 = vmul.f32 -50.0, %v3755_v33  ;;  %v3904_v19 = vpop.xlane.xlu1 %3903  ;;  %v3883_v37 = vpop.xlane.xlu0 %3882 }
 0x40c   :  { %v3953_v13 = vrot.slane %v3883_v37, %v11253_v23  ;;  %v3981_v11 = vrot.slane %v3904_v19, %v11253_v23 }
 0x40d   :  { %v3760_v2 = vmul.f32 1.442695, %v3757_v43  ;;  %v1610_v43 = vadd.f32 %v8015_v30, %v1609_v32 }
 0x40e   :  { %v3998_v57 = vsel %vm1770_vm15, %v3953_v13, %v3997_v18  ;;  %v4004_v45 = vsel %vm1768_vm14, %v3981_v11, %v4003_v41  ;;  %v4127_v41 = vld [vmem:[%s9316_s25 + $0x10] sm:$0xff] }
 0x40f   :  { %9006 = vpow2.f32 %v3760_v2  ;;  %v3907_v31 = vpop.xlane.xlu1 %3906  ;;  %v3886_v60 = vpop.xlane.xlu0 %3885 }
 0x410   :  { %v3957_v62 = vrot.slane %v3886_v60, %v11253_v23  ;;  %v3985_v46 = vrot.slane %v3907_v31, %v11253_v23  ;;  %v4125_v60 = vld [vmem:[%s9316_s25] sm:$0xff] }
 0x412   :  { %v3999_v21 = vsel %vm1772_vm1, %v3957_v62, %v3998_v57  ;;  %v4005_v58 = vsel %vm1770_vm15, %v3985_v46, %v4004_v45  ;;  %v4126_v45 = vld [vmem:[%s9316_s25 + $0x8] sm:$0xff] }
 0x413   :  { %v3910_v4 = vpop.xlane.xlu1 %3909  ;;  %v3889_v48 = vpop.xlane.xlu0 %3888 }
 0x414   :  { %v9005_v7 = vpop.eup %9004  ;;  %v3961_v27 = vrot.slane %v3889_v48, %v11253_v23  ;;  %v3989_v53 = vrot.slane %v3910_v4, %v11253_v23 }
 0x415   :  { %8541 = vmatprep.mubr.msk.f32.mxu1 %vm1796_vm8, %v9005_v7 }
 0x416   :  { %v4000_v44 = vsel %vm1774_vm2, %v3961_v27, %v3999_v21  ;;  %v4006_v6 = vsel %vm1772_vm1, %v3989_v53, %v4005_v58 }
 0x417   :  { %v4010_v40 = vsub.f32 %v9182_v34, %v4000_v44  ;;  %v3913_v36 = vpop.xlane.xlu0 %3912  ;;  %v11645_v13 = vpop.permute.xlu1 %4135 }
 0x418   :  { %v3993_v54 = vrot.slane %v3913_v36, %v11253_v23 }
 0x419   :  { %v4012_v38 = vmul.f32 %v4010_v40, %v4010_v40  ;;  %v4128_v40 = vld [vmem:[%s9316_s25 + $0x18] sm:$0xff]  ;;  %s9270_s25 = smov 56  }
 0x41a   :  { %v4007_v0 = vsel %vm1774_vm2, %v3993_v54, %v4006_v6 }
 0x41b   :  { %v4014_v5 = vmul.f32 -50.0, %v4012_v38  ;;  %v4011_v16 = vsub.f32 %v9183_v9, %v4007_v0  ;;  %v11660_v6 = vpop.permute.xlu1 %4145 }
 0x41c   :  { %v9007_v56 = vpop.eup %9006 }
 0x41d   :  { %v4016_v51 = vmul.f32 1.442695, %v4014_v5  ;;  %v4013_v55 = vmul.f32 %v4011_v16, %v4011_v16  ;;  %8542 = vmatmul.mubr.msk.f32.vlgmr.msra.gmra.mxu1 %vm1796_vm8, %v9007_v56 }
 0x41e   :  { %8545 = vmatpush3.msk.msra.mxu1 %vm1803_vm9, %v11566_v35  ;;  %v4157_v35 = vld [vmem:[%s9361_s12] sm:$0xff]  ;;  %vm4277_vm9 = vcmask 64512  }
 0x41f   :  { %9008 = vpow2.f32 %v4016_v51  ;;  %v4015_v23 = vmul.f32 -50.0, %v4013_v55  ;;  %8555 = vmatprep.subr.mxu0 %v4157_v35  ;;  %v8063_v55 = vld [vmem:[%s12803_s0] ss:$0 sm:$0xff] }
 0x420   :  { %8556 = vmatpush3.msra.mxu0 %v4157_v35 }
 0x421   :  { %v4018_v29 = vmul.f32 1.442695, %v4015_v23 }
 0x423   :  { %9010 = vpow2.f32 %v4018_v29 }
 0x42c   :  { %v9009_v28 = vpop.eup %9008 }
 0x42d   :  { %8546 = vmatprep.mubr.msk.f32.mxu1 %vm1796_vm8, %v9009_v28 }
 0x430   :  { %v9011_v17 = vpop.eup %9010 }
 0x431   :  { %8547 = vmatmul.mubr.msk.f32.vlgmr.msra.gmra.mxu1 %vm1796_vm8, %v9011_v17 }
 0x433   :  { %v8533_v39 = vpop.f32.mrf.mxu0 }
 0x434   :  { %v3332_v18 = vadd.f32 %v8533_v39, %v8049_v22 }
 0x435   :  { %v3326_v24 = vpop.f32.mrf.mxu0 }
 0x436   :  { %v3327_v4 = vadd.f32 %v8049_v22, %v3326_v24 }
 0x443   :  { %v11658_v54 = vpop.permute.xlu0 %4140 }
 0x45c   :  { %v11670_v16 = vpop.permute.xlu1 %4150 }
 0x45d   :  { %v8510_v49 = vpop.f32.mrf.mxu1 }
 0x45e   :  { %v1883_v19 = vadd.f32 %v8510_v49, %v1615_v8 }
 0x45f   :  { %v1873_v14 = vpop.f32.mrf.mxu1 }
 0x460   :  { %v1882_v25 = vadd.f32 %v1873_v14, %v1610_v43  ;;  %v11721_v43 = vld [vmem:[%s12804_s13 + $0x8] sm:$0xff] }
 0x47d   :  { %v8515_v33 = vpop.f32.mrf.mxu1 }
 0x47e   :  { %v2141_v3 = vadd.f32 %v8515_v33, %v1883_v19 }
 0x47f   :  { %v2131_v37 = vpop.f32.mrf.mxu1 }
 0x480   :  { %v2140_v2 = vadd.f32 %v2131_v37, %v1882_v25  ;;  %v11724_v25 = vld [vmem:[%s12804_s13] sm:$0xff] }
 0x49d   :  { %v8520_v1 = vpop.f32.mrf.mxu1 }
 0x49e   :  { %v2399_v10 = vadd.f32 %v8520_v1, %v2141_v3 }
 0x49f   :  { %v2389_v63 = vpop.f32.mrf.mxu1 }
 0x4a0   :  { %4111 = vst.msk [vmem:[#allocation2 + $0x10] sm:$0xff] %vm4108_vm0, %v2399_v10  ;;  %v2398_v31 = vadd.f32 %v2389_v63, %v2140_v2  ;;  %v11728_v10 = vld [vmem:[%s12804_s13 + $0x18] sm:$0xff] }
 0x4a2   :  { %4109 = vst.msk [vmem:[#allocation2] sm:$0xff] %vm4108_vm0, %v2398_v31 }
 0x4a7   :  { %v4123_v44 = vld [vmem:[#allocation2 + $0x10] sm:$0xff] }
 0x4a8   :  { %v4131_v34 = vadd.f32 %v4127_v41, %v4123_v44 }
 0x4a9   :  { %v4121_v20 = vld [vmem:[#allocation2] sm:$0xff] }
 0x4aa   :  { %v4129_v59 = vadd.f32 %v4125_v60, %v4121_v20  ;;  %v11666_v9 = vmul.f32 %v11660_v6, %v4131_v34 }
 0x4ac   :  { %v11648_v61 = vmul.f32 %v11645_v13, %v4129_v59  ;;  %v11733_v59 = vld [vmem:[%s12804_s13 + $0x10] sm:$0xff] }
 0x4ae   :  { %8557 = vmatprep.mubr.msk.f32.mxu0 %vm4108_vm0, %v11648_v61 }
 0x4bd   :  { %v8538_v62 = vpop.f32.mrf.mxu1 }
 0x4be   :  { %v3591_v48 = vadd.f32 %v8538_v62, %v3332_v18 }
 0x4bf   :  { %v3581_v15 = vpop.f32.mrf.mxu1 }
 0x4c0   :  { %v3590_v50 = vadd.f32 %v3581_v15, %v3327_v4 }
 0x4dd   :  { %v8543_v11 = vpop.f32.mrf.mxu1 }
 0x4de   :  { %v3849_v57 = vadd.f32 %v8543_v11, %v3591_v48 }
 0x4df   :  { %v3839_v7 = vpop.f32.mrf.mxu1 }
 0x4e0   :  { %v3848_v27 = vadd.f32 %v3839_v7, %v3590_v50 }
 0x4f1   :  { %v8548_v46 = vpop.f32.mrf.mxu1 }
 0x4f2   :  { %v4107_v52 = vadd.f32 %v8548_v46, %v3849_v57 }
 0x4f3   :  { %v4097_v21 = vpop.f32.mrf.mxu1 }
 0x4f4   :  { %4112 = vst.msk [vmem:[#allocation2 + $0x18] sm:$0xff] %vm4108_vm0, %v4107_v52  ;;  %v4106_v53 = vadd.f32 %v4097_v21, %v3848_v27 }
 0x4f6   :  { %4110 = vst.msk [vmem:[#allocation2 + $0x8] sm:$0xff] %vm4108_vm0, %v4106_v53 }
 0x4fb   :  { %v4124_v36 = vld [vmem:[#allocation2 + $0x18] sm:$0xff] }
 0x4fc   :  { %v4132_v0 = vadd.f32 %v4128_v40, %v4124_v36 }
 0x4fd   :  { %v4122_v58 = vld [vmem:[#allocation2 + $0x8] sm:$0xff] }
 0x4fe   :  { %v4130_v38 = vadd.f32 %v4126_v45, %v4122_v58  ;;  %v11675_v56 = vmul.f32 %v11670_v16, %v4132_v0 }
 0x500   :  { %v11663_v5 = vmul.f32 %v11658_v54, %v4130_v38 }
 0x502   :  { %8558 = vmatmul.mubr.msk.f32.vlgmr.msra.gmra.mxu0 %vm4108_vm0, %v11663_v5 }
 0x503   :  { %8560 = vmatprep.mubr.msk.f32.mxu0 %vm4108_vm0, %v11666_v9 }
 0x506   :  { %8561 = vmatmul.mubr.msk.f32.gmra.mxu0 %vm4108_vm0, %v11675_v56 }
 0x5c2   :  { %v8559_v51 = vpop.f32.mrf.mxu0 }
 0x5c3   :  { %v11694_v42 = vadd.f32 %v8559_v51, %v8063_v55 }
 0x5c4   :  { %v4246_v23 = vpop.f32.mrf.mxu0 }
 0x5c5   :  { %v11680_v29 = vadd.f32 %v8063_v55, %v4246_v23 }
 0x5c6   :  { %v8562_v28 = vpop.f32.mrf.mxu0 }
 0x5c7   :  { %v11682_v17 = vadd.f32 %v8562_v28, %v8063_v55  ;;  %8571 = vmatprep.mubr.msk.f32.mxu1 %vm4277_vm9, %v11680_v29 }
 0x5c8   :  { %v4256_v12 = vpop.f32.mrf.mxu0 }
 0x5c9   :  { %v11686_v26 = vadd.f32 %v8063_v55, %v4256_v12  ;;  %4275 = vrot.lane.b32.xlu1 %v11682_v17, %s9266_s5 }
 0x5cb   :  { %4435 = vrot.lane.b32.xlu0 %v11686_v26, %s9267_s9 }
 0x5cd   :  { %4273 = vrot.lane.b32.xlu1 %v11686_v26, %s9266_s5 }
 0x5d1   :  { %4271 = vrot.lane.b32.xlu1 %v11694_v42, %s9266_s5 }
 0x5d5   :  { %4269 = vrot.lane.b32.xlu1 %v11680_v29, %s9266_s5 }
 0x5d9   :  { %4437 = vrot.lane.b32.xlu1 %v11682_v17, %s9267_s9 }
 0x5dd   :  { %4433 = vrot.lane.b32.xlu1 %v11694_v42, %s9267_s9 }
 0x5e1   :  { %4431 = vrot.lane.b32.xlu1 %v11680_v29, %s9267_s9 }
 0x63b   :  { %v4276_v35 = vpop.permute.xlu1 %4275 }
 0x63c   :  { %8563 = vmatprep.subr.msk.mxu1 %vm4277_vm9, %v4276_v35 }
 0x63d   :  { %8564 = vmatpush3.xpose.msk.msra.mxu1 %vm4277_vm9, %v4276_v35  ;;  %v4436_v14 = vpop.permute.xlu0 %4435 }
 0x63f   :  { %v4274_v47 = vpop.permute.xlu1 %4273 }
 0x640   :  { %8565 = vmatprep.subr.msk.mxu1 %vm4277_vm9, %v4274_v47 }
 0x641   :  { %8566 = vmatpush3.xpose.msk.msra.mxu1 %vm4277_vm9, %v4274_v47 }
 0x643   :  { %v4272_v49 = vpop.permute.xlu1 %4271 }
 0x644   :  { %8567 = vmatprep.subr.msk.mxu1 %vm4277_vm9, %v4272_v49 }
 0x645   :  { %8568 = vmatpush3.xpose.msk.msra.mxu1 %vm4277_vm9, %v4272_v49 }
 0x647   :  { %v4270_v30 = vpop.permute.xlu1 %4269 }
 0x648   :  { %8569 = vmatprep.subr.msk.mxu1 %vm4277_vm9, %v4270_v30 }
 0x649   :  { %8570 = vmatpush3.xpose.msk.msra.mxu1 %vm4277_vm9, %v4270_v30 }
 0x64b   :  { %v4438_v32 = vpop.permute.xlu1 %4437 }
 0x64c   :  { %8572 = vmatmul.mubr.msk.f32.vlgmr.msra.gmra.mxu1 %vm4277_vm9, %v11694_v42  ;;  %8577 = vmatprep.subr.mxu0 %v4438_v32 }
 0x64d   :  { %8574 = vmatprep.mubr.msk.f32.mxu1 %vm4277_vm9, %v11686_v26  ;;  %8578 = vmatpush3.msra.mxu0 %v4438_v32 }
 0x64e   :  { %8579 = vmatprep.subr.mxu0 %v4436_v14 }
 0x64f   :  { %8580 = vmatpush3.msra.mxu0 %v4436_v14  ;;  %v4434_v8 = vpop.permute.xlu1 %4433 }
 0x650   :  { %8575 = vmatmul.mubr.msk.f32.gmra.mxu1 %vm4277_vm9, %v11682_v17  ;;  %8581 = vmatprep.subr.mxu0 %v4434_v8 }
 0x651   :  { %8582 = vmatpush3.msra.mxu0 %v4434_v8 }
 0x653   :  { %v4432_v33 = vpop.permute.xlu1 %4431 }
 0x654   :  { %8583 = vmatprep.subr.mxu0 %v4432_v33 }
 0x655   :  { %8584 = vmatpush3.msra.mxu0 %v4432_v33 }
 0x70c   :  { %v8573_v19 = vpop.f32.mrf.mxu1 }
 0x70d   :  { %v4380_v37 = vmul.f32 0.35355338, %v8573_v19 }
 0x70e   :  { %v4360_v3 = vpop.f32.mrf.mxu1 }
 0x70f   :  { %v4384_v1 = vadd.f32 %v4380_v37, %v11721_v43  ;;  %v4379_v2 = vmul.f32 0.35355338, %v4360_v3 }
 0x710   :  { %v8576_v63 = vpop.f32.mrf.mxu1 }
 0x711   :  { %v4383_v31 = vadd.f32 %v4379_v2, %v11724_v25  ;;  %v4382_v60 = vmul.f32 0.35355338, %v8576_v63  ;;  %v4390_v20 = vsel %vm4108_vm0, %v4384_v1, -inf }
 0x712   :  { %4391 = vmax.xlane.f32.xlu0 %v4390_v20  ;;  %v4370_v39 = vpop.f32.mrf.mxu1 }
 0x713   :  { %v4386_v62 = vadd.f32 %v4382_v60, %v11728_v10  ;;  %v4381_v22 = vmul.f32 0.35355338, %v4370_v39  ;;  %v4387_v24 = vsel %vm4108_vm0, %v4383_v31, -inf }
 0x714   :  { %4388 = vmax.xlane.f32.xlu1 %v4387_v24 }
 0x715   :  { %v4385_v15 = vadd.f32 %v4381_v22, %v11733_v59  ;;  %v4396_v18 = vsel %vm4108_vm0, %v4386_v62, -inf }
 0x716   :  { %4397 = vmax.xlane.f32.xlu0 %v4396_v18 }
 0x717   :  { %v4393_v11 = vsel %vm4108_vm0, %v4385_v15, -inf }
 0x718   :  { %4394 = vmax.xlane.f32.xlu1 %v4393_v11 }
 0x729   :  { %4556 = vrot.lane.b32.xlu1 %v11686_v26, %s9268_s17 }
 0x72c   :  { %4558 = vrot.lane.b32.xlu0 %v11682_v17, %s9268_s17 }
 0x79b   :  { %v4392_v4 = vpop.xlane.xlu0 %4391 }
 0x79c   :  { %v4400_v48 = vsub.f32 %v4384_v1, %v4392_v4 }
 0x79d   :  { %v4389_v7 = vpop.xlane.xlu1 %4388 }
 0x79e   :  { %v4405_v50 = vmul.f32 1.442695, %v4400_v48  ;;  %v4399_v57 = vsub.f32 %v4383_v31, %v4389_v7 }
 0x79f   :  { %v4398_v46 = vpop.xlane.xlu0 %4397 }
 0x7a0   :  { %9012 = vpow2.f32 %v4405_v50  ;;  %v4403_v27 = vmul.f32 1.442695, %v4399_v57  ;;  %v4402_v34 = vsub.f32 %v4386_v62, %v4398_v46 }
 0x7a1   :  { %v4395_v45 = vpop.xlane.xlu1 %4394 }
 0x7a2   :  { %9014 = vpow2.f32 %v4403_v27  ;;  %v4401_v40 = vsub.f32 %v4385_v15, %v4395_v45  ;;  %v4409_v36 = vmul.f32 1.442695, %v4402_v34 }
 0x7a3   :  { %v4559_v52 = vpop.permute.xlu0 %4558 }
 0x7a4   :  { %8591 = vmatprep.subr.msk.mxu0 %vm4277_vm9, %v4559_v52  ;;  %v4407_v58 = vmul.f32 1.442695, %v4401_v40  ;;  %9016 = vpow2.f32 %v4409_v36 }
 0x7a5   :  { %v4557_v23 = vpop.permute.xlu1 %4556 }
 0x7a6   :  { %9018 = vpow2.f32 %v4407_v58 }
 0x7ad   :  { %v9013_v21 = vpop.eup %9012 }
 0x7ae   :  { %v4414_v53 = vsel %vm4108_vm0, %v9013_v21, 0.0 }
 0x7af   :  { %v9015_v41 = vpop.eup %9014  ;;  %4415 = vadd.xlane.f32.xlu0 %v4414_v53 }
 0x7b0   :  { %v4411_v44 = vsel %vm4108_vm0, %v9015_v41, 0.0 }
 0x7b1   :  { %4412 = vadd.xlane.f32.xlu1 %v4411_v44  ;;  %v9017_v38 = vpop.eup %9016 }
 0x7b2   :  { %v4420_v51 = vsel %vm4108_vm0, %v9017_v38, 0.0 }
 0x7b3   :  { %v9019_v0 = vpop.eup %9018 }
 0x7b4   :  { %v4417_v55 = vsel %vm4108_vm0, %v9019_v0, 0.0 }
 0x7c2   :  { %4552 = vrot.lane.b32.xlu1 %v11680_v29, %s9268_s17 }
 0x7c5   :  { %4554 = vrot.lane.b32.xlu0 %v11694_v42, %s9268_s17 }
 0x7e4   :  { %4421 = vadd.xlane.f32.xlu0 %v4420_v51 }
 0x7e6   :  { %4418 = vadd.xlane.f32.xlu1 %v4417_v55 }
 0x7f7   :  { %4546 = vrot.lane.b32.xlu1 %v11694_v42, %s9269_s21 }
 0x7fa   :  { %4544 = vrot.lane.b32.xlu0 %v11680_v29, %s9269_s21 }
 0x7fb   :  { %4550 = vrot.lane.b32.xlu1 %v11682_v17, %s9269_s21 }
 0x7fe   :  { %4548 = vrot.lane.b32.xlu0 %v11686_v26, %s9269_s21 }
 0x7ff   :  { %4719 = vrot.lane.b32.xlu1 %v11682_v17, %s9270_s25 }
 0x802   :  { %4717 = vrot.lane.b32.xlu0 %v11686_v26, %s9270_s25 }
 0x803   :  { %4715 = vrot.lane.b32.xlu1 %v11694_v42, %s9270_s25 }
 0x807   :  { %4713 = vrot.lane.b32.xlu1 %v11680_v29, %s9270_s25 }
 0x838   :  { %v4416_v28 = vpop.xlane.xlu0 %4415 }
 0x839   :  { %9020 = vrcp.f32 %v4416_v28 }
 0x83a   :  { %v4413_v12 = vpop.xlane.xlu1 %4412 }
 0x83b   :  { %9022 = vrcp.f32 %v4413_v12 }
 0x83c   :  { %v4555_v32 = vpop.permute.xlu0 %4554 }
 0x83e   :  { %v4553_v14 = vpop.permute.xlu1 %4552 }
 0x846   :  { %v9021_v35 = vpop.eup %9020 }
 0x847   :  { %v4428_v30 = vmul.f32 %v9021_v35, %v9013_v21 }
 0x848   :  { %v9023_v47 = vpop.eup %9022 }
 0x849   :  { %v4427_v49 = vmul.f32 %v9023_v47, %v9015_v41 }
 0x84b   :  { %8585 = vmatprep.mubr.msk.f32.mxu0 %vm4108_vm0, %v4427_v49 }
 0x84c   :  { %8586 = vmatmul.mubr.msk.f32.vlgmr.msra.gmra.mxu0 %vm4108_vm0, %v4428_v30 }
 0x84d   :  { %8592 = vmatpush3.xpose.msk.msra.mxu0 %vm4277_vm9, %v4559_v52 }
 0x84e   :  { %8593 = vmatprep.subr.msk.mxu0 %vm4277_vm9, %v4557_v23 }
 0x851   :  { %8594 = vmatpush3.xpose.msk.msra.mxu0 %vm4277_vm9, %v4557_v23 }
 0x852   :  { %8595 = vmatprep.subr.msk.mxu0 %vm4277_vm9, %v4555_v32 }
 0x855   :  { %8596 = vmatpush3.xpose.msk.msra.mxu0 %vm4277_vm9, %v4555_v32 }
 0x856   :  { %8597 = vmatprep.subr.msk.mxu0 %vm4277_vm9, %v4553_v14 }
 0x859   :  { %8598 = vmatpush3.xpose.msk.msra.mxu0 %vm4277_vm9, %v4553_v14 }
 0x86d   :  { %v4422_v8 = vpop.xlane.xlu0 %4421 }
 0x86e   :  { %9024 = vrcp.f32 %v4422_v8 }
 0x86f   :  { %v4419_v33 = vpop.xlane.xlu1 %4418 }
 0x870   :  { %9026 = vrcp.f32 %v4419_v33 }
 0x871   :  { %v4545_v19 = vpop.permute.xlu0 %4544 }
 0x873   :  { %v4547_v37 = vpop.permute.xlu1 %4546 }
 0x875   :  { %v4549_v3 = vpop.permute.xlu0 %4548 }
 0x877   :  { %v4551_v1 = vpop.permute.xlu1 %4550 }
 0x879   :  { %v4718_v60 = vpop.permute.xlu0 %4717 }
 0x87b   :  { %v4720_v2 = vpop.permute.xlu1 %4719  ;;  %v9025_v63 = vpop.eup %9024 }
 0x87c   :  { %8605 = vmatprep.subr.mxu1 %v4720_v2  ;;  %v4430_v62 = vmul.f32 %v9025_v63, %v9017_v38 }
 0x87d   :  { %v9027_v31 = vpop.eup %9026  ;;  %8606 = vmatpush3.msra.mxu1 %v4720_v2 }
 0x87e   :  { %8607 = vmatprep.subr.mxu1 %v4718_v60  ;;  %v4429_v20 = vmul.f32 %v9027_v31, %v9019_v0 }
 0x87f   :  { %8608 = vmatpush3.msra.mxu1 %v4718_v60  ;;  %v4716_v39 = vpop.permute.xlu1 %4715 }
 0x880   :  { %8588 = vmatprep.mubr.msk.f32.mxu0 %vm4108_vm0, %v4429_v20  ;;  %8609 = vmatprep.subr.mxu1 %v4716_v39 }
 0x881   :  { %8589 = vmatmul.mubr.msk.f32.gmra.mxu0 %vm4108_vm0, %v4430_v62  ;;  %8610 = vmatpush3.msra.mxu1 %v4716_v39 }
 0x882   :  { %8599 = vmatprep.mubr.msk.f32.mxu0 %vm4277_vm9, %v4545_v19 }
 0x883   :  { %v4714_v22 = vpop.permute.xlu1 %4713 }
 0x884   :  { %8611 = vmatprep.subr.mxu1 %v4714_v22 }
 0x885   :  { %8600 = vmatmul.mubr.msk.f32.vlgmr.msra.gmra.mxu0 %vm4277_vm9, %v4547_v37  ;;  %8612 = vmatpush3.msra.mxu1 %v4714_v22 }
 0x886   :  { %8602 = vmatprep.mubr.msk.f32.mxu0 %vm4277_vm9, %v4549_v3 }
 0x889   :  { %8603 = vmatmul.mubr.msk.f32.gmra.mxu0 %vm4277_vm9, %v4551_v1 }
 0x90c   :  { %v8587_v24 = vpop.f32.mrf.mxu0 }
 0x90d   :  { %4541 = vst.msk [vmem:[#allocation3 + $0x8] sm:$0xff] %vm4277_vm9, %v8587_v24 }
 0x90e   :  { %v4521_v15 = vpop.f32.mrf.mxu0 }
 0x90f   :  { %4540 = vst.msk [vmem:[#allocation3] sm:$0xff] %vm4277_vm9, %v4521_v15 }
 0x941   :  { %v8590_v18 = vpop.f32.mrf.mxu0 }
 0x942   :  { %4543 = vst.msk [vmem:[#allocation3 + $0x18] sm:$0xff] %vm4277_vm9, %v8590_v18 }
 0x943   :  { %v4531_v11 = vpop.f32.mrf.mxu0 }
 0x944   :  { %4542 = vst.msk [vmem:[#allocation3 + $0x10] sm:$0xff] %vm4277_vm9, %v4531_v11 }
 0x945   :  { %v8601_v4 = vpop.f32.mrf.mxu0 }
 0x946   :  { %v4662_v48 = vmul.f32 0.35355338, %v8601_v4 }
 0x947   :  { %v4642_v7 = vpop.f32.mrf.mxu0 }
 0x948   :  { %v4666_v50 = vadd.f32 %v4662_v48, %v11721_v43  ;;  %v4661_v57 = vmul.f32 0.35355338, %v4642_v7 }
 0x949   :  { %v8604_v46 = vpop.f32.mrf.mxu0 }
 0x94a   :  { %v4665_v27 = vadd.f32 %v4661_v57, %v11724_v25  ;;  %v4664_v52 = vmul.f32 0.35355338, %v8604_v46  ;;  %v4672_v21 = vsel %vm4108_vm0, %v4666_v50, -inf }
 0x94b   :  { %4673 = vmax.xlane.f32.xlu1 %v4672_v21  ;;  %v4652_v53 = vpop.f32.mrf.mxu0 }
 0x94c   :  { %v4668_v41 = vadd.f32 %v4664_v52, %v11728_v10  ;;  %v4663_v44 = vmul.f32 0.35355338, %v4652_v53  ;;  %v4669_v45 = vsel %vm4108_vm0, %v4665_v27, -inf }
 0x94d   :  { %4670 = vmax.xlane.f32.xlu0 %v4669_v45 }
 0x94e   :  { %v4667_v34 = vadd.f32 %v4663_v44, %v11733_v59  ;;  %v4678_v40 = vsel %vm4108_vm0, %v4668_v41, -inf }
 0x950   :  { %v4675_v36 = vsel %vm4108_vm0, %v4667_v34, -inf }
 0x951   :  { %4679 = vmax.xlane.f32.xlu0 %v4678_v40 }
 0x955   :  { %4676 = vmax.xlane.f32.xlu0 %v4675_v36 }
 0x95c   :  { %4855 = vrot.lane.b32.xlu1 %v11686_v26, %s9271_s29 }
 0x96b   :  { %4857 = vrot.lane.b32.xlu0 %v11682_v17, %s9271_s29 }
 0x9d4   :  { %v4674_v58 = vpop.xlane.xlu1 %4673 }
 0x9d5   :  { %v4682_v38 = vsub.f32 %v4666_v50, %v4674_v58 }
 0x9d6   :  { %v4671_v0 = vpop.xlane.xlu0 %4670 }
 0x9d7   :  { %v4687_v51 = vmul.f32 1.442695, %v4682_v38  ;;  %v4681_v55 = vsub.f32 %v4665_v27, %v4671_v0 }
 0x9d8   :  { %v4856_v63 = vpop.permute.xlu1 %4855 }
 0x9d9   :  { %9028 = vpow2.f32 %v4687_v51  ;;  %v4685_v23 = vmul.f32 1.442695, %v4681_v55 }
 0x9da   :  { %v4680_v28 = vpop.xlane.xlu0 %4679 }
 0x9db   :  { %9030 = vpow2.f32 %v4685_v23  ;;  %v4684_v14 = vsub.f32 %v4668_v41, %v4680_v28 }
 0x9dd   :  { %v4691_v33 = vmul.f32 1.442695, %v4684_v14 }
 0x9de   :  { %v4677_v12 = vpop.xlane.xlu0 %4676 }
 0x9df   :  { %v4683_v8 = vsub.f32 %v4667_v34, %v4677_v12  ;;  %9032 = vpow2.f32 %v4691_v33 }
 0x9e1   :  { %v4689_v19 = vmul.f32 1.442695, %v4683_v8 }
 0x9e2   :  { %v4858_v35 = vpop.permute.xlu0 %4857 }
 0x9e3   :  { %8619 = vmatprep.subr.msk.mxu1 %vm4277_vm9, %v4858_v35  ;;  %9034 = vpow2.f32 %v4689_v19 }
 0x9e6   :  { %v9029_v47 = vpop.eup %9028 }
 0x9e7   :  { %v4696_v49 = vsel %vm4108_vm0, %v9029_v47, 0.0 }
 0x9e8   :  { %v9031_v30 = vpop.eup %9030  ;;  %4697 = vadd.xlane.f32.xlu0 %v4696_v49 }
 0x9e9   :  { %v4693_v32 = vsel %vm4108_vm0, %v9031_v30, 0.0 }
 0x9ea   :  { %4694 = vadd.xlane.f32.xlu1 %v4693_v32 }
 0x9ec   :  { %v9033_v37 = vpop.eup %9032 }
 0x9ed   :  { %v4702_v1 = vsel %vm4108_vm0, %v9033_v37, 0.0 }
 0x9f0   :  { %v9035_v3 = vpop.eup %9034 }
 0x9f1   :  { %v4699_v2 = vsel %vm4108_vm0, %v9035_v3, 0.0 }
 0x9fb   :  { %4851 = vrot.lane.b32.xlu1 %v11680_v29, %s9271_s29 }
 0x9fe   :  { %4853 = vrot.lane.b32.xlu0 %v11694_v42, %s9271_s29 }
 0xa1d   :  { %4703 = vadd.xlane.f32.xlu0 %v4702_v1 }
 0xa1f   :  { %4700 = vadd.xlane.f32.xlu1 %v4699_v2 }
 0xa30   :  { %4845 = vrot.lane.b32.xlu1 %v11694_v42, %s9272_s8 }
 0xa33   :  { %4843 = vrot.lane.b32.xlu0 %v11680_v29, %s9272_s8 }
 0xa34   :  { %4849 = vrot.lane.b32.xlu1 %v11682_v17, %s9272_s8 }
 0xa37   :  { %4847 = vrot.lane.b32.xlu0 %v11686_v26, %s9272_s8 }
 0xa38   :  { %5018 = vrot.lane.b32.xlu1 %v11682_v17, %s9273_s14 }
 0xa3b   :  { %5016 = vrot.lane.b32.xlu0 %v11686_v26, %s9273_s14 }
 0xa3c   :  { %5014 = vrot.lane.b32.xlu1 %v11694_v42, %s9273_s14 }
 0xa40   :  { %5012 = vrot.lane.b32.xlu1 %v11680_v29, %s9273_s14 }
 0xa71   :  { %v4698_v31 = vpop.xlane.xlu0 %4697 }
 0xa72   :  { %9036 = vrcp.f32 %v4698_v31 }
 0xa73   :  { %v4695_v60 = vpop.xlane.xlu1 %4694 }
 0xa74   :  { %9038 = vrcp.f32 %v4695_v60 }
 0xa75   :  { %v4854_v24 = vpop.permute.xlu0 %4853 }
 0xa77   :  { %v4852_v15 = vpop.permute.xlu1 %4851 }
 0xa7f   :  { %v9037_v20 = vpop.eup %9036 }
 0xa80   :  { %v4710_v22 = vmul.f32 %v9037_v20, %v9029_v47 }
 0xa81   :  { %v9039_v39 = vpop.eup %9038 }
 0xa82   :  { %v4709_v62 = vmul.f32 %v9039_v39, %v9031_v30 }
 0xa84   :  { %8613 = vmatprep.mubr.msk.f32.mxu1 %vm4108_vm0, %v4709_v62 }
 0xa85   :  { %8614 = vmatmul.mubr.msk.f32.vlgmr.msra.gmra.mxu1 %vm4108_vm0, %v4710_v22 }
 0xa86   :  { %8620 = vmatpush3.xpose.msk.msra.mxu1 %vm4277_vm9, %v4858_v35 }
 0xa87   :  { %8621 = vmatprep.subr.msk.mxu1 %vm4277_vm9, %v4856_v63 }
 0xa8a   :  { %8622 = vmatpush3.xpose.msk.msra.mxu1 %vm4277_vm9, %v4856_v63 }
 0xa8b   :  { %8623 = vmatprep.subr.msk.mxu1 %vm4277_vm9, %v4854_v24 }
 0xa8e   :  { %8624 = vmatpush3.xpose.msk.msra.mxu1 %vm4277_vm9, %v4854_v24 }
 0xa8f   :  { %8625 = vmatprep.subr.msk.mxu1 %vm4277_vm9, %v4852_v15 }
 0xa92   :  { %8626 = vmatpush3.xpose.msk.msra.mxu1 %vm4277_vm9, %v4852_v15 }
 0xaa6   :  { %v4704_v18 = vpop.xlane.xlu0 %4703 }
 0xaa7   :  { %9040 = vrcp.f32 %v4704_v18 }
 0xaa8   :  { %v4701_v11 = vpop.xlane.xlu1 %4700 }
 0xaa9   :  { %9042 = vrcp.f32 %v4701_v11 }
 0xaaa   :  { %v4844_v4 = vpop.permute.xlu0 %4843 }
 0xaac   :  { %v4846_v48 = vpop.permute.xlu1 %4845 }
 0xaae   :  { %v4848_v7 = vpop.permute.xlu0 %4847 }
 0xab0   :  { %v4850_v50 = vpop.permute.xlu1 %4849 }
 0xab2   :  { %v5017_v52 = vpop.permute.xlu0 %5016 }
 0xab4   :  { %v5019_v57 = vpop.permute.xlu1 %5018  ;;  %v9041_v46 = vpop.eup %9040 }
 0xab5   :  { %8633 = vmatprep.subr.mxu0 %v5019_v57  ;;  %v4712_v41 = vmul.f32 %v9041_v46, %v9033_v37 }
 0xab6   :  { %v9043_v27 = vpop.eup %9042  ;;  %8634 = vmatpush3.msra.mxu0 %v5019_v57 }
 0xab7   :  { %8635 = vmatprep.subr.mxu0 %v5017_v52  ;;  %v4711_v21 = vmul.f32 %v9043_v27, %v9035_v3 }
 0xab8   :  { %8636 = vmatpush3.msra.mxu0 %v5017_v52  ;;  %v5015_v53 = vpop.permute.xlu1 %5014 }
 0xab9   :  { %8616 = vmatprep.mubr.msk.f32.mxu1 %vm4108_vm0, %v4711_v21  ;;  %8637 = vmatprep.subr.mxu0 %v5015_v53 }
 0xaba   :  { %8617 = vmatmul.mubr.msk.f32.gmra.mxu1 %vm4108_vm0, %v4712_v41  ;;  %8638 = vmatpush3.msra.mxu0 %v5015_v53 }
 0xabb   :  { %8627 = vmatprep.mubr.msk.f32.mxu1 %vm4277_vm9, %v4844_v4 }
 0xabc   :  { %v5013_v44 = vpop.permute.xlu1 %5012 }
 0xabd   :  { %8639 = vmatprep.subr.mxu0 %v5013_v44 }
 0xabe   :  { %8628 = vmatmul.mubr.msk.f32.vlgmr.msra.gmra.mxu1 %vm4277_vm9, %v4846_v48  ;;  %8640 = vmatpush3.msra.mxu0 %v5013_v44 }
 0xabf   :  { %8630 = vmatprep.mubr.msk.f32.mxu1 %vm4277_vm9, %v4848_v7 }
 0xac2   :  { %8631 = vmatmul.mubr.msk.f32.gmra.mxu1 %vm4277_vm9, %v4850_v50 }
 0xb45   :  { %v11840_v45 = vpop.f32.mrf.mxu1 }
 0xb47   :  { %v11842_v34 = vpop.f32.mrf.mxu1 }
 0xb7a   :  { %v11844_v40 = vpop.f32.mrf.mxu1 }
 0xb7c   :  { %v11846_v36 = vpop.f32.mrf.mxu1 }
 0xb7e   :  { %v8629_v58 = vpop.f32.mrf.mxu1 }
 0xb7f   :  { %v4961_v38 = vmul.f32 0.35355338, %v8629_v58 }
 0xb80   :  { %v4941_v0 = vpop.f32.mrf.mxu1 }
 0xb81   :  { %v4965_v51 = vadd.f32 %v4961_v38, %v11721_v43  ;;  %v4960_v55 = vmul.f32 0.35355338, %v4941_v0 }
 0xb82   :  { %v8632_v23 = vpop.f32.mrf.mxu1 }
 0xb83   :  { %v4964_v28 = vadd.f32 %v4960_v55, %v11724_v25  ;;  %v4963_v12 = vmul.f32 0.35355338, %v8632_v23  ;;  %v4971_v35 = vsel %vm4108_vm0, %v4965_v51, -inf }
 0xb84   :  { %4972 = vmax.xlane.f32.xlu1 %v4971_v35  ;;  %v4951_v47 = vpop.f32.mrf.mxu1 }
 0xb85   :  { %v4967_v49 = vadd.f32 %v4963_v12, %v11728_v10  ;;  %v4962_v30 = vmul.f32 0.35355338, %v4951_v47  ;;  %v4968_v32 = vsel %vm4108_vm0, %v4964_v28, -inf }
 0xb86   :  { %4969 = vmax.xlane.f32.xlu0 %v4968_v32 }
 0xb87   :  { %v4966_v14 = vadd.f32 %v4962_v30, %v11733_v59  ;;  %v4977_v8 = vsel %vm4108_vm0, %v4967_v49, -inf }
 0xb89   :  { %v4974_v33 = vsel %vm4108_vm0, %v4966_v14, -inf }
 0xb8a   :  { %4978 = vmax.xlane.f32.xlu0 %v4977_v8 }
 0xb8e   :  { %4975 = vmax.xlane.f32.xlu0 %v4974_v33 }
 0xb95   :  { %5154 = vrot.lane.b32.xlu1 %v11686_v26, %s9274_s19 }
 0xba4   :  { %5156 = vrot.lane.b32.xlu0 %v11682_v17, %s9274_s19 }
 0xc0d   :  { %v4973_v19 = vpop.xlane.xlu1 %4972 }
 0xc0e   :  { %v4981_v37 = vsub.f32 %v4965_v51, %v4973_v19 }
 0xc0f   :  { %v4970_v3 = vpop.xlane.xlu0 %4969 }
 0xc10   :  { %v4986_v1 = vmul.f32 1.442695, %v4981_v37  ;;  %v4980_v2 = vsub.f32 %v4964_v28, %v4970_v3 }
 0xc11   :  { %v5155_v46 = vpop.permute.xlu1 %5154 }
 0xc12   :  { %9044 = vpow2.f32 %v4986_v1  ;;  %v4984_v63 = vmul.f32 1.442695, %v4980_v2 }
 0xc13   :  { %v4979_v31 = vpop.xlane.xlu0 %4978 }
 0xc14   :  { %9046 = vpow2.f32 %v4984_v63  ;;  %v4983_v15 = vsub.f32 %v4967_v49, %v4979_v31 }
 0xc16   :  { %v4990_v11 = vmul.f32 1.442695, %v4983_v15 }
 0xc17   :  { %v4976_v60 = vpop.xlane.xlu0 %4975 }
 0xc18   :  { %v4982_v18 = vsub.f32 %v4966_v14, %v4976_v60  ;;  %9048 = vpow2.f32 %v4990_v11 }
 0xc1a   :  { %v4988_v4 = vmul.f32 1.442695, %v4982_v18 }
 0xc1b   :  { %v5157_v20 = vpop.permute.xlu0 %5156 }
 0xc1c   :  { %8647 = vmatprep.subr.msk.mxu0 %vm4277_vm9, %v5157_v20  ;;  %9050 = vpow2.f32 %v4988_v4 }
 0xc1f   :  { %v9045_v39 = vpop.eup %9044 }
 0xc20   :  { %v4995_v62 = vsel %vm4108_vm0, %v9045_v39, 0.0 }
 0xc21   :  { %v9047_v22 = vpop.eup %9046  ;;  %4996 = vadd.xlane.f32.xlu0 %v4995_v62 }
 0xc22   :  { %v4992_v24 = vsel %vm4108_vm0, %v9047_v22, 0.0 }
 0xc23   :  { %4993 = vadd.xlane.f32.xlu1 %v4992_v24 }
 0xc25   :  { %v9049_v48 = vpop.eup %9048 }
 0xc26   :  { %v5001_v50 = vsel %vm4108_vm0, %v9049_v48, 0.0 }
 0xc29   :  { %v9051_v7 = vpop.eup %9050 }
 0xc2a   :  { %v4998_v57 = vsel %vm4108_vm0, %v9051_v7, 0.0 }
 0xc34   :  { %5150 = vrot.lane.b32.xlu1 %v11680_v29, %s9274_s19 }
 0xc37   :  { %5152 = vrot.lane.b32.xlu0 %v11694_v42, %s9274_s19 }
 0xc56   :  { %5002 = vadd.xlane.f32.xlu0 %v5001_v50 }
 0xc58   :  { %4999 = vadd.xlane.f32.xlu1 %v4998_v57 }
 0xc69   :  { %5144 = vrot.lane.b32.xlu1 %v11694_v42, %s9275_s24 }
 0xc6c   :  { %5142 = vrot.lane.b32.xlu0 %v11680_v29, %s9275_s24 }
 0xc6d   :  { %5148 = vrot.lane.b32.xlu1 %v11682_v17, %s9275_s24 }
 0xc70   :  { %5146 = vrot.lane.b32.xlu0 %v11686_v26, %s9275_s24 }
 0xcaa   :  { %v4997_v27 = vpop.xlane.xlu0 %4996 }
 0xcab   :  { %9052 = vrcp.f32 %v4997_v27 }
 0xcac   :  { %v4994_v52 = vpop.xlane.xlu1 %4993 }
 0xcad   :  { %9054 = vrcp.f32 %v4994_v52 }
 0xcae   :  { %v5153_v58 = vpop.permute.xlu0 %5152 }
 0xcb0   :  { %v5151_v38 = vpop.permute.xlu1 %5150 }
 0xcb8   :  { %v9053_v21 = vpop.eup %9052 }
 0xcb9   :  { %v5009_v44 = vmul.f32 %v9053_v21, %v9045_v39 }
 0xcba   :  { %v9055_v53 = vpop.eup %9054 }
 0xcbb   :  { %v5008_v41 = vmul.f32 %v9055_v53, %v9047_v22 }
 0xcbd   :  { %8641 = vmatprep.mubr.msk.f32.mxu0 %vm4108_vm0, %v5008_v41 }
 0xcbe   :  { %8642 = vmatmul.mubr.msk.f32.vlgmr.msra.gmra.mxu0 %vm4108_vm0, %v5009_v44 }
 0xcbf   :  { %8648 = vmatpush3.xpose.msk.msra.mxu0 %vm4277_vm9, %v5157_v20 }
 0xcc0   :  { %8649 = vmatprep.subr.msk.mxu0 %vm4277_vm9, %v5155_v46 }
 0xcc3   :  { %8650 = vmatpush3.xpose.msk.msra.mxu0 %vm4277_vm9, %v5155_v46 }
 0xcc4   :  { %8651 = vmatprep.subr.msk.mxu0 %vm4277_vm9, %v5153_v58 }
 0xcc7   :  { %8652 = vmatpush3.xpose.msk.msra.mxu0 %vm4277_vm9, %v5153_v58 }
 0xcc8   :  { %8653 = vmatprep.subr.msk.mxu0 %vm4277_vm9, %v5151_v38 }
 0xccb   :  { %8654 = vmatpush3.xpose.msk.msra.mxu0 %vm4277_vm9, %v5151_v38 }
 0xcdf   :  { %v5003_v0 = vpop.xlane.xlu0 %5002 }
 0xce0   :  { %9056 = vrcp.f32 %v5003_v0 }
 0xce1   :  { %v5000_v51 = vpop.xlane.xlu1 %4999 }
 0xce2   :  { %9058 = vrcp.f32 %v5000_v51 }
 0xce3   :  { %v5143_v12 = vpop.permute.xlu0 %5142 }
 0xce5   :  { %v5145_v47 = vpop.permute.xlu1 %5144 }
 0xce7   :  { %v5147_v49 = vpop.permute.xlu0 %5146 }
 0xce9   :  { %v5149_v30 = vpop.permute.xlu1 %5148 }
 0xced   :  { %v9057_v55 = vpop.eup %9056 }
 0xcee   :  { %v5011_v35 = vmul.f32 %v9057_v55, %v9049_v48 }
 0xcef   :  { %v9059_v23 = vpop.eup %9058 }
 0xcf0   :  { %v5010_v28 = vmul.f32 %v9059_v23, %v9051_v7 }
 0xcf2   :  { %8644 = vmatprep.mubr.msk.f32.mxu0 %vm4108_vm0, %v5010_v28 }
 0xcf3   :  { %8645 = vmatmul.mubr.msk.f32.gmra.mxu0 %vm4108_vm0, %v5011_v35 }
 0xcf4   :  { %8655 = vmatprep.mubr.msk.f32.mxu0 %vm4277_vm9, %v5143_v12 }
 0xcf7   :  { %8656 = vmatmul.mubr.msk.f32.vlgmr.msra.gmra.mxu0 %vm4277_vm9, %v5145_v47 }
 0xcf8   :  { %8658 = vmatprep.mubr.msk.f32.mxu0 %vm4277_vm9, %v5147_v49 }
 0xcfb   :  { %8659 = vmatmul.mubr.msk.f32.gmra.mxu0 %vm4277_vm9, %v5149_v30 }
 0xd7e   :  { %v11892_v32 = vpop.f32.mrf.mxu0 }
 0xd80   :  { %v5102_v14 = vpop.f32.mrf.mxu0 }
 0xdb3   :  { %v11894_v8 = vpop.f32.mrf.mxu0 }
 0xdb5   :  { %v5112_v33 = vpop.f32.mrf.mxu0 }
 0xdb7   :  { %v8657_v19 = vpop.f32.mrf.mxu0 }
 0xdb8   :  { %v5260_v37 = vmul.f32 0.35355338, %v8657_v19 }
 0xdb9   :  { %v5240_v3 = vpop.f32.mrf.mxu0 }
 0xdba   :  { %v5264_v1 = vadd.f32 %v5260_v37, %v11721_v43  ;;  %v5259_v2 = vmul.f32 0.35355338, %v5240_v3 }
 0xdbb   :  { %v8660_v63 = vpop.f32.mrf.mxu0 }
 0xdbc   :  { %v5263_v31 = vadd.f32 %v5259_v2, %v11724_v25  ;;  %v5270_v60 = vsel %vm4108_vm0, %v5264_v1, -inf  ;;  %v5262_v39 = vmul.f32 0.35355338, %v8660_v63  ;;  %v5448_v2 = vld [vmem:[%s12805_s23 + $0x18] sm:$0xff]  ;;  %v5447_v63 = vld [vmem:[%s12805_s23 + $0x10] sm:$0xff] }
 0xdbd   :  { %5271 = vmax.xlane.f32.xlu1 %v5270_v60  ;;  %v5250_v20 = vpop.f32.mrf.mxu0  ;;  %v5445_v60 = vld [vmem:[%s12805_s23] sm:$0xff] }
 0xdbe   :  { %v5261_v62 = vmul.f32 0.35355338, %v5250_v20  ;;  %v5267_v22 = vsel %vm4108_vm0, %v5263_v31, -inf  ;;  %v5266_v15 = vadd.f32 %v5262_v39, %v11728_v10 }
 0xdbf   :  { %5268 = vmax.xlane.f32.xlu0 %v5267_v22 }
 0xdc0   :  { %v5265_v24 = vadd.f32 %v5261_v62, %v11733_v59  ;;  %v5276_v43 = vsel %vm4108_vm0, %v5266_v15, -inf }
 0xdc2   :  { %v5273_v18 = vsel %vm4108_vm0, %v5265_v24, -inf }
 0xdc3   :  { %5274 = vmax.xlane.f32.xlu0 %v5273_v18 }
 0xdc7   :  { %5277 = vmax.xlane.f32.xlu0 %v5276_v43 }
 0xdce   :  { %5317 = vrot.lane.b32.xlu1 %v11682_v17, %s9276_s30 }
 0xe46   :  { %v5272_v25 = vpop.xlane.xlu1 %5271 }
 0xe47   :  { %v5280_v11 = vsub.f32 %v5264_v1, %v5272_v25 }
 0xe48   :  { %v5269_v4 = vpop.xlane.xlu0 %5268 }
 0xe49   :  { %v5285_v48 = vmul.f32 1.442695, %v5280_v11  ;;  %v5279_v7 = vsub.f32 %v5263_v31, %v5269_v4  ;;  %v5446_v31 = vld [vmem:[%s12805_s23 + $0x8] sm:$0xff] }
 0xe4a   :  { %v5318_v50 = vpop.permute.xlu1 %5317 }
 0xe4b   :  { %9060 = vpow2.f32 %v5285_v48  ;;  %v5283_v59 = vmul.f32 1.442695, %v5279_v7  ;;  %8661 = vmatprep.subr.mxu1 %v5318_v50  ;;  %v8116_v7 = vld [vmem:[%s12806_s28] ss:$0 sm:$0xff] }
 0xe4c   :  { %v5275_v10 = vpop.xlane.xlu0 %5274  ;;  %8662 = vmatpush3.msra.mxu1 %v5318_v50 }
 0xe4d   :  { %9062 = vpow2.f32 %v5283_v59  ;;  %v5281_v58 = vsub.f32 %v5265_v24, %v5275_v10 }
 0xe4f   :  { %v5287_v38 = vmul.f32 1.442695, %v5281_v58 }
 0xe50   :  { %v5278_v57 = vpop.xlane.xlu0 %5277 }
 0xe51   :  { %v5282_v46 = vsub.f32 %v5266_v15, %v5278_v57 }
 0xe53   :  { %v5289_v27 = vmul.f32 1.442695, %v5282_v46 }
 0xe55   :  { %9064 = vpow2.f32 %v5289_v27 }
 0xe56   :  { %9066 = vpow2.f32 %v5287_v38 }
 0xe58   :  { %v9061_v52 = vpop.eup %9060 }
 0xe59   :  { %v5294_v21 = vsel %vm4108_vm0, %v9061_v52, 0.0 }
 0xe5a   :  { %v9063_v17 = vpop.eup %9062  ;;  %5295 = vadd.xlane.f32.xlu0 %v5294_v21 }
 0xe5b   :  { %v5291_v53 = vsel %vm4108_vm0, %v9063_v17, 0.0 }
 0xe5c   :  { %5292 = vadd.xlane.f32.xlu1 %v5291_v53 }
 0xe62   :  { %v11908_v41 = vpop.eup %9064 }
 0xe63   :  { %v5300_v44 = vsel %vm4108_vm0, %v11908_v41, 0.0  ;;  %v9067_v0 = vpop.eup %9066 }
 0xe64   :  { %5301 = vadd.xlane.f32.xlu0 %v5300_v44 }
 0xe6d   :  { %5313 = vrot.lane.b32.xlu1 %v11694_v42, %s9276_s30  ;;  %v5297_v42 = vsel %vm4108_vm0, %v9067_v0, 0.0 }
 0xe7a   :  { %5315 = vrot.lane.b32.xlu0 %v11686_v26, %s9276_s30 }
 0xe7e   :  { %4826 = vrot.lane.b32.xlu0 %v11842_v34, %s9277_s6 }
 0xe82   :  { %5125 = vrot.lane.b32.xlu0 %v5102_v14, %s9278_s22 }
 0xe86   :  { %4830 = vrot.lane.b32.xlu0 %v11846_v36, %s9277_s6 }
 0xe8a   :  { %5129 = vrot.lane.b32.xlu0 %v5112_v33, %s9278_s22 }
 0xe91   :  { %5298 = vadd.xlane.f32.xlu1 %v5297_v42 }
 0xea2   :  { %5311 = vrot.lane.b32.xlu1 %v11680_v29, %s9276_s30 }
 0xea6   :  { %4828 = vrot.lane.b32.xlu1 %v11840_v45, %s9277_s6 }
 0xeaa   :  { %5127 = vrot.lane.b32.xlu1 %v11892_v32, %s9278_s22 }
 0xeae   :  { %4832 = vrot.lane.b32.xlu1 %v11844_v40, %s9277_s6 }
 0xeb2   :  { %5131 = vrot.lane.b32.xlu1 %v11894_v8, %s9278_s22 }
 0xee3   :  { %v5296_v34 = vpop.xlane.xlu0 %5295 }
 0xee5   :  { %v5293_v26 = vpop.xlane.xlu1 %5292 }
 0xee6   :  { %9068 = vrcp.f32 %v5293_v26 }
 0xee7   :  { %9070 = vrcp.f32 %v5296_v34 }
 0xee9   :  { %v5314_v29 = vpop.permute.xlu1 %5313 }
 0xeed   :  { %v5302_v36 = vpop.xlane.xlu0 %5301 }
 0xeee   :  { %9072 = vrcp.f32 %v5302_v36 }
 0xef1   :  { %v5316_v51 = vpop.permute.xlu0 %5315 }
 0xef2   :  { %8663 = vmatprep.subr.mxu1 %v5316_v51 }
 0xef3   :  { %v9069_v55 = vpop.eup %9068  ;;  %8664 = vmatpush3.msra.mxu1 %v5316_v51 }
 0xef4   :  { %8665 = vmatprep.subr.mxu1 %v5314_v29  ;;  %v5307_v45 = vmul.f32 %v9069_v55, %v9063_v17  ;;  %v9071_v47 = vpop.eup %9070 }
 0xef5   :  { %v4827_v23 = vpop.permute.xlu0 %4826  ;;  %8666 = vmatpush3.msra.mxu1 %v5314_v29  ;;  %v5308_v30 = vmul.f32 %v9071_v47, %v9061_v52 }
 0xef6   :  { %4839 = vst.msk [vmem:[#allocation3] sm:$0xff] %vm4838_vm3, %v4827_v23  ;;  %8669 = vmatprep.mubr.msk.f32.mxu1 %vm4108_vm0, %v5307_v45 }
 0xef9   :  { %v5126_v40 = vpop.permute.xlu0 %5125 }
 0xefa   :  { %5138 = vst.msk [vmem:[#allocation3] sm:$0xff] %vm5137_vm4, %v5126_v40 }
 0xefb   :  { %v9073_v8 = vpop.eup %9072 }
 0xefc   :  { %v5310_v3 = vmul.f32 %v9073_v8, %v11908_v41  ;;  %v5634_v8 = vld [vmem:[%s12807_s1 + $0x10] sm:$0xff] }
 0xefd   :  { %v4831_v28 = vpop.permute.xlu0 %4830 }
 0xefe   :  { %4841 = vst.msk [vmem:[#allocation3 + $0x10] sm:$0xff] %vm4838_vm3, %v4831_v28 }
 0xf01   :  { %v5130_v12 = vpop.permute.xlu0 %5129 }
 0xf02   :  { %5140 = vst.msk [vmem:[#allocation3 + $0x10] sm:$0xff] %vm5137_vm4, %v5130_v12 }
 0xf1a   :  { %v5299_v35 = vpop.xlane.xlu1 %5298 }
 0xf1b   :  { %9074 = vrcp.f32 %v5299_v35 }
 0xf1e   :  { %v5312_v49 = vpop.permute.xlu1 %5311 }
 0xf1f   :  { %8667 = vmatprep.subr.mxu1 %v5312_v49 }
 0xf20   :  { %8668 = vmatpush3.msra.mxu1 %v5312_v49 }
 0xf21   :  { %8670 = vmatmul.mubr.msk.f32.vlgmr.msra.gmra.mxu1 %vm4108_vm0, %v5308_v30  ;;  %8675 = vmatprep.subr.mxu1 %v5448_v2 }
 0xf22   :  { %v4829_v32 = vpop.permute.xlu1 %4828  ;;  %8676 = vmatpush3.msra.mxu1 %v5448_v2  ;;  %v5748_v2 = vld [vmem:[%s12808_s2 + $0x20] sm:$0xff] }
 0xf23   :  { %4840 = vst.msk [vmem:[#allocation3 + $0x8] sm:$0xff] %vm4838_vm3, %v4829_v32  ;;  %8677 = vmatprep.subr.mxu1 %v5447_v63 }
 0xf24   :  { %8678 = vmatpush3.msra.mxu1 %v5447_v63 }
 0xf25   :  { %8679 = vmatprep.subr.mxu1 %v5446_v31 }
 0xf26   :  { %v5128_v14 = vpop.permute.xlu1 %5127  ;;  %8680 = vmatpush3.msra.mxu1 %v5446_v31 }
 0xf27   :  { %5139 = vst.msk [vmem:[#allocation3 + $0x8] sm:$0xff] %vm5137_vm4, %v5128_v14  ;;  %8681 = vmatprep.subr.mxu1 %v5445_v60  ;;  %v5635_v14 = vld [vmem:[%s12807_s1 + $0x18] sm:$0xff] }
 0xf28   :  { %v9075_v33 = vpop.eup %9074  ;;  %8682 = vmatpush3.msra.mxu1 %v5445_v60  ;;  %8689 = vmatprep.subr.mxu0 %v5635_v14 }
 0xf29   :  { %v5309_v19 = vmul.f32 %v9075_v33, %v9067_v0  ;;  %8690 = vmatpush3.msra.mxu0 %v5635_v14  ;;  %v5633_v33 = vld [vmem:[%s12807_s1 + $0x8] sm:$0xff] }
 0xf2a   :  { %v4833_v37 = vpop.permute.xlu1 %4832  ;;  %8691 = vmatprep.subr.mxu0 %v5634_v8 }
 0xf2b   :  { %4842 = vst.msk [vmem:[#allocation3 + $0x18] sm:$0xff] %vm4838_vm3, %v4833_v37  ;;  %8672 = vmatprep.mubr.msk.f32.mxu1 %vm4108_vm0, %v5309_v19  ;;  %8692 = vmatpush3.msra.mxu0 %v5634_v8  ;;  %v5632_v19 = vld [vmem:[%s12807_s1] sm:$0xff]  ;;  %v5751_v37 = vld [vmem:[%s12808_s2 + $0x38] sm:$0xff] }
 0xf2c   :  { %8673 = vmatmul.mubr.msk.f32.gmra.mxu1 %vm4108_vm0, %v5310_v3  ;;  %8693 = vmatprep.subr.mxu0 %v5633_v33  ;;  %v5750_v3 = vld [vmem:[%s12808_s2 + $0x30] sm:$0xff] }
 0xf2d   :  { %8694 = vmatpush3.msra.mxu0 %v5633_v33  ;;  %8703 = vmatprep.subr.mxu1 %v5751_v37 }
 0xf2e   :  { %v5132_v1 = vpop.permute.xlu1 %5131  ;;  %8695 = vmatprep.subr.mxu0 %v5632_v19 }
 0xf2f   :  { %5141 = vst.msk [vmem:[#allocation3 + $0x18] sm:$0xff] %vm5137_vm4, %v5132_v1  ;;  %8696 = vmatpush3.msra.mxu0 %v5632_v19  ;;  %v5749_v1 = vld [vmem:[%s12808_s2 + $0x28] sm:$0xff] }
 0xfe1   :  { %v8671_v20 = vpop.f32.mrf.mxu1 }
 0xfe2   :  { %5426 = vrot.lane.b32.xlu1 %v8671_v20, %s9279_s26 }
 0xfe3   :  { %v5401_v39 = vpop.f32.mrf.mxu1 }
 0xfe4   :  { %5424 = vrot.lane.b32.xlu0 %v5401_v39, %s9279_s26 }
 0xfec   :  { %v8674_v62 = vpop.f32.mrf.mxu1 }
 0xfed   :  { %5430 = vrot.lane.b32.xlu1 %v8674_v62, %s9279_s26 }
 0xfee   :  { %v5411_v22 = vpop.f32.mrf.mxu1 }
 0xfef   :  { %5428 = vrot.lane.b32.xlu0 %v5411_v22, %s9279_s26 }
0x1054   :  { %v5427_v24 = vpop.permute.xlu1 %5426 }
0x1055   :  { %5438 = vst.msk [vmem:[#allocation3 + $0x8] sm:$0xff] %vm5436_vm5, %v5427_v24 }
0x1056   :  { %v5425_v15 = vpop.permute.xlu0 %5424 }
0x1057   :  { %5437 = vst.msk [vmem:[#allocation3] sm:$0xff] %vm5436_vm5, %v5425_v15 }
0x105c   :  { %v5442_v25 = vld [vmem:[#allocation3 + $0x8] sm:$0xff] }
0x105e   :  { %v5441_v18 = vld [vmem:[#allocation3] sm:$0xff] }
0x105f   :  { %8683 = vmatprep.mubr.msk.f32.mxu1 %vm4108_vm0, %v5441_v18  ;;  %v5431_v43 = vpop.permute.xlu1 %5430 }
0x1060   :  { %5440 = vst.msk [vmem:[#allocation3 + $0x18] sm:$0xff] %vm5436_vm5, %v5431_v43  ;;  %8684 = vmatmul.mubr.msk.f32.vlgmr.msra.gmra.mxu1 %vm4108_vm0, %v5442_v25 }
0x1061   :  { %v5429_v11 = vpop.permute.xlu0 %5428  ;;  %8704 = vmatpush3.msra.mxu1 %v5751_v37 }
0x1062   :  { %5439 = vst.msk [vmem:[#allocation3 + $0x10] sm:$0xff] %vm5436_vm5, %v5429_v11  ;;  %8705 = vmatprep.subr.mxu1 %v5750_v3 }
0x1063   :  { %8706 = vmatpush3.msra.mxu1 %v5750_v3 }
0x1064   :  { %8707 = vmatprep.subr.mxu1 %v5749_v1 }
0x1065   :  { %8708 = vmatpush3.msra.mxu1 %v5749_v1 }
0x1066   :  { %8709 = vmatprep.subr.mxu1 %v5748_v2 }
0x1067   :  { %v5444_v48 = vld [vmem:[#allocation3 + $0x18] sm:$0xff]  ;;  %8710 = vmatpush3.msra.mxu1 %v5748_v2 }
0x1069   :  { %v5443_v4 = vld [vmem:[#allocation3 + $0x10] sm:$0xff] }
0x106a   :  { %8686 = vmatprep.mubr.msk.f32.mxu1 %vm4108_vm0, %v5443_v4  ;;  %v8121_v4 = vld [vmem:[%s12809_s7] ss:$0 sm:$0xff] }
0x106b   :  { %8687 = vmatmul.mubr.msk.f32.gmra.mxu1 %vm4108_vm0, %v5444_v48 }
0x1120   :  { %v8685_v50 = vpop.f32.mrf.mxu1 }
0x1121   :  { %v5540_v59 = vadd.f32 %v8685_v50, %v8116_v7 }
0x1122   :  { %v5534_v10 = vpop.f32.mrf.mxu1 }
0x1123   :  { %v5554_v57 = vadd.f32 %v5540_v59, %v11663_v5  ;;  %v5535_v46 = vadd.f32 %v8116_v7, %v5534_v10  ;;  %v8122_v10 = vld [vmem:[%s12810_s10] ss:$0 sm:$0xff] }
0x1125   :  { %v5553_v27 = vadd.f32 %v5535_v46, %v11648_v61  ;;  %v5562_v52 = vsel %vm4108_vm0, %v5554_v57, 0.0 }
0x1126   :  { %5563 = vadd.xlane.f32.xlu1 %v5562_v52 }
0x1127   :  { %v5559_v21 = vsel %vm4108_vm0, %v5553_v27, 0.0 }
0x1128   :  { %5560 = vadd.xlane.f32.xlu0 %v5559_v21 }
0x112b   :  { %v8688_v17 = vpop.f32.mrf.mxu1 }
0x112c   :  { %v5550_v41 = vadd.f32 %v8688_v17, %v8116_v7 }
0x112d   :  { %v5544_v53 = vpop.f32.mrf.mxu1 }
0x112e   :  { %v5545_v44 = vadd.f32 %v8116_v7, %v5544_v53  ;;  %v5556_v38 = vadd.f32 %v5550_v41, %v11675_v56 }
0x1130   :  { %v5555_v58 = vadd.f32 %v5545_v44, %v11666_v9  ;;  %v5568_v5 = vsel %vm4108_vm0, %v5556_v38, 0.0 }
0x1132   :  { %v5565_v0 = vsel %vm4108_vm0, %v5555_v58, 0.0 }
0x1133   :  { %5566 = vadd.xlane.f32.xlu0 %v5565_v0  ;;  %v5747_v0 = vld [vmem:[%s12808_s2 + $0x18] sm:$0xff] }
0x1134   :  { %8711 = vmatprep.subr.mxu1 %v5747_v0 }
0x1135   :  { %8712 = vmatpush3.msra.mxu1 %v5747_v0 }
0x1137   :  { %5569 = vadd.xlane.f32.xlu0 %v5568_v5  ;;  %v5746_v5 = vld [vmem:[%s12808_s2 + $0x10] sm:$0xff] }
0x1138   :  { %8713 = vmatprep.subr.mxu1 %v5746_v5 }
0x1139   :  { %8714 = vmatpush3.msra.mxu1 %v5746_v5 }
0x11af   :  { %v5564_v61 = vpop.xlane.xlu1 %5563 }
0x11b0   :  { %v5573_v42 = vmul.f32 0.03125, %v5564_v61  ;;  %v5745_v61 = vld [vmem:[%s12808_s2 + $0x8] sm:$0xff] }
0x11b1   :  { %v5561_v26 = vpop.xlane.xlu0 %5560  ;;  %8715 = vmatprep.subr.mxu1 %v5745_v61 }
0x11b2   :  { %v5577_v34 = vsub.f32 %v5554_v57, %v5573_v42  ;;  %v5572_v36 = vmul.f32 0.03125, %v5561_v26  ;;  %v5744_v42 = vld [vmem:[%s12808_s2] sm:$0xff]  ;;  %8716 = vmatpush3.msra.mxu1 %v5745_v61 }
0x11b3   :  { %8717 = vmatprep.subr.mxu1 %v5744_v42  ;;  %v8123_v26 = vld [vmem:[%s12811_s11] ss:$0 sm:$0xff] }
0x11b4   :  { %v5576_v51 = vsub.f32 %v5553_v27, %v5572_v36  ;;  %v5581_v55 = vmul.f32 %v5577_v34, %v5577_v34  ;;  %8718 = vmatpush3.msra.mxu1 %v5744_v42 }
0x11b6   :  { %v5587_v29 = vsel %vm4108_vm0, %v5581_v55, 0.0  ;;  %v5580_v45 = vmul.f32 %v5576_v51, %v5576_v51 }
0x11b7   :  { %5588 = vadd.xlane.f32.xlu0 %v5587_v29 }
0x11b8   :  { %v5584_v9 = vsel %vm4108_vm0, %v5580_v45, 0.0 }
0x11b9   :  { %5585 = vadd.xlane.f32.xlu1 %v5584_v9 }
0x11bc   :  { %v5567_v56 = vpop.xlane.xlu0 %5566 }
0x11bd   :  { %v5574_v23 = vmul.f32 0.03125, %v5567_v56 }
0x11bf   :  { %v11973_v40 = vsub.f32 %v5555_v58, %v5574_v23 }
0x11c0   :  { %v5570_v28 = vpop.xlane.xlu0 %5569 }
0x11c1   :  { %v5575_v12 = vmul.f32 0.03125, %v5570_v28  ;;  %v5582_v35 = vmul.f32 %v11973_v40, %v11973_v40 }
0x11c3   :  { %v11977_v47 = vsub.f32 %v5556_v38, %v5575_v12  ;;  %v5590_v49 = vsel %vm4108_vm0, %v5582_v35, 0.0  ;;  %v8128_v35 = vld [vmem:[%s12812_s15] ss:$0 sm:$0xff] }
0x11c4   :  { %5591 = vadd.xlane.f32.xlu1 %v5590_v49 }
0x11c5   :  { %v5583_v30 = vmul.f32 %v11977_v47, %v11977_v47 }
0x11c7   :  { %v5593_v32 = vsel %vm4108_vm0, %v5583_v30, 0.0 }
0x11c8   :  { %5594 = vadd.xlane.f32.xlu0 %v5593_v32 }
0x1240   :  { %v5589_v63 = vpop.xlane.xlu0 %5588 }
0x1241   :  { %v5597_v31 = vmul.f32 0.03125, %v5589_v63 }
0x1242   :  { %v5586_v60 = vpop.xlane.xlu1 %5585 }
0x1243   :  { %v5601_v20 = vadd.f32 1e-05, %v5597_v31  ;;  %v5596_v39 = vmul.f32 0.03125, %v5586_v60 }
0x1245   :  { %9076 = vrsqrt.f32 %v5601_v20  ;;  %v5600_v62 = vadd.f32 1e-05, %v5596_v39 }
0x1247   :  { %9078 = vrsqrt.f32 %v5600_v62 }
0x124d   :  { %v5592_v22 = vpop.xlane.xlu1 %5591 }
0x124e   :  { %v5598_v24 = vmul.f32 0.03125, %v5592_v22 }
0x1250   :  { %v5602_v15 = vadd.f32 1e-05, %v5598_v24 }
0x1251   :  { %v5595_v18 = vpop.xlane.xlu0 %5594 }
0x1252   :  { %v9077_v43 = vpop.eup %9076  ;;  %9080 = vrsqrt.f32 %v5602_v15  ;;  %v5599_v25 = vmul.f32 0.03125, %v5595_v18 }
0x1253   :  { %v5609_v11 = vmul.f32 %v9077_v43, %v5577_v34 }
0x1254   :  { %v9079_v48 = vpop.eup %9078  ;;  %v5603_v7 = vadd.f32 1e-05, %v5599_v25 }
0x1255   :  { %v5608_v50 = vmul.f32 %v9079_v48, %v5576_v51  ;;  %v5619_v59 = vmul.f32 %v8121_v4, %v5609_v11 }
0x1256   :  { %9082 = vrsqrt.f32 %v5603_v7 }
0x1257   :  { %v5618_v57 = vmul.f32 %v8121_v4, %v5608_v50  ;;  %v5629_v27 = vadd.f32 %v8122_v10, %v5619_v59 }
0x1259   :  { %v5628_v46 = vadd.f32 %v8122_v10, %v5618_v57 }
0x125b   :  { %8697 = vmatprep.mubr.msk.f32.mxu0 %vm4108_vm0, %v5628_v46 }
0x125c   :  { %8698 = vmatmul.mubr.msk.f32.vlgmr.msra.gmra.mxu0 %vm4108_vm0, %v5629_v27 }
0x125f   :  { %v9081_v52 = vpop.eup %9080 }
0x1260   :  { %v5610_v21 = vmul.f32 %v9081_v52, %v11973_v40 }
0x1262   :  { %v5620_v17 = vmul.f32 %v8121_v4, %v5610_v21 }
0x1263   :  { %v9083_v53 = vpop.eup %9082 }
0x1264   :  { %v5630_v41 = vadd.f32 %v8122_v10, %v5620_v17  ;;  %v5611_v44 = vmul.f32 %v9083_v53, %v11977_v47  ;;  %v8138_v17 = vld [vmem:[%s9361_s12 + $0x38] sm:$0xff]  ;;  %v8137_v53 = vld [vmem:[%s9361_s12 + $0x30] sm:$0xff] }
0x1265   :  { %8725 = vmatprep.subr.mxu0 %v8138_v17 }
0x1266   :  { %8700 = vmatprep.mubr.msk.f32.mxu0 %vm4108_vm0, %v5630_v41  ;;  %v5621_v58 = vmul.f32 %v8121_v4, %v5611_v44  ;;  %8726 = vmatpush3.msra.mxu0 %v8138_v17  ;;  %v8135_v44 = vld [vmem:[%s9361_s12 + $0x20] sm:$0xff] }
0x1267   :  { %8727 = vmatprep.subr.mxu0 %v8137_v53 }
0x1268   :  { %v5631_v38 = vadd.f32 %v8122_v10, %v5621_v58  ;;  %8728 = vmatpush3.msra.mxu0 %v8137_v53 }
0x126a   :  { %8701 = vmatmul.mubr.msk.f32.gmra.mxu0 %vm4108_vm0, %v5631_v38 }
0x131c   :  { %v8699_v34 = vpop.f32.mrf.mxu0 }
0x131d   :  { %v5727_v36 = vadd.f32 %v8699_v34, %v8123_v26 }
0x131e   :  { %v5721_v51 = vpop.f32.mrf.mxu0 }
0x131f   :  { %v5722_v55 = vadd.f32 %v8123_v26, %v5721_v51  ;;  %v5741_v45 = vmax.f32 %v5727_v36, 0.0 }
0x1321   :  { %v5740_v29 = vmax.f32 %v5722_v55, 0.0 }
0x1323   :  { %8719 = vmatprep.mubr.msk.f32.mxu1 %vm5759_vm6, %v5740_v29 }
0x1324   :  { %8720 = vmatmul.mubr.msk.f32.vlgmr.msra.gmra.mxu1 %vm5759_vm6, %v5741_v45 }
0x132a   :  { %v8702_v9 = vpop.f32.mrf.mxu0 }
0x132b   :  { %v5737_v56 = vadd.f32 %v8702_v9, %v8123_v26 }
0x132c   :  { %v5731_v23 = vpop.f32.mrf.mxu0 }
0x132d   :  { %v5732_v40 = vadd.f32 %v8123_v26, %v5731_v23  ;;  %v5743_v12 = vmax.f32 %v5737_v56, 0.0  ;;  %v8133_v56 = vld [vmem:[%s12813_s16] ss:$0 sm:$0xff] }
0x132f   :  { %v5742_v28 = vmax.f32 %v5732_v40, 0.0 }
0x1331   :  { %8722 = vmatprep.mubr.msk.f32.mxu1 %vm5759_vm6, %v5742_v28 }
0x1332   :  { %8723 = vmatmul.mubr.msk.f32.gmra.mxu1 %vm5759_vm6, %v5743_v12  ;;  %v8134_v12 = vld [vmem:[%s12814_s18] ss:$0 sm:$0xff] }
0x13e4   :  { %v8721_v47 = vpop.f32.mrf.mxu1 }
0x13e5   :  { %v5844_v49 = vadd.f32 %v8721_v47, %v8128_v35 }
0x13e6   :  { %v5838_v30 = vpop.f32.mrf.mxu1 }
0x13e7   :  { %v5858_v32 = vadd.f32 %v5844_v49, %v5629_v27  ;;  %v5839_v14 = vadd.f32 %v8128_v35, %v5838_v30 }
0x13e9   :  { %v5857_v8 = vadd.f32 %v5839_v14, %v5628_v46  ;;  %v5866_v33 = vsel %vm4108_vm0, %v5858_v32, 0.0 }
0x13ea   :  { %5867 = vadd.xlane.f32.xlu0 %v5866_v33 }
0x13eb   :  { %v5863_v19 = vsel %vm4108_vm0, %v5857_v8, 0.0 }
0x13ec   :  { %5864 = vadd.xlane.f32.xlu1 %v5863_v19 }
0x13f2   :  { %v8724_v37 = vpop.f32.mrf.mxu1 }
0x13f3   :  { %v5854_v3 = vadd.f32 %v8724_v37, %v8128_v35 }
0x13f4   :  { %v5848_v1 = vpop.f32.mrf.mxu1 }
0x13f5   :  { %v5860_v2 = vadd.f32 %v5854_v3, %v5631_v38  ;;  %v5849_v63 = vadd.f32 %v8128_v35, %v5848_v1 }
0x13f7   :  { %v5859_v31 = vadd.f32 %v5849_v63, %v5630_v41  ;;  %v5872_v60 = vsel %vm4108_vm0, %v5860_v2, 0.0  ;;  %v8136_v41 = vld [vmem:[%s9361_s12 + $0x28] sm:$0xff]  ;;  %s12815_s12 = sld [smem:[#allocation22_spill]] }
0x13f8   :  { %5873 = vadd.xlane.f32.xlu0 %v5872_v60  ;;  %8729 = vmatprep.subr.mxu0 %v8136_v41 }
0x13f9   :  { %v5869_v20 = vsel %vm4108_vm0, %v5859_v31, 0.0  ;;  %8730 = vmatpush3.msra.mxu0 %v8136_v41 }
0x13fa   :  { %5870 = vadd.xlane.f32.xlu1 %v5869_v20  ;;  %8731 = vmatprep.subr.mxu0 %v8135_v44 }
0x13fb   :  { %8732 = vmatpush3.msra.mxu0 %v8135_v44  ;;  %v12090_v44 = vld [vmem:[%s12804_s13 + $0x18] sm:$0xff] }
0x1473   :  { %v5868_v39 = vpop.xlane.xlu0 %5867 }
0x1474   :  { %v5876_v62 = vmul.f32 0.03125, %v5868_v39 }
0x1475   :  { %v5865_v22 = vpop.xlane.xlu1 %5864 }
0x1476   :  { %v5880_v24 = vsub.f32 %v5858_v32, %v5876_v62  ;;  %v5875_v15 = vmul.f32 0.03125, %v5865_v22 }
0x1478   :  { %v5879_v18 = vsub.f32 %v5857_v8, %v5875_v15  ;;  %v5884_v43 = vmul.f32 %v5880_v24, %v5880_v24 }
0x147a   :  { %v5890_v25 = vsel %vm4108_vm0, %v5884_v43, 0.0  ;;  %v5883_v11 = vmul.f32 %v5879_v18, %v5879_v18 }
0x147b   :  { %5891 = vadd.xlane.f32.xlu0 %v5890_v25 }
0x147c   :  { %v5887_v4 = vsel %vm4108_vm0, %v5883_v11, 0.0 }
0x147d   :  { %5888 = vadd.xlane.f32.xlu1 %v5887_v4 }
0x1481   :  { %v5874_v48 = vpop.xlane.xlu0 %5873 }
0x1482   :  { %v5878_v7 = vmul.f32 0.03125, %v5874_v48 }
0x1483   :  { %v5871_v50 = vpop.xlane.xlu1 %5870 }
0x1484   :  { %v5882_v59 = vsub.f32 %v5860_v2, %v5878_v7  ;;  %v5877_v10 = vmul.f32 0.03125, %v5871_v50  ;;  %v8140_v2 = vld [vmem:[%s12803_s0 + $0x1] ss:$0 sm:$0xff]  ;;  %s12816_s0 = sld [smem:[#allocation23_spill]] }
0x1486   :  { %v5881_v57 = vsub.f32 %v5859_v31, %v5877_v10  ;;  %v5886_v46 = vmul.f32 %v5882_v59, %v5882_v59  ;;  %v12081_v10 = vld [vmem:[%s12804_s13 + $0x8] sm:$0xff] }
0x1488   :  { %v5896_v27 = vsel %vm4108_vm0, %v5886_v46, 0.0  ;;  %v5885_v52 = vmul.f32 %v5881_v57, %v5881_v57 }
0x1489   :  { %5897 = vadd.xlane.f32.xlu0 %v5896_v27 }
0x148a   :  { %v5893_v21 = vsel %vm4108_vm0, %v5885_v52, 0.0  ;;  %v12085_v52 = vld [vmem:[%s12804_s13] sm:$0xff] }
0x148b   :  { %5894 = vadd.xlane.f32.xlu1 %v5893_v21 }
0x1504   :  { %v5892_v58 = vpop.xlane.xlu0 %5891 }
0x1505   :  { %v5900_v38 = vmul.f32 0.03125, %v5892_v58 }
0x1506   :  { %v5889_v0 = vpop.xlane.xlu1 %5888 }
0x1507   :  { %v5904_v5 = vadd.f32 1e-05, %v5900_v38  ;;  %v5899_v61 = vmul.f32 0.03125, %v5889_v0 }
0x1509   :  { %9084 = vrsqrt.f32 %v5904_v5  ;;  %v5903_v42 = vadd.f32 1e-05, %v5899_v61  ;;  %v12095_v5 = vld [vmem:[%s12804_s13 + $0x10] sm:$0xff] }
0x150b   :  { %9086 = vrsqrt.f32 %v5903_v42 }
0x1512   :  { %v5898_v26 = vpop.xlane.xlu0 %5897 }
0x1513   :  { %v5902_v34 = vmul.f32 0.03125, %v5898_v26 }
0x1514   :  { %v5895_v36 = vpop.xlane.xlu1 %5894 }
0x1515   :  { %v5906_v51 = vadd.f32 1e-05, %v5902_v34  ;;  %v5901_v55 = vmul.f32 0.03125, %v5895_v36 }
0x1516   :  { %v9085_v29 = vpop.eup %9084 }
0x1517   :  { %v5912_v45 = vmul.f32 %v9085_v29, %v5880_v24  ;;  %9088 = vrsqrt.f32 %v5906_v51  ;;  %v5905_v9 = vadd.f32 1e-05, %v5901_v55 }
0x1518   :  { %v9087_v23 = vpop.eup %9086 }
0x1519   :  { %9090 = vrsqrt.f32 %v5905_v9  ;;  %v5911_v40 = vmul.f32 %v9087_v23, %v5879_v18  ;;  %v5922_v28 = vmul.f32 %v8133_v56, %v5912_v45 }
0x151b   :  { %v5921_v35 = vmul.f32 %v8133_v56, %v5911_v40  ;;  %v12025_v49 = vadd.f32 %v8134_v12, %v5922_v28 }
0x151d   :  { %v12023_v47 = vadd.f32 %v8134_v12, %v5921_v35 }
0x151f   :  { %8733 = vmatprep.mubr.msk.f32.mxu0 %vm4108_vm0, %v12023_v47 }
0x1520   :  { %8734 = vmatmul.mubr.msk.f32.vlgmr.msra.gmra.mxu0 %vm4108_vm0, %v12025_v49 }
0x1524   :  { %v9089_v30 = vpop.eup %9088 }
0x1525   :  { %v5914_v32 = vmul.f32 %v9089_v30, %v5882_v59 }
0x1526   :  { %v9091_v14 = vpop.eup %9090 }
0x1527   :  { %v5913_v8 = vmul.f32 %v9091_v14, %v5881_v57  ;;  %v5924_v33 = vmul.f32 %v8133_v56, %v5914_v32 }
0x1529   :  { %v5923_v19 = vmul.f32 %v8133_v56, %v5913_v8  ;;  %v12033_v3 = vadd.f32 %v8134_v12, %v5924_v33 }
0x152b   :  { %v12031_v37 = vadd.f32 %v8134_v12, %v5923_v19 }
0x152d   :  { %8736 = vmatprep.mubr.msk.f32.mxu0 %vm4108_vm0, %v12031_v37 }
0x152e   :  { %8737 = vmatmul.mubr.msk.f32.gmra.mxu0 %vm4108_vm0, %v12033_v3 }
0x15e0   :  { %v8735_v1 = vpop.f32.mrf.mxu0 }
0x15e1   :  { %v12050_v22 = vadd.f32 %v8735_v1, %v8140_v2 }
0x15e2   :  { %v6026_v63 = vpop.f32.mrf.mxu0 }
0x15e3   :  { %v12040_v31 = vadd.f32 %v8140_v2, %v6026_v63 }
0x15e5   :  { %8747 = vmatprep.mubr.msk.f32.mxu0 %vm4277_vm9, %v12040_v31 }
0x15ee   :  { %v8738_v60 = vpop.f32.mrf.mxu0 }
0x15ef   :  { %v12044_v20 = vadd.f32 %v8738_v60, %v8140_v2 }
0x15f0   :  { %v6036_v39 = vpop.f32.mrf.mxu0 }
0x15f1   :  { %v12046_v62 = vadd.f32 %v8140_v2, %v6036_v39  ;;  %6055 = vrot.lane.b32.xlu1 %v12044_v20, %s9266_s5 }
0x15f3   :  { %6053 = vrot.lane.b32.xlu0 %v12046_v62, %s9266_s5 }
0x15f5   :  { %6051 = vrot.lane.b32.xlu1 %v12050_v22, %s9266_s5 }
0x15f7   :  { %6214 = vrot.lane.b32.xlu0 %v12046_v62, %s9267_s9 }
0x15f9   :  { %6049 = vrot.lane.b32.xlu1 %v12040_v31, %s9266_s5 }
0x15fd   :  { %6216 = vrot.lane.b32.xlu1 %v12044_v20, %s9267_s9 }
0x1601   :  { %6212 = vrot.lane.b32.xlu1 %v12050_v22, %s9267_s9 }
0x1605   :  { %6210 = vrot.lane.b32.xlu1 %v12040_v31, %s9267_s9  ;;  %s9281_s9 = smov [#allocation6]  }
0x1606   :  { %s7945_s13 = sshll.u32 %s9281_s9, 4  ;;  %s7946_s13 = int_to_ptr.vmem [resolvable:$true] %s7945_s13 }
0x1663   :  { %v6056_v24 = vpop.permute.xlu1 %6055 }
0x1664   :  { %8739 = vmatprep.subr.msk.mxu0 %vm4277_vm9, %v6056_v24 }
0x1665   :  { %8740 = vmatpush3.xpose.msk.msra.mxu0 %vm4277_vm9, %v6056_v24  ;;  %v6054_v15 = vpop.permute.xlu0 %6053 }
0x1666   :  { %8741 = vmatprep.subr.msk.mxu0 %vm4277_vm9, %v6054_v15 }
0x1667   :  { %v6052_v18 = vpop.permute.xlu1 %6051 }
0x1669   :  { %8742 = vmatpush3.xpose.msk.msra.mxu0 %vm4277_vm9, %v6054_v15  ;;  %v6215_v11 = vpop.permute.xlu0 %6214 }
0x166a   :  { %8743 = vmatprep.subr.msk.mxu0 %vm4277_vm9, %v6052_v18 }
0x166b   :  { %v6050_v43 = vpop.permute.xlu1 %6049 }
0x166d   :  { %8744 = vmatpush3.xpose.msk.msra.mxu0 %vm4277_vm9, %v6052_v18 }
0x166e   :  { %8745 = vmatprep.subr.msk.mxu0 %vm4277_vm9, %v6050_v43 }
0x166f   :  { %v6217_v25 = vpop.permute.xlu1 %6216 }
0x1670   :  { %8753 = vmatprep.subr.mxu1 %v6217_v25 }
0x1671   :  { %8746 = vmatpush3.xpose.msk.msra.mxu0 %vm4277_vm9, %v6050_v43  ;;  %8754 = vmatpush3.msra.mxu1 %v6217_v25 }
0x1672   :  { %8755 = vmatprep.subr.mxu1 %v6215_v11 }
0x1673   :  { %v6213_v4 = vpop.permute.xlu1 %6212  ;;  %8756 = vmatpush3.msra.mxu1 %v6215_v11 }
0x1674   :  { %8748 = vmatmul.mubr.msk.f32.vlgmr.msra.gmra.mxu0 %vm4277_vm9, %v12050_v22  ;;  %8757 = vmatprep.subr.mxu1 %v6213_v4 }
0x1675   :  { %8750 = vmatprep.mubr.msk.f32.mxu0 %vm4277_vm9, %v12046_v62  ;;  %8758 = vmatpush3.msra.mxu1 %v6213_v4 }
0x1677   :  { %v6211_v48 = vpop.permute.xlu1 %6210 }
0x1678   :  { %8751 = vmatmul.mubr.msk.f32.gmra.mxu0 %vm4277_vm9, %v12044_v20  ;;  %8759 = vmatprep.subr.mxu1 %v6211_v48 }
0x1679   :  { %8760 = vmatpush3.msra.mxu1 %v6211_v48 }
0x1734   :  { %v8749_v7 = vpop.f32.mrf.mxu0 }
0x1735   :  { %v6159_v50 = vmul.f32 0.35355338, %v8749_v7 }
0x1736   :  { %v6139_v59 = vpop.f32.mrf.mxu0 }
0x1737   :  { %v6163_v57 = vadd.f32 %v12081_v10, %v6159_v50  ;;  %v6158_v46 = vmul.f32 0.35355338, %v6139_v59 }
0x1738   :  { %v8752_v27 = vpop.f32.mrf.mxu0 }
0x1739   :  { %v6162_v21 = vadd.f32 %v12085_v52, %v6158_v46  ;;  %v6161_v17 = vmul.f32 0.35355338, %v8752_v27  ;;  %v6169_v53 = vsel %vm4108_vm0, %v6163_v57, -inf }
0x173a   :  { %6170 = vmax.xlane.f32.xlu1 %v6169_v53  ;;  %v6149_v41 = vpop.f32.mrf.mxu0 }
0x173b   :  { %v6165_v58 = vadd.f32 %v12090_v44, %v6161_v17  ;;  %v6160_v38 = vmul.f32 0.35355338, %v6149_v41  ;;  %v6166_v0 = vsel %vm4108_vm0, %v6162_v21, -inf }
0x173c   :  { %6167 = vmax.xlane.f32.xlu0 %v6166_v0 }
0x173d   :  { %v6164_v61 = vadd.f32 %v12095_v5, %v6160_v38  ;;  %v6175_v42 = vsel %vm4108_vm0, %v6165_v58, -inf }
0x173f   :  { %v6172_v26 = vsel %vm4108_vm0, %v6164_v61, -inf }
0x1740   :  { %6176 = vmax.xlane.f32.xlu0 %v6175_v42 }
0x1744   :  { %6173 = vmax.xlane.f32.xlu0 %v6172_v26 }
0x174b   :  { %6335 = vrot.lane.b32.xlu1 %v12046_v62, %s9268_s17 }
0x175a   :  { %6337 = vrot.lane.b32.xlu0 %v12044_v20, %s9268_s17 }
0x17c3   :  { %v6171_v34 = vpop.xlane.xlu1 %6170 }
0x17c4   :  { %v6179_v36 = vsub.f32 %v6163_v57, %v6171_v34 }
0x17c5   :  { %v6168_v51 = vpop.xlane.xlu0 %6167 }
0x17c6   :  { %v6184_v55 = vmul.f32 1.442695, %v6179_v36  ;;  %v6178_v29 = vsub.f32 %v6162_v21, %v6168_v51 }
0x17c7   :  { %v6336_v63 = vpop.permute.xlu1 %6335 }
0x17c8   :  { %9092 = vpow2.f32 %v6184_v55  ;;  %v6182_v45 = vmul.f32 1.442695, %v6178_v29 }
0x17c9   :  { %v6177_v9 = vpop.xlane.xlu0 %6176 }
0x17ca   :  { %9094 = vpow2.f32 %v6182_v45  ;;  %v6181_v30 = vsub.f32 %v6165_v58, %v6177_v9 }
0x17cc   :  { %v6188_v14 = vmul.f32 1.442695, %v6181_v30 }
0x17cd   :  { %v6174_v56 = vpop.xlane.xlu0 %6173 }
0x17ce   :  { %v6180_v32 = vsub.f32 %v6164_v61, %v6174_v56  ;;  %9096 = vpow2.f32 %v6188_v14 }
0x17d0   :  { %v6186_v8 = vmul.f32 1.442695, %v6180_v32 }
0x17d1   :  { %v6338_v23 = vpop.permute.xlu0 %6337 }
0x17d2   :  { %8767 = vmatprep.subr.msk.mxu1 %vm4277_vm9, %v6338_v23  ;;  %9098 = vpow2.f32 %v6186_v8 }
0x17d5   :  { %v9093_v40 = vpop.eup %9092 }
0x17d6   :  { %v6193_v28 = vsel %vm4108_vm0, %v9093_v40, 0.0 }
0x17d7   :  { %v9095_v12 = vpop.eup %9094  ;;  %6194 = vadd.xlane.f32.xlu0 %v6193_v28 }
0x17d8   :  { %v6190_v35 = vsel %vm4108_vm0, %v9095_v12, 0.0 }
0x17d9   :  { %6191 = vadd.xlane.f32.xlu1 %v6190_v35 }
0x17db   :  { %v9097_v33 = vpop.eup %9096 }
0x17dc   :  { %v6199_v1 = vsel %vm4108_vm0, %v9097_v33, 0.0 }
0x17df   :  { %v9099_v19 = vpop.eup %9098 }
0x17e0   :  { %v6196_v2 = vsel %vm4108_vm0, %v9099_v19, 0.0 }
0x17ea   :  { %6331 = vrot.lane.b32.xlu1 %v12040_v31, %s9268_s17 }
0x17ed   :  { %6333 = vrot.lane.b32.xlu0 %v12050_v22, %s9268_s17 }
0x180c   :  { %6200 = vadd.xlane.f32.xlu0 %v6199_v1 }
0x180e   :  { %6197 = vadd.xlane.f32.xlu1 %v6196_v2 }
0x181f   :  { %6325 = vrot.lane.b32.xlu1 %v12050_v22, %s9269_s21 }
0x1822   :  { %6323 = vrot.lane.b32.xlu0 %v12040_v31, %s9269_s21 }
0x1823   :  { %6329 = vrot.lane.b32.xlu1 %v12044_v20, %s9269_s21 }
0x1826   :  { %6327 = vrot.lane.b32.xlu0 %v12046_v62, %s9269_s21 }
0x1827   :  { %6498 = vrot.lane.b32.xlu1 %v12044_v20, %s9270_s25 }
0x182a   :  { %6496 = vrot.lane.b32.xlu0 %v12046_v62, %s9270_s25 }
0x182b   :  { %6494 = vrot.lane.b32.xlu1 %v12050_v22, %s9270_s25 }
0x182f   :  { %6492 = vrot.lane.b32.xlu1 %v12040_v31, %s9270_s25 }
0x1860   :  { %v6195_v60 = vpop.xlane.xlu0 %6194 }
0x1861   :  { %9100 = vrcp.f32 %v6195_v60 }
0x1862   :  { %v6192_v39 = vpop.xlane.xlu1 %6191 }
0x1863   :  { %9102 = vrcp.f32 %v6192_v39 }
0x1864   :  { %v6334_v25 = vpop.permute.xlu0 %6333 }
0x1866   :  { %v6332_v11 = vpop.permute.xlu1 %6331 }
0x186e   :  { %v9101_v24 = vpop.eup %9100 }
0x186f   :  { %v6207_v43 = vmul.f32 %v9101_v24, %v9093_v40 }
0x1870   :  { %v9103_v15 = vpop.eup %9102 }
0x1871   :  { %v6206_v18 = vmul.f32 %v9103_v15, %v9095_v12 }
0x1873   :  { %8761 = vmatprep.mubr.msk.f32.mxu1 %vm4108_vm0, %v6206_v18 }
0x1874   :  { %8762 = vmatmul.mubr.msk.f32.vlgmr.msra.gmra.mxu1 %vm4108_vm0, %v6207_v43 }
0x1875   :  { %8768 = vmatpush3.xpose.msk.msra.mxu1 %vm4277_vm9, %v6338_v23 }
0x1876   :  { %8769 = vmatprep.subr.msk.mxu1 %vm4277_vm9, %v6336_v63 }
0x1879   :  { %8770 = vmatpush3.xpose.msk.msra.mxu1 %vm4277_vm9, %v6336_v63 }
0x187a   :  { %8771 = vmatprep.subr.msk.mxu1 %vm4277_vm9, %v6334_v25 }
0x187d   :  { %8772 = vmatpush3.xpose.msk.msra.mxu1 %vm4277_vm9, %v6334_v25 }
0x187e   :  { %8773 = vmatprep.subr.msk.mxu1 %vm4277_vm9, %v6332_v11 }
0x1881   :  { %8774 = vmatpush3.xpose.msk.msra.mxu1 %vm4277_vm9, %v6332_v11 }
0x1895   :  { %v6201_v4 = vpop.xlane.xlu0 %6200 }
0x1896   :  { %9104 = vrcp.f32 %v6201_v4 }
0x1897   :  { %v6198_v48 = vpop.xlane.xlu1 %6197 }
0x1898   :  { %9106 = vrcp.f32 %v6198_v48 }
0x1899   :  { %v6324_v7 = vpop.permute.xlu0 %6323 }
0x189b   :  { %v6326_v50 = vpop.permute.xlu1 %6325 }
0x189d   :  { %v6328_v59 = vpop.permute.xlu0 %6327 }
0x189f   :  { %v6330_v57 = vpop.permute.xlu1 %6329 }
0x18a1   :  { %v6497_v17 = vpop.permute.xlu0 %6496 }
0x18a3   :  { %v6499_v46 = vpop.permute.xlu1 %6498  ;;  %v9105_v27 = vpop.eup %9104 }
0x18a4   :  { %8781 = vmatprep.subr.mxu0 %v6499_v46  ;;  %v6209_v58 = vmul.f32 %v9105_v27, %v9097_v33 }
0x18a5   :  { %v9107_v21 = vpop.eup %9106  ;;  %8782 = vmatpush3.msra.mxu0 %v6499_v46 }
0x18a6   :  { %8783 = vmatprep.subr.mxu0 %v6497_v17  ;;  %v6208_v53 = vmul.f32 %v9107_v21, %v9099_v19 }
0x18a7   :  { %v6495_v41 = vpop.permute.xlu1 %6494  ;;  %8784 = vmatpush3.msra.mxu0 %v6497_v17 }
0x18a8   :  { %8764 = vmatprep.mubr.msk.f32.mxu1 %vm4108_vm0, %v6208_v53  ;;  %8785 = vmatprep.subr.mxu0 %v6495_v41 }
0x18a9   :  { %8765 = vmatmul.mubr.msk.f32.gmra.mxu1 %vm4108_vm0, %v6209_v58  ;;  %8786 = vmatpush3.msra.mxu0 %v6495_v41 }
0x18aa   :  { %8775 = vmatprep.mubr.msk.f32.mxu1 %vm4277_vm9, %v6324_v7 }
0x18ab   :  { %v6493_v38 = vpop.permute.xlu1 %6492 }
0x18ac   :  { %8787 = vmatprep.subr.mxu0 %v6493_v38 }
0x18ad   :  { %8776 = vmatmul.mubr.msk.f32.vlgmr.msra.gmra.mxu1 %vm4277_vm9, %v6326_v50  ;;  %8788 = vmatpush3.msra.mxu0 %v6493_v38 }
0x18ae   :  { %8778 = vmatprep.mubr.msk.f32.mxu1 %vm4277_vm9, %v6328_v59 }
0x18b1   :  { %8779 = vmatmul.mubr.msk.f32.gmra.mxu1 %vm4277_vm9, %v6330_v57 }
0x1934   :  { %v8763_v0 = vpop.f32.mrf.mxu1 }
0x1935   :  { %6320 = vst.msk [vmem:[#allocation3 + $0x8] sm:$0xff] %vm4277_vm9, %v8763_v0 }
0x1936   :  { %v6300_v61 = vpop.f32.mrf.mxu1 }
0x1937   :  { %6319 = vst.msk [vmem:[#allocation3] sm:$0xff] %vm4277_vm9, %v6300_v61 }
0x1969   :  { %v8766_v42 = vpop.f32.mrf.mxu1 }
0x196a   :  { %6322 = vst.msk [vmem:[#allocation3 + $0x18] sm:$0xff] %vm4277_vm9, %v8766_v42 }
0x196b   :  { %v6310_v26 = vpop.f32.mrf.mxu1 }
0x196c   :  { %6321 = vst.msk [vmem:[#allocation3 + $0x10] sm:$0xff] %vm4277_vm9, %v6310_v26 }
0x196d   :  { %v8777_v34 = vpop.f32.mrf.mxu1 }
0x196e   :  { %v6441_v36 = vmul.f32 0.35355338, %v8777_v34 }
0x196f   :  { %v6421_v51 = vpop.f32.mrf.mxu1 }
0x1970   :  { %v6445_v55 = vadd.f32 %v12081_v10, %v6441_v36  ;;  %v6440_v29 = vmul.f32 0.35355338, %v6421_v51 }
0x1971   :  { %v8780_v45 = vpop.f32.mrf.mxu1 }
0x1972   :  { %v6444_v9 = vadd.f32 %v12085_v52, %v6440_v29  ;;  %v6443_v56 = vmul.f32 0.35355338, %v8780_v45  ;;  %v6451_v23 = vsel %vm4108_vm0, %v6445_v55, -inf }
0x1973   :  { %6452 = vmax.xlane.f32.xlu1 %v6451_v23  ;;  %v6431_v40 = vpop.f32.mrf.mxu1 }
0x1974   :  { %v6447_v28 = vadd.f32 %v12090_v44, %v6443_v56  ;;  %v6442_v12 = vmul.f32 0.35355338, %v6431_v40  ;;  %v6448_v35 = vsel %vm4108_vm0, %v6444_v9, -inf }
0x1975   :  { %6449 = vmax.xlane.f32.xlu0 %v6448_v35 }
0x1976   :  { %v6446_v30 = vadd.f32 %v12095_v5, %v6442_v12  ;;  %v6457_v32 = vsel %vm4108_vm0, %v6447_v28, -inf }
0x1978   :  { %v6454_v14 = vsel %vm4108_vm0, %v6446_v30, -inf }
0x1979   :  { %6458 = vmax.xlane.f32.xlu0 %v6457_v32 }
0x197d   :  { %6455 = vmax.xlane.f32.xlu0 %v6454_v14 }
0x1984   :  { %6633 = vrot.lane.b32.xlu1 %v12046_v62, %s9271_s29 }
0x1993   :  { %6635 = vrot.lane.b32.xlu0 %v12044_v20, %s9271_s29 }
0x19fc   :  { %v6453_v8 = vpop.xlane.xlu1 %6452 }
0x19fd   :  { %v6461_v33 = vsub.f32 %v6445_v55, %v6453_v8 }
0x19fe   :  { %v6450_v19 = vpop.xlane.xlu0 %6449 }
0x19ff   :  { %v6466_v1 = vmul.f32 1.442695, %v6461_v33  ;;  %v6460_v2 = vsub.f32 %v6444_v9, %v6450_v19 }
0x1a00   :  { %v6634_v27 = vpop.permute.xlu1 %6633 }
0x1a01   :  { %9108 = vpow2.f32 %v6466_v1  ;;  %v6464_v63 = vmul.f32 1.442695, %v6460_v2 }
0x1a02   :  { %v6459_v60 = vpop.xlane.xlu0 %6458 }
0x1a03   :  { %9110 = vpow2.f32 %v6464_v63  ;;  %v6463_v11 = vsub.f32 %v6447_v28, %v6459_v60 }
0x1a05   :  { %v6470_v48 = vmul.f32 1.442695, %v6463_v11 }
0x1a06   :  { %v6456_v39 = vpop.xlane.xlu0 %6455 }
0x1a07   :  { %v6462_v4 = vsub.f32 %v6446_v30, %v6456_v39  ;;  %9112 = vpow2.f32 %v6470_v48 }
0x1a09   :  { %v6468_v7 = vmul.f32 1.442695, %v6462_v4 }
0x1a0a   :  { %v6636_v24 = vpop.permute.xlu0 %6635 }
0x1a0b   :  { %8795 = vmatprep.subr.msk.mxu0 %vm4277_vm9, %v6636_v24  ;;  %9114 = vpow2.f32 %v6468_v7 }
0x1a0e   :  { %v9109_v15 = vpop.eup %9108 }
0x1a0f   :  { %v6475_v18 = vsel %vm4108_vm0, %v9109_v15, 0.0 }
0x1a10   :  { %v9111_v43 = vpop.eup %9110  ;;  %6476 = vadd.xlane.f32.xlu0 %v6475_v18 }
0x1a11   :  { %v6472_v25 = vsel %vm4108_vm0, %v9111_v43, 0.0 }
0x1a12   :  { %6473 = vadd.xlane.f32.xlu1 %v6472_v25 }
0x1a14   :  { %v9113_v50 = vpop.eup %9112 }
0x1a15   :  { %v6481_v57 = vsel %vm4108_vm0, %v9113_v50, 0.0 }
0x1a18   :  { %v9115_v59 = vpop.eup %9114 }
0x1a19   :  { %v6478_v46 = vsel %vm4108_vm0, %v9115_v59, 0.0 }
0x1a23   :  { %6629 = vrot.lane.b32.xlu1 %v12040_v31, %s9271_s29 }
0x1a26   :  { %6631 = vrot.lane.b32.xlu0 %v12050_v22, %s9271_s29 }
0x1a45   :  { %6482 = vadd.xlane.f32.xlu0 %v6481_v57 }
0x1a47   :  { %6479 = vadd.xlane.f32.xlu1 %v6478_v46 }
0x1a58   :  { %6623 = vrot.lane.b32.xlu1 %v12050_v22, %s9272_s8 }
0x1a5b   :  { %6621 = vrot.lane.b32.xlu0 %v12040_v31, %s9272_s8 }
0x1a5c   :  { %6627 = vrot.lane.b32.xlu1 %v12044_v20, %s9272_s8 }
0x1a5f   :  { %6625 = vrot.lane.b32.xlu0 %v12046_v62, %s9272_s8 }
0x1a60   :  { %6796 = vrot.lane.b32.xlu1 %v12044_v20, %s9273_s14 }
0x1a63   :  { %6794 = vrot.lane.b32.xlu0 %v12046_v62, %s9273_s14 }
0x1a64   :  { %6792 = vrot.lane.b32.xlu1 %v12050_v22, %s9273_s14 }
0x1a68   :  { %6790 = vrot.lane.b32.xlu1 %v12040_v31, %s9273_s14 }
0x1a99   :  { %v6477_v21 = vpop.xlane.xlu0 %6476 }
0x1a9a   :  { %9116 = vrcp.f32 %v6477_v21 }
0x1a9b   :  { %v6474_v17 = vpop.xlane.xlu1 %6473 }
0x1a9c   :  { %9118 = vrcp.f32 %v6474_v17 }
0x1a9d   :  { %v6632_v0 = vpop.permute.xlu0 %6631 }
0x1a9f   :  { %v6630_v61 = vpop.permute.xlu1 %6629 }
0x1aa7   :  { %v9117_v53 = vpop.eup %9116 }
0x1aa8   :  { %v6489_v38 = vmul.f32 %v9117_v53, %v9109_v15 }
0x1aa9   :  { %v9119_v41 = vpop.eup %9118 }
0x1aaa   :  { %v6488_v58 = vmul.f32 %v9119_v41, %v9111_v43 }
0x1aac   :  { %8789 = vmatprep.mubr.msk.f32.mxu0 %vm4108_vm0, %v6488_v58 }
0x1aad   :  { %8790 = vmatmul.mubr.msk.f32.vlgmr.msra.gmra.mxu0 %vm4108_vm0, %v6489_v38 }
0x1aae   :  { %8796 = vmatpush3.xpose.msk.msra.mxu0 %vm4277_vm9, %v6636_v24 }
0x1aaf   :  { %8797 = vmatprep.subr.msk.mxu0 %vm4277_vm9, %v6634_v27 }
0x1ab2   :  { %8798 = vmatpush3.xpose.msk.msra.mxu0 %vm4277_vm9, %v6634_v27 }
0x1ab3   :  { %8799 = vmatprep.subr.msk.mxu0 %vm4277_vm9, %v6632_v0 }
0x1ab6   :  { %8800 = vmatpush3.xpose.msk.msra.mxu0 %vm4277_vm9, %v6632_v0 }
0x1ab7   :  { %8801 = vmatprep.subr.msk.mxu0 %vm4277_vm9, %v6630_v61 }
0x1aba   :  { %8802 = vmatpush3.xpose.msk.msra.mxu0 %vm4277_vm9, %v6630_v61 }
0x1ace   :  { %v6483_v42 = vpop.xlane.xlu0 %6482 }
0x1acf   :  { %9120 = vrcp.f32 %v6483_v42 }
0x1ad0   :  { %v6480_v26 = vpop.xlane.xlu1 %6479 }
0x1ad1   :  { %9122 = vrcp.f32 %v6480_v26 }
0x1ad2   :  { %v6622_v34 = vpop.permute.xlu0 %6621 }
0x1ad4   :  { %v6624_v36 = vpop.permute.xlu1 %6623 }
0x1ad6   :  { %v6626_v51 = vpop.permute.xlu0 %6625 }
0x1ad8   :  { %v6628_v55 = vpop.permute.xlu1 %6627 }
0x1ada   :  { %v6795_v56 = vpop.permute.xlu0 %6794 }
0x1adc   :  { %v6797_v29 = vpop.permute.xlu1 %6796  ;;  %v9121_v45 = vpop.eup %9120 }
0x1add   :  { %8809 = vmatprep.subr.mxu1 %v6797_v29  ;;  %v6491_v28 = vmul.f32 %v9121_v45, %v9113_v50 }
0x1ade   :  { %v9123_v9 = vpop.eup %9122  ;;  %8810 = vmatpush3.msra.mxu1 %v6797_v29 }
0x1adf   :  { %8811 = vmatprep.subr.mxu1 %v6795_v56  ;;  %v6490_v23 = vmul.f32 %v9123_v9, %v9115_v59 }
0x1ae0   :  { %v6793_v40 = vpop.permute.xlu1 %6792  ;;  %8812 = vmatpush3.msra.mxu1 %v6795_v56 }
0x1ae1   :  { %8792 = vmatprep.mubr.msk.f32.mxu0 %vm4108_vm0, %v6490_v23  ;;  %8813 = vmatprep.subr.mxu1 %v6793_v40 }
0x1ae2   :  { %8793 = vmatmul.mubr.msk.f32.gmra.mxu0 %vm4108_vm0, %v6491_v28  ;;  %8814 = vmatpush3.msra.mxu1 %v6793_v40 }
0x1ae3   :  { %8803 = vmatprep.mubr.msk.f32.mxu0 %vm4277_vm9, %v6622_v34 }
0x1ae4   :  { %v6791_v12 = vpop.permute.xlu1 %6790 }
0x1ae5   :  { %8815 = vmatprep.subr.mxu1 %v6791_v12 }
0x1ae6   :  { %8804 = vmatmul.mubr.msk.f32.vlgmr.msra.gmra.mxu0 %vm4277_vm9, %v6624_v36  ;;  %8816 = vmatpush3.msra.mxu1 %v6791_v12 }
0x1ae7   :  { %8806 = vmatprep.mubr.msk.f32.mxu0 %vm4277_vm9, %v6626_v51 }
0x1aea   :  { %8807 = vmatmul.mubr.msk.f32.gmra.mxu0 %vm4277_vm9, %v6628_v55 }
0x1b6d   :  { %v12200_v35 = vpop.f32.mrf.mxu0 }
0x1b6f   :  { %v12202_v30 = vpop.f32.mrf.mxu0 }
0x1ba2   :  { %v12204_v32 = vpop.f32.mrf.mxu0 }
0x1ba4   :  { %v12206_v14 = vpop.f32.mrf.mxu0 }
0x1ba6   :  { %v8805_v8 = vpop.f32.mrf.mxu0 }
0x1ba7   :  { %v6739_v33 = vmul.f32 0.35355338, %v8805_v8 }
0x1ba8   :  { %v6719_v19 = vpop.f32.mrf.mxu0 }
0x1ba9   :  { %v6743_v1 = vadd.f32 %v12081_v10, %v6739_v33  ;;  %v6738_v2 = vmul.f32 0.35355338, %v6719_v19 }
0x1baa   :  { %v8808_v63 = vpop.f32.mrf.mxu0 }
0x1bab   :  { %v6742_v60 = vadd.f32 %v12085_v52, %v6738_v2  ;;  %v6741_v39 = vmul.f32 0.35355338, %v8808_v63  ;;  %v6749_v24 = vsel %vm4108_vm0, %v6743_v1, -inf }
0x1bac   :  { %6750 = vmax.xlane.f32.xlu1 %v6749_v24  ;;  %v6729_v15 = vpop.f32.mrf.mxu0 }
0x1bad   :  { %v6745_v18 = vadd.f32 %v12090_v44, %v6741_v39  ;;  %v6740_v43 = vmul.f32 0.35355338, %v6729_v15  ;;  %v6746_v25 = vsel %vm4108_vm0, %v6742_v60, -inf }
0x1bae   :  { %6747 = vmax.xlane.f32.xlu0 %v6746_v25 }
0x1baf   :  { %v6744_v11 = vadd.f32 %v12095_v5, %v6740_v43  ;;  %v6755_v4 = vsel %vm4108_vm0, %v6745_v18, -inf }
0x1bb1   :  { %v6752_v48 = vsel %vm4108_vm0, %v6744_v11, -inf }
0x1bb2   :  { %6756 = vmax.xlane.f32.xlu0 %v6755_v4 }
0x1bb6   :  { %6753 = vmax.xlane.f32.xlu0 %v6752_v48 }
0x1bbd   :  { %6931 = vrot.lane.b32.xlu1 %v12046_v62, %s9274_s19 }
0x1bcc   :  { %6933 = vrot.lane.b32.xlu0 %v12044_v20, %s9274_s19 }
0x1c35   :  { %v6751_v7 = vpop.xlane.xlu1 %6750 }
0x1c36   :  { %v6759_v50 = vsub.f32 %v6743_v1, %v6751_v7 }
0x1c37   :  { %v6748_v59 = vpop.xlane.xlu0 %6747 }
0x1c38   :  { %v6764_v57 = vmul.f32 1.442695, %v6759_v50  ;;  %v6758_v46 = vsub.f32 %v6742_v60, %v6748_v59 }
0x1c39   :  { %v6932_v45 = vpop.permute.xlu1 %6931 }
0x1c3a   :  { %9124 = vpow2.f32 %v6764_v57  ;;  %v6762_v27 = vmul.f32 1.442695, %v6758_v46 }
0x1c3b   :  { %v6757_v21 = vpop.xlane.xlu0 %6756 }
0x1c3c   :  { %9126 = vpow2.f32 %v6762_v27  ;;  %v6761_v61 = vsub.f32 %v6745_v18, %v6757_v21 }
0x1c3e   :  { %v6768_v26 = vmul.f32 1.442695, %v6761_v61 }
0x1c3f   :  { %v6754_v17 = vpop.xlane.xlu0 %6753 }
0x1c40   :  { %v6760_v42 = vsub.f32 %v6744_v11, %v6754_v17  ;;  %9128 = vpow2.f32 %v6768_v26 }
0x1c42   :  { %v6766_v34 = vmul.f32 1.442695, %v6760_v42 }
0x1c43   :  { %v6934_v53 = vpop.permute.xlu0 %6933 }
0x1c44   :  { %8823 = vmatprep.subr.msk.mxu1 %vm4277_vm9, %v6934_v53  ;;  %9130 = vpow2.f32 %v6766_v34 }
0x1c47   :  { %v9125_v41 = vpop.eup %9124 }
0x1c48   :  { %v6773_v58 = vsel %vm4108_vm0, %v9125_v41, 0.0 }
0x1c49   :  { %v9127_v38 = vpop.eup %9126  ;;  %6774 = vadd.xlane.f32.xlu0 %v6773_v58 }
0x1c4a   :  { %v6770_v0 = vsel %vm4108_vm0, %v9127_v38, 0.0 }
0x1c4b   :  { %6771 = vadd.xlane.f32.xlu1 %v6770_v0 }
0x1c4d   :  { %v9129_v36 = vpop.eup %9128 }
0x1c4e   :  { %v6779_v55 = vsel %vm4108_vm0, %v9129_v36, 0.0 }
0x1c51   :  { %v9131_v51 = vpop.eup %9130 }
0x1c52   :  { %v6776_v29 = vsel %vm4108_vm0, %v9131_v51, 0.0 }
0x1c5c   :  { %6927 = vrot.lane.b32.xlu1 %v12040_v31, %s9274_s19 }
0x1c5f   :  { %6929 = vrot.lane.b32.xlu0 %v12050_v22, %s9274_s19 }
0x1c7e   :  { %6780 = vadd.xlane.f32.xlu0 %v6779_v55 }
0x1c80   :  { %6777 = vadd.xlane.f32.xlu1 %v6776_v29 }
0x1c91   :  { %6921 = vrot.lane.b32.xlu1 %v12050_v22, %s9275_s24 }
0x1c94   :  { %6919 = vrot.lane.b32.xlu0 %v12040_v31, %s9275_s24 }
0x1c95   :  { %6925 = vrot.lane.b32.xlu1 %v12044_v20, %s9275_s24 }
0x1c98   :  { %6923 = vrot.lane.b32.xlu0 %v12046_v62, %s9275_s24 }
0x1cd2   :  { %v6775_v9 = vpop.xlane.xlu0 %6774 }
0x1cd3   :  { %9132 = vrcp.f32 %v6775_v9 }
0x1cd4   :  { %v6772_v56 = vpop.xlane.xlu1 %6771 }
0x1cd5   :  { %9134 = vrcp.f32 %v6772_v56 }
0x1cd6   :  { %v6930_v8 = vpop.permute.xlu0 %6929 }
0x1cd8   :  { %v6928_v33 = vpop.permute.xlu1 %6927 }
0x1ce0   :  { %v9133_v23 = vpop.eup %9132 }
0x1ce1   :  { %v6787_v12 = vmul.f32 %v9133_v23, %v9125_v41 }
0x1ce2   :  { %v9135_v40 = vpop.eup %9134 }
0x1ce3   :  { %v6786_v28 = vmul.f32 %v9135_v40, %v9127_v38 }
0x1ce5   :  { %8817 = vmatprep.mubr.msk.f32.mxu1 %vm4108_vm0, %v6786_v28 }
0x1ce6   :  { %8818 = vmatmul.mubr.msk.f32.vlgmr.msra.gmra.mxu1 %vm4108_vm0, %v6787_v12 }
0x1ce7   :  { %8824 = vmatpush3.xpose.msk.msra.mxu1 %vm4277_vm9, %v6934_v53 }
0x1ce8   :  { %8825 = vmatprep.subr.msk.mxu1 %vm4277_vm9, %v6932_v45 }
0x1ceb   :  { %8826 = vmatpush3.xpose.msk.msra.mxu1 %vm4277_vm9, %v6932_v45 }
0x1cec   :  { %8827 = vmatprep.subr.msk.mxu1 %vm4277_vm9, %v6930_v8 }
0x1cef   :  { %8828 = vmatpush3.xpose.msk.msra.mxu1 %vm4277_vm9, %v6930_v8 }
0x1cf0   :  { %8829 = vmatprep.subr.msk.mxu1 %vm4277_vm9, %v6928_v33 }
0x1cf3   :  { %8830 = vmatpush3.xpose.msk.msra.mxu1 %vm4277_vm9, %v6928_v33 }
0x1d07   :  { %v6781_v19 = vpop.xlane.xlu0 %6780 }
0x1d08   :  { %9136 = vrcp.f32 %v6781_v19 }
0x1d09   :  { %v6778_v1 = vpop.xlane.xlu1 %6777 }
0x1d0a   :  { %9138 = vrcp.f32 %v6778_v1 }
0x1d0b   :  { %v6920_v39 = vpop.permute.xlu0 %6919 }
0x1d0d   :  { %v6922_v15 = vpop.permute.xlu1 %6921 }
0x1d0f   :  { %v6924_v18 = vpop.permute.xlu0 %6923 }
0x1d11   :  { %v6926_v43 = vpop.permute.xlu1 %6925 }
0x1d15   :  { %v9137_v2 = vpop.eup %9136 }
0x1d16   :  { %v6789_v24 = vmul.f32 %v9137_v2, %v9129_v36 }
0x1d17   :  { %v9139_v63 = vpop.eup %9138 }
0x1d18   :  { %v6788_v60 = vmul.f32 %v9139_v63, %v9131_v51 }
0x1d1a   :  { %8820 = vmatprep.mubr.msk.f32.mxu1 %vm4108_vm0, %v6788_v60 }
0x1d1b   :  { %8821 = vmatmul.mubr.msk.f32.gmra.mxu1 %vm4108_vm0, %v6789_v24 }
0x1d1c   :  { %8831 = vmatprep.mubr.msk.f32.mxu1 %vm4277_vm9, %v6920_v39 }
0x1d1f   :  { %8832 = vmatmul.mubr.msk.f32.vlgmr.msra.gmra.mxu1 %vm4277_vm9, %v6922_v15 }
0x1d20   :  { %8834 = vmatprep.mubr.msk.f32.mxu1 %vm4277_vm9, %v6924_v18 }
0x1d23   :  { %8835 = vmatmul.mubr.msk.f32.gmra.mxu1 %vm4277_vm9, %v6926_v43 }
0x1da6   :  { %v12252_v25 = vpop.f32.mrf.mxu1 }
0x1da8   :  { %v6880_v11 = vpop.f32.mrf.mxu1 }
0x1ddb   :  { %v12254_v4 = vpop.f32.mrf.mxu1 }
0x1ddd   :  { %v6890_v48 = vpop.f32.mrf.mxu1 }
0x1ddf   :  { %v8833_v7 = vpop.f32.mrf.mxu1 }
0x1de0   :  { %v7037_v50 = vmul.f32 0.35355338, %v8833_v7 }
0x1de1   :  { %v7017_v59 = vpop.f32.mrf.mxu1 }
0x1de2   :  { %v7041_v57 = vadd.f32 %v12081_v10, %v7037_v50  ;;  %v7036_v46 = vmul.f32 0.35355338, %v7017_v59 }
0x1de3   :  { %v8836_v27 = vpop.f32.mrf.mxu1 }
0x1de4   :  { %v7040_v21 = vadd.f32 %v12085_v52, %v7036_v46  ;;  %v7047_v17 = vsel %vm4108_vm0, %v7041_v57, -inf  ;;  %v7039_v41 = vmul.f32 0.35355338, %v8836_v27  ;;  %v8196_v46 = vld [vmem:[%s12805_s23 + $0x38] sm:$0xff]  ;;  %v8195_v27 = vld [vmem:[%s12805_s23 + $0x30] sm:$0xff] }
0x1de5   :  { %7048 = vmax.xlane.f32.xlu1 %v7047_v17  ;;  %v7027_v53 = vpop.f32.mrf.mxu1  ;;  %v8193_v17 = vld [vmem:[%s12805_s23 + $0x20] sm:$0xff] }
0x1de6   :  { %v7038_v58 = vmul.f32 0.35355338, %v7027_v53  ;;  %v7044_v38 = vsel %vm4108_vm0, %v7040_v21, -inf  ;;  %v7043_v61 = vadd.f32 %v12090_v44, %v7039_v41 }
0x1de7   :  { %7045 = vmax.xlane.f32.xlu0 %v7044_v38 }
0x1de8   :  { %v7042_v0 = vadd.f32 %v12095_v5, %v7038_v58  ;;  %v7053_v10 = vsel %vm4108_vm0, %v7043_v61, -inf }
0x1dea   :  { %v7050_v42 = vsel %vm4108_vm0, %v7042_v0, -inf }
0x1deb   :  { %7051 = vmax.xlane.f32.xlu0 %v7050_v42 }
0x1def   :  { %7054 = vmax.xlane.f32.xlu0 %v7053_v10 }
0x1df6   :  { %7094 = vrot.lane.b32.xlu1 %v12044_v20, %s9276_s30 }
0x1e6e   :  { %v7049_v52 = vpop.xlane.xlu1 %7048 }
0x1e6f   :  { %v7057_v26 = vsub.f32 %v7041_v57, %v7049_v52 }
0x1e70   :  { %v7046_v34 = vpop.xlane.xlu0 %7045 }
0x1e71   :  { %v7062_v36 = vmul.f32 1.442695, %v7057_v26  ;;  %v7056_v51 = vsub.f32 %v7040_v21, %v7046_v34  ;;  %v8194_v21 = vld [vmem:[%s12805_s23 + $0x28] sm:$0xff] }
0x1e72   :  { %v7095_v55 = vpop.permute.xlu1 %7094 }
0x1e73   :  { %9140 = vpow2.f32 %v7062_v36  ;;  %v7060_v29 = vmul.f32 1.442695, %v7056_v51  ;;  %8837 = vmatprep.subr.mxu0 %v7095_v55  ;;  %v8198_v51 = vld [vmem:[%s12806_s28 + $0x1] ss:$0 sm:$0xff] }
0x1e74   :  { %8838 = vmatpush3.msra.mxu0 %v7095_v55  ;;  %v7052_v44 = vpop.xlane.xlu0 %7051 }
0x1e75   :  { %9142 = vpow2.f32 %v7060_v29  ;;  %v7058_v8 = vsub.f32 %v7042_v0, %v7052_v44 }
0x1e77   :  { %v7064_v33 = vmul.f32 1.442695, %v7058_v8 }
0x1e78   :  { %v7055_v5 = vpop.xlane.xlu0 %7054 }
0x1e79   :  { %v7059_v45 = vsub.f32 %v7043_v61, %v7055_v5 }
0x1e7b   :  { %v7066_v9 = vmul.f32 1.442695, %v7059_v45 }
0x1e7d   :  { %9144 = vpow2.f32 %v7066_v9 }
0x1e7e   :  { %9146 = vpow2.f32 %v7064_v33 }
0x1e80   :  { %v9141_v56 = vpop.eup %9140 }
0x1e81   :  { %v7071_v23 = vsel %vm4108_vm0, %v9141_v56, 0.0 }
0x1e82   :  { %v9143_v20 = vpop.eup %9142  ;;  %7072 = vadd.xlane.f32.xlu0 %v7071_v23 }
0x1e83   :  { %v7068_v40 = vsel %vm4108_vm0, %v9143_v20, 0.0 }
0x1e84   :  { %7069 = vadd.xlane.f32.xlu1 %v7068_v40 }
0x1e8a   :  { %v9145_v28 = vpop.eup %9144 }
0x1e8b   :  { %v7077_v12 = vsel %vm4108_vm0, %v9145_v28, 0.0  ;;  %v9147_v19 = vpop.eup %9146 }
0x1e8c   :  { %7078 = vadd.xlane.f32.xlu0 %v7077_v12  ;;  %v7074_v1 = vsel %vm4108_vm0, %v9147_v19, 0.0 }
0x1e95   :  { %7090 = vrot.lane.b32.xlu1 %v12050_v22, %s9276_s30 }
0x1ea2   :  { %7092 = vrot.lane.b32.xlu0 %v12046_v62, %s9276_s30 }
0x1ea6   :  { %6605 = vrot.lane.b32.xlu0 %v12202_v30, %s9277_s6 }
0x1eaa   :  { %6903 = vrot.lane.b32.xlu0 %v6880_v11, %s9278_s22 }
0x1eae   :  { %6609 = vrot.lane.b32.xlu0 %v12206_v14, %s9277_s6 }
0x1eb2   :  { %6907 = vrot.lane.b32.xlu0 %v6890_v48, %s9278_s22 }
0x1eb9   :  { %7075 = vadd.xlane.f32.xlu1 %v7074_v1 }
0x1eca   :  { %7088 = vrot.lane.b32.xlu1 %v12040_v31, %s9276_s30 }
0x1ece   :  { %6607 = vrot.lane.b32.xlu1 %v12200_v35, %s9277_s6 }
0x1ed2   :  { %6905 = vrot.lane.b32.xlu1 %v12252_v25, %s9278_s22 }
0x1ed6   :  { %6611 = vrot.lane.b32.xlu1 %v12204_v32, %s9277_s6 }
0x1eda   :  { %6909 = vrot.lane.b32.xlu1 %v12254_v4, %s9278_s22 }
0x1f0b   :  { %v7073_v22 = vpop.xlane.xlu0 %7072 }
0x1f0d   :  { %v7070_v62 = vpop.xlane.xlu1 %7069 }
0x1f0e   :  { %9148 = vrcp.f32 %v7070_v62 }
0x1f0f   :  { %9150 = vrcp.f32 %v7073_v22 }
0x1f11   :  { %v7091_v31 = vpop.permute.xlu1 %7090 }
0x1f15   :  { %v7079_v30 = vpop.xlane.xlu0 %7078 }
0x1f16   :  { %9152 = vrcp.f32 %v7079_v30 }
0x1f19   :  { %v7093_v14 = vpop.permute.xlu0 %7092 }
0x1f1a   :  { %8839 = vmatprep.subr.mxu0 %v7093_v14 }
0x1f1b   :  { %v9149_v2 = vpop.eup %9148  ;;  %8840 = vmatpush3.msra.mxu0 %v7093_v14 }
0x1f1c   :  { %8841 = vmatprep.subr.mxu0 %v7091_v31  ;;  %v7084_v35 = vmul.f32 %v9149_v2, %v9143_v20  ;;  %v9151_v15 = vpop.eup %9150 }
0x1f1d   :  { %8842 = vmatpush3.msra.mxu0 %v7091_v31  ;;  %v6606_v63 = vpop.permute.xlu0 %6605  ;;  %v7085_v43 = vmul.f32 %v9151_v15, %v9141_v56 }
0x1f1e   :  { %6617 = vst.msk [vmem:[#allocation3] sm:$0xff] %vm4838_vm3, %v6606_v63  ;;  %8845 = vmatprep.mubr.msk.f32.mxu0 %vm4108_vm0, %v7084_v35 }
0x1f21   :  { %v6904_v32 = vpop.permute.xlu0 %6903 }
0x1f22   :  { %6915 = vst.msk [vmem:[#allocation3] sm:$0xff] %vm5137_vm4, %v6904_v32 }
0x1f23   :  { %v9153_v4 = vpop.eup %9152 }
0x1f24   :  { %v7087_v59 = vmul.f32 %v9153_v4, %v9145_v28  ;;  %v8209_v4 = vld [vmem:[%s12807_s1 + $0x30] sm:$0xff] }
0x1f25   :  { %v6610_v60 = vpop.permute.xlu0 %6609 }
0x1f26   :  { %6619 = vst.msk [vmem:[#allocation3 + $0x10] sm:$0xff] %vm4838_vm3, %v6610_v60 }
0x1f29   :  { %v6908_v39 = vpop.permute.xlu0 %6907 }
0x1f2a   :  { %6917 = vst.msk [vmem:[#allocation3 + $0x10] sm:$0xff] %vm5137_vm4, %v6908_v39 }
0x1f42   :  { %v7076_v24 = vpop.xlane.xlu1 %7075 }
0x1f43   :  { %9154 = vrcp.f32 %v7076_v24 }
0x1f46   :  { %v7089_v18 = vpop.permute.xlu1 %7088 }
0x1f47   :  { %8843 = vmatprep.subr.mxu0 %v7089_v18 }
0x1f48   :  { %8844 = vmatpush3.msra.mxu0 %v7089_v18 }
0x1f49   :  { %8846 = vmatmul.mubr.msk.f32.vlgmr.msra.gmra.mxu0 %vm4108_vm0, %v7085_v43  ;;  %8851 = vmatprep.subr.mxu0 %v8196_v46 }
0x1f4a   :  { %v6608_v25 = vpop.permute.xlu1 %6607  ;;  %8852 = vmatpush3.msra.mxu0 %v8196_v46  ;;  %v8221_v46 = vld [vmem:[%s12808_s2 + $0x60] sm:$0xff] }
0x1f4b   :  { %6618 = vst.msk [vmem:[#allocation3 + $0x8] sm:$0xff] %vm4838_vm3, %v6608_v25  ;;  %8853 = vmatprep.subr.mxu0 %v8195_v27 }
0x1f4c   :  { %8854 = vmatpush3.msra.mxu0 %v8195_v27 }
0x1f4d   :  { %8855 = vmatprep.subr.mxu0 %v8194_v21 }
0x1f4e   :  { %v6906_v11 = vpop.permute.xlu1 %6905  ;;  %8856 = vmatpush3.msra.mxu0 %v8194_v21 }
0x1f4f   :  { %6916 = vst.msk [vmem:[#allocation3 + $0x8] sm:$0xff] %vm5137_vm4, %v6906_v11  ;;  %8857 = vmatprep.subr.mxu0 %v8193_v17  ;;  %v8210_v11 = vld [vmem:[%s12807_s1 + $0x38] sm:$0xff] }
0x1f50   :  { %v9155_v48 = vpop.eup %9154  ;;  %8858 = vmatpush3.msra.mxu0 %v8193_v17  ;;  %8865 = vmatprep.subr.mxu1 %v8210_v11 }
0x1f51   :  { %v7086_v7 = vmul.f32 %v9155_v48, %v9147_v19  ;;  %8866 = vmatpush3.msra.mxu1 %v8210_v11  ;;  %v8208_v48 = vld [vmem:[%s12807_s1 + $0x28] sm:$0xff] }
0x1f52   :  { %v6612_v50 = vpop.permute.xlu1 %6611  ;;  %8867 = vmatprep.subr.mxu1 %v8209_v4 }
0x1f53   :  { %6620 = vst.msk [vmem:[#allocation3 + $0x18] sm:$0xff] %vm4838_vm3, %v6612_v50  ;;  %8848 = vmatprep.mubr.msk.f32.mxu0 %vm4108_vm0, %v7086_v7  ;;  %8868 = vmatpush3.msra.mxu1 %v8209_v4  ;;  %v8207_v7 = vld [vmem:[%s12807_s1 + $0x20] sm:$0xff]  ;;  %v8224_v50 = vld [vmem:[%s12808_s2 + $0x78] sm:$0xff] }
0x1f54   :  { %8849 = vmatmul.mubr.msk.f32.gmra.mxu0 %vm4108_vm0, %v7087_v59  ;;  %8869 = vmatprep.subr.mxu1 %v8208_v48  ;;  %v8223_v59 = vld [vmem:[%s12808_s2 + $0x70] sm:$0xff] }
0x1f55   :  { %8870 = vmatpush3.msra.mxu1 %v8208_v48  ;;  %8879 = vmatprep.subr.mxu0 %v8224_v50 }
0x1f56   :  { %v6910_v57 = vpop.permute.xlu1 %6909  ;;  %8871 = vmatprep.subr.mxu1 %v8207_v7 }
0x1f57   :  { %6918 = vst.msk [vmem:[#allocation3 + $0x18] sm:$0xff] %vm5137_vm4, %v6910_v57  ;;  %8872 = vmatpush3.msra.mxu1 %v8207_v7  ;;  %v8222_v57 = vld [vmem:[%s12808_s2 + $0x68] sm:$0xff] }
0x2009   :  { %v8847_v53 = vpop.f32.mrf.mxu0 }
0x200a   :  { %7203 = vrot.lane.b32.xlu1 %v8847_v53, %s9279_s26 }
0x200b   :  { %v7178_v41 = vpop.f32.mrf.mxu0 }
0x200c   :  { %7201 = vrot.lane.b32.xlu0 %v7178_v41, %s9279_s26 }
0x2014   :  { %v8850_v58 = vpop.f32.mrf.mxu0 }
0x2015   :  { %7207 = vrot.lane.b32.xlu1 %v8850_v58, %s9279_s26 }
0x2016   :  { %v7188_v38 = vpop.f32.mrf.mxu0 }
0x2017   :  { %7205 = vrot.lane.b32.xlu0 %v7188_v38, %s9279_s26 }
0x207c   :  { %v7204_v0 = vpop.permute.xlu1 %7203 }
0x207d   :  { %7214 = vst.msk [vmem:[#allocation3 + $0x8] sm:$0xff] %vm5436_vm5, %v7204_v0 }
0x207e   :  { %v7202_v61 = vpop.permute.xlu0 %7201 }
0x207f   :  { %7213 = vst.msk [vmem:[#allocation3] sm:$0xff] %vm5436_vm5, %v7202_v61 }
0x2084   :  { %v7218_v52 = vld [vmem:[#allocation3 + $0x8] sm:$0xff] }
0x2086   :  { %v7217_v42 = vld [vmem:[#allocation3] sm:$0xff] }
0x2087   :  { %v7208_v10 = vpop.permute.xlu1 %7207  ;;  %8859 = vmatprep.mubr.msk.f32.mxu0 %vm4108_vm0, %v7217_v42 }
0x2088   :  { %7216 = vst.msk [vmem:[#allocation3 + $0x18] sm:$0xff] %vm5436_vm5, %v7208_v10  ;;  %8860 = vmatmul.mubr.msk.f32.vlgmr.msra.gmra.mxu0 %vm4108_vm0, %v7218_v52 }
0x2089   :  { %v7206_v26 = vpop.permute.xlu0 %7205  ;;  %8880 = vmatpush3.msra.mxu0 %v8224_v50 }
0x208a   :  { %7215 = vst.msk [vmem:[#allocation3 + $0x10] sm:$0xff] %vm5436_vm5, %v7206_v26  ;;  %8881 = vmatprep.subr.mxu0 %v8223_v59 }
0x208b   :  { %8882 = vmatpush3.msra.mxu0 %v8223_v59 }
0x208c   :  { %8883 = vmatprep.subr.mxu0 %v8222_v57 }
0x208d   :  { %8884 = vmatpush3.msra.mxu0 %v8222_v57 }
0x208e   :  { %8885 = vmatprep.subr.mxu0 %v8221_v46 }
0x208f   :  { %v7220_v36 = vld [vmem:[#allocation3 + $0x18] sm:$0xff]  ;;  %8886 = vmatpush3.msra.mxu0 %v8221_v46 }
0x2091   :  { %v7219_v34 = vld [vmem:[#allocation3 + $0x10] sm:$0xff] }
0x2092   :  { %8862 = vmatprep.mubr.msk.f32.mxu0 %vm4108_vm0, %v7219_v34  ;;  %v8205_v34 = vld [vmem:[%s12809_s7 + $0x1] ss:$0 sm:$0xff] }
0x2093   :  { %8863 = vmatmul.mubr.msk.f32.gmra.mxu0 %vm4108_vm0, %v7220_v36 }
0x2148   :  { %v8861_v55 = vpop.f32.mrf.mxu0 }
0x2149   :  { %v7318_v29 = vadd.f32 %v8861_v55, %v8198_v51 }
0x214a   :  { %v7312_v44 = vpop.f32.mrf.mxu0 }
0x214b   :  { %v7332_v5 = vadd.f32 %v7318_v29, %v12025_v49  ;;  %v7313_v45 = vadd.f32 %v8198_v51, %v7312_v44  ;;  %v8206_v44 = vld [vmem:[%s12810_s10 + $0x1] ss:$0 sm:$0xff] }
0x214d   :  { %v7331_v9 = vadd.f32 %v7313_v45, %v12023_v47  ;;  %v7342_v56 = vsel %vm4108_vm0, %v7332_v5, 0.0 }
0x214e   :  { %7343 = vadd.xlane.f32.xlu1 %v7342_v56 }
0x214f   :  { %v7339_v23 = vsel %vm4108_vm0, %v7331_v9, 0.0 }
0x2150   :  { %7340 = vadd.xlane.f32.xlu0 %v7339_v23 }
0x2153   :  { %v8864_v20 = vpop.f32.mrf.mxu0 }
0x2154   :  { %v7328_v28 = vadd.f32 %v8864_v20, %v8198_v51 }
0x2155   :  { %v7322_v40 = vpop.f32.mrf.mxu0 }
0x2156   :  { %v7323_v12 = vadd.f32 %v8198_v51, %v7322_v40  ;;  %v7334_v33 = vadd.f32 %v7328_v28, %v12033_v3 }
0x2158   :  { %v7333_v8 = vadd.f32 %v7323_v12, %v12031_v37  ;;  %v7348_v49 = vsel %vm4108_vm0, %v7334_v33, 0.0 }
0x215a   :  { %v7345_v19 = vsel %vm4108_vm0, %v7333_v8, 0.0 }
0x215b   :  { %7346 = vadd.xlane.f32.xlu0 %v7345_v19  ;;  %v8220_v19 = vld [vmem:[%s12808_s2 + $0x58] sm:$0xff] }
0x215c   :  { %8887 = vmatprep.subr.mxu0 %v8220_v19 }
0x215d   :  { %8888 = vmatpush3.msra.mxu0 %v8220_v19 }
0x215f   :  { %7349 = vadd.xlane.f32.xlu0 %v7348_v49  ;;  %v8219_v49 = vld [vmem:[%s12808_s2 + $0x50] sm:$0xff] }
0x2160   :  { %8889 = vmatprep.subr.mxu0 %v8219_v49 }
0x2161   :  { %8890 = vmatpush3.msra.mxu0 %v8219_v49 }
0x21d7   :  { %v7344_v47 = vpop.xlane.xlu1 %7343 }
0x21d8   :  { %v7352_v1 = vmul.f32 0.03125, %v7344_v47  ;;  %v8218_v47 = vld [vmem:[%s12808_s2 + $0x48] sm:$0xff] }
0x21d9   :  { %v7341_v62 = vpop.xlane.xlu0 %7340  ;;  %8891 = vmatprep.subr.mxu0 %v8218_v47 }
0x21da   :  { %v7356_v22 = vsub.f32 %v7332_v5, %v7352_v1  ;;  %v7351_v30 = vmul.f32 0.03125, %v7341_v62  ;;  %v8217_v1 = vld [vmem:[%s12808_s2 + $0x40] sm:$0xff]  ;;  %8892 = vmatpush3.msra.mxu0 %v8218_v47 }
0x21db   :  { %8893 = vmatprep.subr.mxu0 %v8217_v1  ;;  %v8212_v62 = vld [vmem:[%s12811_s11 + $0x1] ss:$0 sm:$0xff] }
0x21dc   :  { %v7355_v14 = vsub.f32 %v7331_v9, %v7351_v30  ;;  %v7360_v2 = vmul.f32 %v7356_v22, %v7356_v22  ;;  %8894 = vmatpush3.msra.mxu0 %v8217_v1 }
0x21de   :  { %v7366_v31 = vsel %vm4108_vm0, %v7360_v2, 0.0  ;;  %v7359_v35 = vmul.f32 %v7355_v14, %v7355_v14 }
0x21df   :  { %7367 = vadd.xlane.f32.xlu0 %v7366_v31 }
0x21e0   :  { %v7363_v37 = vsel %vm4108_vm0, %v7359_v35, 0.0 }
0x21e1   :  { %7364 = vadd.xlane.f32.xlu1 %v7363_v37 }
0x21e4   :  { %v7347_v3 = vpop.xlane.xlu0 %7346 }
0x21e5   :  { %v7353_v63 = vmul.f32 0.03125, %v7347_v3 }
0x21e7   :  { %v12329_v32 = vsub.f32 %v7333_v8, %v7353_v63 }
0x21e8   :  { %v7350_v60 = vpop.xlane.xlu0 %7349 }
0x21e9   :  { %v7354_v39 = vmul.f32 0.03125, %v7350_v60  ;;  %v7361_v24 = vmul.f32 %v12329_v32, %v12329_v32 }
0x21eb   :  { %v12333_v15 = vsub.f32 %v7334_v33, %v7354_v39  ;;  %v7369_v18 = vsel %vm4108_vm0, %v7361_v24, 0.0  ;;  %v8226_v24 = vld [vmem:[%s12812_s15 + $0x1] ss:$0 sm:$0xff] }
0x21ec   :  { %7370 = vadd.xlane.f32.xlu1 %v7369_v18 }
0x21ed   :  { %v7362_v43 = vmul.f32 %v12333_v15, %v12333_v15 }
0x21ef   :  { %v7372_v25 = vsel %vm4108_vm0, %v7362_v43, 0.0 }
0x21f0   :  { %7373 = vadd.xlane.f32.xlu0 %v7372_v25 }
0x2268   :  { %v7368_v27 = vpop.xlane.xlu0 %7367 }
0x2269   :  { %v7376_v21 = vmul.f32 0.03125, %v7368_v27 }
0x226a   :  { %v7365_v17 = vpop.xlane.xlu1 %7364 }
0x226b   :  { %v7380_v53 = vadd.f32 1e-05, %v7376_v21  ;;  %v7375_v41 = vmul.f32 0.03125, %v7365_v17 }
0x226d   :  { %9156 = vrsqrt.f32 %v7380_v53  ;;  %v7379_v58 = vadd.f32 1e-05, %v7375_v41 }
0x226f   :  { %9158 = vrsqrt.f32 %v7379_v58 }
0x2275   :  { %v7371_v38 = vpop.xlane.xlu1 %7370 }
0x2276   :  { %v7377_v0 = vmul.f32 0.03125, %v7371_v38 }
0x2278   :  { %v7381_v61 = vadd.f32 1e-05, %v7377_v0 }
0x2279   :  { %v7374_v42 = vpop.xlane.xlu0 %7373 }
0x227a   :  { %v9157_v10 = vpop.eup %9156  ;;  %9160 = vrsqrt.f32 %v7381_v61  ;;  %v7378_v52 = vmul.f32 0.03125, %v7374_v42 }
0x227b   :  { %v7388_v26 = vmul.f32 %v9157_v10, %v7356_v22 }
0x227c   :  { %v9159_v36 = vpop.eup %9158  ;;  %v7382_v51 = vadd.f32 1e-05, %v7378_v52 }
0x227d   :  { %v7387_v55 = vmul.f32 %v9159_v36, %v7355_v14  ;;  %v7398_v29 = vmul.f32 %v8205_v34, %v7388_v26 }
0x227e   :  { %9162 = vrsqrt.f32 %v7382_v51 }
0x227f   :  { %v7397_v5 = vmul.f32 %v8205_v34, %v7387_v55  ;;  %v7408_v9 = vadd.f32 %v8206_v44, %v7398_v29 }
0x2281   :  { %v7407_v45 = vadd.f32 %v8206_v44, %v7397_v5 }
0x2283   :  { %8873 = vmatprep.mubr.msk.f32.mxu1 %vm4108_vm0, %v7407_v45 }
0x2284   :  { %8874 = vmatmul.mubr.msk.f32.vlgmr.msra.gmra.mxu1 %vm4108_vm0, %v7408_v9 }
0x2287   :  { %v9161_v56 = vpop.eup %9160 }
0x2288   :  { %v7389_v23 = vmul.f32 %v9161_v56, %v12329_v32 }
0x228a   :  { %v7399_v20 = vmul.f32 %v8205_v34, %v7389_v23 }
0x228b   :  { %v9163_v40 = vpop.eup %9162 }
0x228c   :  { %v7409_v28 = vadd.f32 %v8206_v44, %v7399_v20  ;;  %v7390_v12 = vmul.f32 %v9163_v40, %v12333_v15  ;;  %v7722_v20 = vld [vmem:[%s12815_s12 + $0x18] sm:$0xff]  ;;  %v7721_v40 = vld [vmem:[%s12815_s12 + $0x10] sm:$0xff] }
0x228d   :  { %8901 = vmatprep.subr.mxu1 %v7722_v20 }
0x228e   :  { %8876 = vmatprep.mubr.msk.f32.mxu1 %vm4108_vm0, %v7409_v28  ;;  %v7400_v8 = vmul.f32 %v8205_v34, %v7390_v12  ;;  %8902 = vmatpush3.msra.mxu1 %v7722_v20  ;;  %v7719_v12 = vld [vmem:[%s12815_s12] sm:$0xff] }
0x228f   :  { %8903 = vmatprep.subr.mxu1 %v7721_v40 }
0x2290   :  { %v7410_v33 = vadd.f32 %v8206_v44, %v7400_v8  ;;  %8904 = vmatpush3.msra.mxu1 %v7721_v40  ;;  %v7830_v8 = vld [vmem:[%s9431_s27 + $0x18] sm:$0xff] }
0x2292   :  { %8877 = vmatmul.mubr.msk.f32.gmra.mxu1 %vm4108_vm0, %v7410_v33 }
0x2344   :  { %v8875_v22 = vpop.f32.mrf.mxu1 }
0x2345   :  { %v7508_v30 = vadd.f32 %v8875_v22, %v8212_v62 }
0x2346   :  { %v7502_v14 = vpop.f32.mrf.mxu1 }
0x2347   :  { %v7503_v2 = vadd.f32 %v8212_v62, %v7502_v14  ;;  %v7522_v35 = vmax.f32 %v7508_v30, 0.0 }
0x2349   :  { %v7521_v31 = vmax.f32 %v7503_v2, 0.0 }
0x234b   :  { %8895 = vmatprep.mubr.msk.f32.mxu0 %vm5759_vm6, %v7521_v31 }
0x234c   :  { %8896 = vmatmul.mubr.msk.f32.vlgmr.msra.gmra.mxu0 %vm5759_vm6, %v7522_v35 }
0x2352   :  { %v8878_v37 = vpop.f32.mrf.mxu1 }
0x2353   :  { %v7518_v3 = vadd.f32 %v8878_v37, %v8212_v62 }
0x2354   :  { %v7512_v63 = vpop.f32.mrf.mxu1 }
0x2355   :  { %v7513_v32 = vadd.f32 %v8212_v62, %v7512_v63  ;;  %v7524_v39 = vmax.f32 %v7518_v3, 0.0  ;;  %v8233_v63 = vld [vmem:[%s12813_s16 + $0x1] ss:$0 sm:$0xff] }
0x2357   :  { %v7523_v60 = vmax.f32 %v7513_v32, 0.0 }
0x2359   :  { %8898 = vmatprep.mubr.msk.f32.mxu0 %vm5759_vm6, %v7523_v60 }
0x235a   :  { %8899 = vmatmul.mubr.msk.f32.gmra.mxu0 %vm5759_vm6, %v7524_v39 }
0x240c   :  { %v8897_v15 = vpop.f32.mrf.mxu0 }
0x240d   :  { %v7626_v18 = vadd.f32 %v8897_v15, %v8226_v24 }
0x240e   :  { %v7620_v43 = vpop.f32.mrf.mxu0 }
0x240f   :  { %v7640_v25 = vadd.f32 %v7626_v18, %v7408_v9  ;;  %v7621_v11 = vadd.f32 %v8226_v24, %v7620_v43 }
0x2411   :  { %v7639_v4 = vadd.f32 %v7621_v11, %v7407_v45  ;;  %v7650_v48 = vsel %vm4108_vm0, %v7640_v25, 0.0  ;;  %v7828_v11 = vld [vmem:[%s9431_s27 + $0x8] sm:$0xff] }
0x2412   :  { %7651 = vadd.xlane.f32.xlu0 %v7650_v48 }
0x2413   :  { %v7647_v7 = vsel %vm4108_vm0, %v7639_v4, 0.0 }
0x2414   :  { %7648 = vadd.xlane.f32.xlu1 %v7647_v7 }
0x241a   :  { %v8900_v50 = vpop.f32.mrf.mxu0 }
0x241b   :  { %v7636_v59 = vadd.f32 %v8900_v50, %v8226_v24 }
0x241c   :  { %v7630_v57 = vpop.f32.mrf.mxu0 }
0x241d   :  { %v7642_v46 = vadd.f32 %v7636_v59, %v7410_v33  ;;  %v7631_v27 = vadd.f32 %v8226_v24, %v7630_v57  ;;  %v8234_v24 = vld [vmem:[%s12814_s18 + $0x1] ss:$0 sm:$0xff] }
0x241f   :  { %v7641_v21 = vadd.f32 %v7631_v27, %v7409_v28  ;;  %v7656_v17 = vsel %vm4108_vm0, %v7642_v46, 0.0  ;;  %v7720_v28 = vld [vmem:[%s12815_s12 + $0x8] sm:$0xff] }
0x2420   :  { %7657 = vadd.xlane.f32.xlu0 %v7656_v17  ;;  %8905 = vmatprep.subr.mxu1 %v7720_v28 }
0x2421   :  { %v7653_v53 = vsel %vm4108_vm0, %v7641_v21, 0.0  ;;  %8906 = vmatpush3.msra.mxu1 %v7720_v28 }
0x2422   :  { %7654 = vadd.xlane.f32.xlu1 %v7653_v53  ;;  %8907 = vmatprep.subr.mxu1 %v7719_v12  ;;  %v8235_v53 = vld [vmem:[%s12816_s0] ss:$0 sm:$0xff] }
0x2423   :  { %8908 = vmatpush3.msra.mxu1 %v7719_v12 }
0x2424   :  { %8915 = vmatprep.subr.mxu1 %v7830_v8 }
0x249b   :  { %v7652_v41 = vpop.xlane.xlu0 %7651 }
0x249c   :  { %v7660_v58 = vmul.f32 0.03125, %v7652_v41 }
0x249d   :  { %v7649_v38 = vpop.xlane.xlu1 %7648 }
0x249e   :  { %v7664_v0 = vsub.f32 %v7640_v25, %v7660_v58  ;;  %v7659_v61 = vmul.f32 0.03125, %v7649_v38  ;;  %v7829_v25 = vld [vmem:[%s9431_s27 + $0x10] sm:$0xff] }
0x24a0   :  { %v7663_v42 = vsub.f32 %v7639_v4, %v7659_v61  ;;  %v7668_v10 = vmul.f32 %v7664_v0, %v7664_v0  ;;  %v7827_v4 = vld [vmem:[%s9431_s27] sm:$0xff]  ;;  %s9280_s27 = smov [#allocation4]  }
0x24a1   :  { %s7933_s5 = sshll.u32 %s9280_s27, 4  ;;  %s7934_s5 = int_to_ptr.vmem [resolvable:$true] %s7933_s5 }
0x24a2   :  { %v7674_v52 = vsel %vm4108_vm0, %v7668_v10, 0.0  ;;  %v7667_v26 = vmul.f32 %v7663_v42, %v7663_v42  ;;  %s9188_s17 = scalar_lea.vmem %s7934_s5, 256  ;;  %p9193_p1 = scmp.lt.s32.totalorder %s7934_s5, %s7934_s5 }
0x24a3   :  { %7675 = vadd.xlane.f32.xlu0 %v7674_v52  ;;  %p9189_p0 = scmp.ne.s32.totalorder %s7934_s5, %s9188_s17  ;;  %p9194_p2 = scmp.lt.s32.totalorder %s9188_s17, %s9188_s17 }
0x24a4   :  { %v7671_v34 = vsel %vm4108_vm0, %v7667_v26, 0.0 }
0x24a5   :  { %7672 = vadd.xlane.f32.xlu1 %v7671_v34  ;;  %p9195_p3 = por %p9194_p2, %p9193_p1 }
0x24a7   :  { %p9196_p4 = pnand %p9195_p3, %p9189_p0 }
0x24a9   :  { %v7658_v36 = vpop.xlane.xlu0 %7657 }
0x24aa   :  { %v7662_v51 = vmul.f32 0.03125, %v7658_v36 }
0x24ab   :  { %v7655_v55 = vpop.xlane.xlu1 %7654 }
0x24ac   :  { %v7666_v29 = vsub.f32 %v7642_v46, %v7662_v51  ;;  %v7661_v44 = vmul.f32 0.03125, %v7655_v55 }
0x24ae   :  { %v7665_v5 = vsub.f32 %v7641_v21, %v7661_v44  ;;  %v7670_v45 = vmul.f32 %v7666_v29, %v7666_v29 }
0x24b0   :  { %v7680_v9 = vsel %vm4108_vm0, %v7670_v45, 0.0  ;;  %v7669_v56 = vmul.f32 %v7665_v5, %v7665_v5 }
0x24b1   :  { %7681 = vadd.xlane.f32.xlu0 %v7680_v9 }
0x24b2   :  { %v7677_v23 = vsel %vm4108_vm0, %v7669_v56, 0.0 }
0x24b3   :  { %7678 = vadd.xlane.f32.xlu1 %v7677_v23 }
0x252c   :  { %v7676_v33 = vpop.xlane.xlu0 %7675 }
0x252d   :  { %v7684_v19 = vmul.f32 0.03125, %v7676_v33 }
0x252e   :  { %v7673_v49 = vpop.xlane.xlu1 %7672 }
0x252f   :  { %v7688_v47 = vadd.f32 1e-05, %v7684_v19  ;;  %v7683_v1 = vmul.f32 0.03125, %v7673_v49 }
0x2531   :  { %9164 = vrsqrt.f32 %v7688_v47  ;;  %v7687_v62 = vadd.f32 1e-05, %v7683_v1 }
0x2533   :  { %9166 = vrsqrt.f32 %v7687_v62 }
0x253a   :  { %v7682_v22 = vpop.xlane.xlu0 %7681 }
0x253b   :  { %v7686_v30 = vmul.f32 0.03125, %v7682_v22 }
0x253c   :  { %v7679_v14 = vpop.xlane.xlu1 %7678 }
0x253d   :  { %v7690_v2 = vadd.f32 1e-05, %v7686_v30  ;;  %v7685_v31 = vmul.f32 0.03125, %v7679_v14 }
0x253e   :  { %v9165_v35 = vpop.eup %9164 }
0x253f   :  { %v7696_v37 = vmul.f32 %v9165_v35, %v7664_v0  ;;  %9168 = vrsqrt.f32 %v7690_v2  ;;  %v7689_v3 = vadd.f32 1e-05, %v7685_v31 }
0x2540   :  { %v9167_v32 = vpop.eup %9166 }
0x2541   :  { %9170 = vrsqrt.f32 %v7689_v3  ;;  %v7695_v60 = vmul.f32 %v9167_v32, %v7663_v42  ;;  %v7706_v39 = vmul.f32 %v8233_v63, %v7696_v37  ;;  %v8240_v42 = vld [vmem:[%s9436_s4] ss:$0 sm:$0xff] }
0x2543   :  { %v7705_v15 = vmul.f32 %v8233_v63, %v7695_v60  ;;  %v7716_v43 = vadd.f32 %v8234_v24, %v7706_v39 }
0x2545   :  { %v7715_v18 = vadd.f32 %v8234_v24, %v7705_v15 }
0x2547   :  { %8909 = vmatprep.mubr.msk.f32.mxu1 %vm4108_vm0, %v7715_v18 }
0x2548   :  { %8910 = vmatmul.mubr.msk.f32.vlgmr.msra.gmra.mxu1 %vm4108_vm0, %v7716_v43 }
0x2549   :  { %8916 = vmatpush3.msra.mxu1 %v7830_v8 }
0x254a   :  { %8917 = vmatprep.subr.mxu1 %v7829_v25 }
0x254b   :  { %8918 = vmatpush3.msra.mxu1 %v7829_v25 }
0x254c   :  { %v9169_v48 = vpop.eup %9168  ;;  %8919 = vmatprep.subr.mxu1 %v7828_v11 }
0x254d   :  { %v7698_v7 = vmul.f32 %v9169_v48, %v7666_v29  ;;  %8920 = vmatpush3.msra.mxu1 %v7828_v11 }
0x254e   :  { %v9171_v50 = vpop.eup %9170  ;;  %8921 = vmatprep.subr.mxu1 %v7827_v4 }
0x254f   :  { %v7697_v59 = vmul.f32 %v9171_v50, %v7665_v5  ;;  %8922 = vmatpush3.msra.mxu1 %v7827_v4  ;;  %v7708_v57 = vmul.f32 %v8233_v63, %v7698_v7 }
0x2551   :  { %v7707_v46 = vmul.f32 %v8233_v63, %v7697_v59  ;;  %v7718_v21 = vadd.f32 %v8234_v24, %v7708_v57 }
0x2553   :  { %v7717_v27 = vadd.f32 %v8234_v24, %v7707_v46 }
0x2555   :  { %8912 = vmatprep.mubr.msk.f32.mxu1 %vm4108_vm0, %v7717_v27 }
0x2556   :  { %8913 = vmatmul.mubr.msk.f32.gmra.mxu1 %vm4108_vm0, %v7718_v21 }
0x2557   :  { %8923 = vmatprep.mubr.msk.f32.mxu1 %vm4108_vm0, %v7715_v18 }
0x255a   :  { %8924 = vmatmul.mubr.msk.f32.vlgmr.msra.gmra.mxu1 %vm4108_vm0, %v7716_v43 }
0x255b   :  { %8926 = vmatprep.mubr.msk.f32.mxu1 %vm4108_vm0, %v7717_v27 }
0x255e   :  { %8927 = vmatmul.mubr.msk.f32.gmra.mxu1 %vm4108_vm0, %v7718_v21 }
0x2608   :  { %v8911_v17 = vpop.f32.mrf.mxu1 }
0x260a   :  { %v7808_v41 = vpop.f32.mrf.mxu1 }
0x260b   :  { %v7809_v58 = vadd.f32 %v8235_v53, %v7808_v41 }
0x260d   :  { %v7825_v38 = vmul.f32 %v7809_v58, %v11645_v13 }
0x260f   :  { %7924 = vst.msk [vmem:[#allocation4] sm:$0xff] %vm7923_vm7, %v7825_v38 }
0x2616   :  { %v8914_v0 = vpop.f32.mrf.mxu1 }
0x2618   :  { %v7817_v61 = vpop.f32.mrf.mxu1 }
0x2619   :  { %v7818_v10 = vadd.f32 %v8235_v53, %v7817_v61 }
0x261a   :  { %v8925_v52 = vpop.f32.mrf.mxu1 }
0x261b   :  { %v7826_v26 = vmul.f32 %v7818_v10, %v11660_v6  ;;  %v7909_v34 = vadd.f32 %v8925_v52, %v8240_v42 }
0x261c   :  { %v7904_v36 = vpop.f32.mrf.mxu1 }
0x261d   :  { %7926 = vst.msk [vmem:[#allocation4 + $0x8] sm:$0xff] %vm7923_vm7, %v7826_v26  ;;  %v7921_v51 = vmul.f32 %v7909_v34, %v11658_v54 }
0x261e   :  { %v8928_v13 = vpop.f32.mrf.mxu1 }
0x261f   :  { %9199 = shalt.err (!%p9196_p4)
}
0x2620   :  { %s9282_s4 = smov 128   ;;  %7925 = vst.msk [vmem:[#allocation6] sm:$0xff] %vm7923_vm7, %v7921_v51  ;;  %v7918_v6 = vadd.f32 %v8928_v13, %v8240_v42  ;;  %v7913_v55 = vpop.f32.mrf.mxu1  ;;  %s9208_s21 = scalar_lea.vmem %s7946_s13, 256 }
0x2621   :  { %7939 = dma.vmem_to_hbm [thread:$0]  %s7934_s5, 256, %s9441_s3, [#allocation5], %s9282_s4, %s9282_s4, %s9277_s6  }
0x2622   :  { %v7922_v54 = vmul.f32 %v7918_v6, %v11670_v16  ;;  %p9209_p5 = scmp.ne.s32.totalorder %s7946_s13, %s9208_s21  ;;  %p9213_p6 = scmp.lt.s32.totalorder %s7946_s13, %s7946_s13 }
0x2623   :  { %p9214_p7 = scmp.lt.s32.totalorder %s9208_s21, %s9208_s21 }
0x2624   :  { %7927 = vst.msk [vmem:[#allocation6 + $0x8] sm:$0xff] %vm7923_vm7, %v7922_v54 }
0x2625   :  { %p9215_p8 = por %p9214_p7, %p9213_p6 }
0x2627   :  { %p9216_p9 = pnand %p9215_p8, %p9209_p5 }
0x2629   :  { %9219 = shalt.err (!%p9216_p9)
}
0x262a   :  { %7951 = dma.vmem_to_hbm [thread:$0]  %s7946_s13, 256, %s9446_s20, [#allocation7], %s9282_s4, %s9282_s4, %s9277_s6  }
0x262b   :  { %9228 = dma.done.wait [#allocation5], 256  }
0x262c   :  { %9229 = vsyncadd [#allocation5], 4294967040 }
0x262d   :  { %9230 = dma.done.wait [#allocation7], 256  }
0x262e   :  { %9231 = vsyncadd [#allocation7], 4294967040 }
0x262f   :  { %7958 = vsyncpa [#allocation5], 1 }
0x2630   :  { %7959 = vsyncpa [#allocation7], 1 }

</bundles_post_ra>
